<compile_context>
chip_gen: v7x
topology: tpu7x:2x2x1
jax: 0.10.0
libtpu: 0.0.40
codegen_flags: <defaults>
</compile_context>

<pallas_src>
import functools
import math

import jax
import jax.numpy as jnp
from jax.experimental import pallas as pl
from jax.experimental.pallas import tpu as pltpu

_BN_EPS = 1e-5
_VMEM_SPEC = pl.BlockSpec(memory_space=pltpu.MemorySpace.VMEM)


def _vmem_capacity_bytes():
    """Generation-aware physical VMEM capacity (v7x has only 64 MiB per TC)."""
    try:
        return pltpu.get_tpu_info().vmem_capacity_bytes
    except Exception:
        return 128 * 1024 * 1024


_VMEM_CAP = _vmem_capacity_bytes()


def _vmem_limit_bytes(tile_bytes):
    """Footprint-derived scoped-VMEM budget: double-buffered tile footprint
    plus headroom, clamped to ~70% of the generation's physical VMEM."""
    limit = 2 * int(tile_bytes) + (16 << 20)
    return max(24 << 20, min(limit, int(_VMEM_CAP * 0.7)))


def _round_up(x, m):
    return ((x + m - 1) // m) * m


def _pick_tile(dim, target, align):
    """Largest multiple of `align` that divides `dim` and is <= target; else full dim."""
    if dim <= target:
        return dim
    t = (target // align) * align
    while t >= align:
        if dim % t == 0:
            return t
        t -= align
    return dim


# ---------------------------------------------------------------------------
# Pallas kernels
# ---------------------------------------------------------------------------
def _matmul_bn_kernel(x_ref, w_ref, sb_ref, *rest, relu, residual):
    """Tiled matmul with K-accumulation in an f32 VMEM scratch; folded-BN
    affine / residual / ReLU epilogue (computed in f32) runs only on the last
    K step; result is stored in bf16 so the MXU stays the saturated unit and
    HBM writeback is halved."""
    if residual:
        r_ref, o_ref, acc_ref = rest
    else:
        o_ref, acc_ref = rest
    k = pl.program_id(2)

    prod = jnp.dot(x_ref[...], w_ref[...], preferred_element_type=jnp.float32)

    @pl.when(k == 0)
    def _():
        acc_ref[...] = prod          # direct write: skip the zero-init store

    @pl.when(k > 0)
    def _():
        acc_ref[...] += prod

    @pl.when(k == pl.num_programs(2) - 1)
    def _():
        y = acc_ref[...] * sb_ref[0:1, :] + sb_ref[1:2, :]     # f32 epilogue
        if residual:
            y = y + r_ref[...].astype(jnp.float32)
        if relu:
            y = jnp.maximum(y, 0.0)
        o_ref[...] = y.astype(o_ref.dtype)                     # bf16 store


def _avgpool_fc_kernel(x_ref, w_ref, b_ref, o_ref):
    """Fused global average pool + final Linear (lane-dense padded output)."""
    pooled = jnp.mean(x_ref[...].astype(jnp.float32), axis=1)        # (N, C)
    y = jnp.dot(pooled, w_ref[...], preferred_element_type=jnp.float32)
    o_ref[...] = y + b_ref[...]


# ---------------------------------------------------------------------------
# Pallas wrappers
# ---------------------------------------------------------------------------
def matmul_bn(x, w, scale, bias, residual=None, relu=True,
              tm_target=256, tn_target=256, tk_target=2048):
    """y = relu?( (x @ w) * scale + bias (+ residual) ).  x:(M,K) w:(K,N).
    Returns bf16 (activations stay bf16 end-to-end)."""
    M, K = x.shape
    K2, N = w.shape
    assert K == K2
    assert N % 128 == 0, "output channels must be lane-padded to 128"

    x = x.astype(jnp.bfloat16)                 # no-op when already bf16
    w = w.astype(jnp.bfloat16)
    if residual is not None:
        residual = residual.astype(jnp.bfloat16)

    # Pad M to a sublane multiple and K to a lane multiple so every block is
    # (8,128)-aligned (late layers otherwise degenerate to 2-row blocks).
    Mp = _round_up(max(M, 8), 8)
    Kp = _round_up(K, 128)
    if Mp != M or Kp != K:
        x = jnp.pad(x, ((0, Mp - M), (0, Kp - K)))
    if Kp != K:
        w = jnp.pad(w, ((0, Kp - K), (0, 0)))
    if residual is not None and Mp != M:
        residual = jnp.pad(residual, ((0, Mp - M), (0, 0)))

    # Fold scale/bias into one (2, N) array: one tiny DMA per tile, not two.
    sb = jnp.stack([scale.reshape(N), bias.reshape(N)]).astype(jnp.float32)

    tm = _pick_tile(Mp, tm_target, 8)
    # When M gives a single block, split N into >=2 blocks so both v7x
    # TensorCores get work on the late-layer matmuls (cheap on 1-TC chips).
    if Mp // tm == 1 and N >= 256:
        tn_target = min(tn_target, N // 2)
    tn = _pick_tile(N, tn_target, 128)
    tk = _pick_tile(Kp, tk_target, 128)
    grid = (Mp // tm, N // tn, Kp // tk)

    in_specs = [
        pl.BlockSpec((tm, tk), lambda i, j, k: (i, k)),
        pl.BlockSpec((tk, tn), lambda i, j, k: (k, j)),
        pl.BlockSpec((2, tn), lambda i, j, k: (0, j)),
    ]
    inputs = [x, w, sb]
    if residual is not None:
        in_specs.append(pl.BlockSpec((tm, tn), lambda i, j, k: (i, j)))
        inputs.append(residual)

    # Double-buffered bf16 x/w/out (+ residual), tiny sb, f32 accumulator.
    tile_bytes = (2 * (tm * tk + tk * tn) * 2
                  + 2 * (2 * tn) * 4
                  + 2 * tm * tn * 2 * (2 if residual is not None else 1)
                  + tm * tn * 4)

    kern = functools.partial(_matmul_bn_kernel, relu=relu,
                             residual=residual is not None)
    out = pl.pallas_call(
        kern,
        out_shape=jax.ShapeDtypeStruct((Mp, N), jnp.bfloat16),
        grid=grid,
        in_specs=in_specs,
        out_specs=pl.BlockSpec((tm, tn), lambda i, j, k: (i, j)),
        scratch_shapes=[pltpu.VMEM((tm, tn), jnp.float32)],
        compiler_params=pltpu.CompilerParams(
            dimension_semantics=("parallel", "parallel", "arbitrary"),
            vmem_limit_bytes=_vmem_limit_bytes(tile_bytes)),
    )(*inputs)
    return out[:M] if Mp != M else out


def _im2col(x, k, stride, pad):
    """x: (N,H,W,C) -> patches (N*Ho*Wo, k*k*C) with K ordered (kh, kw, c)."""
    N, H, W, C = x.shape
    xp = jnp.pad(x, ((0, 0), (pad, pad), (pad, pad), (0, 0)))
    Ho = (H + 2 * pad - k) // stride + 1
    Wo = (W + 2 * pad - k) // stride + 1
    cols = []
    for kh in range(k):
        for kw in range(k):
            cols.append(xp[:, kh:kh + Ho * stride:stride,
                           kw:kw + Wo * stride:stride, :])
    patches = jnp.concatenate(cols, axis=-1)          # (N, Ho, Wo, k*k*C)
    return patches.reshape(N * Ho * Wo, k * k * C), (N, Ho, Wo)


def conv_bn(x, w_hwio, bn, *, stride, pad, relu=True, residual=None):
    """Conv2d (no bias) + eval-mode BatchNorm (+ residual) (+ ReLU), NHWC.

    Output channels are zero-padded up to a multiple of 128 so every store is
    lane-dense.  Padded channels have scale=bias=0 -> value 0 -> ReLU 0, so
    the real channels are identical to the unpadded computation."""
    k = w_hwio.shape[0]
    cin_w = w_hwio.shape[2]
    cout = w_hwio.shape[3]
    cin_x = x.shape[-1]

    # Match input channels: the activation may already carry zero-padded
    # channels from the previous layer, and the stem cin (3) is padded to 4.
    cin = max(cin_x, cin_w, 4)
    if cin_x < cin:
        x = jnp.pad(x, ((0, 0), (0, 0), (0, 0), (0, cin - cin_x)))
    if cin_w < cin:
        w_hwio = jnp.pad(w_hwio, ((0, 0), (0, 0), (0, cin - cin_w), (0, 0)))

    # Lane-dense output channels (>=128, multiple of 128).
    coutp = _round_up(max(cout, 128), 128)
    scale = bn["gamma"] / jnp.sqrt(bn["var"] + _BN_EPS)
    bias = bn["beta"] - bn["mean"] * scale
    if coutp != cout:
        w_hwio = jnp.pad(w_hwio, ((0, 0), (0, 0), (0, 0), (0, coutp - cout)))
        scale = jnp.pad(scale, (0, coutp - cout))
        bias = jnp.pad(bias, (0, coutp - cout))

    x = x.astype(jnp.bfloat16)                 # patches are built in bf16
    cols, (N, Ho, Wo) = _im2col(x, k, stride, pad)
    w2 = w_hwio.reshape(-1, coutp)

    res2 = None
    if residual is not None:
        if residual.shape[-1] < coutp:
            residual = jnp.pad(
                residual,
                ((0, 0), (0, 0), (0, 0), (0, coutp - residual.shape[-1])))
        res2 = residual.reshape(N * Ho * Wo, coutp)

    y = matmul_bn(cols, w2, scale, bias, residual=res2, relu=relu)
    return y.reshape(N, Ho, Wo, coutp)


def maxpool_3x3_s2_p1(x):
    """nn.MaxPool2d(3, stride=2, padding=1) as a fused pairwise max tree
    (no 9x HBM stack materialization; XLA fuses slices + maximum)."""
    N, H, W, C = x.shape
    k, s, pad = 3, 2, 1
    xp = jnp.pad(x, ((0, 0), (pad, pad), (pad, pad), (0, 0)),
                 constant_values=-jnp.inf)
    Ho = (H + 2 * pad - k) // s + 1
    Wo = (W + 2 * pad - k) // s + 1
    out = None
    for kh in range(k):
        for kw in range(k):
            v = xp[:, kh:kh + Ho * s:s, kw:kw + Wo * s:s, :]
            out = v if out is None else jnp.maximum(out, v)
    return out


def avgpool_fc(x, fc_w, fc_b):
    """Fused AdaptiveAvgPool2d((1,1)) + flatten + Linear, lane-dense output."""
    N, H, W, C = x.shape
    cin = fc_w.shape[0]
    ncls = fc_w.shape[1]
    if C > cin:                      # activation may carry zero-padded channels
        fc_w = jnp.pad(fc_w, ((0, C - cin), (0, 0)))
    npad = _round_up(max(ncls, 128), 128)
    w_pad = jnp.zeros((C, npad), jnp.float32).at[:, :ncls].set(
        fc_w.astype(jnp.float32))
    b_pad = jnp.zeros((1, npad), jnp.float32).at[:, :ncls].set(
        fc_b.astype(jnp.float32))
    xr = x.reshape(N, H * W, C)
    tile_bytes = (xr.size * xr.dtype.itemsize + w_pad.size * 4
                  + b_pad.size * 4 + N * npad * 4)
    out = pl.pallas_call(
        _avgpool_fc_kernel,
        out_shape=jax.ShapeDtypeStruct((N, npad), jnp.float32),
        in_specs=[_VMEM_SPEC, _VMEM_SPEC, _VMEM_SPEC],
        out_specs=_VMEM_SPEC,
        compiler_params=pltpu.CompilerParams(
            vmem_limit_bytes=_vmem_limit_bytes(tile_bytes)),
    )(xr, w_pad, b_pad)
    return out[:, :ncls]


# ---------------------------------------------------------------------------
# ResNet (BasicBlock) forward, eval mode
# ---------------------------------------------------------------------------
def basic_block(x, p, stride):
    identity = x
    h = conv_bn(x, p["conv1_w"], p["bn1"], stride=stride, pad=1, relu=True)
    if "down_w" in p:
        identity = conv_bn(x, p["down_w"], p["down_bn"],
                           stride=stride, pad=0, relu=False)
    out = conv_bn(h, p["conv2_w"], p["bn2"], stride=1, pad=1,
                  relu=True, residual=identity)
    return out


def resnet_forward(params, x_nchw):
    # layout: NCHW (PyTorch) -> NHWC (channels on the 128-lane axis), bf16.
    x = jnp.transpose(x_nchw, (0, 2, 3, 1)).astype(jnp.bfloat16)
    x = conv_bn(x, params["conv1_w"], params["bn1"], stride=2, pad=3, relu=True)
    x = maxpool_3x3_s2_p1(x)
    for li, layer in enumerate(params["layers"]):
        for bi, blk in enumerate(layer):
            stride = 2 if (li > 0 and bi == 0) else 1
            x = basic_block(x, blk, stride)
    logits = avgpool_fc(x, params["fc_w"], params["fc_b"])
    return logits


# ---------------------------------------------------------------------------
# Deterministic parameter construction (shapes follow the PyTorch __init__)
# ---------------------------------------------------------------------------
def _kaiming_conv(key, kh, kw, cin, cout):
    # kaiming_normal_(mode='fan_out', nonlinearity='relu'); layout HWIO.
    fan_out = kh * kw * cout
    std = math.sqrt(2.0 / fan_out)
    return jax.random.normal(key, (kh, kw, cin, cout), jnp.float32) * std


def _bn_params(c):
    # eval-mode BN: weight=1, bias=0, running_mean=0, running_var=1.
    return dict(gamma=jnp.ones((c,), jnp.float32),
                beta=jnp.zeros((c,), jnp.float32),
                mean=jnp.zeros((c,), jnp.float32),
                var=jnp.ones((c,), jnp.float32))


def make_resnet_params(key, layers=(1, 1, 1, 1), num_classes=10):
    keys = iter(jax.random.split(key, 64))
    params = {}
    inplanes = 64
    params["conv1_w"] = _kaiming_conv(next(keys), 7, 7, 3, inplanes)
    params["bn1"] = _bn_params(inplanes)

    all_layers = []
    for li, (planes, nblocks) in enumerate(zip((64, 128, 256, 512), layers)):
        layer_params = []
        for bi in range(nblocks):
            stride = 2 if (li > 0 and bi == 0) else 1
            blk = {
                "conv1_w": _kaiming_conv(next(keys), 3, 3, inplanes, planes),
                "bn1": _bn_params(planes),
                "conv2_w": _kaiming_conv(next(keys), 3, 3, planes, planes),
                "bn2": _bn_params(planes),
            }
            if stride != 1 or inplanes != planes:
                blk["down_w"] = _kaiming_conv(next(keys), 1, 1, inplanes, planes)
                blk["down_bn"] = _bn_params(planes)
            inplanes = planes
            layer_params.append(blk)
        all_layers.append(layer_params)
    params["layers"] = all_layers

    # fc = nn.Linear(512 * expansion, num_classes); expansion = 1 (BasicBlock)
    bound = 1.0 / math.sqrt(512)
    params["fc_w"] = jax.random.uniform(next(keys), (512, num_classes),
                                        jnp.float32, -bound, bound)
    params["fc_b"] = jax.random.uniform(next(keys), (num_classes,),
                                        jnp.float32, -bound, bound)
    return params


# ---------------------------------------------------------------------------
if __name__ == "__main__":
    key = jax.random.PRNGKey(0)
    pkey, xkey = jax.random.split(key)

    params = make_resnet_params(pkey, layers=(1, 1, 1, 1), num_classes=10)

    # Small input consistent with the module: NCHW, 3 input channels.
    x = jax.random.normal(xkey, (2, 3, 32, 32), jnp.float32)

    fwd = jax.jit(resnet_forward)
    logits = fwd(params, x)
    jax.block_until_ready(logits)

    assert logits.shape == (2, 10)
    assert jnp.all(jnp.isfinite(logits))
    print("KERNEL_OK")
</pallas_src>

<mosaic_0001>
module attributes {stable_mosaic.version = 11 : i64} {
  func.func @_matmul_bn_kernel(%arg0: i32, %arg1: i32, %arg2: i32, %arg3: memref<256x256xbf16, #tpu.memory_space<vmem>>, %arg4: memref<256x128xbf16, #tpu.memory_space<vmem>>, %arg5: memref<2x128xf32, #tpu.memory_space<vmem>>, %arg6: memref<256x128xbf16, #tpu.memory_space<vmem>>, %arg7: memref<256x128xf32, #tpu.memory_space<vmem>>) attributes {dimension_semantics = [#tpu.dimension_semantics<parallel>, #tpu.dimension_semantics<parallel>, #tpu.dimension_semantics<arbitrary>], iteration_bounds = array<i64: 2, 1, 1>, scalar_prefetch = 0 : i64, scratch_operands = 1 : i64, tpu.core_type = #tpu.core_type<tc>, window_params = [{transform_indices = @transform_0, window_bounds = array<i64: 256, 256>}, {transform_indices = @transform_1, window_bounds = array<i64: 256, 128>}, {transform_indices = @transform_2, window_bounds = array<i64: 2, 128>}, {transform_indices = @transform_3, window_bounds = array<i64: 256, 128>}]} {
    %c0 = arith.constant 0 : index
    %c0_0 = arith.constant 0 : index
    %0 = vector.load %arg3[%c0, %c0_0] : memref<256x256xbf16, #tpu.memory_space<vmem>>, vector<256x256xbf16>
    %c0_1 = arith.constant 0 : index
    %c0_2 = arith.constant 0 : index
    %1 = vector.load %arg4[%c0_1, %c0_2] : memref<256x128xbf16, #tpu.memory_space<vmem>>, vector<256x128xbf16>
    %cst = arith.constant dense<0.000000e+00> : vector<256x128xf32>
    %2 = tpu.matmul %0, %1, %cst {dimension_numbers = #tpu.dot_dimension_numbers<[1], [0], [0], [1], [0, 0, 1, 1], [], []>} : vector<256x256xbf16>, vector<256x128xbf16>, vector<256x128xf32> -> vector<256x128xf32>
    %c0_i32 = arith.constant 0 : i32
    %3 = arith.cmpi eq, %arg2, %c0_i32 : i32
    %4 = arith.extui %3 : i1 to i32
    %c0_i32_3 = arith.constant 0 : i32
    %5 = arith.cmpi ne, %4, %c0_i32_3 : i32
    scf.if %5 {
      %c0_8 = arith.constant 0 : index
      %c0_9 = arith.constant 0 : index
      %12 = vector.load %arg7[%c0_8, %c0_9] : memref<256x128xf32, #tpu.memory_space<vmem>>, vector<256x128xf32>
      tpu.vector_store %arg7[%c0_8, %c0_9], %2 {strides = array<i32>} : memref<256x128xf32, #tpu.memory_space<vmem>>, vector<256x128xf32>,
    } else {
    }
    %c0_i32_4 = arith.constant 0 : i32
    %6 = arith.cmpi sgt, %arg2, %c0_i32_4 : i32
    %7 = arith.extui %6 : i1 to i32
    %c0_i32_5 = arith.constant 0 : i32
    %8 = arith.cmpi ne, %7, %c0_i32_5 : i32
    scf.if %8 {
      %c0_8 = arith.constant 0 : index
      %c0_9 = arith.constant 0 : index
      %12 = vector.load %arg7[%c0_8, %c0_9] : memref<256x128xf32, #tpu.memory_space<vmem>>, vector<256x128xf32>
      %13 = arith.addf %12, %2 : vector<256x128xf32>
      %c0_10 = arith.constant 0 : index
      %c0_11 = arith.constant 0 : index
      %14 = vector.load %arg7[%c0_10, %c0_11] : memref<256x128xf32, #tpu.memory_space<vmem>>, vector<256x128xf32>
      tpu.vector_store %arg7[%c0_10, %c0_11], %13 {strides = array<i32>} : memref<256x128xf32, #tpu.memory_space<vmem>>, vector<256x128xf32>,
    } else {
    }
    %c0_i32_6 = arith.constant 0 : i32
    %9 = arith.cmpi eq, %arg2, %c0_i32_6 : i32
    %10 = arith.extui %9 : i1 to i32
    %c0_i32_7 = arith.constant 0 : i32
    %11 = arith.cmpi ne, %10, %c0_i32_7 : i32
    scf.if %11 {
      %c0_8 = arith.constant 0 : index
      %c0_9 = arith.constant 0 : index
      %12 = vector.load %arg7[%c0_8, %c0_9] : memref<256x128xf32, #tpu.memory_space<vmem>>, vector<256x128xf32>
      %c0_10 = arith.constant 0 : index
      %c0_11 = arith.constant 0 : index
      %13 = vector.load %arg5[%c0_10, %c0_11] : memref<2x128xf32, #tpu.memory_space<vmem>>, vector<1x128xf32>
      %14 = vector.broadcast %13 : vector<1x128xf32> to vector<256x128xf32>
      %15 = arith.mulf %12, %14 : vector<256x128xf32>
      %c1 = arith.constant 1 : index
      %c0_12 = arith.constant 0 : index
      %16 = vector.load %arg5[%c1, %c0_12] : memref<2x128xf32, #tpu.memory_space<vmem>>, vector<1x128xf32>
      %17 = vector.broadcast %16 : vector<1x128xf32> to vector<256x128xf32>
      %18 = arith.addf %15, %17 : vector<256x128xf32>
      %cst_13 = arith.constant 0.000000e+00 : f32
      %19 = vector.broadcast %cst_13 : f32 to vector<256x128xf32>
      %20 = arith.maximumf %18, %19 : vector<256x128xf32>
      %21 = arith.truncf %20 : vector<256x128xf32> to vector<256x128xbf16>
      %c0_14 = arith.constant 0 : index
      %c0_15 = arith.constant 0 : index
      %22 = vector.load %arg6[%c0_14, %c0_15] : memref<256x128xbf16, #tpu.memory_space<vmem>>, vector<256x128xbf16>
      tpu.vector_store %arg6[%c0_14, %c0_15], %21 {strides = array<i32>} : memref<256x128xbf16, #tpu.memory_space<vmem>>, vector<256x128xbf16>,
    } else {
    }
    return
  }
  func.func @transform_0(%arg0: i32, %arg1: i32, %arg2: i32) -> (i32, i32) {
    %c0_i32 = arith.constant 0 : i32
    return %arg0, %arg2 : i32, i32
  }
  func.func @transform_1(%arg0: i32, %arg1: i32, %arg2: i32) -> (i32, i32) {
    %c0_i32 = arith.constant 0 : i32
    return %arg2, %arg1 : i32, i32
  }
  func.func @transform_2(%arg0: i32, %arg1: i32, %arg2: i32) -> (i32, i32) {
    %c0_i32 = arith.constant 0 : i32
    %c0_i32_0 = arith.constant 0 : i32
    return %c0_i32, %arg1 : i32, i32
  }
  func.func @transform_3(%arg0: i32, %arg1: i32, %arg2: i32) -> (i32, i32) {
    %c0_i32 = arith.constant 0 : i32
    return %arg0, %arg1 : i32, i32
  }
}

module attributes {stable_mosaic.version = 11 : i64} {
  func.func @_matmul_bn_kernel(%arg0: i32, %arg1: i32, %arg2: i32, %arg3: memref<128x1152xbf16, #tpu.memory_space<vmem>>, %arg4: memref<1152x128xbf16, #tpu.memory_space<vmem>>, %arg5: memref<2x128xf32, #tpu.memory_space<vmem>>, %arg6: memref<128x128xbf16, #tpu.memory_space<vmem>>, %arg7: memref<128x128xf32, #tpu.memory_space<vmem>>) attributes {dimension_semantics = [#tpu.dimension_semantics<parallel>, #tpu.dimension_semantics<parallel>, #tpu.dimension_semantics<arbitrary>], iteration_bounds = array<i64: 1, 1, 1>, scalar_prefetch = 0 : i64, scratch_operands = 1 : i64, tpu.core_type = #tpu.core_type<tc>, window_params = [{transform_indices = @transform_0, window_bounds = array<i64: 128, 1152>}, {transform_indices = @transform_1, window_bounds = array<i64: 1152, 128>}, {transform_indices = @transform_2, window_bounds = array<i64: 2, 128>}, {transform_indices = @transform_3, window_bounds = array<i64: 128, 128>}]} {
    %c0 = arith.constant 0 : index
    %c0_0 = arith.constant 0 : index
    %0 = vector.load %arg3[%c0, %c0_0] : memref<128x1152xbf16, #tpu.memory_space<vmem>>, vector<128x1152xbf16>
    %c0_1 = arith.constant 0 : index
    %c0_2 = arith.constant 0 : index
    %1 = vector.load %arg4[%c0_1, %c0_2] : memref<1152x128xbf16, #tpu.memory_space<vmem>>, vector<1152x128xbf16>
    %cst = arith.constant dense<0.000000e+00> : vector<128x128xf32>
    %2 = tpu.matmul %0, %1, %cst {dimension_numbers = #tpu.dot_dimension_numbers<[1], [0], [0], [1], [0, 0, 1, 1], [], []>} : vector<128x1152xbf16>, vector<1152x128xbf16>, vector<128x128xf32> -> vector<128x128xf32>
    %c0_i32 = arith.constant 0 : i32
    %3 = arith.cmpi eq, %arg2, %c0_i32 : i32
    %4 = arith.extui %3 : i1 to i32
    %c0_i32_3 = arith.constant 0 : i32
    %5 = arith.cmpi ne, %4, %c0_i32_3 : i32
    scf.if %5 {
      %c0_8 = arith.constant 0 : index
      %c0_9 = arith.constant 0 : index
      %12 = vector.load %arg7[%c0_8, %c0_9] : memref<128x128xf32, #tpu.memory_space<vmem>>, vector<128x128xf32>
      tpu.vector_store %arg7[%c0_8, %c0_9], %2 {strides = array<i32>} : memref<128x128xf32, #tpu.memory_space<vmem>>, vector<128x128xf32>,
    } else {
    }
    %c0_i32_4 = arith.constant 0 : i32
    %6 = arith.cmpi sgt, %arg2, %c0_i32_4 : i32
    %7 = arith.extui %6 : i1 to i32
    %c0_i32_5 = arith.constant 0 : i32
    %8 = arith.cmpi ne, %7, %c0_i32_5 : i32
    scf.if %8 {
      %c0_8 = arith.constant 0 : index
      %c0_9 = arith.constant 0 : index
      %12 = vector.load %arg7[%c0_8, %c0_9] : memref<128x128xf32, #tpu.memory_space<vmem>>, vector<128x128xf32>
      %13 = arith.addf %12, %2 : vector<128x128xf32>
      %c0_10 = arith.constant 0 : index
      %c0_11 = arith.constant 0 : index
      %14 = vector.load %arg7[%c0_10, %c0_11] : memref<128x128xf32, #tpu.memory_space<vmem>>, vector<128x128xf32>
      tpu.vector_store %arg7[%c0_10, %c0_11], %13 {strides = array<i32>} : memref<128x128xf32, #tpu.memory_space<vmem>>, vector<128x128xf32>,
    } else {
    }
    %c0_i32_6 = arith.constant 0 : i32
    %9 = arith.cmpi eq, %arg2, %c0_i32_6 : i32
    %10 = arith.extui %9 : i1 to i32
    %c0_i32_7 = arith.constant 0 : i32
    %11 = arith.cmpi ne, %10, %c0_i32_7 : i32
    scf.if %11 {
      %c0_8 = arith.constant 0 : index
      %c0_9 = arith.constant 0 : index
      %12 = vector.load %arg7[%c0_8, %c0_9] : memref<128x128xf32, #tpu.memory_space<vmem>>, vector<128x128xf32>
      %c0_10 = arith.constant 0 : index
      %c0_11 = arith.constant 0 : index
      %13 = vector.load %arg5[%c0_10, %c0_11] : memref<2x128xf32, #tpu.memory_space<vmem>>, vector<1x128xf32>
      %14 = vector.broadcast %13 : vector<1x128xf32> to vector<128x128xf32>
      %15 = arith.mulf %12, %14 : vector<128x128xf32>
      %c1 = arith.constant 1 : index
      %c0_12 = arith.constant 0 : index
      %16 = vector.load %arg5[%c1, %c0_12] : memref<2x128xf32, #tpu.memory_space<vmem>>, vector<1x128xf32>
      %17 = vector.broadcast %16 : vector<1x128xf32> to vector<128x128xf32>
      %18 = arith.addf %15, %17 : vector<128x128xf32>
      %cst_13 = arith.constant 0.000000e+00 : f32
      %19 = vector.broadcast %cst_13 : f32 to vector<128x128xf32>
      %20 = arith.maximumf %18, %19 : vector<128x128xf32>
      %21 = arith.truncf %20 : vector<128x128xf32> to vector<128x128xbf16>
      %c0_14 = arith.constant 0 : index
      %c0_15 = arith.constant 0 : index
      %22 = vector.load %arg6[%c0_14, %c0_15] : memref<128x128xbf16, #tpu.memory_space<vmem>>, vector<128x128xbf16>
      tpu.vector_store %arg6[%c0_14, %c0_15], %21 {strides = array<i32>} : memref<128x128xbf16, #tpu.memory_space<vmem>>, vector<128x128xbf16>,
    } else {
    }
    return
  }
  func.func @transform_0(%arg0: i32, %arg1: i32, %arg2: i32) -> (i32, i32) {
    %c0_i32 = arith.constant 0 : i32
    return %arg0, %arg2 : i32, i32
  }
  func.func @transform_1(%arg0: i32, %arg1: i32, %arg2: i32) -> (i32, i32) {
    %c0_i32 = arith.constant 0 : i32
    return %arg2, %arg1 : i32, i32
  }
  func.func @transform_2(%arg0: i32, %arg1: i32, %arg2: i32) -> (i32, i32) {
    %c0_i32 = arith.constant 0 : i32
    %c0_i32_0 = arith.constant 0 : i32
    return %c0_i32, %arg1 : i32, i32
  }
  func.func @transform_3(%arg0: i32, %arg1: i32, %arg2: i32) -> (i32, i32) {
    %c0_i32 = arith.constant 0 : i32
    return %arg0, %arg1 : i32, i32
  }
}

module attributes {stable_mosaic.version = 11 : i64} {
  func.func @_matmul_bn_kernel(%arg0: i32, %arg1: i32, %arg2: i32, %arg3: memref<128x1152xbf16, #tpu.memory_space<vmem>>, %arg4: memref<1152x128xbf16, #tpu.memory_space<vmem>>, %arg5: memref<2x128xf32, #tpu.memory_space<vmem>>, %arg6: memref<128x128xbf16, #tpu.memory_space<vmem>>, %arg7: memref<128x128xbf16, #tpu.memory_space<vmem>>, %arg8: memref<128x128xf32, #tpu.memory_space<vmem>>) attributes {dimension_semantics = [#tpu.dimension_semantics<parallel>, #tpu.dimension_semantics<parallel>, #tpu.dimension_semantics<arbitrary>], iteration_bounds = array<i64: 1, 1, 1>, scalar_prefetch = 0 : i64, scratch_operands = 1 : i64, tpu.core_type = #tpu.core_type<tc>, window_params = [{transform_indices = @transform_0, window_bounds = array<i64: 128, 1152>}, {transform_indices = @transform_1, window_bounds = array<i64: 1152, 128>}, {transform_indices = @transform_2, window_bounds = array<i64: 2, 128>}, {transform_indices = @transform_3, window_bounds = array<i64: 128, 128>}, {transform_indices = @transform_4, window_bounds = array<i64: 128, 128>}]} {
    %c0 = arith.constant 0 : index
    %c0_0 = arith.constant 0 : index
    %0 = vector.load %arg3[%c0, %c0_0] : memref<128x1152xbf16, #tpu.memory_space<vmem>>, vector<128x1152xbf16>
    %c0_1 = arith.constant 0 : index
    %c0_2 = arith.constant 0 : index
    %1 = vector.load %arg4[%c0_1, %c0_2] : memref<1152x128xbf16, #tpu.memory_space<vmem>>, vector<1152x128xbf16>
    %cst = arith.constant dense<0.000000e+00> : vector<128x128xf32>
    %2 = tpu.matmul %0, %1, %cst {dimension_numbers = #tpu.dot_dimension_numbers<[1], [0], [0], [1], [0, 0, 1, 1], [], []>} : vector<128x1152xbf16>, vector<1152x128xbf16>, vector<128x128xf32> -> vector<128x128xf32>
    %c0_i32 = arith.constant 0 : i32
    %3 = arith.cmpi eq, %arg2, %c0_i32 : i32
    %4 = arith.extui %3 : i1 to i32
    %c0_i32_3 = arith.constant 0 : i32
    %5 = arith.cmpi ne, %4, %c0_i32_3 : i32
    scf.if %5 {
      %c0_8 = arith.constant 0 : index
      %c0_9 = arith.constant 0 : index
      %12 = vector.load %arg8[%c0_8, %c0_9] : memref<128x128xf32, #tpu.memory_space<vmem>>, vector<128x128xf32>
      tpu.vector_store %arg8[%c0_8, %c0_9], %2 {strides = array<i32>} : memref<128x128xf32, #tpu.memory_space<vmem>>, vector<128x128xf32>,
    } else {
    }
    %c0_i32_4 = arith.constant 0 : i32
    %6 = arith.cmpi sgt, %arg2, %c0_i32_4 : i32
    %7 = arith.extui %6 : i1 to i32
    %c0_i32_5 = arith.constant 0 : i32
    %8 = arith.cmpi ne, %7, %c0_i32_5 : i32
    scf.if %8 {
      %c0_8 = arith.constant 0 : index
      %c0_9 = arith.constant 0 : index
      %12 = vector.load %arg8[%c0_8, %c0_9] : memref<128x128xf32, #tpu.memory_space<vmem>>, vector<128x128xf32>
      %13 = arith.addf %12, %2 : vector<128x128xf32>
      %c0_10 = arith.constant 0 : index
      %c0_11 = arith.constant 0 : index
      %14 = vector.load %arg8[%c0_10, %c0_11] : memref<128x128xf32, #tpu.memory_space<vmem>>, vector<128x128xf32>
      tpu.vector_store %arg8[%c0_10, %c0_11], %13 {strides = array<i32>} : memref<128x128xf32, #tpu.memory_space<vmem>>, vector<128x128xf32>,
    } else {
    }
    %c0_i32_6 = arith.constant 0 : i32
    %9 = arith.cmpi eq, %arg2, %c0_i32_6 : i32
    %10 = arith.extui %9 : i1 to i32
    %c0_i32_7 = arith.constant 0 : i32
    %11 = arith.cmpi ne, %10, %c0_i32_7 : i32
    scf.if %11 {
      %c0_8 = arith.constant 0 : index
      %c0_9 = arith.constant 0 : index
      %12 = vector.load %arg8[%c0_8, %c0_9] : memref<128x128xf32, #tpu.memory_space<vmem>>, vector<128x128xf32>
      %c0_10 = arith.constant 0 : index
      %c0_11 = arith.constant 0 : index
      %13 = vector.load %arg5[%c0_10, %c0_11] : memref<2x128xf32, #tpu.memory_space<vmem>>, vector<1x128xf32>
      %14 = vector.broadcast %13 : vector<1x128xf32> to vector<128x128xf32>
      %15 = arith.mulf %12, %14 : vector<128x128xf32>
      %c1 = arith.constant 1 : index
      %c0_12 = arith.constant 0 : index
      %16 = vector.load %arg5[%c1, %c0_12] : memref<2x128xf32, #tpu.memory_space<vmem>>, vector<1x128xf32>
      %17 = vector.broadcast %16 : vector<1x128xf32> to vector<128x128xf32>
      %18 = arith.addf %15, %17 : vector<128x128xf32>
      %c0_13 = arith.constant 0 : index
      %c0_14 = arith.constant 0 : index
      %19 = vector.load %arg6[%c0_13, %c0_14] : memref<128x128xbf16, #tpu.memory_space<vmem>>, vector<128x128xbf16>
      %20 = arith.extf %19 : vector<128x128xbf16> to vector<128x128xf32>
      %21 = arith.addf %18, %20 : vector<128x128xf32>
      %cst_15 = arith.constant 0.000000e+00 : f32
      %22 = vector.broadcast %cst_15 : f32 to vector<128x128xf32>
      %23 = arith.maximumf %21, %22 : vector<128x128xf32>
      %24 = arith.truncf %23 : vector<128x128xf32> to vector<128x128xbf16>
      %c0_16 = arith.constant 0 : index
      %c0_17 = arith.constant 0 : index
      %25 = vector.load %arg7[%c0_16, %c0_17] : memref<128x128xbf16, #tpu.memory_space<vmem>>, vector<128x128xbf16>
      tpu.vector_store %arg7[%c0_16, %c0_17], %24 {strides = array<i32>} : memref<128x128xbf16, #tpu.memory_space<vmem>>, vector<128x128xbf16>,
    } else {
    }
    return
  }
  func.func @transform_0(%arg0: i32, %arg1: i32, %arg2: i32) -> (i32, i32) {
    %c0_i32 = arith.constant 0 : i32
    return %arg0, %arg2 : i32, i32
  }
  func.func @transform_1(%arg0: i32, %arg1: i32, %arg2: i32) -> (i32, i32) {
    %c0_i32 = arith.constant 0 : i32
    return %arg2, %arg1 : i32, i32
  }
  func.func @transform_2(%arg0: i32, %arg1: i32, %arg2: i32) -> (i32, i32) {
    %c0_i32 = arith.constant 0 : i32
    %c0_i32_0 = arith.constant 0 : i32
    return %c0_i32, %arg1 : i32, i32
  }
  func.func @transform_3(%arg0: i32, %arg1: i32, %arg2: i32) -> (i32, i32) {
    %c0_i32 = arith.constant 0 : i32
    return %arg0, %arg1 : i32, i32
  }
  func.func @transform_4(%arg0: i32, %arg1: i32, %arg2: i32) -> (i32, i32) {
    %c0_i32 = arith.constant 0 : i32
    return %arg0, %arg1 : i32, i32
  }
}

module attributes {stable_mosaic.version = 11 : i64} {
  func.func @_matmul_bn_kernel(%arg0: i32, %arg1: i32, %arg2: i32, %arg3: memref<32x1152xbf16, #tpu.memory_space<vmem>>, %arg4: memref<1152x128xbf16, #tpu.memory_space<vmem>>, %arg5: memref<2x128xf32, #tpu.memory_space<vmem>>, %arg6: memref<32x128xbf16, #tpu.memory_space<vmem>>, %arg7: memref<32x128xf32, #tpu.memory_space<vmem>>) attributes {dimension_semantics = [#tpu.dimension_semantics<parallel>, #tpu.dimension_semantics<parallel>, #tpu.dimension_semantics<arbitrary>], iteration_bounds = array<i64: 1, 1, 1>, scalar_prefetch = 0 : i64, scratch_operands = 1 : i64, tpu.core_type = #tpu.core_type<tc>, window_params = [{transform_indices = @transform_0, window_bounds = array<i64: 32, 1152>}, {transform_indices = @transform_1, window_bounds = array<i64: 1152, 128>}, {transform_indices = @transform_2, window_bounds = array<i64: 2, 128>}, {transform_indices = @transform_3, window_bounds = array<i64: 32, 128>}]} {
    %c0 = arith.constant 0 : index
    %c0_0 = arith.constant 0 : index
    %0 = vector.load %arg3[%c0, %c0_0] : memref<32x1152xbf16, #tpu.memory_space<vmem>>, vector<32x1152xbf16>
    %c0_1 = arith.constant 0 : index
    %c0_2 = arith.constant 0 : index
    %1 = vector.load %arg4[%c0_1, %c0_2] : memref<1152x128xbf16, #tpu.memory_space<vmem>>, vector<1152x128xbf16>
    %cst = arith.constant dense<0.000000e+00> : vector<32x128xf32>
    %2 = tpu.matmul %0, %1, %cst {dimension_numbers = #tpu.dot_dimension_numbers<[1], [0], [0], [1], [0, 0, 1, 1], [], []>} : vector<32x1152xbf16>, vector<1152x128xbf16>, vector<32x128xf32> -> vector<32x128xf32>
    %c0_i32 = arith.constant 0 : i32
    %3 = arith.cmpi eq, %arg2, %c0_i32 : i32
    %4 = arith.extui %3 : i1 to i32
    %c0_i32_3 = arith.constant 0 : i32
    %5 = arith.cmpi ne, %4, %c0_i32_3 : i32
    scf.if %5 {
      %c0_8 = arith.constant 0 : index
      %c0_9 = arith.constant 0 : index
      %12 = vector.load %arg7[%c0_8, %c0_9] : memref<32x128xf32, #tpu.memory_space<vmem>>, vector<32x128xf32>
      tpu.vector_store %arg7[%c0_8, %c0_9], %2 {strides = array<i32>} : memref<32x128xf32, #tpu.memory_space<vmem>>, vector<32x128xf32>,
    } else {
    }
    %c0_i32_4 = arith.constant 0 : i32
    %6 = arith.cmpi sgt, %arg2, %c0_i32_4 : i32
    %7 = arith.extui %6 : i1 to i32
    %c0_i32_5 = arith.constant 0 : i32
    %8 = arith.cmpi ne, %7, %c0_i32_5 : i32
    scf.if %8 {
      %c0_8 = arith.constant 0 : index
      %c0_9 = arith.constant 0 : index
      %12 = vector.load %arg7[%c0_8, %c0_9] : memref<32x128xf32, #tpu.memory_space<vmem>>, vector<32x128xf32>
      %13 = arith.addf %12, %2 : vector<32x128xf32>
      %c0_10 = arith.constant 0 : index
      %c0_11 = arith.constant 0 : index
      %14 = vector.load %arg7[%c0_10, %c0_11] : memref<32x128xf32, #tpu.memory_space<vmem>>, vector<32x128xf32>
      tpu.vector_store %arg7[%c0_10, %c0_11], %13 {strides = array<i32>} : memref<32x128xf32, #tpu.memory_space<vmem>>, vector<32x128xf32>,
    } else {
    }
    %c0_i32_6 = arith.constant 0 : i32
    %9 = arith.cmpi eq, %arg2, %c0_i32_6 : i32
    %10 = arith.extui %9 : i1 to i32
    %c0_i32_7 = arith.constant 0 : i32
    %11 = arith.cmpi ne, %10, %c0_i32_7 : i32
    scf.if %11 {
      %c0_8 = arith.constant 0 : index
      %c0_9 = arith.constant 0 : index
      %12 = vector.load %arg7[%c0_8, %c0_9] : memref<32x128xf32, #tpu.memory_space<vmem>>, vector<32x128xf32>
      %c0_10 = arith.constant 0 : index
      %c0_11 = arith.constant 0 : index
      %13 = vector.load %arg5[%c0_10, %c0_11] : memref<2x128xf32, #tpu.memory_space<vmem>>, vector<1x128xf32>
      %14 = vector.broadcast %13 : vector<1x128xf32> to vector<32x128xf32>
      %15 = arith.mulf %12, %14 : vector<32x128xf32>
      %c1 = arith.constant 1 : index
      %c0_12 = arith.constant 0 : index
      %16 = vector.load %arg5[%c1, %c0_12] : memref<2x128xf32, #tpu.memory_space<vmem>>, vector<1x128xf32>
      %17 = vector.broadcast %16 : vector<1x128xf32> to vector<32x128xf32>
      %18 = arith.addf %15, %17 : vector<32x128xf32>
      %cst_13 = arith.constant 0.000000e+00 : f32
      %19 = vector.broadcast %cst_13 : f32 to vector<32x128xf32>
      %20 = arith.maximumf %18, %19 : vector<32x128xf32>
      %21 = arith.truncf %20 : vector<32x128xf32> to vector<32x128xbf16>
      %c0_14 = arith.constant 0 : index
      %c0_15 = arith.constant 0 : index
      %22 = vector.load %arg6[%c0_14, %c0_15] : memref<32x128xbf16, #tpu.memory_space<vmem>>, vector<32x128xbf16>
      tpu.vector_store %arg6[%c0_14, %c0_15], %21 {strides = array<i32>} : memref<32x128xbf16, #tpu.memory_space<vmem>>, vector<32x128xbf16>,
    } else {
    }
    return
  }
  func.func @transform_0(%arg0: i32, %arg1: i32, %arg2: i32) -> (i32, i32) {
    %c0_i32 = arith.constant 0 : i32
    return %arg0, %arg2 : i32, i32
  }
  func.func @transform_1(%arg0: i32, %arg1: i32, %arg2: i32) -> (i32, i32) {
    %c0_i32 = arith.constant 0 : i32
    return %arg2, %arg1 : i32, i32
  }
  func.func @transform_2(%arg0: i32, %arg1: i32, %arg2: i32) -> (i32, i32) {
    %c0_i32 = arith.constant 0 : i32
    %c0_i32_0 = arith.constant 0 : i32
    return %c0_i32, %arg1 : i32, i32
  }
  func.func @transform_3(%arg0: i32, %arg1: i32, %arg2: i32) -> (i32, i32) {
    %c0_i32 = arith.constant 0 : i32
    return %arg0, %arg1 : i32, i32
  }
}

module attributes {stable_mosaic.version = 11 : i64} {
  func.func @_matmul_bn_kernel(%arg0: i32, %arg1: i32, %arg2: i32, %arg3: memref<32x128xbf16, #tpu.memory_space<vmem>>, %arg4: memref<128x128xbf16, #tpu.memory_space<vmem>>, %arg5: memref<2x128xf32, #tpu.memory_space<vmem>>, %arg6: memref<32x128xbf16, #tpu.memory_space<vmem>>, %arg7: memref<32x128xf32, #tpu.memory_space<vmem>>) attributes {dimension_semantics = [#tpu.dimension_semantics<parallel>, #tpu.dimension_semantics<parallel>, #tpu.dimension_semantics<arbitrary>], iteration_bounds = array<i64: 1, 1, 1>, scalar_prefetch = 0 : i64, scratch_operands = 1 : i64, tpu.core_type = #tpu.core_type<tc>, window_params = [{transform_indices = @transform_0, window_bounds = array<i64: 32, 128>}, {transform_indices = @transform_1, window_bounds = array<i64: 128, 128>}, {transform_indices = @transform_2, window_bounds = array<i64: 2, 128>}, {transform_indices = @transform_3, window_bounds = array<i64: 32, 128>}]} {
    %c0 = arith.constant 0 : index
    %c0_0 = arith.constant 0 : index
    %0 = vector.load %arg3[%c0, %c0_0] : memref<32x128xbf16, #tpu.memory_space<vmem>>, vector<32x128xbf16>
    %c0_1 = arith.constant 0 : index
    %c0_2 = arith.constant 0 : index
    %1 = vector.load %arg4[%c0_1, %c0_2] : memref<128x128xbf16, #tpu.memory_space<vmem>>, vector<128x128xbf16>
    %cst = arith.constant dense<0.000000e+00> : vector<32x128xf32>
    %2 = tpu.matmul %0, %1, %cst {dimension_numbers = #tpu.dot_dimension_numbers<[1], [0], [0], [1], [0, 0, 1, 1], [], []>} : vector<32x128xbf16>, vector<128x128xbf16>, vector<32x128xf32> -> vector<32x128xf32>
    %c0_i32 = arith.constant 0 : i32
    %3 = arith.cmpi eq, %arg2, %c0_i32 : i32
    %4 = arith.extui %3 : i1 to i32
    %c0_i32_3 = arith.constant 0 : i32
    %5 = arith.cmpi ne, %4, %c0_i32_3 : i32
    scf.if %5 {
      %c0_8 = arith.constant 0 : index
      %c0_9 = arith.constant 0 : index
      %12 = vector.load %arg7[%c0_8, %c0_9] : memref<32x128xf32, #tpu.memory_space<vmem>>, vector<32x128xf32>
      tpu.vector_store %arg7[%c0_8, %c0_9], %2 {strides = array<i32>} : memref<32x128xf32, #tpu.memory_space<vmem>>, vector<32x128xf32>,
    } else {
    }
    %c0_i32_4 = arith.constant 0 : i32
    %6 = arith.cmpi sgt, %arg2, %c0_i32_4 : i32
    %7 = arith.extui %6 : i1 to i32
    %c0_i32_5 = arith.constant 0 : i32
    %8 = arith.cmpi ne, %7, %c0_i32_5 : i32
    scf.if %8 {
      %c0_8 = arith.constant 0 : index
      %c0_9 = arith.constant 0 : index
      %12 = vector.load %arg7[%c0_8, %c0_9] : memref<32x128xf32, #tpu.memory_space<vmem>>, vector<32x128xf32>
      %13 = arith.addf %12, %2 : vector<32x128xf32>
      %c0_10 = arith.constant 0 : index
      %c0_11 = arith.constant 0 : index
      %14 = vector.load %arg7[%c0_10, %c0_11] : memref<32x128xf32, #tpu.memory_space<vmem>>, vector<32x128xf32>
      tpu.vector_store %arg7[%c0_10, %c0_11], %13 {strides = array<i32>} : memref<32x128xf32, #tpu.memory_space<vmem>>, vector<32x128xf32>,
    } else {
    }
    %c0_i32_6 = arith.constant 0 : i32
    %9 = arith.cmpi eq, %arg2, %c0_i32_6 : i32
    %10 = arith.extui %9 : i1 to i32
    %c0_i32_7 = arith.constant 0 : i32
    %11 = arith.cmpi ne, %10, %c0_i32_7 : i32
    scf.if %11 {
      %c0_8 = arith.constant 0 : index
      %c0_9 = arith.constant 0 : index
      %12 = vector.load %arg7[%c0_8, %c0_9] : memref<32x128xf32, #tpu.memory_space<vmem>>, vector<32x128xf32>
      %c0_10 = arith.constant 0 : index
      %c0_11 = arith.constant 0 : index
      %13 = vector.load %arg5[%c0_10, %c0_11] : memref<2x128xf32, #tpu.memory_space<vmem>>, vector<1x128xf32>
      %14 = vector.broadcast %13 : vector<1x128xf32> to vector<32x128xf32>
      %15 = arith.mulf %12, %14 : vector<32x128xf32>
      %c1 = arith.constant 1 : index
      %c0_12 = arith.constant 0 : index
      %16 = vector.load %arg5[%c1, %c0_12] : memref<2x128xf32, #tpu.memory_space<vmem>>, vector<1x128xf32>
      %17 = vector.broadcast %16 : vector<1x128xf32> to vector<32x128xf32>
      %18 = arith.addf %15, %17 : vector<32x128xf32>
      %19 = arith.truncf %18 : vector<32x128xf32> to vector<32x128xbf16>
      %c0_13 = arith.constant 0 : index
      %c0_14 = arith.constant 0 : index
      %20 = vector.load %arg6[%c0_13, %c0_14] : memref<32x128xbf16, #tpu.memory_space<vmem>>, vector<32x128xbf16>
      tpu.vector_store %arg6[%c0_13, %c0_14], %19 {strides = array<i32>} : memref<32x128xbf16, #tpu.memory_space<vmem>>, vector<32x128xbf16>,
    } else {
    }
    return
  }
  func.func @transform_0(%arg0: i32, %arg1: i32, %arg2: i32) -> (i32, i32) {
    %c0_i32 = arith.constant 0 : i32
    return %arg0, %arg2 : i32, i32
  }
  func.func @transform_1(%arg0: i32, %arg1: i32, %arg2: i32) -> (i32, i32) {
    %c0_i32 = arith.constant 0 : i32
    return %arg2, %arg1 : i32, i32
  }
  func.func @transform_2(%arg0: i32, %arg1: i32, %arg2: i32) -> (i32, i32) {
    %c0_i32 = arith.constant 0 : i32
    %c0_i32_0 = arith.constant 0 : i32
    return %c0_i32, %arg1 : i32, i32
  }
  func.func @transform_3(%arg0: i32, %arg1: i32, %arg2: i32) -> (i32, i32) {
    %c0_i32 = arith.constant 0 : i32
    return %arg0, %arg1 : i32, i32
  }
}

module attributes {stable_mosaic.version = 11 : i64} {
  func.func @_matmul_bn_kernel(%arg0: i32, %arg1: i32, %arg2: i32, %arg3: memref<32x1152xbf16, #tpu.memory_space<vmem>>, %arg4: memref<1152x128xbf16, #tpu.memory_space<vmem>>, %arg5: memref<2x128xf32, #tpu.memory_space<vmem>>, %arg6: memref<32x128xbf16, #tpu.memory_space<vmem>>, %arg7: memref<32x128xbf16, #tpu.memory_space<vmem>>, %arg8: memref<32x128xf32, #tpu.memory_space<vmem>>) attributes {dimension_semantics = [#tpu.dimension_semantics<parallel>, #tpu.dimension_semantics<parallel>, #tpu.dimension_semantics<arbitrary>], iteration_bounds = array<i64: 1, 1, 1>, scalar_prefetch = 0 : i64, scratch_operands = 1 : i64, tpu.core_type = #tpu.core_type<tc>, window_params = [{transform_indices = @transform_0, window_bounds = array<i64: 32, 1152>}, {transform_indices = @transform_1, window_bounds = array<i64: 1152, 128>}, {transform_indices = @transform_2, window_bounds = array<i64: 2, 128>}, {transform_indices = @transform_3, window_bounds = array<i64: 32, 128>}, {transform_indices = @transform_4, window_bounds = array<i64: 32, 128>}]} {
    %c0 = arith.constant 0 : index
    %c0_0 = arith.constant 0 : index
    %0 = vector.load %arg3[%c0, %c0_0] : memref<32x1152xbf16, #tpu.memory_space<vmem>>, vector<32x1152xbf16>
    %c0_1 = arith.constant 0 : index
    %c0_2 = arith.constant 0 : index
    %1 = vector.load %arg4[%c0_1, %c0_2] : memref<1152x128xbf16, #tpu.memory_space<vmem>>, vector<1152x128xbf16>
    %cst = arith.constant dense<0.000000e+00> : vector<32x128xf32>
    %2 = tpu.matmul %0, %1, %cst {dimension_numbers = #tpu.dot_dimension_numbers<[1], [0], [0], [1], [0, 0, 1, 1], [], []>} : vector<32x1152xbf16>, vector<1152x128xbf16>, vector<32x128xf32> -> vector<32x128xf32>
    %c0_i32 = arith.constant 0 : i32
    %3 = arith.cmpi eq, %arg2, %c0_i32 : i32
    %4 = arith.extui %3 : i1 to i32
    %c0_i32_3 = arith.constant 0 : i32
    %5 = arith.cmpi ne, %4, %c0_i32_3 : i32
    scf.if %5 {
      %c0_8 = arith.constant 0 : index
      %c0_9 = arith.constant 0 : index
      %12 = vector.load %arg8[%c0_8, %c0_9] : memref<32x128xf32, #tpu.memory_space<vmem>>, vector<32x128xf32>
      tpu.vector_store %arg8[%c0_8, %c0_9], %2 {strides = array<i32>} : memref<32x128xf32, #tpu.memory_space<vmem>>, vector<32x128xf32>,
    } else {
    }
    %c0_i32_4 = arith.constant 0 : i32
    %6 = arith.cmpi sgt, %arg2, %c0_i32_4 : i32
    %7 = arith.extui %6 : i1 to i32
    %c0_i32_5 = arith.constant 0 : i32
    %8 = arith.cmpi ne, %7, %c0_i32_5 : i32
    scf.if %8 {
      %c0_8 = arith.constant 0 : index
      %c0_9 = arith.constant 0 : index
      %12 = vector.load %arg8[%c0_8, %c0_9] : memref<32x128xf32, #tpu.memory_space<vmem>>, vector<32x128xf32>
      %13 = arith.addf %12, %2 : vector<32x128xf32>
      %c0_10 = arith.constant 0 : index
      %c0_11 = arith.constant 0 : index
      %14 = vector.load %arg8[%c0_10, %c0_11] : memref<32x128xf32, #tpu.memory_space<vmem>>, vector<32x128xf32>
      tpu.vector_store %arg8[%c0_10, %c0_11], %13 {strides = array<i32>} : memref<32x128xf32, #tpu.memory_space<vmem>>, vector<32x128xf32>,
    } else {
    }
    %c0_i32_6 = arith.constant 0 : i32
    %9 = arith.cmpi eq, %arg2, %c0_i32_6 : i32
    %10 = arith.extui %9 : i1 to i32
    %c0_i32_7 = arith.constant 0 : i32
    %11 = arith.cmpi ne, %10, %c0_i32_7 : i32
    scf.if %11 {
      %c0_8 = arith.constant 0 : index
      %c0_9 = arith.constant 0 : index
      %12 = vector.load %arg8[%c0_8, %c0_9] : memref<32x128xf32, #tpu.memory_space<vmem>>, vector<32x128xf32>
      %c0_10 = arith.constant 0 : index
      %c0_11 = arith.constant 0 : index
      %13 = vector.load %arg5[%c0_10, %c0_11] : memref<2x128xf32, #tpu.memory_space<vmem>>, vector<1x128xf32>
      %14 = vector.broadcast %13 : vector<1x128xf32> to vector<32x128xf32>
      %15 = arith.mulf %12, %14 : vector<32x128xf32>
      %c1 = arith.constant 1 : index
      %c0_12 = arith.constant 0 : index
      %16 = vector.load %arg5[%c1, %c0_12] : memref<2x128xf32, #tpu.memory_space<vmem>>, vector<1x128xf32>
      %17 = vector.broadcast %16 : vector<1x128xf32> to vector<32x128xf32>
      %18 = arith.addf %15, %17 : vector<32x128xf32>
      %c0_13 = arith.constant 0 : index
      %c0_14 = arith.constant 0 : index
      %19 = vector.load %arg6[%c0_13, %c0_14] : memref<32x128xbf16, #tpu.memory_space<vmem>>, vector<32x128xbf16>
      %20 = arith.extf %19 : vector<32x128xbf16> to vector<32x128xf32>
      %21 = arith.addf %18, %20 : vector<32x128xf32>
      %cst_15 = arith.constant 0.000000e+00 : f32
      %22 = vector.broadcast %cst_15 : f32 to vector<32x128xf32>
      %23 = arith.maximumf %21, %22 : vector<32x128xf32>
      %24 = arith.truncf %23 : vector<32x128xf32> to vector<32x128xbf16>
      %c0_16 = arith.constant 0 : index
      %c0_17 = arith.constant 0 : index
      %25 = vector.load %arg7[%c0_16, %c0_17] : memref<32x128xbf16, #tpu.memory_space<vmem>>, vector<32x128xbf16>
      tpu.vector_store %arg7[%c0_16, %c0_17], %24 {strides = array<i32>} : memref<32x128xbf16, #tpu.memory_space<vmem>>, vector<32x128xbf16>,
    } else {
    }
    return
  }
  func.func @transform_0(%arg0: i32, %arg1: i32, %arg2: i32) -> (i32, i32) {
    %c0_i32 = arith.constant 0 : i32
    return %arg0, %arg2 : i32, i32
  }
  func.func @transform_1(%arg0: i32, %arg1: i32, %arg2: i32) -> (i32, i32) {
    %c0_i32 = arith.constant 0 : i32
    return %arg2, %arg1 : i32, i32
  }
  func.func @transform_2(%arg0: i32, %arg1: i32, %arg2: i32) -> (i32, i32) {
    %c0_i32 = arith.constant 0 : i32
    %c0_i32_0 = arith.constant 0 : i32
    return %c0_i32, %arg1 : i32, i32
  }
  func.func @transform_3(%arg0: i32, %arg1: i32, %arg2: i32) -> (i32, i32) {
    %c0_i32 = arith.constant 0 : i32
    return %arg0, %arg1 : i32, i32
  }
  func.func @transform_4(%arg0: i32, %arg1: i32, %arg2: i32) -> (i32, i32) {
    %c0_i32 = arith.constant 0 : i32
    return %arg0, %arg1 : i32, i32
  }
}

module attributes {stable_mosaic.version = 11 : i64} {
  func.func @_matmul_bn_kernel(%arg0: i32, %arg1: i32, %arg2: i32, %arg3: memref<8x1152xbf16, #tpu.memory_space<vmem>>, %arg4: memref<1152x128xbf16, #tpu.memory_space<vmem>>, %arg5: memref<2x128xf32, #tpu.memory_space<vmem>>, %arg6: memref<8x128xbf16, #tpu.memory_space<vmem>>, %arg7: memref<8x128xf32, #tpu.memory_space<vmem>>) attributes {dimension_semantics = [#tpu.dimension_semantics<parallel>, #tpu.dimension_semantics<parallel>, #tpu.dimension_semantics<arbitrary>], iteration_bounds = array<i64: 1, 2, 1>, scalar_prefetch = 0 : i64, scratch_operands = 1 : i64, tpu.core_type = #tpu.core_type<tc>, window_params = [{transform_indices = @transform_0, window_bounds = array<i64: 8, 1152>}, {transform_indices = @transform_1, window_bounds = array<i64: 1152, 128>}, {transform_indices = @transform_2, window_bounds = array<i64: 2, 128>}, {transform_indices = @transform_3, window_bounds = array<i64: 8, 128>}]} {
    %c0 = arith.constant 0 : index
    %c0_0 = arith.constant 0 : index
    %0 = vector.load %arg3[%c0, %c0_0] : memref<8x1152xbf16, #tpu.memory_space<vmem>>, vector<8x1152xbf16>
    %c0_1 = arith.constant 0 : index
    %c0_2 = arith.constant 0 : index
    %1 = vector.load %arg4[%c0_1, %c0_2] : memref<1152x128xbf16, #tpu.memory_space<vmem>>, vector<1152x128xbf16>
    %cst = arith.constant dense<0.000000e+00> : vector<8x128xf32>
    %2 = tpu.matmul %0, %1, %cst {dimension_numbers = #tpu.dot_dimension_numbers<[1], [0], [0], [1], [0, 0, 1, 1], [], []>} : vector<8x1152xbf16>, vector<1152x128xbf16>, vector<8x128xf32> -> vector<8x128xf32>
    %c0_i32 = arith.constant 0 : i32
    %3 = arith.cmpi eq, %arg2, %c0_i32 : i32
    %4 = arith.extui %3 : i1 to i32
    %c0_i32_3 = arith.constant 0 : i32
    %5 = arith.cmpi ne, %4, %c0_i32_3 : i32
    scf.if %5 {
      %c0_8 = arith.constant 0 : index
      %c0_9 = arith.constant 0 : index
      %12 = vector.load %arg7[%c0_8, %c0_9] : memref<8x128xf32, #tpu.memory_space<vmem>>, vector<8x128xf32>
      tpu.vector_store %arg7[%c0_8, %c0_9], %2 {strides = array<i32>} : memref<8x128xf32, #tpu.memory_space<vmem>>, vector<8x128xf32>,
    } else {
    }
    %c0_i32_4 = arith.constant 0 : i32
    %6 = arith.cmpi sgt, %arg2, %c0_i32_4 : i32
    %7 = arith.extui %6 : i1 to i32
    %c0_i32_5 = arith.constant 0 : i32
    %8 = arith.cmpi ne, %7, %c0_i32_5 : i32
    scf.if %8 {
      %c0_8 = arith.constant 0 : index
      %c0_9 = arith.constant 0 : index
      %12 = vector.load %arg7[%c0_8, %c0_9] : memref<8x128xf32, #tpu.memory_space<vmem>>, vector<8x128xf32>
      %13 = arith.addf %12, %2 : vector<8x128xf32>
      %c0_10 = arith.constant 0 : index
      %c0_11 = arith.constant 0 : index
      %14 = vector.load %arg7[%c0_10, %c0_11] : memref<8x128xf32, #tpu.memory_space<vmem>>, vector<8x128xf32>
      tpu.vector_store %arg7[%c0_10, %c0_11], %13 {strides = array<i32>} : memref<8x128xf32, #tpu.memory_space<vmem>>, vector<8x128xf32>,
    } else {
    }
    %c0_i32_6 = arith.constant 0 : i32
    %9 = arith.cmpi eq, %arg2, %c0_i32_6 : i32
    %10 = arith.extui %9 : i1 to i32
    %c0_i32_7 = arith.constant 0 : i32
    %11 = arith.cmpi ne, %10, %c0_i32_7 : i32
    scf.if %11 {
      %c0_8 = arith.constant 0 : index
      %c0_9 = arith.constant 0 : index
      %12 = vector.load %arg7[%c0_8, %c0_9] : memref<8x128xf32, #tpu.memory_space<vmem>>, vector<8x128xf32>
      %c0_10 = arith.constant 0 : index
      %c0_11 = arith.constant 0 : index
      %13 = vector.load %arg5[%c0_10, %c0_11] : memref<2x128xf32, #tpu.memory_space<vmem>>, vector<1x128xf32>
      %14 = vector.broadcast %13 : vector<1x128xf32> to vector<8x128xf32>
      %15 = arith.mulf %12, %14 : vector<8x128xf32>
      %c1 = arith.constant 1 : index
      %c0_12 = arith.constant 0 : index
      %16 = vector.load %arg5[%c1, %c0_12] : memref<2x128xf32, #tpu.memory_space<vmem>>, vector<1x128xf32>
      %17 = vector.broadcast %16 : vector<1x128xf32> to vector<8x128xf32>
      %18 = arith.addf %15, %17 : vector<8x128xf32>
      %cst_13 = arith.constant 0.000000e+00 : f32
      %19 = vector.broadcast %cst_13 : f32 to vector<8x128xf32>
      %20 = arith.maximumf %18, %19 : vector<8x128xf32>
      %21 = arith.truncf %20 : vector<8x128xf32> to vector<8x128xbf16>
      %c0_14 = arith.constant 0 : index
      %c0_15 = arith.constant 0 : index
      %22 = vector.load %arg6[%c0_14, %c0_15] : memref<8x128xbf16, #tpu.memory_space<vmem>>, vector<8x128xbf16>
      tpu.vector_store %arg6[%c0_14, %c0_15], %21 {strides = array<i32>} : memref<8x128xbf16, #tpu.memory_space<vmem>>, vector<8x128xbf16>,
    } else {
    }
    return
  }
  func.func @transform_0(%arg0: i32, %arg1: i32, %arg2: i32) -> (i32, i32) {
    %c0_i32 = arith.constant 0 : i32
    return %arg0, %arg2 : i32, i32
  }
  func.func @transform_1(%arg0: i32, %arg1: i32, %arg2: i32) -> (i32, i32) {
    %c0_i32 = arith.constant 0 : i32
    return %arg2, %arg1 : i32, i32
  }
  func.func @transform_2(%arg0: i32, %arg1: i32, %arg2: i32) -> (i32, i32) {
    %c0_i32 = arith.constant 0 : i32
    %c0_i32_0 = arith.constant 0 : i32
    return %c0_i32, %arg1 : i32, i32
  }
  func.func @transform_3(%arg0: i32, %arg1: i32, %arg2: i32) -> (i32, i32) {
    %c0_i32 = arith.constant 0 : i32
    return %arg0, %arg1 : i32, i32
  }
}

module attributes {stable_mosaic.version = 11 : i64} {
  func.func @_matmul_bn_kernel(%arg0: i32, %arg1: i32, %arg2: i32, %arg3: memref<8x1152xbf16, #tpu.memory_space<vmem>>, %arg4: memref<1152x128xbf16, #tpu.memory_space<vmem>>, %arg5: memref<2x128xf32, #tpu.memory_space<vmem>>, %arg6: memref<8x128xbf16, #tpu.memory_space<vmem>>, %arg7: memref<8x128xbf16, #tpu.memory_space<vmem>>, %arg8: memref<8x128xf32, #tpu.memory_space<vmem>>) attributes {dimension_semantics = [#tpu.dimension_semantics<parallel>, #tpu.dimension_semantics<parallel>, #tpu.dimension_semantics<arbitrary>], iteration_bounds = array<i64: 1, 2, 2>, scalar_prefetch = 0 : i64, scratch_operands = 1 : i64, tpu.core_type = #tpu.core_type<tc>, window_params = [{transform_indices = @transform_0, window_bounds = array<i64: 8, 1152>}, {transform_indices = @transform_1, window_bounds = array<i64: 1152, 128>}, {transform_indices = @transform_2, window_bounds = array<i64: 2, 128>}, {transform_indices = @transform_3, window_bounds = array<i64: 8, 128>}, {transform_indices = @transform_4, window_bounds = array<i64: 8, 128>}]} {
    %c0 = arith.constant 0 : index
    %c0_0 = arith.constant 0 : index
    %0 = vector.load %arg3[%c0, %c0_0] : memref<8x1152xbf16, #tpu.memory_space<vmem>>, vector<8x1152xbf16>
    %c0_1 = arith.constant 0 : index
    %c0_2 = arith.constant 0 : index
    %1 = vector.load %arg4[%c0_1, %c0_2] : memref<1152x128xbf16, #tpu.memory_space<vmem>>, vector<1152x128xbf16>
    %cst = arith.constant dense<0.000000e+00> : vector<8x128xf32>
    %2 = tpu.matmul %0, %1, %cst {dimension_numbers = #tpu.dot_dimension_numbers<[1], [0], [0], [1], [0, 0, 1, 1], [], []>} : vector<8x1152xbf16>, vector<1152x128xbf16>, vector<8x128xf32> -> vector<8x128xf32>
    %c0_i32 = arith.constant 0 : i32
    %3 = arith.cmpi eq, %arg2, %c0_i32 : i32
    %4 = arith.extui %3 : i1 to i32
    %c0_i32_3 = arith.constant 0 : i32
    %5 = arith.cmpi ne, %4, %c0_i32_3 : i32
    scf.if %5 {
      %c0_7 = arith.constant 0 : index
      %c0_8 = arith.constant 0 : index
      %12 = vector.load %arg8[%c0_7, %c0_8] : memref<8x128xf32, #tpu.memory_space<vmem>>, vector<8x128xf32>
      tpu.vector_store %arg8[%c0_7, %c0_8], %2 {strides = array<i32>} : memref<8x128xf32, #tpu.memory_space<vmem>>, vector<8x128xf32>,
    } else {
    }
    %c0_i32_4 = arith.constant 0 : i32
    %6 = arith.cmpi sgt, %arg2, %c0_i32_4 : i32
    %7 = arith.extui %6 : i1 to i32
    %c0_i32_5 = arith.constant 0 : i32
    %8 = arith.cmpi ne, %7, %c0_i32_5 : i32
    scf.if %8 {
      %c0_7 = arith.constant 0 : index
      %c0_8 = arith.constant 0 : index
      %12 = vector.load %arg8[%c0_7, %c0_8] : memref<8x128xf32, #tpu.memory_space<vmem>>, vector<8x128xf32>
      %13 = arith.addf %12, %2 : vector<8x128xf32>
      %c0_9 = arith.constant 0 : index
      %c0_10 = arith.constant 0 : index
      %14 = vector.load %arg8[%c0_9, %c0_10] : memref<8x128xf32, #tpu.memory_space<vmem>>, vector<8x128xf32>
      tpu.vector_store %arg8[%c0_9, %c0_10], %13 {strides = array<i32>} : memref<8x128xf32, #tpu.memory_space<vmem>>, vector<8x128xf32>,
    } else {
    }
    %c1_i32 = arith.constant 1 : i32
    %9 = arith.cmpi eq, %arg2, %c1_i32 : i32
    %10 = arith.extui %9 : i1 to i32
    %c0_i32_6 = arith.constant 0 : i32
    %11 = arith.cmpi ne, %10, %c0_i32_6 : i32
    scf.if %11 {
      %c0_7 = arith.constant 0 : index
      %c0_8 = arith.constant 0 : index
      %12 = vector.load %arg8[%c0_7, %c0_8] : memref<8x128xf32, #tpu.memory_space<vmem>>, vector<8x128xf32>
      %c0_9 = arith.constant 0 : index
      %c0_10 = arith.constant 0 : index
      %13 = vector.load %arg5[%c0_9, %c0_10] : memref<2x128xf32, #tpu.memory_space<vmem>>, vector<1x128xf32>
      %14 = vector.broadcast %13 : vector<1x128xf32> to vector<8x128xf32>
      %15 = arith.mulf %12, %14 : vector<8x128xf32>
      %c1 = arith.constant 1 : index
      %c0_11 = arith.constant 0 : index
      %16 = vector.load %arg5[%c1, %c0_11] : memref<2x128xf32, #tpu.memory_space<vmem>>, vector<1x128xf32>
      %17 = vector.broadcast %16 : vector<1x128xf32> to vector<8x128xf32>
      %18 = arith.addf %15, %17 : vector<8x128xf32>
      %c0_12 = arith.constant 0 : index
      %c0_13 = arith.constant 0 : index
      %19 = vector.load %arg6[%c0_12, %c0_13] : memref<8x128xbf16, #tpu.memory_space<vmem>>, vector<8x128xbf16>
      %20 = arith.extf %19 : vector<8x128xbf16> to vector<8x128xf32>
      %21 = arith.addf %18, %20 : vector<8x128xf32>
      %cst_14 = arith.constant 0.000000e+00 : f32
      %22 = vector.broadcast %cst_14 : f32 to vector<8x128xf32>
      %23 = arith.maximumf %21, %22 : vector<8x128xf32>
      %24 = arith.truncf %23 : vector<8x128xf32> to vector<8x128xbf16>
      %c0_15 = arith.constant 0 : index
      %c0_16 = arith.constant 0 : index
      %25 = vector.load %arg7[%c0_15, %c0_16] : memref<8x128xbf16, #tpu.memory_space<vmem>>, vector<8x128xbf16>
      tpu.vector_store %arg7[%c0_15, %c0_16], %24 {strides = array<i32>} : memref<8x128xbf16, #tpu.memory_space<vmem>>, vector<8x128xbf16>,
    } else {
    }
    return
  }
  func.func @transform_0(%arg0: i32, %arg1: i32, %arg2: i32) -> (i32, i32) {
    %c0_i32 = arith.constant 0 : i32
    return %arg0, %arg2 : i32, i32
  }
  func.func @transform_1(%arg0: i32, %arg1: i32, %arg2: i32) -> (i32, i32) {
    %c0_i32 = arith.constant 0 : i32
    return %arg2, %arg1 : i32, i32
  }
  func.func @transform_2(%arg0: i32, %arg1: i32, %arg2: i32) -> (i32, i32) {
    %c0_i32 = arith.constant 0 : i32
    %c0_i32_0 = arith.constant 0 : i32
    return %c0_i32, %arg1 : i32, i32
  }
  func.func @transform_3(%arg0: i32, %arg1: i32, %arg2: i32) -> (i32, i32) {
    %c0_i32 = arith.constant 0 : i32
    return %arg0, %arg1 : i32, i32
  }
  func.func @transform_4(%arg0: i32, %arg1: i32, %arg2: i32) -> (i32, i32) {
    %c0_i32 = arith.constant 0 : i32
    return %arg0, %arg1 : i32, i32
  }
}

module attributes {stable_mosaic.version = 11 : i64} {
  func.func @_matmul_bn_kernel(%arg0: i32, %arg1: i32, %arg2: i32, %arg3: memref<8x128xbf16, #tpu.memory_space<vmem>>, %arg4: memref<128x128xbf16, #tpu.memory_space<vmem>>, %arg5: memref<2x128xf32, #tpu.memory_space<vmem>>, %arg6: memref<8x128xbf16, #tpu.memory_space<vmem>>, %arg7: memref<8x128xf32, #tpu.memory_space<vmem>>) attributes {dimension_semantics = [#tpu.dimension_semantics<parallel>, #tpu.dimension_semantics<parallel>, #tpu.dimension_semantics<arbitrary>], iteration_bounds = array<i64: 1, 2, 1>, scalar_prefetch = 0 : i64, scratch_operands = 1 : i64, tpu.core_type = #tpu.core_type<tc>, window_params = [{transform_indices = @transform_0, window_bounds = array<i64: 8, 128>}, {transform_indices = @transform_1, window_bounds = array<i64: 128, 128>}, {transform_indices = @transform_2, window_bounds = array<i64: 2, 128>}, {transform_indices = @transform_3, window_bounds = array<i64: 8, 128>}]} {
    %c0 = arith.constant 0 : index
    %c0_0 = arith.constant 0 : index
    %0 = vector.load %arg3[%c0, %c0_0] : memref<8x128xbf16, #tpu.memory_space<vmem>>, vector<8x128xbf16>
    %c0_1 = arith.constant 0 : index
    %c0_2 = arith.constant 0 : index
    %1 = vector.load %arg4[%c0_1, %c0_2] : memref<128x128xbf16, #tpu.memory_space<vmem>>, vector<128x128xbf16>
    %cst = arith.constant dense<0.000000e+00> : vector<8x128xf32>
    %2 = tpu.matmul %0, %1, %cst {dimension_numbers = #tpu.dot_dimension_numbers<[1], [0], [0], [1], [0, 0, 1, 1], [], []>} : vector<8x128xbf16>, vector<128x128xbf16>, vector<8x128xf32> -> vector<8x128xf32>
    %c0_i32 = arith.constant 0 : i32
    %3 = arith.cmpi eq, %arg2, %c0_i32 : i32
    %4 = arith.extui %3 : i1 to i32
    %c0_i32_3 = arith.constant 0 : i32
    %5 = arith.cmpi ne, %4, %c0_i32_3 : i32
    scf.if %5 {
      %c0_8 = arith.constant 0 : index
      %c0_9 = arith.constant 0 : index
      %12 = vector.load %arg7[%c0_8, %c0_9] : memref<8x128xf32, #tpu.memory_space<vmem>>, vector<8x128xf32>
      tpu.vector_store %arg7[%c0_8, %c0_9], %2 {strides = array<i32>} : memref<8x128xf32, #tpu.memory_space<vmem>>, vector<8x128xf32>,
    } else {
    }
    %c0_i32_4 = arith.constant 0 : i32
    %6 = arith.cmpi sgt, %arg2, %c0_i32_4 : i32
    %7 = arith.extui %6 : i1 to i32
    %c0_i32_5 = arith.constant 0 : i32
    %8 = arith.cmpi ne, %7, %c0_i32_5 : i32
    scf.if %8 {
      %c0_8 = arith.constant 0 : index
      %c0_9 = arith.constant 0 : index
      %12 = vector.load %arg7[%c0_8, %c0_9] : memref<8x128xf32, #tpu.memory_space<vmem>>, vector<8x128xf32>
      %13 = arith.addf %12, %2 : vector<8x128xf32>
      %c0_10 = arith.constant 0 : index
      %c0_11 = arith.constant 0 : index
      %14 = vector.load %arg7[%c0_10, %c0_11] : memref<8x128xf32, #tpu.memory_space<vmem>>, vector<8x128xf32>
      tpu.vector_store %arg7[%c0_10, %c0_11], %13 {strides = array<i32>} : memref<8x128xf32, #tpu.memory_space<vmem>>, vector<8x128xf32>,
    } else {
    }
    %c0_i32_6 = arith.constant 0 : i32
    %9 = arith.cmpi eq, %arg2, %c0_i32_6 : i32
    %10 = arith.extui %9 : i1 to i32
    %c0_i32_7 = arith.constant 0 : i32
    %11 = arith.cmpi ne, %10, %c0_i32_7 : i32
    scf.if %11 {
      %c0_8 = arith.constant 0 : index
      %c0_9 = arith.constant 0 : index
      %12 = vector.load %arg7[%c0_8, %c0_9] : memref<8x128xf32, #tpu.memory_space<vmem>>, vector<8x128xf32>
      %c0_10 = arith.constant 0 : index
      %c0_11 = arith.constant 0 : index
      %13 = vector.load %arg5[%c0_10, %c0_11] : memref<2x128xf32, #tpu.memory_space<vmem>>, vector<1x128xf32>
      %14 = vector.broadcast %13 : vector<1x128xf32> to vector<8x128xf32>
      %15 = arith.mulf %12, %14 : vector<8x128xf32>
      %c1 = arith.constant 1 : index
      %c0_12 = arith.constant 0 : index
      %16 = vector.load %arg5[%c1, %c0_12] : memref<2x128xf32, #tpu.memory_space<vmem>>, vector<1x128xf32>
      %17 = vector.broadcast %16 : vector<1x128xf32> to vector<8x128xf32>
      %18 = arith.addf %15, %17 : vector<8x128xf32>
      %19 = arith.truncf %18 : vector<8x128xf32> to vector<8x128xbf16>
      %c0_13 = arith.constant 0 : index
      %c0_14 = arith.constant 0 : index
      %20 = vector.load %arg6[%c0_13, %c0_14] : memref<8x128xbf16, #tpu.memory_space<vmem>>, vector<8x128xbf16>
      tpu.vector_store %arg6[%c0_13, %c0_14], %19 {strides = array<i32>} : memref<8x128xbf16, #tpu.memory_space<vmem>>, vector<8x128xbf16>,
    } else {
    }
    return
  }
  func.func @transform_0(%arg0: i32, %arg1: i32, %arg2: i32) -> (i32, i32) {
    %c0_i32 = arith.constant 0 : i32
    return %arg0, %arg2 : i32, i32
  }
  func.func @transform_1(%arg0: i32, %arg1: i32, %arg2: i32) -> (i32, i32) {
    %c0_i32 = arith.constant 0 : i32
    return %arg2, %arg1 : i32, i32
  }
  func.func @transform_2(%arg0: i32, %arg1: i32, %arg2: i32) -> (i32, i32) {
    %c0_i32 = arith.constant 0 : i32
    %c0_i32_0 = arith.constant 0 : i32
    return %c0_i32, %arg1 : i32, i32
  }
  func.func @transform_3(%arg0: i32, %arg1: i32, %arg2: i32) -> (i32, i32) {
    %c0_i32 = arith.constant 0 : i32
    return %arg0, %arg1 : i32, i32
  }
}

module attributes {stable_mosaic.version = 11 : i64} {
  func.func @_matmul_bn_kernel(%arg0: i32, %arg1: i32, %arg2: i32, %arg3: memref<8x1152xbf16, #tpu.memory_space<vmem>>, %arg4: memref<1152x256xbf16, #tpu.memory_space<vmem>>, %arg5: memref<2x256xf32, #tpu.memory_space<vmem>>, %arg6: memref<8x256xbf16, #tpu.memory_space<vmem>>, %arg7: memref<8x256xf32, #tpu.memory_space<vmem>>) attributes {dimension_semantics = [#tpu.dimension_semantics<parallel>, #tpu.dimension_semantics<parallel>, #tpu.dimension_semantics<arbitrary>], iteration_bounds = array<i64: 1, 2, 2>, scalar_prefetch = 0 : i64, scratch_operands = 1 : i64, tpu.core_type = #tpu.core_type<tc>, window_params = [{transform_indices = @transform_0, window_bounds = array<i64: 8, 1152>}, {transform_indices = @transform_1, window_bounds = array<i64: 1152, 256>}, {transform_indices = @transform_2, window_bounds = array<i64: 2, 256>}, {transform_indices = @transform_3, window_bounds = array<i64: 8, 256>}]} {
    %c0 = arith.constant 0 : index
    %c0_0 = arith.constant 0 : index
    %0 = vector.load %arg3[%c0, %c0_0] : memref<8x1152xbf16, #tpu.memory_space<vmem>>, vector<8x1152xbf16>
    %c0_1 = arith.constant 0 : index
    %c0_2 = arith.constant 0 : index
    %1 = vector.load %arg4[%c0_1, %c0_2] : memref<1152x256xbf16, #tpu.memory_space<vmem>>, vector<1152x256xbf16>
    %cst = arith.constant dense<0.000000e+00> : vector<8x256xf32>
    %2 = tpu.matmul %0, %1, %cst {dimension_numbers = #tpu.dot_dimension_numbers<[1], [0], [0], [1], [0, 0, 1, 1], [], []>} : vector<8x1152xbf16>, vector<1152x256xbf16>, vector<8x256xf32> -> vector<8x256xf32>
    %c0_i32 = arith.constant 0 : i32
    %3 = arith.cmpi eq, %arg2, %c0_i32 : i32
    %4 = arith.extui %3 : i1 to i32
    %c0_i32_3 = arith.constant 0 : i32
    %5 = arith.cmpi ne, %4, %c0_i32_3 : i32
    scf.if %5 {
      %c0_7 = arith.constant 0 : index
      %c0_8 = arith.constant 0 : index
      %12 = vector.load %arg7[%c0_7, %c0_8] : memref<8x256xf32, #tpu.memory_space<vmem>>, vector<8x256xf32>
      tpu.vector_store %arg7[%c0_7, %c0_8], %2 {strides = array<i32>} : memref<8x256xf32, #tpu.memory_space<vmem>>, vector<8x256xf32>,
    } else {
    }
    %c0_i32_4 = arith.constant 0 : i32
    %6 = arith.cmpi sgt, %arg2, %c0_i32_4 : i32
    %7 = arith.extui %6 : i1 to i32
    %c0_i32_5 = arith.constant 0 : i32
    %8 = arith.cmpi ne, %7, %c0_i32_5 : i32
    scf.if %8 {
      %c0_7 = arith.constant 0 : index
      %c0_8 = arith.constant 0 : index
      %12 = vector.load %arg7[%c0_7, %c0_8] : memref<8x256xf32, #tpu.memory_space<vmem>>, vector<8x256xf32>
      %13 = arith.addf %12, %2 : vector<8x256xf32>
      %c0_9 = arith.constant 0 : index
      %c0_10 = arith.constant 0 : index
      %14 = vector.load %arg7[%c0_9, %c0_10] : memref<8x256xf32, #tpu.memory_space<vmem>>, vector<8x256xf32>
      tpu.vector_store %arg7[%c0_9, %c0_10], %13 {strides = array<i32>} : memref<8x256xf32, #tpu.memory_space<vmem>>, vector<8x256xf32>,
    } else {
    }
    %c1_i32 = arith.constant 1 : i32
    %9 = arith.cmpi eq, %arg2, %c1_i32 : i32
    %10 = arith.extui %9 : i1 to i32
    %c0_i32_6 = arith.constant 0 : i32
    %11 = arith.cmpi ne, %10, %c0_i32_6 : i32
    scf.if %11 {
      %c0_7 = arith.constant 0 : index
      %c0_8 = arith.constant 0 : index
      %12 = vector.load %arg7[%c0_7, %c0_8] : memref<8x256xf32, #tpu.memory_space<vmem>>, vector<8x256xf32>
      %c0_9 = arith.constant 0 : index
      %c0_10 = arith.constant 0 : index
      %13 = vector.load %arg5[%c0_9, %c0_10] : memref<2x256xf32, #tpu.memory_space<vmem>>, vector<1x256xf32>
      %14 = vector.broadcast %13 : vector<1x256xf32> to vector<8x256xf32>
      %15 = arith.mulf %12, %14 : vector<8x256xf32>
      %c1 = arith.constant 1 : index
      %c0_11 = arith.constant 0 : index
      %16 = vector.load %arg5[%c1, %c0_11] : memref<2x256xf32, #tpu.memory_space<vmem>>, vector<1x256xf32>
      %17 = vector.broadcast %16 : vector<1x256xf32> to vector<8x256xf32>
      %18 = arith.addf %15, %17 : vector<8x256xf32>
      %cst_12 = arith.constant 0.000000e+00 : f32
      %19 = vector.broadcast %cst_12 : f32 to vector<8x256xf32>
      %20 = arith.maximumf %18, %19 : vector<8x256xf32>
      %21 = arith.truncf %20 : vector<8x256xf32> to vector<8x256xbf16>
      %c0_13 = arith.constant 0 : index
      %c0_14 = arith.constant 0 : index
      %22 = vector.load %arg6[%c0_13, %c0_14] : memref<8x256xbf16, #tpu.memory_space<vmem>>, vector<8x256xbf16>
      tpu.vector_store %arg6[%c0_13, %c0_14], %21 {strides = array<i32>} : memref<8x256xbf16, #tpu.memory_space<vmem>>, vector<8x256xbf16>,
    } else {
    }
    return
  }
  func.func @transform_0(%arg0: i32, %arg1: i32, %arg2: i32) -> (i32, i32) {
    %c0_i32 = arith.constant 0 : i32
    return %arg0, %arg2 : i32, i32
  }
  func.func @transform_1(%arg0: i32, %arg1: i32, %arg2: i32) -> (i32, i32) {
    %c0_i32 = arith.constant 0 : i32
    return %arg2, %arg1 : i32, i32
  }
  func.func @transform_2(%arg0: i32, %arg1: i32, %arg2: i32) -> (i32, i32) {
    %c0_i32 = arith.constant 0 : i32
    %c0_i32_0 = arith.constant 0 : i32
    return %c0_i32, %arg1 : i32, i32
  }
  func.func @transform_3(%arg0: i32, %arg1: i32, %arg2: i32) -> (i32, i32) {
    %c0_i32 = arith.constant 0 : i32
    return %arg0, %arg1 : i32, i32
  }
}

module attributes {stable_mosaic.version = 11 : i64} {
  func.func @_matmul_bn_kernel(%arg0: i32, %arg1: i32, %arg2: i32, %arg3: memref<8x256xbf16, #tpu.memory_space<vmem>>, %arg4: memref<256x256xbf16, #tpu.memory_space<vmem>>, %arg5: memref<2x256xf32, #tpu.memory_space<vmem>>, %arg6: memref<8x256xbf16, #tpu.memory_space<vmem>>, %arg7: memref<8x256xf32, #tpu.memory_space<vmem>>) attributes {dimension_semantics = [#tpu.dimension_semantics<parallel>, #tpu.dimension_semantics<parallel>, #tpu.dimension_semantics<arbitrary>], iteration_bounds = array<i64: 1, 2, 1>, scalar_prefetch = 0 : i64, scratch_operands = 1 : i64, tpu.core_type = #tpu.core_type<tc>, window_params = [{transform_indices = @transform_0, window_bounds = array<i64: 8, 256>}, {transform_indices = @transform_1, window_bounds = array<i64: 256, 256>}, {transform_indices = @transform_2, window_bounds = array<i64: 2, 256>}, {transform_indices = @transform_3, window_bounds = array<i64: 8, 256>}]} {
    %c0 = arith.constant 0 : index
    %c0_0 = arith.constant 0 : index
    %0 = vector.load %arg3[%c0, %c0_0] : memref<8x256xbf16, #tpu.memory_space<vmem>>, vector<8x256xbf16>
    %c0_1 = arith.constant 0 : index
    %c0_2 = arith.constant 0 : index
    %1 = vector.load %arg4[%c0_1, %c0_2] : memref<256x256xbf16, #tpu.memory_space<vmem>>, vector<256x256xbf16>
    %cst = arith.constant dense<0.000000e+00> : vector<8x256xf32>
    %2 = tpu.matmul %0, %1, %cst {dimension_numbers = #tpu.dot_dimension_numbers<[1], [0], [0], [1], [0, 0, 1, 1], [], []>} : vector<8x256xbf16>, vector<256x256xbf16>, vector<8x256xf32> -> vector<8x256xf32>
    %c0_i32 = arith.constant 0 : i32
    %3 = arith.cmpi eq, %arg2, %c0_i32 : i32
    %4 = arith.extui %3 : i1 to i32
    %c0_i32_3 = arith.constant 0 : i32
    %5 = arith.cmpi ne, %4, %c0_i32_3 : i32
    scf.if %5 {
      %c0_8 = arith.constant 0 : index
      %c0_9 = arith.constant 0 : index
      %12 = vector.load %arg7[%c0_8, %c0_9] : memref<8x256xf32, #tpu.memory_space<vmem>>, vector<8x256xf32>
      tpu.vector_store %arg7[%c0_8, %c0_9], %2 {strides = array<i32>} : memref<8x256xf32, #tpu.memory_space<vmem>>, vector<8x256xf32>,
    } else {
    }
    %c0_i32_4 = arith.constant 0 : i32
    %6 = arith.cmpi sgt, %arg2, %c0_i32_4 : i32
    %7 = arith.extui %6 : i1 to i32
    %c0_i32_5 = arith.constant 0 : i32
    %8 = arith.cmpi ne, %7, %c0_i32_5 : i32
    scf.if %8 {
      %c0_8 = arith.constant 0 : index
      %c0_9 = arith.constant 0 : index
      %12 = vector.load %arg7[%c0_8, %c0_9] : memref<8x256xf32, #tpu.memory_space<vmem>>, vector<8x256xf32>
      %13 = arith.addf %12, %2 : vector<8x256xf32>
      %c0_10 = arith.constant 0 : index
      %c0_11 = arith.constant 0 : index
      %14 = vector.load %arg7[%c0_10, %c0_11] : memref<8x256xf32, #tpu.memory_space<vmem>>, vector<8x256xf32>
      tpu.vector_store %arg7[%c0_10, %c0_11], %13 {strides = array<i32>} : memref<8x256xf32, #tpu.memory_space<vmem>>, vector<8x256xf32>,
    } else {
    }
    %c0_i32_6 = arith.constant 0 : i32
    %9 = arith.cmpi eq, %arg2, %c0_i32_6 : i32
    %10 = arith.extui %9 : i1 to i32
    %c0_i32_7 = arith.constant 0 : i32
    %11 = arith.cmpi ne, %10, %c0_i32_7 : i32
    scf.if %11 {
      %c0_8 = arith.constant 0 : index
      %c0_9 = arith.constant 0 : index
      %12 = vector.load %arg7[%c0_8, %c0_9] : memref<8x256xf32, #tpu.memory_space<vmem>>, vector<8x256xf32>
      %c0_10 = arith.constant 0 : index
      %c0_11 = arith.constant 0 : index
      %13 = vector.load %arg5[%c0_10, %c0_11] : memref<2x256xf32, #tpu.memory_space<vmem>>, vector<1x256xf32>
      %14 = vector.broadcast %13 : vector<1x256xf32> to vector<8x256xf32>
      %15 = arith.mulf %12, %14 : vector<8x256xf32>
      %c1 = arith.constant 1 : index
      %c0_12 = arith.constant 0 : index
      %16 = vector.load %arg5[%c1, %c0_12] : memref<2x256xf32, #tpu.memory_space<vmem>>, vector<1x256xf32>
      %17 = vector.broadcast %16 : vector<1x256xf32> to vector<8x256xf32>
      %18 = arith.addf %15, %17 : vector<8x256xf32>
      %19 = arith.truncf %18 : vector<8x256xf32> to vector<8x256xbf16>
      %c0_13 = arith.constant 0 : index
      %c0_14 = arith.constant 0 : index
      %20 = vector.load %arg6[%c0_13, %c0_14] : memref<8x256xbf16, #tpu.memory_space<vmem>>, vector<8x256xbf16>
      tpu.vector_store %arg6[%c0_13, %c0_14], %19 {strides = array<i32>} : memref<8x256xbf16, #tpu.memory_space<vmem>>, vector<8x256xbf16>,
    } else {
    }
    return
  }
  func.func @transform_0(%arg0: i32, %arg1: i32, %arg2: i32) -> (i32, i32) {
    %c0_i32 = arith.constant 0 : i32
    return %arg0, %arg2 : i32, i32
  }
  func.func @transform_1(%arg0: i32, %arg1: i32, %arg2: i32) -> (i32, i32) {
    %c0_i32 = arith.constant 0 : i32
    return %arg2, %arg1 : i32, i32
  }
  func.func @transform_2(%arg0: i32, %arg1: i32, %arg2: i32) -> (i32, i32) {
    %c0_i32 = arith.constant 0 : i32
    %c0_i32_0 = arith.constant 0 : i32
    return %c0_i32, %arg1 : i32, i32
  }
  func.func @transform_3(%arg0: i32, %arg1: i32, %arg2: i32) -> (i32, i32) {
    %c0_i32 = arith.constant 0 : i32
    return %arg0, %arg1 : i32, i32
  }
}

module attributes {stable_mosaic.version = 11 : i64} {
  func.func @_matmul_bn_kernel(%arg0: i32, %arg1: i32, %arg2: i32, %arg3: memref<8x1536xbf16, #tpu.memory_space<vmem>>, %arg4: memref<1536x256xbf16, #tpu.memory_space<vmem>>, %arg5: memref<2x256xf32, #tpu.memory_space<vmem>>, %arg6: memref<8x256xbf16, #tpu.memory_space<vmem>>, %arg7: memref<8x256xbf16, #tpu.memory_space<vmem>>, %arg8: memref<8x256xf32, #tpu.memory_space<vmem>>) attributes {dimension_semantics = [#tpu.dimension_semantics<parallel>, #tpu.dimension_semantics<parallel>, #tpu.dimension_semantics<arbitrary>], iteration_bounds = array<i64: 1, 2, 3>, scalar_prefetch = 0 : i64, scratch_operands = 1 : i64, tpu.core_type = #tpu.core_type<tc>, window_params = [{transform_indices = @transform_0, window_bounds = array<i64: 8, 1536>}, {transform_indices = @transform_1, window_bounds = array<i64: 1536, 256>}, {transform_indices = @transform_2, window_bounds = array<i64: 2, 256>}, {transform_indices = @transform_3, window_bounds = array<i64: 8, 256>}, {transform_indices = @transform_4, window_bounds = array<i64: 8, 256>}]} {
    %c0 = arith.constant 0 : index
    %c0_0 = arith.constant 0 : index
    %0 = vector.load %arg3[%c0, %c0_0] : memref<8x1536xbf16, #tpu.memory_space<vmem>>, vector<8x1536xbf16>
    %c0_1 = arith.constant 0 : index
    %c0_2 = arith.constant 0 : index
    %1 = vector.load %arg4[%c0_1, %c0_2] : memref<1536x256xbf16, #tpu.memory_space<vmem>>, vector<1536x256xbf16>
    %cst = arith.constant dense<0.000000e+00> : vector<8x256xf32>
    %2 = tpu.matmul %0, %1, %cst {dimension_numbers = #tpu.dot_dimension_numbers<[1], [0], [0], [1], [0, 0, 1, 1], [], []>} : vector<8x1536xbf16>, vector<1536x256xbf16>, vector<8x256xf32> -> vector<8x256xf32>
    %c0_i32 = arith.constant 0 : i32
    %3 = arith.cmpi eq, %arg2, %c0_i32 : i32
    %4 = arith.extui %3 : i1 to i32
    %c0_i32_3 = arith.constant 0 : i32
    %5 = arith.cmpi ne, %4, %c0_i32_3 : i32
    scf.if %5 {
      %c0_7 = arith.constant 0 : index
      %c0_8 = arith.constant 0 : index
      %12 = vector.load %arg8[%c0_7, %c0_8] : memref<8x256xf32, #tpu.memory_space<vmem>>, vector<8x256xf32>
      tpu.vector_store %arg8[%c0_7, %c0_8], %2 {strides = array<i32>} : memref<8x256xf32, #tpu.memory_space<vmem>>, vector<8x256xf32>,
    } else {
    }
    %c0_i32_4 = arith.constant 0 : i32
    %6 = arith.cmpi sgt, %arg2, %c0_i32_4 : i32
    %7 = arith.extui %6 : i1 to i32
    %c0_i32_5 = arith.constant 0 : i32
    %8 = arith.cmpi ne, %7, %c0_i32_5 : i32
    scf.if %8 {
      %c0_7 = arith.constant 0 : index
      %c0_8 = arith.constant 0 : index
      %12 = vector.load %arg8[%c0_7, %c0_8] : memref<8x256xf32, #tpu.memory_space<vmem>>, vector<8x256xf32>
      %13 = arith.addf %12, %2 : vector<8x256xf32>
      %c0_9 = arith.constant 0 : index
      %c0_10 = arith.constant 0 : index
      %14 = vector.load %arg8[%c0_9, %c0_10] : memref<8x256xf32, #tpu.memory_space<vmem>>, vector<8x256xf32>
      tpu.vector_store %arg8[%c0_9, %c0_10], %13 {strides = array<i32>} : memref<8x256xf32, #tpu.memory_space<vmem>>, vector<8x256xf32>,
    } else {
    }
    %c2_i32 = arith.constant 2 : i32
    %9 = arith.cmpi eq, %arg2, %c2_i32 : i32
    %10 = arith.extui %9 : i1 to i32
    %c0_i32_6 = arith.constant 0 : i32
    %11 = arith.cmpi ne, %10, %c0_i32_6 : i32
    scf.if %11 {
      %c0_7 = arith.constant 0 : index
      %c0_8 = arith.constant 0 : index
      %12 = vector.load %arg8[%c0_7, %c0_8] : memref<8x256xf32, #tpu.memory_space<vmem>>, vector<8x256xf32>
      %c0_9 = arith.constant 0 : index
      %c0_10 = arith.constant 0 : index
      %13 = vector.load %arg5[%c0_9, %c0_10] : memref<2x256xf32, #tpu.memory_space<vmem>>, vector<1x256xf32>
      %14 = vector.broadcast %13 : vector<1x256xf32> to vector<8x256xf32>
      %15 = arith.mulf %12, %14 : vector<8x256xf32>
      %c1 = arith.constant 1 : index
      %c0_11 = arith.constant 0 : index
      %16 = vector.load %arg5[%c1, %c0_11] : memref<2x256xf32, #tpu.memory_space<vmem>>, vector<1x256xf32>
      %17 = vector.broadcast %16 : vector<1x256xf32> to vector<8x256xf32>
      %18 = arith.addf %15, %17 : vector<8x256xf32>
      %c0_12 = arith.constant 0 : index
      %c0_13 = arith.constant 0 : index
      %19 = vector.load %arg6[%c0_12, %c0_13] : memref<8x256xbf16, #tpu.memory_space<vmem>>, vector<8x256xbf16>
      %20 = arith.extf %19 : vector<8x256xbf16> to vector<8x256xf32>
      %21 = arith.addf %18, %20 : vector<8x256xf32>
      %cst_14 = arith.constant 0.000000e+00 : f32
      %22 = vector.broadcast %cst_14 : f32 to vector<8x256xf32>
      %23 = arith.maximumf %21, %22 : vector<8x256xf32>
      %24 = arith.truncf %23 : vector<8x256xf32> to vector<8x256xbf16>
      %c0_15 = arith.constant 0 : index
      %c0_16 = arith.constant 0 : index
      %25 = vector.load %arg7[%c0_15, %c0_16] : memref<8x256xbf16, #tpu.memory_space<vmem>>, vector<8x256xbf16>
      tpu.vector_store %arg7[%c0_15, %c0_16], %24 {strides = array<i32>} : memref<8x256xbf16, #tpu.memory_space<vmem>>, vector<8x256xbf16>,
    } else {
    }
    return
  }
  func.func @transform_0(%arg0: i32, %arg1: i32, %arg2: i32) -> (i32, i32) {
    %c0_i32 = arith.constant 0 : i32
    return %arg0, %arg2 : i32, i32
  }
  func.func @transform_1(%arg0: i32, %arg1: i32, %arg2: i32) -> (i32, i32) {
    %c0_i32 = arith.constant 0 : i32
    return %arg2, %arg1 : i32, i32
  }
  func.func @transform_2(%arg0: i32, %arg1: i32, %arg2: i32) -> (i32, i32) {
    %c0_i32 = arith.constant 0 : i32
    %c0_i32_0 = arith.constant 0 : i32
    return %c0_i32, %arg1 : i32, i32
  }
  func.func @transform_3(%arg0: i32, %arg1: i32, %arg2: i32) -> (i32, i32) {
    %c0_i32 = arith.constant 0 : i32
    return %arg0, %arg1 : i32, i32
  }
  func.func @transform_4(%arg0: i32, %arg1: i32, %arg2: i32) -> (i32, i32) {
    %c0_i32 = arith.constant 0 : i32
    return %arg0, %arg1 : i32, i32
  }
}

module attributes {stable_mosaic.version = 11 : i64} {
  func.func @_avgpool_fc_kernel(%arg0: memref<2x1x512xbf16, #tpu.memory_space<vmem>>, %arg1: memref<512x128xf32, #tpu.memory_space<vmem>>, %arg2: memref<1x128xf32, #tpu.memory_space<vmem>>, %arg3: memref<2x128xf32, #tpu.memory_space<vmem>>) attributes {dimension_semantics = [], scalar_prefetch = 0 : i64, scratch_operands = 0 : i64, tpu.core_type = #tpu.core_type<tc>} {
    %c0 = arith.constant 0 : index
    %c0_0 = arith.constant 0 : index
    %c0_1 = arith.constant 0 : index
    %0 = vector.load %arg0[%c0, %c0_0, %c0_1] : memref<2x1x512xbf16, #tpu.memory_space<vmem>>, vector<2x1x512xbf16>
    %1 = arith.extf %0 : vector<2x1x512xbf16> to vector<2x1x512xf32>
    %cst = arith.constant dense<0.000000e+00> : vector<2x512xf32>
    %2 = vector.multi_reduction <add>, %1, %cst [1] : vector<2x1x512xf32> to vector<2x512xf32>
    %cst_2 = arith.constant 1.000000e+00 : f32
    %3 = vector.broadcast %cst_2 : f32 to vector<2x512xf32>
    %4 = arith.divf %2, %3 : vector<2x512xf32>
    %c0_3 = arith.constant 0 : index
    %c0_4 = arith.constant 0 : index
    %5 = vector.load %arg1[%c0_3, %c0_4] : memref<512x128xf32, #tpu.memory_space<vmem>>, vector<512x128xf32>
    %cst_5 = arith.constant dense<0.000000e+00> : vector<2x128xf32>
    %6 = tpu.matmul %4, %5, %cst_5 {dimension_numbers = #tpu.dot_dimension_numbers<[1], [0], [0], [1], [0, 0, 1, 1], [], []>} : vector<2x512xf32>, vector<512x128xf32>, vector<2x128xf32> -> vector<2x128xf32>
    %c0_6 = arith.constant 0 : index
    %c0_7 = arith.constant 0 : index
    %7 = vector.load %arg2[%c0_6, %c0_7] : memref<1x128xf32, #tpu.memory_space<vmem>>, vector<1x128xf32>
    %8 = vector.broadcast %7 : vector<1x128xf32> to vector<2x128xf32>
    %9 = arith.addf %6, %8 : vector<2x128xf32>
    %c0_8 = arith.constant 0 : index
    %c0_9 = arith.constant 0 : index
    %10 = vector.load %arg3[%c0_8, %c0_9] : memref<2x128xf32, #tpu.memory_space<vmem>>, vector<2x128xf32>
    tpu.vector_store %arg3[%c0_8, %c0_9], %9 {strides = array<i32>} : memref<2x128xf32, #tpu.memory_space<vmem>>, vector<2x128xf32>,
    return
  }
}

</mosaic_0001>

<bundles_post_ra>
// kernel: resnet_forward.13
= control target key start
LH: loop header
LB: loop body
LE: loop exit
PB: predicated region body
PF: predicated region fallthrough
CT: control target
= control target key end

     0   :  { %s1790_s12 = smov 0   ;;  %s1792_s13 = smov 0   ;;  %s2001_s0 = inlined_call_operand.vmem [shape: bf16[512,256], index: 0, kind: input, shape index: {}]   ;;  %s2002_s1 = inlined_call_operand.vmem [shape: bf16[256,128], index: 1, kind: input, shape index: {}]   ;;  %s2003_s2 = inlined_call_operand.vmem [shape: f32[2,128], index: 2, kind: input, shape index: {}]   ;;  %s2004_s3 = inlined_call_operand.vmem [shape: bf16[512,128], index: 3, kind: output, shape index: {}]  }
   0x1   :  { %s1794_s14 = smov 0  }
   0x2 LB: > { %s32_s15 = sadd.s32 1, %s1764_s13  ;;  %p1312_p0 = scmp.ge.s32.totalorder %s1768_s14, 1  ;;  %s1768_s14 = sphi %s1794_s14, %s13_s14   ;;  %s1764_s13 = sphi %s1792_s13, %s2006_s13   ;;  %s1760_s12 = sphi %s1790_s12, %s2005_s12  }
   0x3   : > { %p34_p1 = scmp.ge.s32.totalorder %s32_s15, 2  ;;  %p192_p2 = scmp.lt.s32.totalorder %s1768_s14, 3 }
   0x5   : > { %s2008_s15 = smov (%p34_p1, %s32_s15), 0  ;;  %p193_p3 = pnand %p1312_p0, %p192_p2 }
   0x6   : > { %v1682_v0 = vld [vmem:[%s2002_s1 + $0x40] sm:$0xff] (!%p193_p3)   ;;  %s1313_s18 = sshll.u32 (!%p193_p3), %s1760_s12, 5  ;;  %v1684_v2 = vld [vmem:[%s2002_s1 + $0x48] sm:$0xff] (!%p193_p3)   ;;  %v1686_v4 = vld [vmem:[%s2002_s1 + $0x50] sm:$0xff] (!%p193_p3)  }
   0x7   : > { %196 = sbr.rel (%p193_p3) target bundleno = 322 (0x142), region = 32  ;;  %v1683_v1 = vld [vmem:[%s2002_s1] sm:$0xff] (!%p193_p3)   ;;  %1530 = vmatprep.subr.bf16.mxu0 (!%p193_p3), %v1682_v0  ;;  %1642 = vmatprep.subr.bf16.mxu1 (!%p193_p3), %v1682_v0  ;;  %v1685_v3 = vld [vmem:[%s2002_s1 + $0x8] sm:$0xff] (!%p193_p3)   ;;  %p238_p4 = scmp.lt.s32.totalorder (!%p193_p3), %s1313_s18, 63  ;;  %v1687_v5 = vld [vmem:[%s2002_s1 + $0x10] sm:$0xff] (!%p193_p3)  }
   0x8   : > { %1531 = vmatpush3.bf16.msra.mxu0 (!%p193_p3), %v1683_v1  ;;  %1650 = vmatpush3.bf16.msra.mxu1 (!%p193_p3), %v1683_v1  ;;  %v1688_v6 = vld [vmem:[%s2002_s1 + $0x58] sm:$0xff] (!%p193_p3)   ;;  %v1690_v8 = vld [vmem:[%s2002_s1 + $0x60] sm:$0xff] (!%p193_p3)   ;;  %v1692_v10 = vld [vmem:[%s2002_s1 + $0x68] sm:$0xff] (!%p193_p3)  }
   0x9   : > { %1532 = vmatprep.subr.bf16.mxu0 (!%p193_p3), %v1684_v2  ;;  %1643 = vmatprep.subr.bf16.mxu1 (!%p193_p3), %v1684_v2  ;;  %v1689_v7 = vld [vmem:[%s2002_s1 + $0x18] sm:$0xff] (!%p193_p3)   ;;  %v1691_v9 = vld [vmem:[%s2002_s1 + $0x20] sm:$0xff] (!%p193_p3)   ;;  %v1693_v13 = vld [vmem:[%s2002_s1 + $0x28] sm:$0xff] (!%p193_p3)  }
   0xa   : > { %v1694_v14 = vld [vmem:[%s2002_s1 + $0x70] sm:$0xff] (!%p193_p3)   ;;  %v1696_v16 = vld [vmem:[%s2002_s1 + $0x78] sm:$0xff] (!%p193_p3)   ;;  %v1899_v51 = vld [vmem:[%s2003_s2] ss:$0 sm:$0xff] (!%p193_p3) }
   0xb   : > { %v1695_v15 = vld [vmem:[%s2002_s1 + $0x30] sm:$0xff] (!%p193_p3)   ;;  %v1697_v17 = vld [vmem:[%s2002_s1 + $0x38] sm:$0xff] (!%p193_p3)   ;;  %v1904_v57 = vld [vmem:[%s2003_s2 + $0x1] ss:$0 sm:$0xff] (!%p193_p3) }
   0xc   : > { %1533 = vmatpush3.bf16.msra.mxu0 (!%p193_p3), %v1685_v3  ;;  %1651 = vmatpush3.bf16.msra.mxu1 (!%p193_p3), %v1685_v3 }
   0xd   : > { %1534 = vmatprep.subr.bf16.mxu0 (!%p193_p3), %v1686_v4  ;;  %1644 = vmatprep.subr.bf16.mxu1 (!%p193_p3), %v1686_v4 }
   0xe   : > { %s2010_s18 = smov (!%p238_p4, %s1313_s18), 63 }
   0xf   : > { %s1402_s6 = sshll.u32 %s2010_s18, 3  ;;  %s1317_s7 = sshll.u32 %s2010_s18, 2 }
  0x10   : > { %1535 = vmatpush3.bf16.msra.mxu0 %v1687_v5  ;;  %1652 = vmatpush3.bf16.msra.mxu1 %v1687_v5  ;;  %s1841_s11 = scalar_lea.vmem %s2001_s0, %s1402_s6  ;;  %s1918_s18 = scalar_lea.vmem %s2004_s3, %s1317_s7 }
  0x11   : > { %1536 = vmatprep.subr.bf16.mxu0 %v1688_v6  ;;  %1645 = vmatprep.subr.bf16.mxu1 %v1688_v6  ;;  %v1700_v11 = vld [vmem:[%s1841_s11 + $0x4] ss:$8 sps:$4 sm:$0xff]   ;;  %v1698_v18 = vld [vmem:[%s1841_s11] ss:$8 sps:$4 sm:$0xff]   ;;  %v1704_v20 = vld [vmem:[%s1841_s11 + $0x14] ss:$8 sps:$4 sm:$0xff]  }
  0x12   : > { %v1703_v12 = vld [vmem:[%s1841_s11 + $0x84] ss:$8 sps:$4 sm:$0xff]   ;;  %623 = vmatprep.mubr.bf16.mxu0 %v1700_v11  ;;  %v1701_v19 = vld [vmem:[%s1841_s11 + $0x80] ss:$8 sps:$4 sm:$0xff]   ;;  %v1706_v21 = vld [vmem:[%s1841_s11 + $0x94] ss:$8 sps:$4 sm:$0xff]  }
  0x13   : > { %687 = vmatprep.mubr.bf16.mxu1 %v1703_v12  ;;  %v1708_v22 = vld [vmem:[%s1841_s11 + $0x10] ss:$8 sps:$4 sm:$0xff]   ;;  %v1710_v24 = vld [vmem:[%s1841_s11 + $0x24] ss:$8 sps:$4 sm:$0xff]   ;;  %v1714_v26 = vld [vmem:[%s1841_s11 + $0x20] ss:$8 sps:$4 sm:$0xff]  }
  0x14   : > { %1537 = vmatpush3.bf16.msra.mxu0 %v1689_v7  ;;  %1653 = vmatpush3.bf16.msra.mxu1 %v1689_v7  ;;  %v1709_v23 = vld [vmem:[%s1841_s11 + $0x90] ss:$8 sps:$4 sm:$0xff]   ;;  %v1712_v25 = vld [vmem:[%s1841_s11 + $0xa4] ss:$8 sps:$4 sm:$0xff]   ;;  %v1715_v27 = vld [vmem:[%s1841_s11 + $0xa0] ss:$8 sps:$4 sm:$0xff]  }
  0x15   : > { %1538 = vmatprep.subr.bf16.mxu0 %v1690_v8  ;;  %1646 = vmatprep.subr.bf16.mxu1 %v1690_v8  ;;  %v1716_v28 = vld [vmem:[%s1841_s11 + $0x34] ss:$8 sps:$4 sm:$0xff]   ;;  %v1720_v30 = vld [vmem:[%s1841_s11 + $0x30] ss:$8 sps:$4 sm:$0xff]   ;;  %v1722_v32 = vld [vmem:[%s1841_s11 + $0x44] ss:$8 sps:$4 sm:$0xff]  }
  0x16   : > { %v1718_v29 = vld [vmem:[%s1841_s11 + $0xb4] ss:$8 sps:$4 sm:$0xff]   ;;  %v1721_v31 = vld [vmem:[%s1841_s11 + $0xb0] ss:$8 sps:$4 sm:$0xff]   ;;  %v1724_v33 = vld [vmem:[%s1841_s11 + $0xc4] ss:$8 sps:$4 sm:$0xff]  }
  0x17   : > { %v1726_v34 = vld [vmem:[%s1841_s11 + $0x40] ss:$8 sps:$4 sm:$0xff]   ;;  %v1728_v36 = vld [vmem:[%s1841_s11 + $0x54] ss:$8 sps:$4 sm:$0xff]   ;;  %v1732_v38 = vld [vmem:[%s1841_s11 + $0x50] ss:$8 sps:$4 sm:$0xff]  }
  0x18   : > { %1539 = vmatpush3.bf16.msra.mxu0 %v1691_v9  ;;  %1654 = vmatpush3.bf16.msra.mxu1 %v1691_v9  ;;  %v1727_v35 = vld [vmem:[%s1841_s11 + $0xc0] ss:$8 sps:$4 sm:$0xff]   ;;  %v1730_v37 = vld [vmem:[%s1841_s11 + $0xd4] ss:$8 sps:$4 sm:$0xff]   ;;  %v1733_v39 = vld [vmem:[%s1841_s11 + $0xd0] ss:$8 sps:$4 sm:$0xff]  }
  0x19   : > { %1540 = vmatprep.subr.bf16.mxu0 %v1692_v10  ;;  %1647 = vmatprep.subr.bf16.mxu1 %v1692_v10  ;;  %v1734_v40 = vld [vmem:[%s1841_s11 + $0x64] ss:$8 sps:$4 sm:$0xff]   ;;  %v1738_v42 = vld [vmem:[%s1841_s11 + $0x60] ss:$8 sps:$4 sm:$0xff]   ;;  %v1740_v44 = vld [vmem:[%s1841_s11 + $0x74] ss:$8 sps:$4 sm:$0xff]  }
  0x1a   : > { %v1736_v41 = vld [vmem:[%s1841_s11 + $0xe4] ss:$8 sps:$4 sm:$0xff]   ;;  %v1739_v43 = vld [vmem:[%s1841_s11 + $0xe0] ss:$8 sps:$4 sm:$0xff]   ;;  %v1742_v45 = vld [vmem:[%s1841_s11 + $0xf4] ss:$8 sps:$4 sm:$0xff]  }
  0x1b   : > { %v1744_v46 = vld [vmem:[%s1841_s11 + $0x70] ss:$8 sps:$4 sm:$0xff]  }
  0x1c   : > { %1541 = vmatpush3.bf16.msra.mxu0 %v1693_v13  ;;  %1655 = vmatpush3.bf16.msra.mxu1 %v1693_v13  ;;  %v1745_v47 = vld [vmem:[%s1841_s11 + $0xf0] ss:$8 sps:$4 sm:$0xff]  }
  0x1d   : > { %1542 = vmatprep.subr.bf16.mxu0 %v1694_v14  ;;  %1648 = vmatprep.subr.bf16.mxu1 %v1694_v14 }
  0x20   : > { %1543 = vmatpush3.bf16.msra.mxu0 %v1695_v15  ;;  %1656 = vmatpush3.bf16.msra.mxu1 %v1695_v15 }
  0x21   : > { %1544 = vmatprep.subr.bf16.mxu0 %v1696_v16  ;;  %1649 = vmatprep.subr.bf16.mxu1 %v1696_v16 }
  0x24   : > { %1545 = vmatpush3.bf16.msra.mxu0 %v1697_v17  ;;  %1657 = vmatpush3.bf16.msra.mxu1 %v1697_v17 }
  0x27   : > { %624 = vmatmul.mubr.bf16.vlgmr.msra.gmra.mrb[0].mxu0 %v1698_v18  ;;  %688 = vmatmul.mubr.bf16.vlgmr.msra.gmra.mrb[0].mxu1 %v1701_v19 }
  0x28   : > { %631 = vmatprep.mubr.bf16.mxu0 %v1704_v20  ;;  %695 = vmatprep.mubr.bf16.mxu1 %v1706_v21 }
  0x2f   : > { %632 = vmatmul.mubr.bf16.gmra.mrb[4].mxu0 %v1708_v22  ;;  %696 = vmatmul.mubr.bf16.gmra.mrb[4].mxu1 %v1709_v23 }
  0x30   : > { %639 = vmatprep.mubr.bf16.mxu0 %v1710_v24  ;;  %703 = vmatprep.mubr.bf16.mxu1 %v1712_v25 }
  0x37   : > { %640 = vmatmul.mubr.bf16.gmra.mrb[8].mxu0 %v1714_v26  ;;  %704 = vmatmul.mubr.bf16.gmra.mrb[8].mxu1 %v1715_v27 }
  0x38   : > { %647 = vmatprep.mubr.bf16.mxu0 %v1716_v28  ;;  %711 = vmatprep.mubr.bf16.mxu1 %v1718_v29 }
  0x3f   : > { %648 = vmatmul.mubr.bf16.gmra.mrb[12].mxu0 %v1720_v30  ;;  %712 = vmatmul.mubr.bf16.gmra.mrb[12].mxu1 %v1721_v31 }
  0x40   : > { %655 = vmatprep.mubr.bf16.mxu0 %v1722_v32  ;;  %719 = vmatprep.mubr.bf16.mxu1 %v1724_v33 }
  0x47   : > { %656 = vmatmul.mubr.bf16.gmra.mrb[16].mxu0 %v1726_v34  ;;  %720 = vmatmul.mubr.bf16.gmra.mrb[16].mxu1 %v1727_v35 }
  0x48   : > { %663 = vmatprep.mubr.bf16.mxu0 %v1728_v36  ;;  %727 = vmatprep.mubr.bf16.mxu1 %v1730_v37 }
  0x4f   : > { %664 = vmatmul.mubr.bf16.gmra.mrb[20].mxu0 %v1732_v38  ;;  %728 = vmatmul.mubr.bf16.gmra.mrb[20].mxu1 %v1733_v39 }
  0x50   : > { %671 = vmatprep.mubr.bf16.mxu0 %v1734_v40  ;;  %735 = vmatprep.mubr.bf16.mxu1 %v1736_v41 }
  0x57   : > { %672 = vmatmul.mubr.bf16.gmra.mrb[24].mxu0 %v1738_v42  ;;  %736 = vmatmul.mubr.bf16.gmra.mrb[24].mxu1 %v1739_v43 }
  0x58   : > { %679 = vmatprep.mubr.bf16.mxu0 %v1740_v44  ;;  %743 = vmatprep.mubr.bf16.mxu1 %v1742_v45 }
  0x5f   : > { %680 = vmatmul.mubr.bf16.gmra.mrb[28].mxu0 %v1744_v46  ;;  %744 = vmatmul.mubr.bf16.gmra.mrb[28].mxu1 %v1745_v47 }
  0xfa   : > { %v1546_v48 = vpop.f32.mrb[0].mxu0  ;;  %v1594_v49 = vpop.f32.mrb[0].mxu1 }
  0xfb   : > { %v1547_v50 = vpop.f32.mrb[1].mxu0  ;;  %v1595_v52 = vpop.f32.mrb[1].mxu1 }
  0xfc   : > { %v1548_v53 = vadd.f32 %v1547_v50, %v1546_v48  ;;  %v1596_v54 = vadd.f32 %v1595_v52, %v1594_v49  ;;  %v1549_v55 = vpop.f32.mrb[2].mxu0  ;;  %v1597_v56 = vpop.f32.mrb[2].mxu1 }
  0xfd   : > { %v1550_v58 = vpop.f32.mrb[3].mxu0  ;;  %v1598_v59 = vpop.f32.mrb[3].mxu1 }
  0xfe   : > { %v928_v60 = vmul.f32 %v1548_v53, %v1899_v51  ;;  %v944_v61 = vmul.f32 %v1596_v54, %v1899_v51  ;;  %v1551_v62 = vadd.f32 %v1550_v58, %v1549_v55  ;;  %v1599_v63 = vadd.f32 %v1598_v59, %v1597_v56 }
 0x100   : > { %v965_v0 = vadd.f32 %v1904_v57, %v928_v60  ;;  %v981_v1 = vadd.f32 %v1904_v57, %v944_v61  ;;  %v929_v2 = vmul.f32 %v1551_v62, %v1899_v51  ;;  %v945_v3 = vmul.f32 %v1599_v63, %v1899_v51 }
 0x102   : > { %v966_v4 = vadd.f32 %v1904_v57, %v929_v2  ;;  %v982_v5 = vadd.f32 %v1904_v57, %v945_v3  ;;  %v1552_v6 = vpop.f32.mrb[4].mxu0  ;;  %v1600_v7 = vpop.f32.mrb[4].mxu1  ;;  %v997_v8 = vmax.f32 %v965_v0, 0.0  ;;  %v1013_v9 = vmax.f32 %v981_v1, 0.0 }
 0x103   : > { %v1553_v10 = vpop.f32.mrb[5].mxu0  ;;  %v1601_v11 = vpop.f32.mrb[5].mxu1 }
 0x104   : > { %v998_v12 = vmax.f32 %v966_v4, 0.0  ;;  %v1014_v13 = vmax.f32 %v982_v5, 0.0  ;;  %v1554_v14 = vadd.f32 %v1553_v10, %v1552_v6  ;;  %v1602_v15 = vadd.f32 %v1601_v11, %v1600_v7  ;;  %v1555_v16 = vpop.f32.mrb[6].mxu0  ;;  %v1603_v17 = vpop.f32.mrb[6].mxu1 }
 0x105   : > { %v1556_v18 = vpop.f32.mrb[7].mxu0  ;;  %v1604_v19 = vpop.f32.mrb[7].mxu1 }
 0x106   : > { %v1438_v20 = vpack.c.bf16 %v998_v12, %v997_v8  ;;  %v1478_v21 = vpack.c.bf16 %v1014_v13, %v1013_v9  ;;  %v930_v22 = vmul.f32 %v1554_v14, %v1899_v51  ;;  %v946_v23 = vmul.f32 %v1602_v15, %v1899_v51 }
 0x107   : > { %v1557_v24 = vadd.f32 %v1556_v18, %v1555_v16  ;;  %v1605_v25 = vadd.f32 %v1604_v19, %v1603_v17 }
 0x108   : > { %1439 = vst [vmem:[%s1918_s18] sm:$0xff] %v1438_v20   ;;  %1522 = vst [vmem:[%s1918_s18 + $0x40] sm:$0xff] %v1478_v21   ;;  %v967_v26 = vadd.f32 %v1904_v57, %v930_v22  ;;  %v983_v27 = vadd.f32 %v1904_v57, %v946_v23 }
 0x109   : > { %v931_v28 = vmul.f32 %v1557_v24, %v1899_v51  ;;  %v947_v29 = vmul.f32 %v1605_v25, %v1899_v51 }
 0x10a   : > { %v1558_v30 = vpop.f32.mrb[8].mxu0  ;;  %v1606_v31 = vpop.f32.mrb[8].mxu1  ;;  %v999_v40 = vmax.f32 %v967_v26, 0.0  ;;  %v1015_v41 = vmax.f32 %v983_v27, 0.0 }
 0x10b   : > { %v968_v32 = vadd.f32 %v1904_v57, %v931_v28  ;;  %v984_v33 = vadd.f32 %v1904_v57, %v947_v29  ;;  %v1559_v34 = vpop.f32.mrb[9].mxu0  ;;  %v1607_v35 = vpop.f32.mrb[9].mxu1 }
 0x10c   : > { %v1560_v36 = vadd.f32 %v1559_v34, %v1558_v30  ;;  %v1608_v37 = vadd.f32 %v1607_v35, %v1606_v31  ;;  %v1561_v38 = vpop.f32.mrb[10].mxu0  ;;  %v1609_v39 = vpop.f32.mrb[10].mxu1 }
 0x10d   : > { %v1000_v42 = vmax.f32 %v968_v32, 0.0  ;;  %v1016_v43 = vmax.f32 %v984_v33, 0.0  ;;  %v1562_v44 = vpop.f32.mrb[11].mxu0  ;;  %v1610_v45 = vpop.f32.mrb[11].mxu1 }
 0x10e   : > { %v932_v46 = vmul.f32 %v1560_v36, %v1899_v51  ;;  %v948_v47 = vmul.f32 %v1608_v37, %v1899_v51  ;;  %v1563_v48 = vadd.f32 %v1562_v44, %v1561_v38  ;;  %v1611_v49 = vadd.f32 %v1610_v45, %v1609_v39 }
 0x10f   : > { %v1443_v50 = vpack.c.bf16 %v1000_v42, %v999_v40  ;;  %v1483_v52 = vpack.c.bf16 %v1016_v43, %v1015_v41 }
 0x110   : > { %v969_v53 = vadd.f32 %v1904_v57, %v932_v46  ;;  %v985_v54 = vadd.f32 %v1904_v57, %v948_v47  ;;  %v933_v55 = vmul.f32 %v1563_v48, %v1899_v51  ;;  %v949_v56 = vmul.f32 %v1611_v49, %v1899_v51 }
 0x111   : > { %1515 = vst [vmem:[%s1918_s18 + $0x8] sm:$0xff] %v1443_v50   ;;  %1523 = vst [vmem:[%s1918_s18 + $0x48] sm:$0xff] %v1483_v52  }
 0x112   : > { %v970_v58 = vadd.f32 %v1904_v57, %v933_v55  ;;  %v986_v59 = vadd.f32 %v1904_v57, %v949_v56  ;;  %v1564_v60 = vpop.f32.mrb[12].mxu0  ;;  %v1612_v61 = vpop.f32.mrb[12].mxu1  ;;  %v1001_v62 = vmax.f32 %v969_v53, 0.0  ;;  %v1017_v63 = vmax.f32 %v985_v54, 0.0 }
 0x113   : > { %v1565_v0 = vpop.f32.mrb[13].mxu0  ;;  %v1613_v1 = vpop.f32.mrb[13].mxu1 }
 0x114   : > { %v1002_v2 = vmax.f32 %v970_v58, 0.0  ;;  %v1018_v3 = vmax.f32 %v986_v59, 0.0  ;;  %v1566_v4 = vadd.f32 %v1565_v0, %v1564_v60  ;;  %v1614_v5 = vadd.f32 %v1613_v1, %v1612_v61  ;;  %v1567_v6 = vpop.f32.mrb[14].mxu0  ;;  %v1615_v7 = vpop.f32.mrb[14].mxu1 }
 0x115   : > { %v1568_v8 = vpop.f32.mrb[15].mxu0  ;;  %v1616_v9 = vpop.f32.mrb[15].mxu1 }
 0x116   : > { %v1448_v10 = vpack.c.bf16 %v1002_v2, %v1001_v62  ;;  %v1488_v11 = vpack.c.bf16 %v1018_v3, %v1017_v63  ;;  %v934_v12 = vmul.f32 %v1566_v4, %v1899_v51  ;;  %v950_v13 = vmul.f32 %v1614_v5, %v1899_v51 }
 0x117   : > { %v1569_v14 = vadd.f32 %v1568_v8, %v1567_v6  ;;  %v1617_v15 = vadd.f32 %v1616_v9, %v1615_v7 }
 0x118   : > { %1516 = vst [vmem:[%s1918_s18 + $0x10] sm:$0xff] %v1448_v10   ;;  %1524 = vst [vmem:[%s1918_s18 + $0x50] sm:$0xff] %v1488_v11   ;;  %v971_v16 = vadd.f32 %v1904_v57, %v934_v12  ;;  %v987_v17 = vadd.f32 %v1904_v57, %v950_v13 }
 0x119   : > { %v935_v18 = vmul.f32 %v1569_v14, %v1899_v51  ;;  %v951_v19 = vmul.f32 %v1617_v15, %v1899_v51 }
 0x11a   : > { %v1570_v20 = vpop.f32.mrb[16].mxu0  ;;  %v1618_v21 = vpop.f32.mrb[16].mxu1  ;;  %v1003_v30 = vmax.f32 %v971_v16, 0.0  ;;  %v1019_v31 = vmax.f32 %v987_v17, 0.0 }
 0x11b   : > { %v972_v22 = vadd.f32 %v1904_v57, %v935_v18  ;;  %v988_v23 = vadd.f32 %v1904_v57, %v951_v19  ;;  %v1571_v24 = vpop.f32.mrb[17].mxu0  ;;  %v1619_v25 = vpop.f32.mrb[17].mxu1 }
 0x11c   : > { %v1572_v26 = vadd.f32 %v1571_v24, %v1570_v20  ;;  %v1620_v27 = vadd.f32 %v1619_v25, %v1618_v21  ;;  %v1573_v28 = vpop.f32.mrb[18].mxu0  ;;  %v1621_v29 = vpop.f32.mrb[18].mxu1 }
 0x11d   : > { %v1004_v32 = vmax.f32 %v972_v22, 0.0  ;;  %v1020_v33 = vmax.f32 %v988_v23, 0.0  ;;  %v1574_v34 = vpop.f32.mrb[19].mxu0  ;;  %v1622_v35 = vpop.f32.mrb[19].mxu1 }
 0x11e   : > { %v936_v36 = vmul.f32 %v1572_v26, %v1899_v51  ;;  %v952_v37 = vmul.f32 %v1620_v27, %v1899_v51  ;;  %v1575_v38 = vadd.f32 %v1574_v34, %v1573_v28  ;;  %v1623_v39 = vadd.f32 %v1622_v35, %v1621_v29 }
 0x11f   : > { %v1453_v40 = vpack.c.bf16 %v1004_v32, %v1003_v30  ;;  %v1493_v41 = vpack.c.bf16 %v1020_v33, %v1019_v31 }
 0x120   : > { %v973_v42 = vadd.f32 %v1904_v57, %v936_v36  ;;  %v989_v43 = vadd.f32 %v1904_v57, %v952_v37  ;;  %v937_v44 = vmul.f32 %v1575_v38, %v1899_v51  ;;  %v953_v45 = vmul.f32 %v1623_v39, %v1899_v51 }
 0x121   : > { %1517 = vst [vmem:[%s1918_s18 + $0x18] sm:$0xff] %v1453_v40   ;;  %1525 = vst [vmem:[%s1918_s18 + $0x58] sm:$0xff] %v1493_v41  }
 0x122   : > { %v974_v46 = vadd.f32 %v1904_v57, %v937_v44  ;;  %v990_v47 = vadd.f32 %v1904_v57, %v953_v45  ;;  %v1576_v48 = vpop.f32.mrb[20].mxu0  ;;  %v1624_v49 = vpop.f32.mrb[20].mxu1  ;;  %v1005_v50 = vmax.f32 %v973_v42, 0.0  ;;  %v1021_v52 = vmax.f32 %v989_v43, 0.0 }
 0x123   : > { %v1577_v53 = vpop.f32.mrb[21].mxu0  ;;  %v1625_v54 = vpop.f32.mrb[21].mxu1 }
 0x124   : > { %v1006_v55 = vmax.f32 %v974_v46, 0.0  ;;  %v1022_v56 = vmax.f32 %v990_v47, 0.0  ;;  %v1578_v58 = vadd.f32 %v1577_v53, %v1576_v48  ;;  %v1626_v59 = vadd.f32 %v1625_v54, %v1624_v49  ;;  %v1579_v60 = vpop.f32.mrb[22].mxu0  ;;  %v1627_v61 = vpop.f32.mrb[22].mxu1 }
 0x125   : > { %v1580_v62 = vpop.f32.mrb[23].mxu0  ;;  %v1628_v63 = vpop.f32.mrb[23].mxu1 }
 0x126   : > { %v1458_v0 = vpack.c.bf16 %v1006_v55, %v1005_v50  ;;  %v1498_v1 = vpack.c.bf16 %v1022_v56, %v1021_v52  ;;  %v938_v2 = vmul.f32 %v1578_v58, %v1899_v51  ;;  %v954_v3 = vmul.f32 %v1626_v59, %v1899_v51 }
 0x127   : > { %v1581_v4 = vadd.f32 %v1580_v62, %v1579_v60  ;;  %v1629_v5 = vadd.f32 %v1628_v63, %v1627_v61 }
 0x128   : > { %1518 = vst [vmem:[%s1918_s18 + $0x20] sm:$0xff] %v1458_v0   ;;  %1526 = vst [vmem:[%s1918_s18 + $0x60] sm:$0xff] %v1498_v1   ;;  %v975_v6 = vadd.f32 %v1904_v57, %v938_v2  ;;  %v991_v7 = vadd.f32 %v1904_v57, %v954_v3 }
 0x129   : > { %v939_v8 = vmul.f32 %v1581_v4, %v1899_v51  ;;  %v955_v9 = vmul.f32 %v1629_v5, %v1899_v51 }
 0x12a   : > { %v1582_v10 = vpop.f32.mrb[24].mxu0  ;;  %v1630_v11 = vpop.f32.mrb[24].mxu1  ;;  %v1007_v20 = vmax.f32 %v975_v6, 0.0  ;;  %v1023_v21 = vmax.f32 %v991_v7, 0.0 }
 0x12b   : > { %v976_v12 = vadd.f32 %v1904_v57, %v939_v8  ;;  %v992_v13 = vadd.f32 %v1904_v57, %v955_v9  ;;  %v1583_v14 = vpop.f32.mrb[25].mxu0  ;;  %v1631_v15 = vpop.f32.mrb[25].mxu1 }
 0x12c   : > { %v1584_v16 = vadd.f32 %v1583_v14, %v1582_v10  ;;  %v1632_v17 = vadd.f32 %v1631_v15, %v1630_v11  ;;  %v1585_v18 = vpop.f32.mrb[26].mxu0  ;;  %v1633_v19 = vpop.f32.mrb[26].mxu1 }
 0x12d   : > { %v1008_v22 = vmax.f32 %v976_v12, 0.0  ;;  %v1024_v23 = vmax.f32 %v992_v13, 0.0  ;;  %v1586_v24 = vpop.f32.mrb[27].mxu0  ;;  %v1634_v25 = vpop.f32.mrb[27].mxu1 }
 0x12e   : > { %v940_v26 = vmul.f32 %v1584_v16, %v1899_v51  ;;  %v956_v27 = vmul.f32 %v1632_v17, %v1899_v51  ;;  %v1587_v28 = vadd.f32 %v1586_v24, %v1585_v18  ;;  %v1635_v29 = vadd.f32 %v1634_v25, %v1633_v19 }
 0x12f   : > { %v1463_v30 = vpack.c.bf16 %v1008_v22, %v1007_v20  ;;  %v1503_v31 = vpack.c.bf16 %v1024_v23, %v1023_v21 }
 0x130   : > { %v977_v32 = vadd.f32 %v1904_v57, %v940_v26  ;;  %v993_v33 = vadd.f32 %v1904_v57, %v956_v27  ;;  %v941_v34 = vmul.f32 %v1587_v28, %v1899_v51  ;;  %v957_v35 = vmul.f32 %v1635_v29, %v1899_v51 }
 0x131   : > { %1519 = vst [vmem:[%s1918_s18 + $0x28] sm:$0xff] %v1463_v30   ;;  %1527 = vst [vmem:[%s1918_s18 + $0x68] sm:$0xff] %v1503_v31  }
 0x132   : > { %v978_v36 = vadd.f32 %v1904_v57, %v941_v34  ;;  %v994_v37 = vadd.f32 %v1904_v57, %v957_v35  ;;  %v1588_v38 = vpop.f32.mrb[28].mxu0  ;;  %v1636_v39 = vpop.f32.mrb[28].mxu1  ;;  %v1009_v40 = vmax.f32 %v977_v32, 0.0  ;;  %v1025_v41 = vmax.f32 %v993_v33, 0.0 }
 0x133   : > { %v1589_v42 = vpop.f32.mrb[29].mxu0  ;;  %v1637_v43 = vpop.f32.mrb[29].mxu1 }
 0x134   : > { %v1010_v44 = vmax.f32 %v978_v36, 0.0  ;;  %v1026_v45 = vmax.f32 %v994_v37, 0.0  ;;  %v1590_v46 = vadd.f32 %v1589_v42, %v1588_v38  ;;  %v1638_v47 = vadd.f32 %v1637_v43, %v1636_v39  ;;  %v1591_v48 = vpop.f32.mrb[30].mxu0  ;;  %v1639_v49 = vpop.f32.mrb[30].mxu1 }
 0x135   : > { %v1592_v50 = vpop.f32.mrb[31].mxu0  ;;  %v1640_v52 = vpop.f32.mrb[31].mxu1 }
 0x136   : > { %v1468_v53 = vpack.c.bf16 %v1010_v44, %v1009_v40  ;;  %v1508_v54 = vpack.c.bf16 %v1026_v45, %v1025_v41  ;;  %v942_v55 = vmul.f32 %v1590_v46, %v1899_v51  ;;  %v958_v56 = vmul.f32 %v1638_v47, %v1899_v51 }
 0x137   : > { %v1593_v58 = vadd.f32 %v1592_v50, %v1591_v48  ;;  %v1641_v59 = vadd.f32 %v1640_v52, %v1639_v49 }
 0x138   : > { %1520 = vst [vmem:[%s1918_s18 + $0x30] sm:$0xff] %v1468_v53   ;;  %1528 = vst [vmem:[%s1918_s18 + $0x70] sm:$0xff] %v1508_v54   ;;  %v979_v60 = vadd.f32 %v1904_v57, %v942_v55  ;;  %v995_v61 = vadd.f32 %v1904_v57, %v958_v56 }
 0x139   : > { %v943_v62 = vmul.f32 %v1593_v58, %v1899_v51  ;;  %v959_v63 = vmul.f32 %v1641_v59, %v1899_v51 }
 0x13a   : > { %v1011_v2 = vmax.f32 %v979_v60, 0.0  ;;  %v1027_v3 = vmax.f32 %v995_v61, 0.0 }
 0x13b   : > { %v980_v0 = vadd.f32 %v1904_v57, %v943_v62  ;;  %v996_v1 = vadd.f32 %v1904_v57, %v959_v63 }
 0x13d   : > { %v1012_v4 = vmax.f32 %v980_v0, 0.0  ;;  %v1028_v5 = vmax.f32 %v996_v1, 0.0 }
 0x13f   : > { %v1473_v6 = vpack.c.bf16 %v1012_v4, %v1011_v2  ;;  %v1513_v7 = vpack.c.bf16 %v1028_v5, %v1027_v3 }
 0x141   : > { %1521 = vst [vmem:[%s1918_s18 + $0x38] sm:$0xff] %v1473_v6   ;;  %1529 = vst [vmem:[%s1918_s18 + $0x78] sm:$0xff] %v1513_v7  }
 0x142 PF: > { %s13_s14 = sadd.s32 1, %s1768_s14   ;;  %s2005_s12 = smov %s1764_s13 }
 0x143   : > { %p10_p5 = scmp.ge.s32.totalorder %s13_s14, 4   ;;  %s2006_s13 = smov %s2008_s15 }
 0x145   :  { %12 = sbr.rel (!%p10_p5) target bundleno = 2 (0x2), region = 80 }

// kernel: resnet_forward.14
= control target key start
LH: loop header
LB: loop body
LE: loop exit
PB: predicated region body
PF: predicated region fallthrough
CT: control target
= control target key end

     0   :  { %s3080_s1 = inlined_call_operand.vmem [shape: bf16[1152,128], index: 1, kind: input, shape index: {}]   ;;  %s3081_s0 = inlined_call_operand.vmem [shape: bf16[128,1152], index: 0, kind: input, shape index: {}]   ;;  %s3082_s2 = inlined_call_operand.vmem [shape: f32[2,128], index: 2, kind: input, shape index: {}]   ;;  %s3083_s3 = inlined_call_operand.vmem [shape: bf16[128,128], index: 3, kind: output, shape index: {}]  }
   0x1   :  { %v2302_v0 = vld [vmem:[%s3080_s1 + $0x40] sm:$0xff]   ;;  %v2306_v4 = vld [vmem:[%s3080_s1 + $0x48] sm:$0xff]   ;;  %v2310_v8 = vld [vmem:[%s3080_s1 + $0x50] sm:$0xff]  }
   0x2   :  { %v2303_v1 = vld [vmem:[%s3080_s1 + $0xc0] sm:$0xff]   ;;  %1982 = vmatprep.subr.bf16.mxu0 %v2302_v0  ;;  %v2307_v5 = vld [vmem:[%s3080_s1 + $0xc8] sm:$0xff]   ;;  %v2311_v9 = vld [vmem:[%s3080_s1 + $0xd0] sm:$0xff]  }
   0x3   :  { %v2304_v2 = vld [vmem:[%s3080_s1] sm:$0xff]   ;;  %2046 = vmatprep.subr.bf16.mxu1 %v2303_v1  ;;  %v2308_v6 = vld [vmem:[%s3080_s1 + $0x8] sm:$0xff]   ;;  %v2312_v10 = vld [vmem:[%s3080_s1 + $0x10] sm:$0xff]  }
   0x4   :  { %v2305_v3 = vld [vmem:[%s3080_s1 + $0x80] sm:$0xff]   ;;  %1983 = vmatpush3.bf16.msra.mxu0 %v2304_v2  ;;  %v2309_v7 = vld [vmem:[%s3080_s1 + $0x88] sm:$0xff]   ;;  %v2313_v11 = vld [vmem:[%s3080_s1 + $0x90] sm:$0xff]  }
   0x5   :  { %2047 = vmatpush3.bf16.msra.mxu1 %v2305_v3  ;;  %1984 = vmatprep.subr.bf16.mxu0 %v2306_v4  ;;  %v2314_v12 = vld [vmem:[%s3080_s1 + $0x58] sm:$0xff]   ;;  %v2318_v16 = vld [vmem:[%s3080_s1 + $0x60] sm:$0xff]   ;;  %v2322_v20 = vld [vmem:[%s3080_s1 + $0x68] sm:$0xff]  }
   0x6   :  { %2048 = vmatprep.subr.bf16.mxu1 %v2307_v5  ;;  %v2315_v13 = vld [vmem:[%s3080_s1 + $0xd8] sm:$0xff]   ;;  %v2319_v17 = vld [vmem:[%s3080_s1 + $0xe0] sm:$0xff]   ;;  %v2323_v21 = vld [vmem:[%s3080_s1 + $0xe8] sm:$0xff]  }
   0x7   :  { %v2316_v14 = vld [vmem:[%s3080_s1 + $0x18] sm:$0xff]   ;;  %v2320_v18 = vld [vmem:[%s3080_s1 + $0x20] sm:$0xff]   ;;  %v2324_v22 = vld [vmem:[%s3080_s1 + $0x28] sm:$0xff]  }
   0x8   :  { %1985 = vmatpush3.bf16.msra.mxu0 %v2308_v6  ;;  %v2317_v15 = vld [vmem:[%s3080_s1 + $0x98] sm:$0xff]   ;;  %v2321_v19 = vld [vmem:[%s3080_s1 + $0xa0] sm:$0xff]   ;;  %v2325_v23 = vld [vmem:[%s3080_s1 + $0xa8] sm:$0xff]  }
   0x9   :  { %2049 = vmatpush3.bf16.msra.mxu1 %v2309_v7  ;;  %1986 = vmatprep.subr.bf16.mxu0 %v2310_v8  ;;  %v2326_v24 = vld [vmem:[%s3080_s1 + $0x70] sm:$0xff]   ;;  %v2330_v28 = vld [vmem:[%s3080_s1 + $0x78] sm:$0xff]   ;;  %v2334_v32 = vld [vmem:[%s3081_s0] ss:$36 sps:$4 sm:$0xff]  }
   0xa   :  { %2050 = vmatprep.subr.bf16.mxu1 %v2311_v9  ;;  %v2327_v25 = vld [vmem:[%s3080_s1 + $0xf0] sm:$0xff]   ;;  %v2331_v29 = vld [vmem:[%s3080_s1 + $0xf8] sm:$0xff]   ;;  %v2336_v33 = vld [vmem:[%s3081_s0 + $0x4] ss:$36 sps:$4 sm:$0xff]  }
   0xb   :  { %v2328_v26 = vld [vmem:[%s3080_s1 + $0x30] sm:$0xff]   ;;  %v2332_v30 = vld [vmem:[%s3080_s1 + $0x38] sm:$0xff]   ;;  %v2337_v34 = vld [vmem:[%s3081_s0 + $0x8] ss:$36 sps:$4 sm:$0xff]   ;;  %1071 = vmatprep.mubr.bf16.mxu0 %v2336_v33 }
   0xc   :  { %1987 = vmatpush3.bf16.msra.mxu0 %v2312_v10  ;;  %v2329_v27 = vld [vmem:[%s3080_s1 + $0xb0] sm:$0xff]   ;;  %v2333_v31 = vld [vmem:[%s3080_s1 + $0xb8] sm:$0xff]   ;;  %v2340_v36 = vld [vmem:[%s3080_s1 + $0x140] sm:$0xff]  }
   0xd   :  { %2051 = vmatpush3.bf16.msra.mxu1 %v2313_v11  ;;  %1988 = vmatprep.subr.bf16.mxu0 %v2314_v12  ;;  %v2339_v35 = vld [vmem:[%s3081_s0 + $0xc] ss:$36 sps:$4 sm:$0xff]   ;;  %v2341_v37 = vld [vmem:[%s3080_s1 + $0x1c0] sm:$0xff]   ;;  %v2346_v41 = vld [vmem:[%s3081_s0 + $0x54] ss:$36 sps:$4 sm:$0xff]  }
   0xe   :  { %2052 = vmatprep.subr.bf16.mxu1 %v2315_v13  ;;  %1168 = vmatprep.mubr.bf16.mxu1 %v2339_v35  ;;  %v2342_v38 = vld [vmem:[%s3080_s1 + $0x100] sm:$0xff]   ;;  %v2344_v40 = vld [vmem:[%s3081_s0 + $0x4c] ss:$36 sps:$4 sm:$0xff]   ;;  %v2354_v48 = vld [vmem:[%s3081_s0 + $0x94] ss:$36 sps:$4 sm:$0xff]  }
   0xf   :  { %v2343_v39 = vld [vmem:[%s3080_s1 + $0x180] sm:$0xff]   ;;  %v2348_v42 = vld [vmem:[%s3081_s0 + $0x48] ss:$36 sps:$4 sm:$0xff]   ;;  %v2349_v43 = vld [vmem:[%s3081_s0 + $0x50] ss:$36 sps:$4 sm:$0xff]  }
  0x10   :  { %1989 = vmatpush3.bf16.msra.mxu0 %v2316_v14  ;;  %v2350_v44 = vld [vmem:[%s3080_s1 + $0x148] sm:$0xff]   ;;  %v2356_v49 = vld [vmem:[%s3081_s0 + $0x9c] ss:$36 sps:$4 sm:$0xff]   ;;  %v2358_v50 = vld [vmem:[%s3081_s0 + $0x90] ss:$36 sps:$4 sm:$0xff]  }
  0x11   :  { %2053 = vmatpush3.bf16.msra.mxu1 %v2317_v15  ;;  %1990 = vmatprep.subr.bf16.mxu0 %v2318_v16  ;;  %v2351_v45 = vld [vmem:[%s3080_s1 + $0x1c8] sm:$0xff]   ;;  %v2359_v51 = vld [vmem:[%s3081_s0 + $0x98] ss:$36 sps:$4 sm:$0xff]   ;;  %v2360_v52 = vld [vmem:[%s3080_s1 + $0x150] sm:$0xff]  }
  0x12   :  { %2054 = vmatprep.subr.bf16.mxu1 %v2319_v17  ;;  %v2352_v46 = vld [vmem:[%s3080_s1 + $0x108] sm:$0xff]   ;;  %v2361_v53 = vld [vmem:[%s3080_s1 + $0x1d0] sm:$0xff]   ;;  %v2364_v56 = vld [vmem:[%s3081_s0 + $0xdc] ss:$36 sps:$4 sm:$0xff]  }
  0x13   :  { %v2353_v47 = vld [vmem:[%s3080_s1 + $0x188] sm:$0xff]   ;;  %v2362_v54 = vld [vmem:[%s3080_s1 + $0x110] sm:$0xff]   ;;  %v2368_v58 = vld [vmem:[%s3081_s0 + $0xd8] ss:$36 sps:$4 sm:$0xff]  }
  0x14   :  { %1991 = vmatpush3.bf16.msra.mxu0 %v2320_v18  ;;  %v2363_v55 = vld [vmem:[%s3080_s1 + $0x190] sm:$0xff]   ;;  %v2366_v57 = vld [vmem:[%s3081_s0 + $0xe4] ss:$36 sps:$4 sm:$0xff]   ;;  %v2370_v60 = vld [vmem:[%s3080_s1 + $0x158] sm:$0xff]  }
  0x15   :  { %2055 = vmatpush3.bf16.msra.mxu1 %v2321_v19  ;;  %1992 = vmatprep.subr.bf16.mxu0 %v2322_v20  ;;  %v2369_v59 = vld [vmem:[%s3081_s0 + $0xe0] ss:$36 sps:$4 sm:$0xff]   ;;  %v2371_v61 = vld [vmem:[%s3080_s1 + $0x1d8] sm:$0xff]   ;;  %v2376_v1 = vld [vmem:[%s3081_s0 + $0x12c] ss:$36 sps:$4 sm:$0xff]  }
  0x16   :  { %2056 = vmatprep.subr.bf16.mxu1 %v2323_v21  ;;  %v2372_v62 = vld [vmem:[%s3080_s1 + $0x118] sm:$0xff]   ;;  %v2374_v0 = vld [vmem:[%s3081_s0 + $0x124] ss:$36 sps:$4 sm:$0xff]   ;;  %v2384_v8 = vld [vmem:[%s3081_s0 + $0x16c] ss:$36 sps:$4 sm:$0xff]  }
  0x17   :  { %v2373_v63 = vld [vmem:[%s3080_s1 + $0x198] sm:$0xff]   ;;  %v2378_v2 = vld [vmem:[%s3081_s0 + $0x120] ss:$36 sps:$4 sm:$0xff]   ;;  %v2379_v4 = vld [vmem:[%s3081_s0 + $0x128] ss:$36 sps:$4 sm:$0xff]  }
  0x18   :  { %1993 = vmatpush3.bf16.msra.mxu0 %v2324_v22  ;;  %v2380_v3 = vld [vmem:[%s3080_s1 + $0x160] sm:$0xff]   ;;  %v2386_v9 = vld [vmem:[%s3081_s0 + $0x174] ss:$36 sps:$4 sm:$0xff]   ;;  %v2390_v10 = vld [vmem:[%s3080_s1 + $0x168] sm:$0xff]  }
  0x19   :  { %2057 = vmatpush3.bf16.msra.mxu1 %v2325_v23  ;;  %1994 = vmatprep.subr.bf16.mxu0 %v2326_v24  ;;  %v2381_v5 = vld [vmem:[%s3080_s1 + $0x1e0] sm:$0xff]   ;;  %v2391_v11 = vld [vmem:[%s3080_s1 + $0x1e8] sm:$0xff]   ;;  %v2389_v15 = vld [vmem:[%s3081_s0 + $0x170] ss:$36 sps:$4 sm:$0xff]  }
  0x1a   :  { %2058 = vmatprep.subr.bf16.mxu1 %v2327_v25  ;;  %v2382_v6 = vld [vmem:[%s3080_s1 + $0x120] sm:$0xff]   ;;  %v2388_v12 = vld [vmem:[%s3081_s0 + $0x168] ss:$36 sps:$4 sm:$0xff]   ;;  %v2394_v16 = vld [vmem:[%s3081_s0 + $0x1b4] ss:$36 sps:$4 sm:$0xff]  }
  0x1b   :  { %v2383_v7 = vld [vmem:[%s3080_s1 + $0x1a0] sm:$0xff]   ;;  %v2392_v13 = vld [vmem:[%s3080_s1 + $0x128] sm:$0xff]   ;;  %v2400_v18 = vld [vmem:[%s3080_s1 + $0x170] sm:$0xff]  }
  0x1c   :  { %1995 = vmatpush3.bf16.msra.mxu0 %v2328_v26  ;;  %v2393_v14 = vld [vmem:[%s3080_s1 + $0x1a8] sm:$0xff]   ;;  %v2396_v17 = vld [vmem:[%s3081_s0 + $0x1bc] ss:$36 sps:$4 sm:$0xff]   ;;  %v2401_v19 = vld [vmem:[%s3080_s1 + $0x1f0] sm:$0xff]  }
  0x1d   :  { %2059 = vmatpush3.bf16.msra.mxu1 %v2329_v27  ;;  %1996 = vmatprep.subr.bf16.mxu0 %v2330_v28  ;;  %v2402_v20 = vld [vmem:[%s3080_s1 + $0x130] sm:$0xff]   ;;  %v2399_v23 = vld [vmem:[%s3081_s0 + $0x1b8] ss:$36 sps:$4 sm:$0xff]   ;;  %v2406_v25 = vld [vmem:[%s3081_s0 + $0x204] ss:$36 sps:$4 sm:$0xff]  }
  0x1e   :  { %2060 = vmatprep.subr.bf16.mxu1 %v2331_v29  ;;  %v2403_v21 = vld [vmem:[%s3080_s1 + $0x1b0] sm:$0xff]   ;;  %v2404_v24 = vld [vmem:[%s3081_s0 + $0x1fc] ss:$36 sps:$4 sm:$0xff]  }
  0x1f   :  { %v2398_v22 = vld [vmem:[%s3081_s0 + $0x1b0] ss:$36 sps:$4 sm:$0xff]   ;;  %v2410_v26 = vld [vmem:[%s3080_s1 + $0x178] sm:$0xff]  }
  0x20   :  { %1997 = vmatpush3.bf16.msra.mxu0 %v2332_v30  ;;  %v2411_v27 = vld [vmem:[%s3080_s1 + $0x1f8] sm:$0xff]   ;;  %v2414_v35 = vld [vmem:[%s3081_s0 + $0x10] ss:$36 sps:$4 sm:$0xff]  }
  0x21   :  { %2061 = vmatpush3.bf16.msra.mxu1 %v2333_v31  ;;  %2110 = vmatprep.subr.bf16.mxu0 %v2340_v36  ;;  %v2412_v28 = vld [vmem:[%s3080_s1 + $0x138] sm:$0xff]   ;;  %v2409_v31 = vld [vmem:[%s3081_s0 + $0x200] ss:$36 sps:$4 sm:$0xff]  }
  0x22   :  { %2174 = vmatprep.subr.bf16.mxu1 %v2341_v37  ;;  %v2413_v29 = vld [vmem:[%s3080_s1 + $0x1b8] sm:$0xff]  }
  0x23   :  { %1072 = vmatmul.mubr.bf16.vlgmr.msra.gmra.mrb[0].mxu0 %v2334_v32  ;;  %v2408_v30 = vld [vmem:[%s3081_s0 + $0x1f8] ss:$36 sps:$4 sm:$0xff]   ;;  %v2420_v32 = vld [vmem:[%s3080_s1 + $0x200] sm:$0xff]  }
  0x24   :  { %1169 = vmatmul.mubr.bf16.vlgmr.msra.gmra.mrb[0].mxu1 %v2337_v34  ;;  %2111 = vmatpush3.bf16.msra.mxu0 %v2342_v38  ;;  %v2416_v33 = vld [vmem:[%s3081_s0 + $0x14] ss:$36 sps:$4 sm:$0xff]   ;;  %v2419_v34 = vld [vmem:[%s3081_s0 + $0x1c] ss:$36 sps:$4 sm:$0xff]   ;;  %v2423_v38 = vld [vmem:[%s3081_s0 + $0x64] ss:$36 sps:$4 sm:$0xff]  }
  0x25   :  { %2175 = vmatpush3.bf16.msra.mxu1 %v2343_v39  ;;  %1079 = vmatprep.mubr.bf16.mxu0 %v2344_v40  ;;  %v2417_v36 = vld [vmem:[%s3081_s0 + $0x18] ss:$36 sps:$4 sm:$0xff]   ;;  %v2427_v39 = vld [vmem:[%s3080_s1 + $0x208] sm:$0xff]   ;;  %v2434_v40 = vld [vmem:[%s3080_s1 + $0x210] sm:$0xff]  }
  0x26   :  { %1176 = vmatprep.mubr.bf16.mxu1 %v2346_v41  ;;  %2112 = vmatprep.subr.bf16.mxu0 %v2350_v44  ;;  %v2421_v37 = vld [vmem:[%s3081_s0 + $0x5c] ss:$36 sps:$4 sm:$0xff]   ;;  %v2430_v44 = vld [vmem:[%s3081_s0 + $0xac] ss:$36 sps:$4 sm:$0xff]  }
  0x27   :  { %2176 = vmatprep.subr.bf16.mxu1 %v2351_v45  ;;  %v2425_v41 = vld [vmem:[%s3081_s0 + $0x58] ss:$36 sps:$4 sm:$0xff]  }
  0x28   :  { %2113 = vmatpush3.bf16.msra.mxu0 %v2352_v46  ;;  %v2441_v45 = vld [vmem:[%s3080_s1 + $0x218] sm:$0xff]   ;;  %v2448_v46 = vld [vmem:[%s3080_s1 + $0x220] sm:$0xff]  }
  0x29   :  { %2177 = vmatpush3.bf16.msra.mxu1 %v2353_v47  ;;  %2114 = vmatprep.subr.bf16.mxu0 %v2360_v52  ;;  %v2432_v47 = vld [vmem:[%s3081_s0 + $0xa0] ss:$36 sps:$4 sm:$0xff]   ;;  %v2439_v52 = vld [vmem:[%s3081_s0 + $0xe8] ss:$36 sps:$4 sm:$0xff]  }
  0x2a   :  { %2178 = vmatprep.subr.bf16.mxu1 %v2361_v53  ;;  %v2462_v53 = vld [vmem:[%s3080_s1 + $0x230] sm:$0xff]  }
  0x2b   :  { %1080 = vmatmul.mubr.bf16.gmra.mrb[4].mxu0 %v2348_v42  ;;  %v2426_v42 = vld [vmem:[%s3081_s0 + $0x60] ss:$36 sps:$4 sm:$0xff]  }
  0x2c   :  { %1177 = vmatmul.mubr.bf16.gmra.mrb[4].mxu1 %v2349_v43  ;;  %1087 = vmatprep.mubr.bf16.mxu0 %v2354_v48  ;;  %v2428_v43 = vld [vmem:[%s3081_s0 + $0xa4] ss:$36 sps:$4 sm:$0xff]  }
  0x2d   :  { %1184 = vmatprep.mubr.bf16.mxu1 %v2356_v49  ;;  %2115 = vmatpush3.bf16.msra.mxu0 %v2362_v54  ;;  %v2433_v48 = vld [vmem:[%s3081_s0 + $0xa8] ss:$36 sps:$4 sm:$0xff]   ;;  %v2440_v54 = vld [vmem:[%s3081_s0 + $0xf0] ss:$36 sps:$4 sm:$0xff]  }
  0x2e   :  { %2179 = vmatpush3.bf16.msra.mxu1 %v2363_v55  ;;  %2116 = vmatprep.subr.bf16.mxu0 %v2370_v60  ;;  %v2435_v49 = vld [vmem:[%s3081_s0 + $0xec] ss:$36 sps:$4 sm:$0xff]   ;;  %v2442_v55 = vld [vmem:[%s3081_s0 + $0x134] ss:$36 sps:$4 sm:$0xff]   ;;  %v2449_v60 = vld [vmem:[%s3081_s0 + $0x17c] ss:$36 sps:$4 sm:$0xff]  }
  0x2f   :  { %2180 = vmatprep.subr.bf16.mxu1 %v2371_v61  ;;  %v2451_v61 = vld [vmem:[%s3081_s0 + $0x184] ss:$36 sps:$4 sm:$0xff]  }
  0x31   :  { %2117 = vmatpush3.bf16.msra.mxu0 %v2372_v62  ;;  %v2453_v62 = vld [vmem:[%s3081_s0 + $0x178] ss:$36 sps:$4 sm:$0xff]  }
  0x32   :  { %2181 = vmatpush3.bf16.msra.mxu1 %v2373_v63  ;;  %2118 = vmatprep.subr.bf16.mxu0 %v2380_v3  ;;  %v2454_v63 = vld [vmem:[%s3081_s0 + $0x180] ss:$36 sps:$4 sm:$0xff]   ;;  %v2461_v3 = vld [vmem:[%s3081_s0 + $0x1c8] ss:$36 sps:$4 sm:$0xff]  }
  0x33   :  { %1088 = vmatmul.mubr.bf16.gmra.mrb[8].mxu0 %v2358_v50  ;;  %2182 = vmatprep.subr.bf16.mxu1 %v2381_v5  ;;  %v2437_v50 = vld [vmem:[%s3081_s0 + $0xf4] ss:$36 sps:$4 sm:$0xff]  }
  0x34   :  { %1185 = vmatmul.mubr.bf16.gmra.mrb[8].mxu1 %v2359_v51  ;;  %1095 = vmatprep.mubr.bf16.mxu0 %v2364_v56  ;;  %v2455_v51 = vld [vmem:[%s3080_s1 + $0x228] sm:$0xff]   ;;  %v2444_v56 = vld [vmem:[%s3081_s0 + $0x13c] ss:$36 sps:$4 sm:$0xff]   ;;  %v2465_v5 = vld [vmem:[%s3081_s0 + $0x214] ss:$36 sps:$4 sm:$0xff]  }
  0x35   :  { %1192 = vmatprep.mubr.bf16.mxu1 %v2366_v57  ;;  %2119 = vmatpush3.bf16.msra.mxu0 %v2382_v6  ;;  %v2469_v57 = vld [vmem:[%s3080_s1 + $0x238] sm:$0xff]   ;;  %v2467_v6 = vld [vmem:[%s3081_s0 + $0x208] ss:$36 sps:$4 sm:$0xff]  }
  0x36   :  { %2183 = vmatpush3.bf16.msra.mxu1 %v2383_v7  ;;  %2120 = vmatprep.subr.bf16.mxu0 %v2390_v10  ;;  %v2468_v7 = vld [vmem:[%s3081_s0 + $0x210] ss:$36 sps:$4 sm:$0xff]   ;;  %v2472_v10 = vld [vmem:[%s3081_s0 + $0x68] ss:$36 sps:$4 sm:$0xff]  }
  0x37   :  { %2184 = vmatprep.subr.bf16.mxu1 %v2391_v11  ;;  %v2473_v11 = vld [vmem:[%s3081_s0 + $0x188] ss:$36 sps:$4 sm:$0xff]  }
  0x39   :  { %2121 = vmatpush3.bf16.msra.mxu0 %v2392_v13  ;;  %v2475_v13 = vld [vmem:[%s3081_s0 + $0x1d0] ss:$36 sps:$4 sm:$0xff]  }
  0x3a   :  { %2185 = vmatpush3.bf16.msra.mxu1 %v2393_v14  ;;  %2122 = vmatprep.subr.bf16.mxu0 %v2400_v18  ;;  %v2476_v14 = vld [vmem:[%s3081_s0 + $0xf8] ss:$36 sps:$4 sm:$0xff]  }
  0x3b   :  { %1096 = vmatmul.mubr.bf16.gmra.mrb[12].mxu0 %v2368_v58  ;;  %2186 = vmatprep.subr.bf16.mxu1 %v2401_v19  ;;  %v2446_v58 = vld [vmem:[%s3081_s0 + $0x130] ss:$36 sps:$4 sm:$0xff]  }
  0x3c   :  { %1193 = vmatmul.mubr.bf16.gmra.mrb[12].mxu1 %v2369_v59  ;;  %1103 = vmatprep.mubr.bf16.mxu0 %v2374_v0  ;;  %v2447_v59 = vld [vmem:[%s3081_s0 + $0x138] ss:$36 sps:$4 sm:$0xff]   ;;  %v2456_v0 = vld [vmem:[%s3081_s0 + $0x1c4] ss:$36 sps:$4 sm:$0xff]  }
  0x3d   :  { %1200 = vmatprep.mubr.bf16.mxu1 %v2376_v1  ;;  %2123 = vmatpush3.bf16.msra.mxu0 %v2402_v20  ;;  %v2458_v1 = vld [vmem:[%s3081_s0 + $0x1cc] ss:$36 sps:$4 sm:$0xff]  }
  0x3e   :  { %2187 = vmatpush3.bf16.msra.mxu1 %v2403_v21  ;;  %2124 = vmatprep.subr.bf16.mxu0 %v2410_v26 }
  0x3f   :  { %2188 = vmatprep.subr.bf16.mxu1 %v2411_v27 }
  0x41   :  { %2125 = vmatpush3.bf16.msra.mxu0 %v2412_v28 }
  0x42   :  { %2189 = vmatpush3.bf16.msra.mxu1 %v2413_v29  ;;  %2254 = vmatprep.subr.bf16.mxu0 %v2420_v32 }
  0x43   :  { %1104 = vmatmul.mubr.bf16.gmra.mrb[16].mxu0 %v2378_v2  ;;  %2286 = vmatprep.subr.bf16.mxu1 %v2420_v32  ;;  %v2460_v2 = vld [vmem:[%s3081_s0 + $0x1c0] ss:$36 sps:$4 sm:$0xff]  }
  0x44   :  { %1201 = vmatmul.mubr.bf16.gmra.mrb[16].mxu1 %v2379_v4  ;;  %1111 = vmatprep.mubr.bf16.mxu0 %v2384_v8  ;;  %v2463_v4 = vld [vmem:[%s3081_s0 + $0x20c] ss:$36 sps:$4 sm:$0xff]   ;;  %v2470_v8 = vld [vmem:[%s3081_s0 + $0x20] ss:$36 sps:$4 sm:$0xff]  }
  0x45   :  { %1208 = vmatprep.mubr.bf16.mxu1 %v2386_v9  ;;  %v2471_v9 = vld [vmem:[%s3081_s0 + $0x140] ss:$36 sps:$4 sm:$0xff]  }
  0x4b   :  { %1112 = vmatmul.mubr.bf16.gmra.mrb[20].mxu0 %v2388_v12  ;;  %v2474_v12 = vld [vmem:[%s3081_s0 + $0xb0] ss:$36 sps:$4 sm:$0xff]  }
  0x4c   :  { %1209 = vmatmul.mubr.bf16.gmra.mrb[20].mxu1 %v2389_v15  ;;  %1119 = vmatprep.mubr.bf16.mxu0 %v2394_v16  ;;  %v2477_v15 = vld [vmem:[%s3081_s0 + $0x218] ss:$36 sps:$4 sm:$0xff]  }
  0x4d   :  { %1216 = vmatprep.mubr.bf16.mxu1 %v2396_v17 }
  0x53   :  { %1120 = vmatmul.mubr.bf16.gmra.mrb[24].mxu0 %v2398_v22 }
  0x54   :  { %1217 = vmatmul.mubr.bf16.gmra.mrb[24].mxu1 %v2399_v23  ;;  %1127 = vmatprep.mubr.bf16.mxu0 %v2404_v24 }
  0x55   :  { %1224 = vmatprep.mubr.bf16.mxu1 %v2406_v25 }
  0x5b   :  { %1128 = vmatmul.mubr.bf16.gmra.mrb[28].mxu0 %v2408_v30 }
  0x5c   :  { %1225 = vmatmul.mubr.bf16.gmra.mrb[28].mxu1 %v2409_v31  ;;  %1265 = vmatprep.mubr.bf16.mxu0 %v2416_v33 }
  0x5d   :  { %1362 = vmatprep.mubr.bf16.mxu1 %v2419_v34 }
  0x63   :  { %1266 = vmatmul.mubr.bf16.vlgmr.msra.gmra.mrb[32].mxu0 %v2414_v35 }
  0x64   :  { %1363 = vmatmul.mubr.bf16.vlgmr.msra.gmra.mrb[32].mxu1 %v2417_v36  ;;  %2255 = vmatpush3.bf16.msra.mxu0 %v2420_v32 }
  0x65   :  { %2294 = vmatpush3.bf16.msra.mxu1 %v2420_v32  ;;  %1273 = vmatprep.mubr.bf16.mxu0 %v2421_v37 }
  0x66   :  { %1370 = vmatprep.mubr.bf16.mxu1 %v2423_v38  ;;  %2256 = vmatprep.subr.bf16.mxu0 %v2427_v39 }
  0x67   :  { %2287 = vmatprep.subr.bf16.mxu1 %v2427_v39 }
  0x68   :  { %2257 = vmatpush3.bf16.msra.mxu0 %v2427_v39 }
  0x69   :  { %2295 = vmatpush3.bf16.msra.mxu1 %v2427_v39  ;;  %2258 = vmatprep.subr.bf16.mxu0 %v2434_v40 }
  0x6a   :  { %2288 = vmatprep.subr.bf16.mxu1 %v2434_v40 }
  0x6b   :  { %1274 = vmatmul.mubr.bf16.gmra.mrb[36].mxu0 %v2425_v41 }
  0x6c   :  { %1371 = vmatmul.mubr.bf16.gmra.mrb[36].mxu1 %v2426_v42  ;;  %1281 = vmatprep.mubr.bf16.mxu0 %v2428_v43 }
  0x6d   :  { %1378 = vmatprep.mubr.bf16.mxu1 %v2430_v44  ;;  %2259 = vmatpush3.bf16.msra.mxu0 %v2434_v40 }
  0x6e   :  { %2296 = vmatpush3.bf16.msra.mxu1 %v2434_v40  ;;  %2260 = vmatprep.subr.bf16.mxu0 %v2441_v45 }
  0x6f   :  { %2289 = vmatprep.subr.bf16.mxu1 %v2441_v45 }
  0x71   :  { %2261 = vmatpush3.bf16.msra.mxu0 %v2441_v45 }
  0x72   :  { %2297 = vmatpush3.bf16.msra.mxu1 %v2441_v45  ;;  %2262 = vmatprep.subr.bf16.mxu0 %v2448_v46 }
  0x73   :  { %1282 = vmatmul.mubr.bf16.gmra.mrb[40].mxu0 %v2432_v47  ;;  %2290 = vmatprep.subr.bf16.mxu1 %v2448_v46 }
  0x74   :  { %1379 = vmatmul.mubr.bf16.gmra.mrb[40].mxu1 %v2433_v48  ;;  %1289 = vmatprep.mubr.bf16.mxu0 %v2435_v49 }
  0x75   :  { %1386 = vmatprep.mubr.bf16.mxu1 %v2437_v50  ;;  %2263 = vmatpush3.bf16.msra.mxu0 %v2448_v46 }
  0x76   :  { %2298 = vmatpush3.bf16.msra.mxu1 %v2448_v46  ;;  %2264 = vmatprep.subr.bf16.mxu0 %v2455_v51 }
  0x77   :  { %2291 = vmatprep.subr.bf16.mxu1 %v2455_v51 }
  0x79   :  { %2265 = vmatpush3.bf16.msra.mxu0 %v2455_v51 }
  0x7a   :  { %2299 = vmatpush3.bf16.msra.mxu1 %v2455_v51  ;;  %2266 = vmatprep.subr.bf16.mxu0 %v2462_v53 }
  0x7b   :  { %1290 = vmatmul.mubr.bf16.gmra.mrb[44].mxu0 %v2439_v52  ;;  %2292 = vmatprep.subr.bf16.mxu1 %v2462_v53 }
  0x7c   :  { %1387 = vmatmul.mubr.bf16.gmra.mrb[44].mxu1 %v2440_v54  ;;  %1297 = vmatprep.mubr.bf16.mxu0 %v2442_v55 }
  0x7d   :  { %1394 = vmatprep.mubr.bf16.mxu1 %v2444_v56  ;;  %2267 = vmatpush3.bf16.msra.mxu0 %v2462_v53 }
  0x7e   :  { %2300 = vmatpush3.bf16.msra.mxu1 %v2462_v53  ;;  %2268 = vmatprep.subr.bf16.mxu0 %v2469_v57 }
  0x7f   :  { %2293 = vmatprep.subr.bf16.mxu1 %v2469_v57 }
  0x81   :  { %2269 = vmatpush3.bf16.msra.mxu0 %v2469_v57 }
  0x82   :  { %2301 = vmatpush3.bf16.msra.mxu1 %v2469_v57 }
  0x83   :  { %1298 = vmatmul.mubr.bf16.gmra.mrb[48].mxu0 %v2446_v58 }
  0x84   :  { %1395 = vmatmul.mubr.bf16.gmra.mrb[48].mxu1 %v2447_v59  ;;  %1305 = vmatprep.mubr.bf16.mxu0 %v2449_v60 }
  0x85   :  { %1402 = vmatprep.mubr.bf16.mxu1 %v2451_v61 }
  0x8b   :  { %1306 = vmatmul.mubr.bf16.gmra.mrb[52].mxu0 %v2453_v62 }
  0x8c   :  { %1403 = vmatmul.mubr.bf16.gmra.mrb[52].mxu1 %v2454_v63  ;;  %1313 = vmatprep.mubr.bf16.mxu0 %v2456_v0 }
  0x8d   :  { %1410 = vmatprep.mubr.bf16.mxu1 %v2458_v1 }
  0x93   :  { %1314 = vmatmul.mubr.bf16.gmra.mrb[56].mxu0 %v2460_v2 }
  0x94   :  { %1411 = vmatmul.mubr.bf16.gmra.mrb[56].mxu1 %v2461_v3  ;;  %1321 = vmatprep.mubr.bf16.mxu0 %v2463_v4 }
  0x95   :  { %1418 = vmatprep.mubr.bf16.mxu1 %v2465_v5 }
  0x9b   :  { %1322 = vmatmul.mubr.bf16.gmra.mrb[60].mxu0 %v2467_v6 }
  0x9c   :  { %1419 = vmatmul.mubr.bf16.gmra.mrb[60].mxu1 %v2468_v7  ;;  %2270 = vmatprep.mubr.bf16.mxu0 %v2470_v8 }
  0x9d   :  { %2278 = vmatprep.mubr.bf16.mxu1 %v2471_v9 }
  0xa3   :  { %2271 = vmatmul.mubr.bf16.vlgmr.msra.gmra.mrb[64].mxu0 %v2472_v10 }
  0xa4   :  { %2279 = vmatmul.mubr.bf16.vlgmr.msra.gmra.mrb[64].mxu1 %v2473_v11  ;;  %2274 = vmatprep.mubr.bf16.mxu0 %v2474_v12 }
  0xa5   :  { %2282 = vmatprep.mubr.bf16.mxu1 %v2475_v13 }
  0xab   :  { %2275 = vmatmul.mubr.bf16.gmra.mrb[68].mxu0 %v2476_v14 }
  0xac   :  { %2283 = vmatmul.mubr.bf16.gmra.mrb[68].mxu1 %v2477_v15 }
  0xf6   :  { %v1998_v16 = vpop.f32.mrb[0].mxu0 }
  0xf7   :  { %v2062_v17 = vpop.f32.mrb[0].mxu1  ;;  %v1999_v18 = vpop.f32.mrb[1].mxu0 }
  0xf8   :  { %v2000_v19 = vadd.f32 %v1999_v18, %v1998_v16  ;;  %v2063_v20 = vpop.f32.mrb[1].mxu1  ;;  %v2001_v21 = vpop.f32.mrb[2].mxu0 }
  0xf9   :  { %v2064_v22 = vadd.f32 %v2063_v20, %v2062_v17  ;;  %v2065_v23 = vpop.f32.mrb[2].mxu1  ;;  %v2002_v24 = vpop.f32.mrb[3].mxu0 }
  0xfa   :  { %v2003_v25 = vadd.f32 %v2002_v24, %v2001_v21  ;;  %v2066_v26 = vpop.f32.mrb[3].mxu1 }
  0xfb   :  { %v2930_v27 = vadd.f32 %v2064_v22, %v2000_v19  ;;  %v2067_v28 = vadd.f32 %v2066_v26, %v2065_v23 }
  0xfd   :  { %v2932_v29 = vadd.f32 %v2067_v28, %v2003_v25 }
  0xfe   :  { %v2004_v30 = vpop.f32.mrb[4].mxu0 }
  0xff   :  { %v2068_v31 = vpop.f32.mrb[4].mxu1  ;;  %v2005_v32 = vpop.f32.mrb[5].mxu0 }
 0x100   :  { %v2006_v33 = vadd.f32 %v2005_v32, %v2004_v30  ;;  %v2069_v34 = vpop.f32.mrb[5].mxu1  ;;  %v2007_v35 = vpop.f32.mrb[6].mxu0 }
 0x101   :  { %v2070_v36 = vadd.f32 %v2069_v34, %v2068_v31  ;;  %v2071_v37 = vpop.f32.mrb[6].mxu1  ;;  %v2008_v38 = vpop.f32.mrb[7].mxu0 }
 0x102   :  { %v2009_v39 = vadd.f32 %v2008_v38, %v2007_v35  ;;  %v2072_v40 = vpop.f32.mrb[7].mxu1 }
 0x103   :  { %v2934_v41 = vadd.f32 %v2070_v36, %v2006_v33  ;;  %v2073_v42 = vadd.f32 %v2072_v40, %v2071_v37 }
 0x105   :  { %v2936_v43 = vadd.f32 %v2073_v42, %v2009_v39 }
 0x106   :  { %v2010_v44 = vpop.f32.mrb[8].mxu0 }
 0x107   :  { %v2074_v45 = vpop.f32.mrb[8].mxu1  ;;  %v2011_v46 = vpop.f32.mrb[9].mxu0 }
 0x108   :  { %v2012_v47 = vadd.f32 %v2011_v46, %v2010_v44  ;;  %v2075_v48 = vpop.f32.mrb[9].mxu1  ;;  %v2013_v49 = vpop.f32.mrb[10].mxu0 }
 0x109   :  { %v2076_v50 = vadd.f32 %v2075_v48, %v2074_v45  ;;  %v2077_v51 = vpop.f32.mrb[10].mxu1  ;;  %v2014_v52 = vpop.f32.mrb[11].mxu0 }
 0x10a   :  { %v2015_v53 = vadd.f32 %v2014_v52, %v2013_v49  ;;  %v2078_v54 = vpop.f32.mrb[11].mxu1 }
 0x10b   :  { %v2938_v55 = vadd.f32 %v2076_v50, %v2012_v47  ;;  %v2079_v56 = vadd.f32 %v2078_v54, %v2077_v51 }
 0x10d   :  { %v2940_v57 = vadd.f32 %v2079_v56, %v2015_v53 }
 0x10e   :  { %v2016_v58 = vpop.f32.mrb[12].mxu0 }
 0x10f   :  { %v2080_v59 = vpop.f32.mrb[12].mxu1  ;;  %v2017_v60 = vpop.f32.mrb[13].mxu0 }
 0x110   :  { %v2018_v61 = vadd.f32 %v2017_v60, %v2016_v58  ;;  %v2081_v62 = vpop.f32.mrb[13].mxu1  ;;  %v2019_v63 = vpop.f32.mrb[14].mxu0 }
 0x111   :  { %v2082_v0 = vadd.f32 %v2081_v62, %v2080_v59  ;;  %v2083_v1 = vpop.f32.mrb[14].mxu1  ;;  %v2020_v2 = vpop.f32.mrb[15].mxu0 }
 0x112   :  { %v2021_v3 = vadd.f32 %v2020_v2, %v2019_v63  ;;  %v2084_v4 = vpop.f32.mrb[15].mxu1 }
 0x113   :  { %v2942_v5 = vadd.f32 %v2082_v0, %v2018_v61  ;;  %v2085_v6 = vadd.f32 %v2084_v4, %v2083_v1 }
 0x115   :  { %v2944_v7 = vadd.f32 %v2085_v6, %v2021_v3 }
 0x116   :  { %v2022_v8 = vpop.f32.mrb[16].mxu0 }
 0x117   :  { %v2086_v9 = vpop.f32.mrb[16].mxu1  ;;  %v2023_v10 = vpop.f32.mrb[17].mxu0 }
 0x118   :  { %v2024_v11 = vadd.f32 %v2023_v10, %v2022_v8  ;;  %v2087_v12 = vpop.f32.mrb[17].mxu1  ;;  %v2025_v13 = vpop.f32.mrb[18].mxu0 }
 0x119   :  { %v2088_v14 = vadd.f32 %v2087_v12, %v2086_v9  ;;  %v2089_v15 = vpop.f32.mrb[18].mxu1  ;;  %v2026_v16 = vpop.f32.mrb[19].mxu0 }
 0x11a   :  { %v2027_v17 = vadd.f32 %v2026_v16, %v2025_v13  ;;  %v2090_v18 = vpop.f32.mrb[19].mxu1 }
 0x11b   :  { %v2946_v19 = vadd.f32 %v2088_v14, %v2024_v11  ;;  %v2091_v20 = vadd.f32 %v2090_v18, %v2089_v15 }
 0x11d   :  { %v2948_v21 = vadd.f32 %v2091_v20, %v2027_v17 }
 0x11e   :  { %v2028_v22 = vpop.f32.mrb[20].mxu0 }
 0x11f   :  { %v2092_v23 = vpop.f32.mrb[20].mxu1  ;;  %v2029_v24 = vpop.f32.mrb[21].mxu0 }
 0x120   :  { %v2030_v25 = vadd.f32 %v2029_v24, %v2028_v22  ;;  %v2093_v26 = vpop.f32.mrb[21].mxu1  ;;  %v2031_v28 = vpop.f32.mrb[22].mxu0 }
 0x121   :  { %v2094_v30 = vadd.f32 %v2093_v26, %v2092_v23  ;;  %v2095_v31 = vpop.f32.mrb[22].mxu1  ;;  %v2032_v32 = vpop.f32.mrb[23].mxu0 }
 0x122   :  { %v2033_v33 = vadd.f32 %v2032_v32, %v2031_v28  ;;  %v2096_v34 = vpop.f32.mrb[23].mxu1 }
 0x123   :  { %v2950_v35 = vadd.f32 %v2094_v30, %v2030_v25  ;;  %v2097_v36 = vadd.f32 %v2096_v34, %v2095_v31 }
 0x125   :  { %v2952_v37 = vadd.f32 %v2097_v36, %v2033_v33 }
 0x126   :  { %v2034_v38 = vpop.f32.mrb[24].mxu0 }
 0x127   :  { %v2098_v39 = vpop.f32.mrb[24].mxu1  ;;  %v2035_v40 = vpop.f32.mrb[25].mxu0 }
 0x128   :  { %v2036_v42 = vadd.f32 %v2035_v40, %v2034_v38  ;;  %v2099_v44 = vpop.f32.mrb[25].mxu1  ;;  %v2037_v45 = vpop.f32.mrb[26].mxu0 }
 0x129   :  { %v2100_v46 = vadd.f32 %v2099_v44, %v2098_v39  ;;  %v2101_v47 = vpop.f32.mrb[26].mxu1  ;;  %v2038_v48 = vpop.f32.mrb[27].mxu0 }
 0x12a   :  { %v2039_v49 = vadd.f32 %v2038_v48, %v2037_v45  ;;  %v2102_v50 = vpop.f32.mrb[27].mxu1 }
 0x12b   :  { %v2954_v51 = vadd.f32 %v2100_v46, %v2036_v42  ;;  %v2103_v52 = vadd.f32 %v2102_v50, %v2101_v47 }
 0x12d   :  { %v2956_v53 = vadd.f32 %v2103_v52, %v2039_v49 }
 0x12e   :  { %v2040_v54 = vpop.f32.mrb[28].mxu0 }
 0x12f   :  { %v2104_v56 = vpop.f32.mrb[28].mxu1  ;;  %v2041_v58 = vpop.f32.mrb[29].mxu0 }
 0x130   :  { %v2042_v59 = vadd.f32 %v2041_v58, %v2040_v54  ;;  %v2105_v60 = vpop.f32.mrb[29].mxu1  ;;  %v2043_v61 = vpop.f32.mrb[30].mxu0 }
 0x131   :  { %v2106_v62 = vadd.f32 %v2105_v60, %v2104_v56  ;;  %v2107_v63 = vpop.f32.mrb[30].mxu1  ;;  %v2044_v0 = vpop.f32.mrb[31].mxu0 }
 0x132   :  { %v2045_v1 = vadd.f32 %v2044_v0, %v2043_v61  ;;  %v2108_v2 = vpop.f32.mrb[31].mxu1 }
 0x133   :  { %v2958_v3 = vadd.f32 %v2106_v62, %v2042_v59  ;;  %v2109_v4 = vadd.f32 %v2108_v2, %v2107_v63 }
 0x135   :  { %v2960_v6 = vadd.f32 %v2109_v4, %v2045_v1 }
 0x136   :  { %v2126_v8 = vpop.f32.mrb[32].mxu0 }
 0x137   :  { %v2190_v9 = vpop.f32.mrb[32].mxu1  ;;  %v2127_v10 = vpop.f32.mrb[33].mxu0 }
 0x138   :  { %v2128_v11 = vadd.f32 %v2127_v10, %v2126_v8  ;;  %v2191_v12 = vpop.f32.mrb[33].mxu1  ;;  %v2129_v13 = vpop.f32.mrb[34].mxu0 }
 0x139   :  { %v2192_v14 = vadd.f32 %v2191_v12, %v2190_v9  ;;  %v2193_v15 = vpop.f32.mrb[34].mxu1  ;;  %v2130_v16 = vpop.f32.mrb[35].mxu0 }
 0x13a   :  { %v1268_v17 = vadd.f32 %v2128_v11, %v2930_v27  ;;  %v2131_v18 = vadd.f32 %v2130_v16, %v2129_v13  ;;  %v2194_v20 = vpop.f32.mrb[35].mxu1 }
 0x13b   :  { %v2195_v22 = vadd.f32 %v2194_v20, %v2193_v15 }
 0x13c   :  { %v1271_v23 = vadd.f32 %v2131_v18, %v2932_v29  ;;  %v2964_v24 = vadd.f32 %v2192_v14, %v1268_v17 }
 0x13e   :  { %v2132_v25 = vpop.f32.mrb[36].mxu0  ;;  %v2966_v26 = vadd.f32 %v2195_v22, %v1271_v23 }
 0x13f   :  { %v2196_v28 = vpop.f32.mrb[36].mxu1  ;;  %v2133_v30 = vpop.f32.mrb[37].mxu0 }
 0x140   :  { %v2134_v31 = vadd.f32 %v2133_v30, %v2132_v25  ;;  %v2197_v32 = vpop.f32.mrb[37].mxu1  ;;  %v2135_v33 = vpop.f32.mrb[38].mxu0 }
 0x141   :  { %v2198_v34 = vadd.f32 %v2197_v32, %v2196_v28  ;;  %v2199_v36 = vpop.f32.mrb[38].mxu1  ;;  %v2136_v38 = vpop.f32.mrb[39].mxu0 }
 0x142   :  { %v1276_v27 = vadd.f32 %v2134_v31, %v2934_v41  ;;  %v2137_v39 = vadd.f32 %v2136_v38, %v2135_v33  ;;  %v2200_v40 = vpop.f32.mrb[39].mxu1 }
 0x143   :  { %v2201_v42 = vadd.f32 %v2200_v40, %v2199_v36 }
 0x144   :  { %v1279_v29 = vadd.f32 %v2137_v39, %v2936_v43  ;;  %v2970_v44 = vadd.f32 %v2198_v34, %v1276_v27 }
 0x146   :  { %v2138_v45 = vpop.f32.mrb[40].mxu0  ;;  %v2972_v46 = vadd.f32 %v2201_v42, %v1279_v29 }
 0x147   :  { %v2202_v47 = vpop.f32.mrb[40].mxu1  ;;  %v2139_v48 = vpop.f32.mrb[41].mxu0 }
 0x148   :  { %v2140_v49 = vadd.f32 %v2139_v48, %v2138_v45  ;;  %v2203_v50 = vpop.f32.mrb[41].mxu1  ;;  %v2141_v52 = vpop.f32.mrb[42].mxu0 }
 0x149   :  { %v2204_v54 = vadd.f32 %v2203_v50, %v2202_v47  ;;  %v2205_v56 = vpop.f32.mrb[42].mxu1  ;;  %v2142_v58 = vpop.f32.mrb[43].mxu0 }
 0x14a   :  { %v1284_v41 = vadd.f32 %v2140_v49, %v2938_v55  ;;  %v2143_v59 = vadd.f32 %v2142_v58, %v2141_v52  ;;  %v2206_v60 = vpop.f32.mrb[43].mxu1 }
 0x14b   :  { %v2207_v61 = vadd.f32 %v2206_v60, %v2205_v56 }
 0x14c   :  { %v1287_v43 = vadd.f32 %v2143_v59, %v2940_v57  ;;  %v2976_v62 = vadd.f32 %v2204_v54, %v1284_v41 }
 0x14e   :  { %v2144_v63 = vpop.f32.mrb[44].mxu0  ;;  %v2978_v0 = vadd.f32 %v2207_v61, %v1287_v43 }
 0x14f   :  { %v2208_v1 = vpop.f32.mrb[44].mxu1  ;;  %v2145_v2 = vpop.f32.mrb[45].mxu0 }
 0x150   :  { %v2146_v4 = vadd.f32 %v2145_v2, %v2144_v63  ;;  %v2209_v8 = vpop.f32.mrb[45].mxu1  ;;  %v2147_v9 = vpop.f32.mrb[46].mxu0 }
 0x151   :  { %v2210_v10 = vadd.f32 %v2209_v8, %v2208_v1  ;;  %v2211_v11 = vpop.f32.mrb[46].mxu1  ;;  %v2148_v12 = vpop.f32.mrb[47].mxu0 }
 0x152   :  { %v1292_v55 = vadd.f32 %v2146_v4, %v2942_v5  ;;  %v2149_v13 = vadd.f32 %v2148_v12, %v2147_v9  ;;  %v2212_v14 = vpop.f32.mrb[47].mxu1 }
 0x153   :  { %v2213_v15 = vadd.f32 %v2212_v14, %v2211_v11 }
 0x154   :  { %v1295_v57 = vadd.f32 %v2149_v13, %v2944_v7  ;;  %v2982_v16 = vadd.f32 %v2210_v10, %v1292_v55 }
 0x156   :  { %v2150_v17 = vpop.f32.mrb[48].mxu0  ;;  %v2984_v18 = vadd.f32 %v2213_v15, %v1295_v57 }
 0x157   :  { %v2214_v20 = vpop.f32.mrb[48].mxu1  ;;  %v2151_v22 = vpop.f32.mrb[49].mxu0 }
 0x158   :  { %v2152_v23 = vadd.f32 %v2151_v22, %v2150_v17  ;;  %v2215_v25 = vpop.f32.mrb[49].mxu1  ;;  %v2153_v28 = vpop.f32.mrb[50].mxu0 }
 0x159   :  { %v2216_v30 = vadd.f32 %v2215_v25, %v2214_v20  ;;  %v2217_v31 = vpop.f32.mrb[50].mxu1  ;;  %v2154_v32 = vpop.f32.mrb[51].mxu0 }
 0x15a   :  { %v1300_v5 = vadd.f32 %v2152_v23, %v2946_v19  ;;  %v2155_v33 = vadd.f32 %v2154_v32, %v2153_v28  ;;  %v2218_v34 = vpop.f32.mrb[51].mxu1 }
 0x15b   :  { %v2219_v36 = vadd.f32 %v2218_v34, %v2217_v31 }
 0x15c   :  { %v1303_v7 = vadd.f32 %v2155_v33, %v2948_v21  ;;  %v1397_v38 = vadd.f32 %v2216_v30, %v1300_v5  ;;  %v3003_v33 = vld [vmem:[%s3082_s2] ss:$0 sm:$0xff] }
 0x15e   :  { %v2156_v27 = vpop.f32.mrb[52].mxu0  ;;  %v2988_v39 = vadd.f32 %v2219_v36, %v1303_v7 }
 0x15f   :  { %v2220_v40 = vpop.f32.mrb[52].mxu1  ;;  %v2157_v42 = vpop.f32.mrb[53].mxu0 }
 0x160   :  { %v2158_v29 = vadd.f32 %v2157_v42, %v2156_v27  ;;  %v2221_v45 = vpop.f32.mrb[53].mxu1  ;;  %v2159_v47 = vpop.f32.mrb[54].mxu0 }
 0x161   :  { %v2222_v48 = vadd.f32 %v2221_v45, %v2220_v40  ;;  %v2223_v49 = vpop.f32.mrb[54].mxu1  ;;  %v2160_v50 = vpop.f32.mrb[55].mxu0 }
 0x162   :  { %v1308_v52 = vadd.f32 %v2158_v29, %v2950_v35  ;;  %v2161_v19 = vadd.f32 %v2160_v50, %v2159_v47  ;;  %v2224_v54 = vpop.f32.mrb[55].mxu1 }
 0x163   :  { %v2225_v56 = vadd.f32 %v2224_v54, %v2223_v49 }
 0x164   :  { %v1311_v58 = vadd.f32 %v2161_v19, %v2952_v37  ;;  %v1405_v21 = vadd.f32 %v2222_v48, %v1308_v52 }
 0x166   :  { %v2162_v41 = vpop.f32.mrb[56].mxu0  ;;  %v1408_v59 = vadd.f32 %v2225_v56, %v1311_v58 }
 0x167   :  { %v2226_v60 = vpop.f32.mrb[56].mxu1  ;;  %v2163_v61 = vpop.f32.mrb[57].mxu0 }
 0x168   :  { %v2164_v43 = vadd.f32 %v2163_v61, %v2162_v41  ;;  %v2227_v63 = vpop.f32.mrb[57].mxu1  ;;  %v2165_v1 = vpop.f32.mrb[58].mxu0 }
 0x169   :  { %v2228_v2 = vadd.f32 %v2227_v63, %v2226_v60  ;;  %v2229_v4 = vpop.f32.mrb[58].mxu1  ;;  %v2166_v8 = vpop.f32.mrb[59].mxu0 }
 0x16a   :  { %v1316_v9 = vadd.f32 %v2164_v43, %v2954_v51  ;;  %v2167_v10 = vadd.f32 %v2166_v8, %v2165_v1  ;;  %v2230_v35 = vpop.f32.mrb[59].mxu1 }
 0x16b   :  { %v2231_v11 = vadd.f32 %v2230_v35, %v2229_v4 }
 0x16c   :  { %v1319_v12 = vadd.f32 %v2167_v10, %v2956_v53  ;;  %v2994_v55 = vadd.f32 %v2228_v2, %v1316_v9 }
 0x16e   :  { %v2168_v37 = vpop.f32.mrb[60].mxu0  ;;  %v2996_v13 = vadd.f32 %v2231_v11, %v1319_v12 }
 0x16f   :  { %v2232_v14 = vpop.f32.mrb[60].mxu1  ;;  %v2169_v15 = vpop.f32.mrb[61].mxu0 }
 0x170   :  { %v2170_v57 = vadd.f32 %v2169_v15, %v2168_v37  ;;  %v2233_v17 = vpop.f32.mrb[61].mxu1  ;;  %v2171_v20 = vpop.f32.mrb[62].mxu0 }
 0x171   :  { %v2234_v22 = vadd.f32 %v2233_v17, %v2232_v14  ;;  %v2235_v23 = vpop.f32.mrb[62].mxu1  ;;  %v2172_v25 = vpop.f32.mrb[63].mxu0 }
 0x172   :  { %v1324_v51 = vadd.f32 %v2170_v57, %v2958_v3  ;;  %v2173_v28 = vadd.f32 %v2172_v25, %v2171_v20  ;;  %v2236_v30 = vpop.f32.mrb[63].mxu1  ;;  %v3011_v3 = vld [vmem:[%s3082_s2 + $0x1] ss:$0 sm:$0xff] }
 0x173   :  { %v2237_v31 = vadd.f32 %v2236_v30, %v2235_v23 }
 0x174   :  { %v1327_v53 = vadd.f32 %v2173_v28, %v2960_v6  ;;  %v1421_v32 = vadd.f32 %v2234_v22, %v1324_v51 }
 0x176   :  { %v2272_v5 = vpop.f32.mrb[64].mxu0  ;;  %v3005_v34 = vadd.f32 %v2237_v31, %v1327_v53 }
 0x177   :  { %v1470_v36 = vadd.f32 %v2272_v5, %v2970_v44  ;;  %v2280_v7 = vpop.f32.mrb[64].mxu1  ;;  %v1461_v27 = vpop.f32.mrb[65].mxu0 }
 0x178   :  { %v1502_v40 = vadd.f32 %v2280_v7, %v1405_v21  ;;  %v1462_v6 = vadd.f32 %v1461_v27, %v2964_v24  ;;  %v1493_v42 = vpop.f32.mrb[65].mxu1  ;;  %v2273_v29 = vpop.f32.mrb[66].mxu0 }
 0x179   :  { %v1622_v45 = vmul.f32 %v3003_v33, %v1470_v36  ;;  %v1494_v47 = vadd.f32 %v1493_v42, %v1397_v38  ;;  %v1473_v48 = vadd.f32 %v2273_v29, %v2972_v46  ;;  %v2281_v49 = vpop.f32.mrb[66].mxu1  ;;  %v1464_v50 = vpop.f32.mrb[67].mxu0 }
 0x17a   :  { %v1630_v44 = vmul.f32 %v3003_v33, %v1502_v40  ;;  %v1620_v52 = vmul.f32 %v3003_v33, %v1462_v6  ;;  %v1505_v19 = vadd.f32 %v2281_v49, %v1408_v59  ;;  %v1465_v54 = vadd.f32 %v1464_v50, %v2966_v26  ;;  %v1496_v56 = vpop.f32.mrb[67].mxu1 }
 0x17b   :  { %v1643_v58 = vadd.f32 %v3011_v3, %v1622_v45  ;;  %v1628_v24 = vmul.f32 %v3003_v33, %v1494_v47  ;;  %v1623_v21 = vmul.f32 %v3003_v33, %v1473_v48  ;;  %v1497_v38 = vadd.f32 %v1496_v56, %v2988_v39 }
 0x17c   :  { %v1651_v46 = vadd.f32 %v3011_v3, %v1630_v44  ;;  %v1641_v41 = vadd.f32 %v3011_v3, %v1620_v52  ;;  %v1631_v60 = vmul.f32 %v3003_v33, %v1505_v19  ;;  %v1621_v61 = vmul.f32 %v3003_v33, %v1465_v54 }
 0x17d   :  { %v1659_v59 = vmax.f32 %v1643_v58, 0.0  ;;  %v1649_v26 = vadd.f32 %v3011_v3, %v1628_v24  ;;  %v1644_v43 = vadd.f32 %v3011_v3, %v1623_v21  ;;  %v1629_v63 = vmul.f32 %v3003_v33, %v1497_v38 }
 0x17e   :  { %v1667_v1 = vmax.f32 %v1651_v46, 0.0  ;;  %v1657_v2 = vmax.f32 %v1641_v41, 0.0  ;;  %v1652_v4 = vadd.f32 %v3011_v3, %v1631_v60  ;;  %v1642_v39 = vadd.f32 %v3011_v3, %v1621_v61  ;;  %v2276_v8 = vpop.f32.mrb[68].mxu0 }
 0x17f   :  { %v1665_v9 = vmax.f32 %v1649_v26, 0.0  ;;  %v1660_v10 = vmax.f32 %v1644_v43, 0.0  ;;  %v1650_v35 = vadd.f32 %v3011_v3, %v1629_v63  ;;  %v1486_v11 = vadd.f32 %v2276_v8, %v2982_v16  ;;  %v2284_v12 = vpop.f32.mrb[68].mxu1  ;;  %v1477_v37 = vpop.f32.mrb[69].mxu0 }
 0x180   :  { %v1668_v14 = vmax.f32 %v1652_v4, 0.0  ;;  %v1658_v15 = vmax.f32 %v1642_v39, 0.0  ;;  %v1518_v57 = vadd.f32 %v2284_v12, %v1421_v32  ;;  %v1478_v17 = vadd.f32 %v1477_v37, %v2976_v62  ;;  %v1509_v20 = vpop.f32.mrb[69].mxu1  ;;  %v2277_v22 = vpop.f32.mrb[70].mxu0 }
 0x181   :  { %v1943_v23 = vpack.c.bf16 %v1660_v10, %v1659_v59  ;;  %v1666_v25 = vmax.f32 %v1650_v35, 0.0  ;;  %v1626_v51 = vmul.f32 %v3003_v33, %v1486_v11  ;;  %v1510_v28 = vadd.f32 %v1509_v20, %v2994_v55  ;;  %v2285_v30 = vpop.f32.mrb[70].mxu1  ;;  %v1480_v31 = vpop.f32.mrb[71].mxu0 }
 0x182   :  { %v1963_v53 = vpack.c.bf16 %v1668_v14, %v1667_v1  ;;  %v1938_v5 = vpack.c.bf16 %v1658_v15, %v1657_v2  ;;  %v1634_v16 = vmul.f32 %v3003_v33, %v1518_v57  ;;  %v1624_v36 = vmul.f32 %v3003_v33, %v1478_v17  ;;  %v1512_v7 = vpop.f32.mrb[71].mxu1 }
 0x183   :  { %1975 = vst [vmem:[%s3083_s3 + $0x8] sm:$0xff] %v1943_v23   ;;  %v1958_v62 = vpack.c.bf16 %v1666_v25, %v1665_v9  ;;  %v1632_v32 = vmul.f32 %v3003_v33, %v1510_v28  ;;  %v1489_v27 = vadd.f32 %v2277_v22, %v2984_v18  ;;  %v1521_v55 = vadd.f32 %v2285_v30, %v3005_v34 }
 0x184   :  { %1979 = vst [vmem:[%s3083_s3 + $0x28] sm:$0xff] %v1963_v53   ;;  %1939 = vst [vmem:[%s3083_s3] sm:$0xff] %v1938_v5   ;;  %v1481_v40 = vadd.f32 %v1480_v31, %v2978_v0  ;;  %v1647_v6 = vadd.f32 %v3011_v3, %v1626_v51  ;;  %v1513_v42 = vadd.f32 %v1512_v7, %v2996_v13 }
 0x185   :  { %1978 = vst [vmem:[%s3083_s3 + $0x20] sm:$0xff] %v1958_v62   ;;  %v1627_v18 = vmul.f32 %v3003_v33, %v1489_v27  ;;  %v1655_v29 = vadd.f32 %v3011_v3, %v1634_v16  ;;  %v1645_v45 = vadd.f32 %v3011_v3, %v1624_v36  ;;  %v1635_v47 = vmul.f32 %v3003_v33, %v1521_v55 }
 0x186   :  { %v1625_v34 = vmul.f32 %v3003_v33, %v1481_v40  ;;  %v1653_v0 = vadd.f32 %v3011_v3, %v1632_v32  ;;  %v1633_v49 = vmul.f32 %v3003_v33, %v1513_v42  ;;  %v1663_v52 = vmax.f32 %v1647_v6, 0.0 }
 0x187   :  { %v1648_v48 = vadd.f32 %v3011_v3, %v1627_v18  ;;  %v1656_v50 = vadd.f32 %v3011_v3, %v1635_v47  ;;  %v1671_v54 = vmax.f32 %v1655_v29, 0.0  ;;  %v1661_v56 = vmax.f32 %v1645_v45, 0.0 }
 0x188   :  { %v1646_v44 = vadd.f32 %v3011_v3, %v1625_v34  ;;  %v1654_v19 = vadd.f32 %v3011_v3, %v1633_v49  ;;  %v1669_v21 = vmax.f32 %v1653_v0, 0.0 }
 0x189   :  { %v1664_v13 = vmax.f32 %v1648_v48, 0.0  ;;  %v1672_v58 = vmax.f32 %v1656_v50, 0.0 }
 0x18a   :  { %v1662_v24 = vmax.f32 %v1646_v44, 0.0  ;;  %v1670_v46 = vmax.f32 %v1654_v19, 0.0 }
 0x18b   :  { %v1953_v38 = vpack.c.bf16 %v1664_v13, %v1663_v52  ;;  %v1973_v41 = vpack.c.bf16 %v1672_v58, %v1671_v54 }
 0x18c   :  { %v1948_v60 = vpack.c.bf16 %v1662_v24, %v1661_v56  ;;  %v1968_v33 = vpack.c.bf16 %v1670_v46, %v1669_v21 }
 0x18d   :  { %1977 = vst [vmem:[%s3083_s3 + $0x18] sm:$0xff] %v1953_v38   ;;  %1981 = vst [vmem:[%s3083_s3 + $0x38] sm:$0xff] %v1973_v41  }
 0x18e   :  { %1976 = vst [vmem:[%s3083_s3 + $0x10] sm:$0xff] %v1948_v60   ;;  %1980 = vst [vmem:[%s3083_s3 + $0x30] sm:$0xff] %v1968_v33  }

// kernel: resnet_forward.15
= control target key start
LH: loop header
LB: loop body
LE: loop exit
PB: predicated region body
PF: predicated region fallthrough
CT: control target
= control target key end

     0   :  { %s3248_s1 = inlined_call_operand.vmem [shape: bf16[1152,128], index: 1, kind: input, shape index: {}]   ;;  %s3249_s0 = inlined_call_operand.vmem [shape: bf16[128,1152], index: 0, kind: input, shape index: {}]   ;;  %s3250_s3 = inlined_call_operand.vmem [shape: bf16[128,128], index: 3, kind: input, shape index: {}]   ;;  %s3251_s2 = inlined_call_operand.vmem [shape: f32[2,128], index: 2, kind: input, shape index: {}]   ;;  %s3252_s4 = inlined_call_operand.vmem [shape: bf16[128,128], index: 4, kind: output, shape index: {}]  }
   0x1   :  { %v2392_v0 = vld [vmem:[%s3248_s1 + $0x40] sm:$0xff]   ;;  %v2396_v4 = vld [vmem:[%s3248_s1 + $0x48] sm:$0xff]   ;;  %v2400_v8 = vld [vmem:[%s3248_s1 + $0x50] sm:$0xff]  }
   0x2   :  { %v2393_v1 = vld [vmem:[%s3248_s1 + $0xc0] sm:$0xff]   ;;  %2072 = vmatprep.subr.bf16.mxu0 %v2392_v0  ;;  %v2397_v5 = vld [vmem:[%s3248_s1 + $0xc8] sm:$0xff]   ;;  %v2401_v9 = vld [vmem:[%s3248_s1 + $0xd0] sm:$0xff]  }
   0x3   :  { %v2394_v2 = vld [vmem:[%s3248_s1] sm:$0xff]   ;;  %2136 = vmatprep.subr.bf16.mxu1 %v2393_v1  ;;  %v2398_v6 = vld [vmem:[%s3248_s1 + $0x8] sm:$0xff]   ;;  %v2402_v10 = vld [vmem:[%s3248_s1 + $0x10] sm:$0xff]  }
   0x4   :  { %v2395_v3 = vld [vmem:[%s3248_s1 + $0x80] sm:$0xff]   ;;  %2073 = vmatpush3.bf16.msra.mxu0 %v2394_v2  ;;  %v2399_v7 = vld [vmem:[%s3248_s1 + $0x88] sm:$0xff]   ;;  %v2403_v11 = vld [vmem:[%s3248_s1 + $0x90] sm:$0xff]  }
   0x5   :  { %2137 = vmatpush3.bf16.msra.mxu1 %v2395_v3  ;;  %2074 = vmatprep.subr.bf16.mxu0 %v2396_v4  ;;  %v2404_v12 = vld [vmem:[%s3248_s1 + $0x58] sm:$0xff]   ;;  %v2408_v16 = vld [vmem:[%s3248_s1 + $0x60] sm:$0xff]   ;;  %v2412_v20 = vld [vmem:[%s3248_s1 + $0x68] sm:$0xff]  }
   0x6   :  { %2138 = vmatprep.subr.bf16.mxu1 %v2397_v5  ;;  %v2405_v13 = vld [vmem:[%s3248_s1 + $0xd8] sm:$0xff]   ;;  %v2409_v17 = vld [vmem:[%s3248_s1 + $0xe0] sm:$0xff]   ;;  %v2413_v21 = vld [vmem:[%s3248_s1 + $0xe8] sm:$0xff]  }
   0x7   :  { %v2406_v14 = vld [vmem:[%s3248_s1 + $0x18] sm:$0xff]   ;;  %v2410_v18 = vld [vmem:[%s3248_s1 + $0x20] sm:$0xff]   ;;  %v2414_v22 = vld [vmem:[%s3248_s1 + $0x28] sm:$0xff]  }
   0x8   :  { %2075 = vmatpush3.bf16.msra.mxu0 %v2398_v6  ;;  %v2407_v15 = vld [vmem:[%s3248_s1 + $0x98] sm:$0xff]   ;;  %v2411_v19 = vld [vmem:[%s3248_s1 + $0xa0] sm:$0xff]   ;;  %v2415_v23 = vld [vmem:[%s3248_s1 + $0xa8] sm:$0xff]  }
   0x9   :  { %2139 = vmatpush3.bf16.msra.mxu1 %v2399_v7  ;;  %2076 = vmatprep.subr.bf16.mxu0 %v2400_v8  ;;  %v2416_v24 = vld [vmem:[%s3248_s1 + $0x70] sm:$0xff]   ;;  %v2420_v28 = vld [vmem:[%s3248_s1 + $0x78] sm:$0xff]   ;;  %v2424_v32 = vld [vmem:[%s3249_s0] ss:$36 sps:$4 sm:$0xff]  }
   0xa   :  { %2140 = vmatprep.subr.bf16.mxu1 %v2401_v9  ;;  %v2417_v25 = vld [vmem:[%s3248_s1 + $0xf0] sm:$0xff]   ;;  %v2421_v29 = vld [vmem:[%s3248_s1 + $0xf8] sm:$0xff]   ;;  %v2426_v33 = vld [vmem:[%s3249_s0 + $0x4] ss:$36 sps:$4 sm:$0xff]  }
   0xb   :  { %v2418_v26 = vld [vmem:[%s3248_s1 + $0x30] sm:$0xff]   ;;  %v2422_v30 = vld [vmem:[%s3248_s1 + $0x38] sm:$0xff]   ;;  %v2427_v34 = vld [vmem:[%s3249_s0 + $0x8] ss:$36 sps:$4 sm:$0xff]   ;;  %1074 = vmatprep.mubr.bf16.mxu0 %v2426_v33 }
   0xc   :  { %2077 = vmatpush3.bf16.msra.mxu0 %v2402_v10  ;;  %v2419_v27 = vld [vmem:[%s3248_s1 + $0xb0] sm:$0xff]   ;;  %v2423_v31 = vld [vmem:[%s3248_s1 + $0xb8] sm:$0xff]   ;;  %v2430_v36 = vld [vmem:[%s3248_s1 + $0x140] sm:$0xff]  }
   0xd   :  { %2141 = vmatpush3.bf16.msra.mxu1 %v2403_v11  ;;  %2078 = vmatprep.subr.bf16.mxu0 %v2404_v12  ;;  %v2429_v35 = vld [vmem:[%s3249_s0 + $0xc] ss:$36 sps:$4 sm:$0xff]   ;;  %v2431_v37 = vld [vmem:[%s3248_s1 + $0x1c0] sm:$0xff]   ;;  %v2436_v41 = vld [vmem:[%s3249_s0 + $0x54] ss:$36 sps:$4 sm:$0xff]  }
   0xe   :  { %2142 = vmatprep.subr.bf16.mxu1 %v2405_v13  ;;  %1171 = vmatprep.mubr.bf16.mxu1 %v2429_v35  ;;  %v2432_v38 = vld [vmem:[%s3248_s1 + $0x100] sm:$0xff]   ;;  %v2434_v40 = vld [vmem:[%s3249_s0 + $0x4c] ss:$36 sps:$4 sm:$0xff]   ;;  %v2444_v48 = vld [vmem:[%s3249_s0 + $0x94] ss:$36 sps:$4 sm:$0xff]  }
   0xf   :  { %v2433_v39 = vld [vmem:[%s3248_s1 + $0x180] sm:$0xff]   ;;  %v2438_v42 = vld [vmem:[%s3249_s0 + $0x48] ss:$36 sps:$4 sm:$0xff]   ;;  %v2439_v43 = vld [vmem:[%s3249_s0 + $0x50] ss:$36 sps:$4 sm:$0xff]  }
  0x10   :  { %2079 = vmatpush3.bf16.msra.mxu0 %v2406_v14  ;;  %v2440_v44 = vld [vmem:[%s3248_s1 + $0x148] sm:$0xff]   ;;  %v2446_v49 = vld [vmem:[%s3249_s0 + $0x9c] ss:$36 sps:$4 sm:$0xff]   ;;  %v2448_v50 = vld [vmem:[%s3249_s0 + $0x90] ss:$36 sps:$4 sm:$0xff]  }
  0x11   :  { %2143 = vmatpush3.bf16.msra.mxu1 %v2407_v15  ;;  %2080 = vmatprep.subr.bf16.mxu0 %v2408_v16  ;;  %v2441_v45 = vld [vmem:[%s3248_s1 + $0x1c8] sm:$0xff]   ;;  %v2449_v51 = vld [vmem:[%s3249_s0 + $0x98] ss:$36 sps:$4 sm:$0xff]   ;;  %v2450_v52 = vld [vmem:[%s3248_s1 + $0x150] sm:$0xff]  }
  0x12   :  { %2144 = vmatprep.subr.bf16.mxu1 %v2409_v17  ;;  %v2442_v46 = vld [vmem:[%s3248_s1 + $0x108] sm:$0xff]   ;;  %v2451_v53 = vld [vmem:[%s3248_s1 + $0x1d0] sm:$0xff]   ;;  %v2454_v56 = vld [vmem:[%s3249_s0 + $0xdc] ss:$36 sps:$4 sm:$0xff]  }
  0x13   :  { %v2443_v47 = vld [vmem:[%s3248_s1 + $0x188] sm:$0xff]   ;;  %v2452_v54 = vld [vmem:[%s3248_s1 + $0x110] sm:$0xff]   ;;  %v2458_v58 = vld [vmem:[%s3249_s0 + $0xd8] ss:$36 sps:$4 sm:$0xff]  }
  0x14   :  { %2081 = vmatpush3.bf16.msra.mxu0 %v2410_v18  ;;  %v2453_v55 = vld [vmem:[%s3248_s1 + $0x190] sm:$0xff]   ;;  %v2456_v57 = vld [vmem:[%s3249_s0 + $0xe4] ss:$36 sps:$4 sm:$0xff]   ;;  %v2460_v60 = vld [vmem:[%s3248_s1 + $0x158] sm:$0xff]  }
  0x15   :  { %2145 = vmatpush3.bf16.msra.mxu1 %v2411_v19  ;;  %2082 = vmatprep.subr.bf16.mxu0 %v2412_v20  ;;  %v2459_v59 = vld [vmem:[%s3249_s0 + $0xe0] ss:$36 sps:$4 sm:$0xff]   ;;  %v2461_v61 = vld [vmem:[%s3248_s1 + $0x1d8] sm:$0xff]   ;;  %v2466_v1 = vld [vmem:[%s3249_s0 + $0x12c] ss:$36 sps:$4 sm:$0xff]  }
  0x16   :  { %2146 = vmatprep.subr.bf16.mxu1 %v2413_v21  ;;  %v2462_v62 = vld [vmem:[%s3248_s1 + $0x118] sm:$0xff]   ;;  %v2464_v0 = vld [vmem:[%s3249_s0 + $0x124] ss:$36 sps:$4 sm:$0xff]   ;;  %v2474_v8 = vld [vmem:[%s3249_s0 + $0x16c] ss:$36 sps:$4 sm:$0xff]  }
  0x17   :  { %v2463_v63 = vld [vmem:[%s3248_s1 + $0x198] sm:$0xff]   ;;  %v2468_v2 = vld [vmem:[%s3249_s0 + $0x120] ss:$36 sps:$4 sm:$0xff]   ;;  %v2469_v4 = vld [vmem:[%s3249_s0 + $0x128] ss:$36 sps:$4 sm:$0xff]  }
  0x18   :  { %2083 = vmatpush3.bf16.msra.mxu0 %v2414_v22  ;;  %v2470_v3 = vld [vmem:[%s3248_s1 + $0x160] sm:$0xff]   ;;  %v2476_v9 = vld [vmem:[%s3249_s0 + $0x174] ss:$36 sps:$4 sm:$0xff]   ;;  %v2480_v10 = vld [vmem:[%s3248_s1 + $0x168] sm:$0xff]  }
  0x19   :  { %2147 = vmatpush3.bf16.msra.mxu1 %v2415_v23  ;;  %2084 = vmatprep.subr.bf16.mxu0 %v2416_v24  ;;  %v2471_v5 = vld [vmem:[%s3248_s1 + $0x1e0] sm:$0xff]   ;;  %v2481_v11 = vld [vmem:[%s3248_s1 + $0x1e8] sm:$0xff]   ;;  %v2479_v15 = vld [vmem:[%s3249_s0 + $0x170] ss:$36 sps:$4 sm:$0xff]  }
  0x1a   :  { %2148 = vmatprep.subr.bf16.mxu1 %v2417_v25  ;;  %v2472_v6 = vld [vmem:[%s3248_s1 + $0x120] sm:$0xff]   ;;  %v2478_v12 = vld [vmem:[%s3249_s0 + $0x168] ss:$36 sps:$4 sm:$0xff]   ;;  %v2484_v16 = vld [vmem:[%s3249_s0 + $0x1b4] ss:$36 sps:$4 sm:$0xff]  }
  0x1b   :  { %v2473_v7 = vld [vmem:[%s3248_s1 + $0x1a0] sm:$0xff]   ;;  %v2482_v13 = vld [vmem:[%s3248_s1 + $0x128] sm:$0xff]   ;;  %v2490_v18 = vld [vmem:[%s3248_s1 + $0x170] sm:$0xff]  }
  0x1c   :  { %2085 = vmatpush3.bf16.msra.mxu0 %v2418_v26  ;;  %v2483_v14 = vld [vmem:[%s3248_s1 + $0x1a8] sm:$0xff]   ;;  %v2486_v17 = vld [vmem:[%s3249_s0 + $0x1bc] ss:$36 sps:$4 sm:$0xff]   ;;  %v2491_v19 = vld [vmem:[%s3248_s1 + $0x1f0] sm:$0xff]  }
  0x1d   :  { %2149 = vmatpush3.bf16.msra.mxu1 %v2419_v27  ;;  %2086 = vmatprep.subr.bf16.mxu0 %v2420_v28  ;;  %v2492_v20 = vld [vmem:[%s3248_s1 + $0x130] sm:$0xff]   ;;  %v2489_v23 = vld [vmem:[%s3249_s0 + $0x1b8] ss:$36 sps:$4 sm:$0xff]   ;;  %v2496_v25 = vld [vmem:[%s3249_s0 + $0x204] ss:$36 sps:$4 sm:$0xff]  }
  0x1e   :  { %2150 = vmatprep.subr.bf16.mxu1 %v2421_v29  ;;  %v2493_v21 = vld [vmem:[%s3248_s1 + $0x1b0] sm:$0xff]   ;;  %v2494_v24 = vld [vmem:[%s3249_s0 + $0x1fc] ss:$36 sps:$4 sm:$0xff]  }
  0x1f   :  { %v2488_v22 = vld [vmem:[%s3249_s0 + $0x1b0] ss:$36 sps:$4 sm:$0xff]   ;;  %v2500_v26 = vld [vmem:[%s3248_s1 + $0x178] sm:$0xff]  }
  0x20   :  { %2087 = vmatpush3.bf16.msra.mxu0 %v2422_v30  ;;  %v2501_v27 = vld [vmem:[%s3248_s1 + $0x1f8] sm:$0xff]   ;;  %v2504_v35 = vld [vmem:[%s3249_s0 + $0x10] ss:$36 sps:$4 sm:$0xff]  }
  0x21   :  { %2151 = vmatpush3.bf16.msra.mxu1 %v2423_v31  ;;  %2200 = vmatprep.subr.bf16.mxu0 %v2430_v36  ;;  %v2502_v28 = vld [vmem:[%s3248_s1 + $0x138] sm:$0xff]   ;;  %v2499_v31 = vld [vmem:[%s3249_s0 + $0x200] ss:$36 sps:$4 sm:$0xff]  }
  0x22   :  { %2264 = vmatprep.subr.bf16.mxu1 %v2431_v37  ;;  %v2503_v29 = vld [vmem:[%s3248_s1 + $0x1b8] sm:$0xff]  }
  0x23   :  { %1075 = vmatmul.mubr.bf16.vlgmr.msra.gmra.mrb[0].mxu0 %v2424_v32  ;;  %v2498_v30 = vld [vmem:[%s3249_s0 + $0x1f8] ss:$36 sps:$4 sm:$0xff]   ;;  %v2510_v32 = vld [vmem:[%s3248_s1 + $0x200] sm:$0xff]  }
  0x24   :  { %1172 = vmatmul.mubr.bf16.vlgmr.msra.gmra.mrb[0].mxu1 %v2427_v34  ;;  %2201 = vmatpush3.bf16.msra.mxu0 %v2432_v38  ;;  %v2506_v33 = vld [vmem:[%s3249_s0 + $0x14] ss:$36 sps:$4 sm:$0xff]   ;;  %v2509_v34 = vld [vmem:[%s3249_s0 + $0x1c] ss:$36 sps:$4 sm:$0xff]   ;;  %v2513_v38 = vld [vmem:[%s3249_s0 + $0x64] ss:$36 sps:$4 sm:$0xff]  }
  0x25   :  { %2265 = vmatpush3.bf16.msra.mxu1 %v2433_v39  ;;  %1082 = vmatprep.mubr.bf16.mxu0 %v2434_v40  ;;  %v2507_v36 = vld [vmem:[%s3249_s0 + $0x18] ss:$36 sps:$4 sm:$0xff]   ;;  %v2517_v39 = vld [vmem:[%s3248_s1 + $0x208] sm:$0xff]   ;;  %v2524_v40 = vld [vmem:[%s3248_s1 + $0x210] sm:$0xff]  }
  0x26   :  { %1179 = vmatprep.mubr.bf16.mxu1 %v2436_v41  ;;  %2202 = vmatprep.subr.bf16.mxu0 %v2440_v44  ;;  %v2511_v37 = vld [vmem:[%s3249_s0 + $0x5c] ss:$36 sps:$4 sm:$0xff]   ;;  %v2520_v44 = vld [vmem:[%s3249_s0 + $0xac] ss:$36 sps:$4 sm:$0xff]  }
  0x27   :  { %2266 = vmatprep.subr.bf16.mxu1 %v2441_v45  ;;  %v2515_v41 = vld [vmem:[%s3249_s0 + $0x58] ss:$36 sps:$4 sm:$0xff]  }
  0x28   :  { %2203 = vmatpush3.bf16.msra.mxu0 %v2442_v46  ;;  %v2531_v45 = vld [vmem:[%s3248_s1 + $0x218] sm:$0xff]   ;;  %v2538_v46 = vld [vmem:[%s3248_s1 + $0x220] sm:$0xff]  }
  0x29   :  { %2267 = vmatpush3.bf16.msra.mxu1 %v2443_v47  ;;  %2204 = vmatprep.subr.bf16.mxu0 %v2450_v52  ;;  %v2522_v47 = vld [vmem:[%s3249_s0 + $0xa0] ss:$36 sps:$4 sm:$0xff]   ;;  %v2529_v52 = vld [vmem:[%s3249_s0 + $0xe8] ss:$36 sps:$4 sm:$0xff]  }
  0x2a   :  { %2268 = vmatprep.subr.bf16.mxu1 %v2451_v53  ;;  %v2552_v53 = vld [vmem:[%s3248_s1 + $0x230] sm:$0xff]  }
  0x2b   :  { %1083 = vmatmul.mubr.bf16.gmra.mrb[4].mxu0 %v2438_v42  ;;  %v2516_v42 = vld [vmem:[%s3249_s0 + $0x60] ss:$36 sps:$4 sm:$0xff]  }
  0x2c   :  { %1180 = vmatmul.mubr.bf16.gmra.mrb[4].mxu1 %v2439_v43  ;;  %1090 = vmatprep.mubr.bf16.mxu0 %v2444_v48  ;;  %v2518_v43 = vld [vmem:[%s3249_s0 + $0xa4] ss:$36 sps:$4 sm:$0xff]  }
  0x2d   :  { %1187 = vmatprep.mubr.bf16.mxu1 %v2446_v49  ;;  %2205 = vmatpush3.bf16.msra.mxu0 %v2452_v54  ;;  %v2523_v48 = vld [vmem:[%s3249_s0 + $0xa8] ss:$36 sps:$4 sm:$0xff]   ;;  %v2530_v54 = vld [vmem:[%s3249_s0 + $0xf0] ss:$36 sps:$4 sm:$0xff]  }
  0x2e   :  { %2269 = vmatpush3.bf16.msra.mxu1 %v2453_v55  ;;  %2206 = vmatprep.subr.bf16.mxu0 %v2460_v60  ;;  %v2525_v49 = vld [vmem:[%s3249_s0 + $0xec] ss:$36 sps:$4 sm:$0xff]   ;;  %v2532_v55 = vld [vmem:[%s3249_s0 + $0x134] ss:$36 sps:$4 sm:$0xff]   ;;  %v2539_v60 = vld [vmem:[%s3249_s0 + $0x17c] ss:$36 sps:$4 sm:$0xff]  }
  0x2f   :  { %2270 = vmatprep.subr.bf16.mxu1 %v2461_v61  ;;  %v2541_v61 = vld [vmem:[%s3249_s0 + $0x184] ss:$36 sps:$4 sm:$0xff]  }
  0x31   :  { %2207 = vmatpush3.bf16.msra.mxu0 %v2462_v62  ;;  %v2543_v62 = vld [vmem:[%s3249_s0 + $0x178] ss:$36 sps:$4 sm:$0xff]  }
  0x32   :  { %2271 = vmatpush3.bf16.msra.mxu1 %v2463_v63  ;;  %2208 = vmatprep.subr.bf16.mxu0 %v2470_v3  ;;  %v2544_v63 = vld [vmem:[%s3249_s0 + $0x180] ss:$36 sps:$4 sm:$0xff]   ;;  %v2551_v3 = vld [vmem:[%s3249_s0 + $0x1c8] ss:$36 sps:$4 sm:$0xff]  }
  0x33   :  { %1091 = vmatmul.mubr.bf16.gmra.mrb[8].mxu0 %v2448_v50  ;;  %2272 = vmatprep.subr.bf16.mxu1 %v2471_v5  ;;  %v2527_v50 = vld [vmem:[%s3249_s0 + $0xf4] ss:$36 sps:$4 sm:$0xff]  }
  0x34   :  { %1188 = vmatmul.mubr.bf16.gmra.mrb[8].mxu1 %v2449_v51  ;;  %1098 = vmatprep.mubr.bf16.mxu0 %v2454_v56  ;;  %v2545_v51 = vld [vmem:[%s3248_s1 + $0x228] sm:$0xff]   ;;  %v2534_v56 = vld [vmem:[%s3249_s0 + $0x13c] ss:$36 sps:$4 sm:$0xff]   ;;  %v2555_v5 = vld [vmem:[%s3249_s0 + $0x214] ss:$36 sps:$4 sm:$0xff]  }
  0x35   :  { %1195 = vmatprep.mubr.bf16.mxu1 %v2456_v57  ;;  %2209 = vmatpush3.bf16.msra.mxu0 %v2472_v6  ;;  %v2559_v57 = vld [vmem:[%s3248_s1 + $0x238] sm:$0xff]   ;;  %v2557_v6 = vld [vmem:[%s3249_s0 + $0x208] ss:$36 sps:$4 sm:$0xff]  }
  0x36   :  { %2273 = vmatpush3.bf16.msra.mxu1 %v2473_v7  ;;  %2210 = vmatprep.subr.bf16.mxu0 %v2480_v10  ;;  %v2558_v7 = vld [vmem:[%s3249_s0 + $0x210] ss:$36 sps:$4 sm:$0xff]   ;;  %v2562_v10 = vld [vmem:[%s3249_s0 + $0x68] ss:$36 sps:$4 sm:$0xff]  }
  0x37   :  { %2274 = vmatprep.subr.bf16.mxu1 %v2481_v11  ;;  %v2563_v11 = vld [vmem:[%s3249_s0 + $0x188] ss:$36 sps:$4 sm:$0xff]  }
  0x39   :  { %2211 = vmatpush3.bf16.msra.mxu0 %v2482_v13  ;;  %v2565_v13 = vld [vmem:[%s3249_s0 + $0x1d0] ss:$36 sps:$4 sm:$0xff]  }
  0x3a   :  { %2275 = vmatpush3.bf16.msra.mxu1 %v2483_v14  ;;  %2212 = vmatprep.subr.bf16.mxu0 %v2490_v18  ;;  %v2566_v14 = vld [vmem:[%s3249_s0 + $0xf8] ss:$36 sps:$4 sm:$0xff]  }
  0x3b   :  { %1099 = vmatmul.mubr.bf16.gmra.mrb[12].mxu0 %v2458_v58  ;;  %2276 = vmatprep.subr.bf16.mxu1 %v2491_v19  ;;  %v2536_v58 = vld [vmem:[%s3249_s0 + $0x130] ss:$36 sps:$4 sm:$0xff]  }
  0x3c   :  { %1196 = vmatmul.mubr.bf16.gmra.mrb[12].mxu1 %v2459_v59  ;;  %1106 = vmatprep.mubr.bf16.mxu0 %v2464_v0  ;;  %v2537_v59 = vld [vmem:[%s3249_s0 + $0x138] ss:$36 sps:$4 sm:$0xff]   ;;  %v2546_v0 = vld [vmem:[%s3249_s0 + $0x1c4] ss:$36 sps:$4 sm:$0xff]  }
  0x3d   :  { %1203 = vmatprep.mubr.bf16.mxu1 %v2466_v1  ;;  %2213 = vmatpush3.bf16.msra.mxu0 %v2492_v20  ;;  %v2548_v1 = vld [vmem:[%s3249_s0 + $0x1cc] ss:$36 sps:$4 sm:$0xff]  }
  0x3e   :  { %2277 = vmatpush3.bf16.msra.mxu1 %v2493_v21  ;;  %2214 = vmatprep.subr.bf16.mxu0 %v2500_v26 }
  0x3f   :  { %2278 = vmatprep.subr.bf16.mxu1 %v2501_v27 }
  0x41   :  { %2215 = vmatpush3.bf16.msra.mxu0 %v2502_v28 }
  0x42   :  { %2279 = vmatpush3.bf16.msra.mxu1 %v2503_v29  ;;  %2344 = vmatprep.subr.bf16.mxu0 %v2510_v32 }
  0x43   :  { %1107 = vmatmul.mubr.bf16.gmra.mrb[16].mxu0 %v2468_v2  ;;  %2376 = vmatprep.subr.bf16.mxu1 %v2510_v32  ;;  %v2550_v2 = vld [vmem:[%s3249_s0 + $0x1c0] ss:$36 sps:$4 sm:$0xff]  }
  0x44   :  { %1204 = vmatmul.mubr.bf16.gmra.mrb[16].mxu1 %v2469_v4  ;;  %1114 = vmatprep.mubr.bf16.mxu0 %v2474_v8  ;;  %v2553_v4 = vld [vmem:[%s3249_s0 + $0x20c] ss:$36 sps:$4 sm:$0xff]   ;;  %v2560_v8 = vld [vmem:[%s3249_s0 + $0x20] ss:$36 sps:$4 sm:$0xff]  }
  0x45   :  { %1211 = vmatprep.mubr.bf16.mxu1 %v2476_v9  ;;  %v2561_v9 = vld [vmem:[%s3249_s0 + $0x140] ss:$36 sps:$4 sm:$0xff]  }
  0x4b   :  { %1115 = vmatmul.mubr.bf16.gmra.mrb[20].mxu0 %v2478_v12  ;;  %v2564_v12 = vld [vmem:[%s3249_s0 + $0xb0] ss:$36 sps:$4 sm:$0xff]  }
  0x4c   :  { %1212 = vmatmul.mubr.bf16.gmra.mrb[20].mxu1 %v2479_v15  ;;  %1122 = vmatprep.mubr.bf16.mxu0 %v2484_v16  ;;  %v2567_v15 = vld [vmem:[%s3249_s0 + $0x218] ss:$36 sps:$4 sm:$0xff]  }
  0x4d   :  { %1219 = vmatprep.mubr.bf16.mxu1 %v2486_v17 }
  0x53   :  { %1123 = vmatmul.mubr.bf16.gmra.mrb[24].mxu0 %v2488_v22 }
  0x54   :  { %1220 = vmatmul.mubr.bf16.gmra.mrb[24].mxu1 %v2489_v23  ;;  %1130 = vmatprep.mubr.bf16.mxu0 %v2494_v24 }
  0x55   :  { %1227 = vmatprep.mubr.bf16.mxu1 %v2496_v25 }
  0x5b   :  { %1131 = vmatmul.mubr.bf16.gmra.mrb[28].mxu0 %v2498_v30 }
  0x5c   :  { %1228 = vmatmul.mubr.bf16.gmra.mrb[28].mxu1 %v2499_v31  ;;  %1268 = vmatprep.mubr.bf16.mxu0 %v2506_v33 }
  0x5d   :  { %1365 = vmatprep.mubr.bf16.mxu1 %v2509_v34 }
  0x63   :  { %1269 = vmatmul.mubr.bf16.vlgmr.msra.gmra.mrb[32].mxu0 %v2504_v35 }
  0x64   :  { %1366 = vmatmul.mubr.bf16.vlgmr.msra.gmra.mrb[32].mxu1 %v2507_v36  ;;  %2345 = vmatpush3.bf16.msra.mxu0 %v2510_v32 }
  0x65   :  { %2384 = vmatpush3.bf16.msra.mxu1 %v2510_v32  ;;  %1276 = vmatprep.mubr.bf16.mxu0 %v2511_v37 }
  0x66   :  { %1373 = vmatprep.mubr.bf16.mxu1 %v2513_v38  ;;  %2346 = vmatprep.subr.bf16.mxu0 %v2517_v39 }
  0x67   :  { %2377 = vmatprep.subr.bf16.mxu1 %v2517_v39 }
  0x68   :  { %2347 = vmatpush3.bf16.msra.mxu0 %v2517_v39 }
  0x69   :  { %2385 = vmatpush3.bf16.msra.mxu1 %v2517_v39  ;;  %2348 = vmatprep.subr.bf16.mxu0 %v2524_v40 }
  0x6a   :  { %2378 = vmatprep.subr.bf16.mxu1 %v2524_v40 }
  0x6b   :  { %1277 = vmatmul.mubr.bf16.gmra.mrb[36].mxu0 %v2515_v41 }
  0x6c   :  { %1374 = vmatmul.mubr.bf16.gmra.mrb[36].mxu1 %v2516_v42  ;;  %1284 = vmatprep.mubr.bf16.mxu0 %v2518_v43 }
  0x6d   :  { %1381 = vmatprep.mubr.bf16.mxu1 %v2520_v44  ;;  %2349 = vmatpush3.bf16.msra.mxu0 %v2524_v40 }
  0x6e   :  { %2386 = vmatpush3.bf16.msra.mxu1 %v2524_v40  ;;  %2350 = vmatprep.subr.bf16.mxu0 %v2531_v45 }
  0x6f   :  { %2379 = vmatprep.subr.bf16.mxu1 %v2531_v45 }
  0x71   :  { %2351 = vmatpush3.bf16.msra.mxu0 %v2531_v45 }
  0x72   :  { %2387 = vmatpush3.bf16.msra.mxu1 %v2531_v45  ;;  %2352 = vmatprep.subr.bf16.mxu0 %v2538_v46 }
  0x73   :  { %1285 = vmatmul.mubr.bf16.gmra.mrb[40].mxu0 %v2522_v47  ;;  %2380 = vmatprep.subr.bf16.mxu1 %v2538_v46 }
  0x74   :  { %1382 = vmatmul.mubr.bf16.gmra.mrb[40].mxu1 %v2523_v48  ;;  %1292 = vmatprep.mubr.bf16.mxu0 %v2525_v49 }
  0x75   :  { %1389 = vmatprep.mubr.bf16.mxu1 %v2527_v50  ;;  %2353 = vmatpush3.bf16.msra.mxu0 %v2538_v46 }
  0x76   :  { %2388 = vmatpush3.bf16.msra.mxu1 %v2538_v46  ;;  %2354 = vmatprep.subr.bf16.mxu0 %v2545_v51 }
  0x77   :  { %2381 = vmatprep.subr.bf16.mxu1 %v2545_v51 }
  0x79   :  { %2355 = vmatpush3.bf16.msra.mxu0 %v2545_v51 }
  0x7a   :  { %2389 = vmatpush3.bf16.msra.mxu1 %v2545_v51  ;;  %2356 = vmatprep.subr.bf16.mxu0 %v2552_v53 }
  0x7b   :  { %1293 = vmatmul.mubr.bf16.gmra.mrb[44].mxu0 %v2529_v52  ;;  %2382 = vmatprep.subr.bf16.mxu1 %v2552_v53 }
  0x7c   :  { %1390 = vmatmul.mubr.bf16.gmra.mrb[44].mxu1 %v2530_v54  ;;  %1300 = vmatprep.mubr.bf16.mxu0 %v2532_v55 }
  0x7d   :  { %1397 = vmatprep.mubr.bf16.mxu1 %v2534_v56  ;;  %2357 = vmatpush3.bf16.msra.mxu0 %v2552_v53 }
  0x7e   :  { %2390 = vmatpush3.bf16.msra.mxu1 %v2552_v53  ;;  %2358 = vmatprep.subr.bf16.mxu0 %v2559_v57 }
  0x7f   :  { %2383 = vmatprep.subr.bf16.mxu1 %v2559_v57 }
  0x81   :  { %2359 = vmatpush3.bf16.msra.mxu0 %v2559_v57 }
  0x82   :  { %2391 = vmatpush3.bf16.msra.mxu1 %v2559_v57 }
  0x83   :  { %1301 = vmatmul.mubr.bf16.gmra.mrb[48].mxu0 %v2536_v58 }
  0x84   :  { %1398 = vmatmul.mubr.bf16.gmra.mrb[48].mxu1 %v2537_v59  ;;  %1308 = vmatprep.mubr.bf16.mxu0 %v2539_v60 }
  0x85   :  { %1405 = vmatprep.mubr.bf16.mxu1 %v2541_v61 }
  0x8b   :  { %1309 = vmatmul.mubr.bf16.gmra.mrb[52].mxu0 %v2543_v62 }
  0x8c   :  { %1406 = vmatmul.mubr.bf16.gmra.mrb[52].mxu1 %v2544_v63  ;;  %1316 = vmatprep.mubr.bf16.mxu0 %v2546_v0 }
  0x8d   :  { %1413 = vmatprep.mubr.bf16.mxu1 %v2548_v1 }
  0x93   :  { %1317 = vmatmul.mubr.bf16.gmra.mrb[56].mxu0 %v2550_v2 }
  0x94   :  { %1414 = vmatmul.mubr.bf16.gmra.mrb[56].mxu1 %v2551_v3  ;;  %1324 = vmatprep.mubr.bf16.mxu0 %v2553_v4 }
  0x95   :  { %1421 = vmatprep.mubr.bf16.mxu1 %v2555_v5 }
  0x9b   :  { %1325 = vmatmul.mubr.bf16.gmra.mrb[60].mxu0 %v2557_v6 }
  0x9c   :  { %1422 = vmatmul.mubr.bf16.gmra.mrb[60].mxu1 %v2558_v7  ;;  %2360 = vmatprep.mubr.bf16.mxu0 %v2560_v8 }
  0x9d   :  { %2368 = vmatprep.mubr.bf16.mxu1 %v2561_v9 }
  0xa3   :  { %2361 = vmatmul.mubr.bf16.vlgmr.msra.gmra.mrb[64].mxu0 %v2562_v10 }
  0xa4   :  { %2369 = vmatmul.mubr.bf16.vlgmr.msra.gmra.mrb[64].mxu1 %v2563_v11  ;;  %2364 = vmatprep.mubr.bf16.mxu0 %v2564_v12 }
  0xa5   :  { %2372 = vmatprep.mubr.bf16.mxu1 %v2565_v13 }
  0xab   :  { %2365 = vmatmul.mubr.bf16.gmra.mrb[68].mxu0 %v2566_v14 }
  0xac   :  { %2373 = vmatmul.mubr.bf16.gmra.mrb[68].mxu1 %v2567_v15 }
  0xf6   :  { %v2088_v16 = vpop.f32.mrb[0].mxu0 }
  0xf7   :  { %v2152_v17 = vpop.f32.mrb[0].mxu1  ;;  %v2089_v18 = vpop.f32.mrb[1].mxu0 }
  0xf8   :  { %v2090_v19 = vadd.f32 %v2089_v18, %v2088_v16  ;;  %v2153_v20 = vpop.f32.mrb[1].mxu1  ;;  %v2091_v21 = vpop.f32.mrb[2].mxu0 }
  0xf9   :  { %v2154_v22 = vadd.f32 %v2153_v20, %v2152_v17  ;;  %v2155_v23 = vpop.f32.mrb[2].mxu1  ;;  %v2092_v24 = vpop.f32.mrb[3].mxu0 }
  0xfa   :  { %v2093_v25 = vadd.f32 %v2092_v24, %v2091_v21  ;;  %v2156_v26 = vpop.f32.mrb[3].mxu1 }
  0xfb   :  { %v3025_v27 = vadd.f32 %v2154_v22, %v2090_v19  ;;  %v2157_v28 = vadd.f32 %v2156_v26, %v2155_v23 }
  0xfd   :  { %v3027_v29 = vadd.f32 %v2157_v28, %v2093_v25 }
  0xfe   :  { %v2094_v30 = vpop.f32.mrb[4].mxu0 }
  0xff   :  { %v2158_v31 = vpop.f32.mrb[4].mxu1  ;;  %v2095_v32 = vpop.f32.mrb[5].mxu0 }
 0x100   :  { %v2096_v33 = vadd.f32 %v2095_v32, %v2094_v30  ;;  %v2159_v34 = vpop.f32.mrb[5].mxu1  ;;  %v2097_v35 = vpop.f32.mrb[6].mxu0 }
 0x101   :  { %v2160_v36 = vadd.f32 %v2159_v34, %v2158_v31  ;;  %v2161_v37 = vpop.f32.mrb[6].mxu1  ;;  %v2098_v38 = vpop.f32.mrb[7].mxu0 }
 0x102   :  { %v2099_v39 = vadd.f32 %v2098_v38, %v2097_v35  ;;  %v2162_v40 = vpop.f32.mrb[7].mxu1 }
 0x103   :  { %v3029_v41 = vadd.f32 %v2160_v36, %v2096_v33  ;;  %v2163_v42 = vadd.f32 %v2162_v40, %v2161_v37 }
 0x105   :  { %v3031_v43 = vadd.f32 %v2163_v42, %v2099_v39 }
 0x106   :  { %v2100_v44 = vpop.f32.mrb[8].mxu0 }
 0x107   :  { %v2164_v45 = vpop.f32.mrb[8].mxu1  ;;  %v2101_v46 = vpop.f32.mrb[9].mxu0 }
 0x108   :  { %v2102_v47 = vadd.f32 %v2101_v46, %v2100_v44  ;;  %v2165_v48 = vpop.f32.mrb[9].mxu1  ;;  %v2103_v49 = vpop.f32.mrb[10].mxu0 }
 0x109   :  { %v2166_v50 = vadd.f32 %v2165_v48, %v2164_v45  ;;  %v2167_v51 = vpop.f32.mrb[10].mxu1  ;;  %v2104_v52 = vpop.f32.mrb[11].mxu0 }
 0x10a   :  { %v2105_v53 = vadd.f32 %v2104_v52, %v2103_v49  ;;  %v2168_v54 = vpop.f32.mrb[11].mxu1 }
 0x10b   :  { %v3033_v55 = vadd.f32 %v2166_v50, %v2102_v47  ;;  %v2169_v56 = vadd.f32 %v2168_v54, %v2167_v51 }
 0x10d   :  { %v3035_v57 = vadd.f32 %v2169_v56, %v2105_v53 }
 0x10e   :  { %v2106_v58 = vpop.f32.mrb[12].mxu0 }
 0x10f   :  { %v2170_v59 = vpop.f32.mrb[12].mxu1  ;;  %v2107_v60 = vpop.f32.mrb[13].mxu0 }
 0x110   :  { %v2108_v61 = vadd.f32 %v2107_v60, %v2106_v58  ;;  %v2171_v62 = vpop.f32.mrb[13].mxu1  ;;  %v2109_v63 = vpop.f32.mrb[14].mxu0 }
 0x111   :  { %v2172_v0 = vadd.f32 %v2171_v62, %v2170_v59  ;;  %v2173_v1 = vpop.f32.mrb[14].mxu1  ;;  %v2110_v2 = vpop.f32.mrb[15].mxu0 }
 0x112   :  { %v2111_v3 = vadd.f32 %v2110_v2, %v2109_v63  ;;  %v2174_v4 = vpop.f32.mrb[15].mxu1 }
 0x113   :  { %v3037_v5 = vadd.f32 %v2172_v0, %v2108_v61  ;;  %v2175_v6 = vadd.f32 %v2174_v4, %v2173_v1 }
 0x115   :  { %v3039_v7 = vadd.f32 %v2175_v6, %v2111_v3 }
 0x116   :  { %v2112_v8 = vpop.f32.mrb[16].mxu0 }
 0x117   :  { %v2176_v9 = vpop.f32.mrb[16].mxu1  ;;  %v2113_v10 = vpop.f32.mrb[17].mxu0 }
 0x118   :  { %v2114_v11 = vadd.f32 %v2113_v10, %v2112_v8  ;;  %v2177_v12 = vpop.f32.mrb[17].mxu1  ;;  %v2115_v13 = vpop.f32.mrb[18].mxu0 }
 0x119   :  { %v2178_v14 = vadd.f32 %v2177_v12, %v2176_v9  ;;  %v2179_v15 = vpop.f32.mrb[18].mxu1  ;;  %v2116_v16 = vpop.f32.mrb[19].mxu0 }
 0x11a   :  { %v2117_v17 = vadd.f32 %v2116_v16, %v2115_v13  ;;  %v2180_v18 = vpop.f32.mrb[19].mxu1 }
 0x11b   :  { %v3041_v19 = vadd.f32 %v2178_v14, %v2114_v11  ;;  %v2181_v20 = vadd.f32 %v2180_v18, %v2179_v15 }
 0x11d   :  { %v3043_v21 = vadd.f32 %v2181_v20, %v2117_v17 }
 0x11e   :  { %v2118_v22 = vpop.f32.mrb[20].mxu0 }
 0x11f   :  { %v2182_v23 = vpop.f32.mrb[20].mxu1  ;;  %v2119_v24 = vpop.f32.mrb[21].mxu0 }
 0x120   :  { %v2120_v25 = vadd.f32 %v2119_v24, %v2118_v22  ;;  %v2183_v26 = vpop.f32.mrb[21].mxu1  ;;  %v2121_v28 = vpop.f32.mrb[22].mxu0 }
 0x121   :  { %v2184_v30 = vadd.f32 %v2183_v26, %v2182_v23  ;;  %v2185_v31 = vpop.f32.mrb[22].mxu1  ;;  %v2122_v32 = vpop.f32.mrb[23].mxu0 }
 0x122   :  { %v2123_v33 = vadd.f32 %v2122_v32, %v2121_v28  ;;  %v2186_v34 = vpop.f32.mrb[23].mxu1 }
 0x123   :  { %v3045_v35 = vadd.f32 %v2184_v30, %v2120_v25  ;;  %v2187_v36 = vadd.f32 %v2186_v34, %v2185_v31 }
 0x125   :  { %v3047_v37 = vadd.f32 %v2187_v36, %v2123_v33 }
 0x126   :  { %v2124_v38 = vpop.f32.mrb[24].mxu0 }
 0x127   :  { %v2188_v39 = vpop.f32.mrb[24].mxu1  ;;  %v2125_v40 = vpop.f32.mrb[25].mxu0 }
 0x128   :  { %v2126_v42 = vadd.f32 %v2125_v40, %v2124_v38  ;;  %v2189_v44 = vpop.f32.mrb[25].mxu1  ;;  %v2127_v45 = vpop.f32.mrb[26].mxu0 }
 0x129   :  { %v2190_v46 = vadd.f32 %v2189_v44, %v2188_v39  ;;  %v2191_v47 = vpop.f32.mrb[26].mxu1  ;;  %v2128_v48 = vpop.f32.mrb[27].mxu0 }
 0x12a   :  { %v2129_v49 = vadd.f32 %v2128_v48, %v2127_v45  ;;  %v2192_v50 = vpop.f32.mrb[27].mxu1 }
 0x12b   :  { %v3049_v51 = vadd.f32 %v2190_v46, %v2126_v42  ;;  %v2193_v52 = vadd.f32 %v2192_v50, %v2191_v47 }
 0x12d   :  { %v3051_v53 = vadd.f32 %v2193_v52, %v2129_v49 }
 0x12e   :  { %v2130_v54 = vpop.f32.mrb[28].mxu0 }
 0x12f   :  { %v2194_v56 = vpop.f32.mrb[28].mxu1  ;;  %v2131_v58 = vpop.f32.mrb[29].mxu0 }
 0x130   :  { %v2132_v59 = vadd.f32 %v2131_v58, %v2130_v54  ;;  %v2195_v60 = vpop.f32.mrb[29].mxu1  ;;  %v2133_v61 = vpop.f32.mrb[30].mxu0 }
 0x131   :  { %v2196_v62 = vadd.f32 %v2195_v60, %v2194_v56  ;;  %v2197_v63 = vpop.f32.mrb[30].mxu1  ;;  %v2134_v0 = vpop.f32.mrb[31].mxu0 }
 0x132   :  { %v2135_v1 = vadd.f32 %v2134_v0, %v2133_v61  ;;  %v2198_v2 = vpop.f32.mrb[31].mxu1 }
 0x133   :  { %v3053_v3 = vadd.f32 %v2196_v62, %v2132_v59  ;;  %v2199_v4 = vadd.f32 %v2198_v2, %v2197_v63 }
 0x135   :  { %v3055_v6 = vadd.f32 %v2199_v4, %v2135_v1 }
 0x136   :  { %v2216_v8 = vpop.f32.mrb[32].mxu0 }
 0x137   :  { %v2280_v9 = vpop.f32.mrb[32].mxu1  ;;  %v2217_v10 = vpop.f32.mrb[33].mxu0 }
 0x138   :  { %v2218_v11 = vadd.f32 %v2217_v10, %v2216_v8  ;;  %v2281_v12 = vpop.f32.mrb[33].mxu1  ;;  %v2219_v13 = vpop.f32.mrb[34].mxu0 }
 0x139   :  { %v2282_v14 = vadd.f32 %v2281_v12, %v2280_v9  ;;  %v2283_v15 = vpop.f32.mrb[34].mxu1  ;;  %v2220_v16 = vpop.f32.mrb[35].mxu0 }
 0x13a   :  { %v1271_v17 = vadd.f32 %v2218_v11, %v3025_v27  ;;  %v2221_v18 = vadd.f32 %v2220_v16, %v2219_v13  ;;  %v2284_v20 = vpop.f32.mrb[35].mxu1 }
 0x13b   :  { %v2285_v22 = vadd.f32 %v2284_v20, %v2283_v15 }
 0x13c   :  { %v1274_v23 = vadd.f32 %v2221_v18, %v3027_v29  ;;  %v3059_v24 = vadd.f32 %v2282_v14, %v1271_v17 }
 0x13e   :  { %v2222_v25 = vpop.f32.mrb[36].mxu0  ;;  %v3061_v26 = vadd.f32 %v2285_v22, %v1274_v23 }
 0x13f   :  { %v2286_v28 = vpop.f32.mrb[36].mxu1  ;;  %v2223_v30 = vpop.f32.mrb[37].mxu0 }
 0x140   :  { %v2224_v31 = vadd.f32 %v2223_v30, %v2222_v25  ;;  %v2287_v32 = vpop.f32.mrb[37].mxu1  ;;  %v2225_v33 = vpop.f32.mrb[38].mxu0 }
 0x141   :  { %v2288_v34 = vadd.f32 %v2287_v32, %v2286_v28  ;;  %v2289_v36 = vpop.f32.mrb[38].mxu1  ;;  %v2226_v38 = vpop.f32.mrb[39].mxu0 }
 0x142   :  { %v1279_v27 = vadd.f32 %v2224_v31, %v3029_v41  ;;  %v2227_v39 = vadd.f32 %v2226_v38, %v2225_v33  ;;  %v2290_v40 = vpop.f32.mrb[39].mxu1 }
 0x143   :  { %v2291_v42 = vadd.f32 %v2290_v40, %v2289_v36 }
 0x144   :  { %v1282_v29 = vadd.f32 %v2227_v39, %v3031_v43  ;;  %v3065_v44 = vadd.f32 %v2288_v34, %v1279_v27 }
 0x146   :  { %v2228_v45 = vpop.f32.mrb[40].mxu0  ;;  %v3067_v46 = vadd.f32 %v2291_v42, %v1282_v29 }
 0x147   :  { %v2292_v47 = vpop.f32.mrb[40].mxu1  ;;  %v2229_v48 = vpop.f32.mrb[41].mxu0 }
 0x148   :  { %v2230_v49 = vadd.f32 %v2229_v48, %v2228_v45  ;;  %v2293_v50 = vpop.f32.mrb[41].mxu1  ;;  %v2231_v52 = vpop.f32.mrb[42].mxu0 }
 0x149   :  { %v2294_v54 = vadd.f32 %v2293_v50, %v2292_v47  ;;  %v2295_v56 = vpop.f32.mrb[42].mxu1  ;;  %v2232_v58 = vpop.f32.mrb[43].mxu0 }
 0x14a   :  { %v1287_v41 = vadd.f32 %v2230_v49, %v3033_v55  ;;  %v2233_v59 = vadd.f32 %v2232_v58, %v2231_v52  ;;  %v2296_v60 = vpop.f32.mrb[43].mxu1 }
 0x14b   :  { %v2297_v61 = vadd.f32 %v2296_v60, %v2295_v56 }
 0x14c   :  { %v1290_v43 = vadd.f32 %v2233_v59, %v3035_v57  ;;  %v3071_v62 = vadd.f32 %v2294_v54, %v1287_v41 }
 0x14e   :  { %v2234_v63 = vpop.f32.mrb[44].mxu0  ;;  %v3073_v0 = vadd.f32 %v2297_v61, %v1290_v43 }
 0x14f   :  { %v2298_v1 = vpop.f32.mrb[44].mxu1  ;;  %v2235_v2 = vpop.f32.mrb[45].mxu0 }
 0x150   :  { %v2236_v4 = vadd.f32 %v2235_v2, %v2234_v63  ;;  %v2299_v8 = vpop.f32.mrb[45].mxu1  ;;  %v2237_v9 = vpop.f32.mrb[46].mxu0 }
 0x151   :  { %v2300_v10 = vadd.f32 %v2299_v8, %v2298_v1  ;;  %v2301_v11 = vpop.f32.mrb[46].mxu1  ;;  %v2238_v12 = vpop.f32.mrb[47].mxu0 }
 0x152   :  { %v1295_v55 = vadd.f32 %v2236_v4, %v3037_v5  ;;  %v2239_v13 = vadd.f32 %v2238_v12, %v2237_v9  ;;  %v2302_v14 = vpop.f32.mrb[47].mxu1 }
 0x153   :  { %v2303_v15 = vadd.f32 %v2302_v14, %v2301_v11 }
 0x154   :  { %v1298_v57 = vadd.f32 %v2239_v13, %v3039_v7  ;;  %v3077_v16 = vadd.f32 %v2300_v10, %v1295_v55 }
 0x156   :  { %v2240_v17 = vpop.f32.mrb[48].mxu0  ;;  %v3079_v18 = vadd.f32 %v2303_v15, %v1298_v57 }
 0x157   :  { %v2304_v20 = vpop.f32.mrb[48].mxu1  ;;  %v2241_v22 = vpop.f32.mrb[49].mxu0 }
 0x158   :  { %v2242_v23 = vadd.f32 %v2241_v22, %v2240_v17  ;;  %v2305_v25 = vpop.f32.mrb[49].mxu1  ;;  %v2243_v28 = vpop.f32.mrb[50].mxu0 }
 0x159   :  { %v2306_v30 = vadd.f32 %v2305_v25, %v2304_v20  ;;  %v2307_v31 = vpop.f32.mrb[50].mxu1  ;;  %v2244_v32 = vpop.f32.mrb[51].mxu0 }
 0x15a   :  { %v1303_v5 = vadd.f32 %v2242_v23, %v3041_v19  ;;  %v2245_v33 = vadd.f32 %v2244_v32, %v2243_v28  ;;  %v2308_v34 = vpop.f32.mrb[51].mxu1  ;;  %v3111_v32 = vld [vmem:[%s3250_s3] sm:$0xff]  }
 0x15b   :  { %v2309_v36 = vadd.f32 %v2308_v34, %v2307_v31  ;;  %v3106_v31 = vld [vmem:[%s3250_s3 + $0x28] sm:$0xff]   ;;  %v3122_v34 = vld [vmem:[%s3250_s3 + $0x18] sm:$0xff]  }
 0x15c   :  { %v1306_v7 = vadd.f32 %v2245_v33, %v3043_v21  ;;  %v3083_v38 = vadd.f32 %v2306_v30, %v1303_v5 }
 0x15e   :  { %v2246_v27 = vpop.f32.mrb[52].mxu0  ;;  %v3085_v39 = vadd.f32 %v2309_v36, %v1306_v7 }
 0x15f   :  { %v2310_v40 = vpop.f32.mrb[52].mxu1  ;;  %v2247_v42 = vpop.f32.mrb[53].mxu0 }
 0x160   :  { %v2248_v29 = vadd.f32 %v2247_v42, %v2246_v27  ;;  %v2311_v45 = vpop.f32.mrb[53].mxu1  ;;  %v2249_v47 = vpop.f32.mrb[54].mxu0  ;;  %v2008_v27 = vunpack.c.l.bf16 %v3106_v31  ;;  %v3132_v42 = vld [vmem:[%s3250_s3 + $0x38] sm:$0xff]  }
 0x161   :  { %v2312_v48 = vadd.f32 %v2311_v45, %v2310_v40  ;;  %v2313_v49 = vpop.f32.mrb[54].mxu1  ;;  %v2250_v50 = vpop.f32.mrb[55].mxu0  ;;  %v1988_v40 = vunpack.c.l.bf16 %v3111_v32  ;;  %v3142_v45 = vld [vmem:[%s3251_s2] ss:$0 sm:$0xff] }
 0x162   :  { %v1311_v19 = vadd.f32 %v2248_v29, %v3045_v35  ;;  %v2251_v52 = vadd.f32 %v2250_v50, %v2249_v47  ;;  %v2314_v54 = vpop.f32.mrb[55].mxu1  ;;  %v3150_v50 = vld [vmem:[%s3250_s3 + $0x30] sm:$0xff]  }
 0x163   :  { %v2315_v56 = vadd.f32 %v2314_v54, %v2313_v49  ;;  %v2009_v49 = vunpack.c.h.bf16 %v3106_v31 }
 0x164   :  { %v1314_v21 = vadd.f32 %v2251_v52, %v3047_v37  ;;  %v1408_v58 = vadd.f32 %v2312_v48, %v1311_v19 }
 0x166   :  { %v2252_v41 = vpop.f32.mrb[56].mxu0  ;;  %v3089_v59 = vadd.f32 %v2315_v56, %v1314_v21  ;;  %v1989_v21 = vunpack.c.h.bf16 %v3111_v32 }
 0x167   :  { %v2316_v60 = vpop.f32.mrb[56].mxu1  ;;  %v2253_v61 = vpop.f32.mrb[57].mxu0 }
 0x168   :  { %v2254_v43 = vadd.f32 %v2253_v61, %v2252_v41  ;;  %v2317_v63 = vpop.f32.mrb[57].mxu1  ;;  %v2255_v1 = vpop.f32.mrb[58].mxu0  ;;  %v3161_v61 = vld [vmem:[%s3251_s2 + $0x1] ss:$0 sm:$0xff] }
 0x169   :  { %v2318_v2 = vadd.f32 %v2317_v63, %v2316_v60  ;;  %v2319_v4 = vpop.f32.mrb[58].mxu1  ;;  %v2256_v8 = vpop.f32.mrb[59].mxu0  ;;  %v2000_v60 = vunpack.c.l.bf16 %v3122_v34 }
 0x16a   :  { %v1319_v9 = vadd.f32 %v2254_v43, %v3049_v51  ;;  %v2257_v35 = vadd.f32 %v2256_v8, %v2255_v1  ;;  %v2320_v10 = vpop.f32.mrb[59].mxu1 }
 0x16b   :  { %v2321_v11 = vadd.f32 %v2320_v10, %v2319_v4 }
 0x16c   :  { %v1322_v12 = vadd.f32 %v2257_v35, %v3051_v53  ;;  %v3093_v37 = vadd.f32 %v2318_v2, %v1319_v9  ;;  %v3101_v53 = vld [vmem:[%s3250_s3 + $0x8] sm:$0xff]  }
 0x16d   :  { %v1992_v7 = vunpack.c.l.bf16 %v3101_v53  ;;  %v1993_v48 = vunpack.c.h.bf16 %v3101_v53 }
 0x16e   :  { %v2258_v55 = vpop.f32.mrb[60].mxu0  ;;  %v3095_v13 = vadd.f32 %v2321_v11, %v1322_v12  ;;  %v2012_v12 = vunpack.c.l.bf16 %v3150_v50 }
 0x16f   :  { %v2322_v14 = vpop.f32.mrb[60].mxu1  ;;  %v2259_v15 = vpop.f32.mrb[61].mxu0 }
 0x170   :  { %v2260_v57 = vadd.f32 %v2259_v15, %v2258_v55  ;;  %v2323_v17 = vpop.f32.mrb[61].mxu1  ;;  %v2261_v20 = vpop.f32.mrb[62].mxu0 }
 0x171   :  { %v2324_v22 = vadd.f32 %v2323_v17, %v2322_v14  ;;  %v2325_v23 = vpop.f32.mrb[62].mxu1  ;;  %v2262_v25 = vpop.f32.mrb[63].mxu0 }
 0x172   :  { %v1327_v51 = vadd.f32 %v2260_v57, %v3053_v3  ;;  %v2263_v28 = vadd.f32 %v2262_v25, %v2261_v20  ;;  %v2326_v30 = vpop.f32.mrb[63].mxu1  ;;  %v3116_v3 = vld [vmem:[%s3250_s3 + $0x20] sm:$0xff]  }
 0x173   :  { %v2327_v5 = vadd.f32 %v2326_v30, %v2325_v23  ;;  %v2004_v47 = vunpack.c.l.bf16 %v3116_v3  ;;  %v2005_v41 = vunpack.c.h.bf16 %v3116_v3 }
 0x174   :  { %v1330_v33 = vadd.f32 %v2263_v28, %v3055_v6  ;;  %v3124_v36 = vadd.f32 %v2324_v22, %v1327_v51  ;;  %v3137_v6 = vld [vmem:[%s3250_s3 + $0x10] sm:$0xff]  }
 0x175   :  { %v1996_v4 = vunpack.c.l.bf16 %v3137_v6 }
 0x176   :  { %v2362_v29 = vpop.f32.mrb[64].mxu0  ;;  %v3152_v19 = vadd.f32 %v2327_v5, %v1330_v33 }
 0x177   :  { %v1473_v52 = vadd.f32 %v2362_v29, %v3065_v44  ;;  %v2370_v54 = vpop.f32.mrb[64].mxu1  ;;  %v1464_v56 = vpop.f32.mrb[65].mxu0  ;;  %v2016_v44 = vunpack.c.l.bf16 %v3132_v42 }
 0x178   :  { %v1505_v43 = vadd.f32 %v2370_v54, %v1408_v58  ;;  %v1465_v63 = vadd.f32 %v1464_v56, %v3059_v24  ;;  %v1496_v1 = vpop.f32.mrb[65].mxu1  ;;  %v2363_v2 = vpop.f32.mrb[66].mxu0 }
 0x179   :  { %v1625_v8 = vmul.f32 %v3142_v45, %v1473_v52  ;;  %v1497_v9 = vadd.f32 %v1496_v1, %v3083_v38  ;;  %v1476_v35 = vadd.f32 %v2363_v2, %v3067_v46  ;;  %v2371_v10 = vpop.f32.mrb[66].mxu1  ;;  %v1467_v11 = vpop.f32.mrb[67].mxu0 }
 0x17a   :  { %v1633_v58 = vmul.f32 %v3142_v45, %v1505_v43  ;;  %v1623_v24 = vmul.f32 %v3142_v45, %v1465_v63  ;;  %v1508_v55 = vadd.f32 %v2371_v10, %v3089_v59  ;;  %v1468_v14 = vadd.f32 %v1467_v11, %v3061_v26  ;;  %v1499_v15 = vpop.f32.mrb[67].mxu1 }
 0x17b   :  { %v1646_v57 = vadd.f32 %v3161_v61, %v1625_v8  ;;  %v1631_v17 = vmul.f32 %v3142_v45, %v1497_v9  ;;  %v1626_v38 = vmul.f32 %v3142_v45, %v1476_v35  ;;  %v1500_v46 = vadd.f32 %v1499_v15, %v3085_v39 }
 0x17c   :  { %v1654_v20 = vadd.f32 %v3161_v61, %v1633_v58  ;;  %v1644_v22 = vadd.f32 %v3161_v61, %v1623_v24  ;;  %v1634_v23 = vmul.f32 %v3142_v45, %v1508_v55  ;;  %v1624_v25 = vmul.f32 %v3142_v45, %v1468_v14 }
 0x17d   :  { %v1694_v59 = vadd.f32 %v1992_v7, %v1646_v57  ;;  %v1652_v26 = vadd.f32 %v3161_v61, %v1631_v17  ;;  %v1647_v51 = vadd.f32 %v3161_v61, %v1626_v38  ;;  %v1632_v28 = vmul.f32 %v3142_v45, %v1500_v46 }
 0x17e   :  { %v1702_v30 = vadd.f32 %v2008_v27, %v1654_v20  ;;  %v1692_v53 = vadd.f32 %v1988_v40, %v1644_v22  ;;  %v1655_v31 = vadd.f32 %v3161_v61, %v1634_v23  ;;  %v1645_v39 = vadd.f32 %v3161_v61, %v1624_v25  ;;  %v2366_v32 = vpop.f32.mrb[68].mxu0 }
 0x17f   :  { %v1710_v5 = vmax.f32 %v1694_v59, 0.0  ;;  %v1700_v3 = vadd.f32 %v2004_v47, %v1652_v26  ;;  %v1695_v33 = vadd.f32 %v1993_v48, %v1647_v51  ;;  %v1653_v29 = vadd.f32 %v3161_v61, %v1632_v28  ;;  %v2374_v52 = vpop.f32.mrb[68].mxu1  ;;  %v1480_v7 = vpop.f32.mrb[69].mxu0 }
 0x180   :  { %v1718_v54 = vmax.f32 %v1702_v30, 0.0  ;;  %v1708_v56 = vmax.f32 %v1692_v53, 0.0  ;;  %v1703_v43 = vadd.f32 %v2009_v49, %v1655_v31  ;;  %v1693_v63 = vadd.f32 %v1989_v21, %v1645_v39  ;;  %v1512_v1 = vpop.f32.mrb[69].mxu1  ;;  %v2367_v2 = vpop.f32.mrb[70].mxu0 }
 0x181   :  { %v1716_v27 = vmax.f32 %v1700_v3, 0.0  ;;  %v1711_v40 = vmax.f32 %v1695_v33, 0.0  ;;  %v1701_v8 = vadd.f32 %v2005_v41, %v1653_v29  ;;  %v1489_v9 = vadd.f32 %v2366_v32, %v3077_v16  ;;  %v2375_v35 = vpop.f32.mrb[70].mxu1  ;;  %v1483_v10 = vpop.f32.mrb[71].mxu0 }
 0x182   :  { %v1719_v11 = vmax.f32 %v1703_v43, 0.0  ;;  %v1709_v47 = vmax.f32 %v1693_v63, 0.0  ;;  %v1521_v48 = vadd.f32 %v2374_v52, %v3124_v36  ;;  %v1481_v58 = vadd.f32 %v1480_v7, %v3071_v62  ;;  %v1515_v24 = vpop.f32.mrb[71].mxu1 }
 0x183   :  { %v2026_v55 = vpack.c.bf16 %v1711_v40, %v1710_v5  ;;  %v1717_v14 = vmax.f32 %v1701_v8, 0.0  ;;  %v1629_v49 = vmul.f32 %v3142_v45, %v1489_v9  ;;  %v1513_v21 = vadd.f32 %v1512_v1, %v3093_v37 }
 0x184   :  { %v2046_v15 = vpack.c.bf16 %v1719_v11, %v1718_v54  ;;  %v2021_v57 = vpack.c.bf16 %v1709_v47, %v1708_v56  ;;  %v1637_v41 = vmul.f32 %v3142_v45, %v1521_v48  ;;  %v1627_v16 = vmul.f32 %v3142_v45, %v1481_v58 }
 0x185   :  { %2065 = vst [vmem:[%s3252_s4 + $0x8] sm:$0xff] %v2026_v55   ;;  %v2041_v36 = vpack.c.bf16 %v1717_v14, %v1716_v27  ;;  %v1650_v62 = vadd.f32 %v3161_v61, %v1629_v49  ;;  %v1635_v17 = vmul.f32 %v3142_v45, %v1513_v21  ;;  %v1492_v38 = vadd.f32 %v2367_v2, %v3079_v18 }
 0x186   :  { %2069 = vst [vmem:[%s3252_s4 + $0x28] sm:$0xff] %v2046_v15   ;;  %2022 = vst [vmem:[%s3252_s4] sm:$0xff] %v2021_v57   ;;  %v1658_v37 = vadd.f32 %v3161_v61, %v1637_v41  ;;  %v1648_v46 = vadd.f32 %v3161_v61, %v1627_v16  ;;  %v1524_v20 = vadd.f32 %v2375_v35, %v3152_v19  ;;  %v2001_v25 = vunpack.c.h.bf16 %v3122_v34 }
 0x187   :  { %v1484_v22 = vadd.f32 %v1483_v10, %v3073_v0  ;;  %2068 = vst [vmem:[%s3252_s4 + $0x20] sm:$0xff] %v2041_v36   ;;  %v1656_v18 = vadd.f32 %v3161_v61, %v1635_v17  ;;  %v1630_v23 = vmul.f32 %v3142_v45, %v1492_v38  ;;  %v1516_v59 = vadd.f32 %v1515_v24, %v3095_v13 }
 0x188   :  { %v1638_v26 = vmul.f32 %v3142_v45, %v1524_v20  ;;  %v2017_v51 = vunpack.c.h.bf16 %v3132_v42  ;;  %v1997_v0 = vunpack.c.h.bf16 %v3137_v6  ;;  %v1698_v28 = vadd.f32 %v2000_v60, %v1650_v62 }
 0x189   :  { %v1628_v19 = vmul.f32 %v3142_v45, %v1484_v22  ;;  %v1651_v30 = vadd.f32 %v3161_v61, %v1630_v23  ;;  %v1636_v53 = vmul.f32 %v3142_v45, %v1516_v59  ;;  %v2013_v31 = vunpack.c.h.bf16 %v3150_v50 }
 0x18a   :  { %v1706_v13 = vadd.f32 %v2016_v44, %v1658_v37  ;;  %v1696_v39 = vadd.f32 %v1996_v4, %v1648_v46  ;;  %v1659_v32 = vadd.f32 %v3161_v61, %v1638_v26  ;;  %v1704_v34 = vadd.f32 %v2012_v12, %v1656_v18 }
 0x18b   :  { %v1649_v5 = vadd.f32 %v3161_v61, %v1628_v19  ;;  %v1699_v60 = vadd.f32 %v2001_v25, %v1651_v30  ;;  %v1657_v3 = vadd.f32 %v3161_v61, %v1636_v53  ;;  %v1714_v29 = vmax.f32 %v1698_v28, 0.0 }
 0x18c   :  { %v1707_v33 = vadd.f32 %v2017_v51, %v1659_v32  ;;  %v1722_v42 = vmax.f32 %v1706_v13, 0.0  ;;  %v1712_v44 = vmax.f32 %v1696_v39, 0.0  ;;  %v1720_v4 = vmax.f32 %v1704_v34, 0.0 }
 0x18d   :  { %v1697_v45 = vadd.f32 %v1997_v0, %v1649_v5  ;;  %v1715_v52 = vmax.f32 %v1699_v60, 0.0  ;;  %v1705_v7 = vadd.f32 %v2013_v31, %v1657_v3 }
 0x18e   :  { %v1723_v54 = vmax.f32 %v1707_v33, 0.0 }
 0x18f   :  { %v1713_v6 = vmax.f32 %v1697_v45, 0.0  ;;  %v2036_v56 = vpack.c.bf16 %v1715_v52, %v1714_v29  ;;  %v1721_v43 = vmax.f32 %v1705_v7, 0.0 }
 0x190   :  { %v2056_v63 = vpack.c.bf16 %v1723_v54, %v1722_v42 }
 0x191   :  { %v2031_v1 = vpack.c.bf16 %v1713_v6, %v1712_v44  ;;  %2067 = vst [vmem:[%s3252_s4 + $0x18] sm:$0xff] %v2036_v56   ;;  %v2051_v50 = vpack.c.bf16 %v1721_v43, %v1720_v4 }
 0x192   :  { %2071 = vst [vmem:[%s3252_s4 + $0x38] sm:$0xff] %v2056_v63  }
 0x193   :  { %2066 = vst [vmem:[%s3252_s4 + $0x10] sm:$0xff] %v2031_v1   ;;  %2070 = vst [vmem:[%s3252_s4 + $0x30] sm:$0xff] %v2051_v50  }

// kernel: resnet_forward.16
= control target key start
LH: loop header
LB: loop body
LE: loop exit
PB: predicated region body
PF: predicated region fallthrough
CT: control target
= control target key end

     0   :  { %s1678_s1 = inlined_call_operand.vmem [shape: bf16[1152,128], index: 1, kind: input, shape index: {}]   ;;  %s1679_s0 = inlined_call_operand.vmem [shape: bf16[32,1152], index: 0, kind: input, shape index: {}]   ;;  %s1680_s2 = inlined_call_operand.vmem [shape: f32[2,128], index: 2, kind: input, shape index: {}]   ;;  %s1681_s3 = inlined_call_operand.vmem [shape: bf16[32,128], index: 3, kind: output, shape index: {}]  }
   0x1   :  { %v1278_v0 = vld [vmem:[%s1678_s1 + $0x40] sm:$0xff]   ;;  %v1282_v4 = vld [vmem:[%s1678_s1 + $0x48] sm:$0xff]   ;;  %v1286_v8 = vld [vmem:[%s1678_s1 + $0x50] sm:$0xff]  }
   0x2   :  { %v1279_v1 = vld [vmem:[%s1678_s1 + $0xc0] sm:$0xff]   ;;  %1136 = vmatprep.subr.bf16.mxu0 %v1278_v0  ;;  %v1283_v5 = vld [vmem:[%s1678_s1 + $0xc8] sm:$0xff]   ;;  %v1287_v9 = vld [vmem:[%s1678_s1 + $0xd0] sm:$0xff]  }
   0x3   :  { %v1280_v2 = vld [vmem:[%s1678_s1] sm:$0xff]   ;;  %1164 = vmatprep.subr.bf16.mxu1 %v1279_v1  ;;  %v1284_v6 = vld [vmem:[%s1678_s1 + $0x8] sm:$0xff]   ;;  %v1288_v10 = vld [vmem:[%s1678_s1 + $0x10] sm:$0xff]  }
   0x4   :  { %v1281_v3 = vld [vmem:[%s1678_s1 + $0x80] sm:$0xff]   ;;  %1137 = vmatpush3.bf16.msra.mxu0 %v1280_v2  ;;  %v1285_v7 = vld [vmem:[%s1678_s1 + $0x88] sm:$0xff]   ;;  %v1289_v11 = vld [vmem:[%s1678_s1 + $0x90] sm:$0xff]  }
   0x5   :  { %1165 = vmatpush3.bf16.msra.mxu1 %v1281_v3  ;;  %1138 = vmatprep.subr.bf16.mxu0 %v1282_v4  ;;  %v1290_v12 = vld [vmem:[%s1678_s1 + $0x58] sm:$0xff]   ;;  %v1294_v16 = vld [vmem:[%s1678_s1 + $0x60] sm:$0xff]   ;;  %v1298_v20 = vld [vmem:[%s1678_s1 + $0x68] sm:$0xff]  }
   0x6   :  { %1166 = vmatprep.subr.bf16.mxu1 %v1283_v5  ;;  %v1291_v13 = vld [vmem:[%s1678_s1 + $0xd8] sm:$0xff]   ;;  %v1295_v17 = vld [vmem:[%s1678_s1 + $0xe0] sm:$0xff]   ;;  %v1299_v21 = vld [vmem:[%s1678_s1 + $0xe8] sm:$0xff]  }
   0x7   :  { %v1292_v14 = vld [vmem:[%s1678_s1 + $0x18] sm:$0xff]   ;;  %v1296_v18 = vld [vmem:[%s1678_s1 + $0x20] sm:$0xff]   ;;  %v1300_v22 = vld [vmem:[%s1678_s1 + $0x28] sm:$0xff]  }
   0x8   :  { %1139 = vmatpush3.bf16.msra.mxu0 %v1284_v6  ;;  %v1293_v15 = vld [vmem:[%s1678_s1 + $0x98] sm:$0xff]   ;;  %v1297_v19 = vld [vmem:[%s1678_s1 + $0xa0] sm:$0xff]   ;;  %v1301_v23 = vld [vmem:[%s1678_s1 + $0xa8] sm:$0xff]  }
   0x9   :  { %1167 = vmatpush3.bf16.msra.mxu1 %v1285_v7  ;;  %1140 = vmatprep.subr.bf16.mxu0 %v1286_v8  ;;  %v1302_v24 = vld [vmem:[%s1678_s1 + $0x70] sm:$0xff]   ;;  %v1306_v28 = vld [vmem:[%s1678_s1 + $0x78] sm:$0xff]   ;;  %v1310_v32 = vld [vmem:[%s1679_s0] ss:$36 sps:$4 sm:$0xff]  }
   0xa   :  { %1168 = vmatprep.subr.bf16.mxu1 %v1287_v9  ;;  %v1303_v25 = vld [vmem:[%s1678_s1 + $0xf0] sm:$0xff]   ;;  %v1307_v29 = vld [vmem:[%s1678_s1 + $0xf8] sm:$0xff]   ;;  %v1312_v33 = vld [vmem:[%s1679_s0 + $0x4] ss:$36 sps:$4 sm:$0xff]  }
   0xb   :  { %v1304_v26 = vld [vmem:[%s1678_s1 + $0x30] sm:$0xff]   ;;  %v1308_v30 = vld [vmem:[%s1678_s1 + $0x38] sm:$0xff]   ;;  %v1313_v34 = vld [vmem:[%s1679_s0 + $0x8] ss:$36 sps:$4 sm:$0xff]   ;;  %735 = vmatprep.mubr.bf16.mxu0 %v1312_v33 }
   0xc   :  { %1141 = vmatpush3.bf16.msra.mxu0 %v1288_v10  ;;  %v1305_v27 = vld [vmem:[%s1678_s1 + $0xb0] sm:$0xff]   ;;  %v1309_v31 = vld [vmem:[%s1678_s1 + $0xb8] sm:$0xff]   ;;  %v1316_v36 = vld [vmem:[%s1678_s1 + $0x140] sm:$0xff]  }
   0xd   :  { %1169 = vmatpush3.bf16.msra.mxu1 %v1289_v11  ;;  %1142 = vmatprep.subr.bf16.mxu0 %v1290_v12  ;;  %v1315_v35 = vld [vmem:[%s1679_s0 + $0xc] ss:$36 sps:$4 sm:$0xff]   ;;  %v1317_v37 = vld [vmem:[%s1678_s1 + $0x100] sm:$0xff]   ;;  %v1328_v48 = vld [vmem:[%s1678_s1 + $0x158] sm:$0xff]  }
   0xe   :  { %1170 = vmatprep.subr.bf16.mxu1 %v1291_v13  ;;  %784 = vmatprep.mubr.bf16.mxu1 %v1315_v35  ;;  %v1318_v38 = vld [vmem:[%s1678_s1 + $0x1c0] sm:$0xff]   ;;  %v1320_v40 = vld [vmem:[%s1678_s1 + $0x148] sm:$0xff]   ;;  %v1324_v44 = vld [vmem:[%s1678_s1 + $0x150] sm:$0xff]  }
   0xf   :  { %v1319_v39 = vld [vmem:[%s1678_s1 + $0x180] sm:$0xff]   ;;  %v1321_v41 = vld [vmem:[%s1678_s1 + $0x108] sm:$0xff]   ;;  %v1325_v45 = vld [vmem:[%s1678_s1 + $0x110] sm:$0xff]  }
  0x10   :  { %1143 = vmatpush3.bf16.msra.mxu0 %v1292_v14  ;;  %v1322_v42 = vld [vmem:[%s1678_s1 + $0x1c8] sm:$0xff]   ;;  %v1326_v46 = vld [vmem:[%s1678_s1 + $0x1d0] sm:$0xff]   ;;  %v1329_v49 = vld [vmem:[%s1678_s1 + $0x118] sm:$0xff]  }
  0x11   :  { %1171 = vmatpush3.bf16.msra.mxu1 %v1293_v15  ;;  %1144 = vmatprep.subr.bf16.mxu0 %v1294_v16  ;;  %v1323_v43 = vld [vmem:[%s1678_s1 + $0x188] sm:$0xff]   ;;  %v1327_v47 = vld [vmem:[%s1678_s1 + $0x190] sm:$0xff]   ;;  %v1330_v50 = vld [vmem:[%s1678_s1 + $0x1d8] sm:$0xff]  }
  0x12   :  { %1172 = vmatprep.subr.bf16.mxu1 %v1295_v17  ;;  %v1331_v51 = vld [vmem:[%s1678_s1 + $0x198] sm:$0xff]   ;;  %v1332_v52 = vld [vmem:[%s1678_s1 + $0x160] sm:$0xff]   ;;  %v1336_v56 = vld [vmem:[%s1678_s1 + $0x168] sm:$0xff]  }
  0x13   :  { %v1333_v53 = vld [vmem:[%s1678_s1 + $0x120] sm:$0xff]   ;;  %v1337_v57 = vld [vmem:[%s1679_s0 + $0x4c] ss:$36 sps:$4 sm:$0xff]   ;;  %v1339_v58 = vld [vmem:[%s1679_s0 + $0x54] ss:$36 sps:$4 sm:$0xff]  }
  0x14   :  { %1145 = vmatpush3.bf16.msra.mxu0 %v1296_v18  ;;  %v1334_v54 = vld [vmem:[%s1678_s1 + $0x1e0] sm:$0xff]   ;;  %v1341_v59 = vld [vmem:[%s1678_s1 + $0x128] sm:$0xff]   ;;  %v1343_v61 = vld [vmem:[%s1679_s0 + $0x50] ss:$36 sps:$4 sm:$0xff]  }
  0x15   :  { %1173 = vmatpush3.bf16.msra.mxu1 %v1297_v19  ;;  %1146 = vmatprep.subr.bf16.mxu0 %v1298_v20  ;;  %v1335_v55 = vld [vmem:[%s1678_s1 + $0x1a0] sm:$0xff]   ;;  %v1342_v60 = vld [vmem:[%s1679_s0 + $0x48] ss:$36 sps:$4 sm:$0xff]   ;;  %v1346_v0 = vld [vmem:[%s1678_s1 + $0x170] sm:$0xff]  }
  0x16   :  { %1174 = vmatprep.subr.bf16.mxu1 %v1299_v21  ;;  %v1344_v62 = vld [vmem:[%s1678_s1 + $0x1e8] sm:$0xff]   ;;  %v1347_v1 = vld [vmem:[%s1678_s1 + $0x130] sm:$0xff]   ;;  %v1350_v4 = vld [vmem:[%s1678_s1 + $0x178] sm:$0xff]  }
  0x17   :  { %v1345_v63 = vld [vmem:[%s1678_s1 + $0x1a8] sm:$0xff]   ;;  %v1348_v2 = vld [vmem:[%s1678_s1 + $0x1f0] sm:$0xff]   ;;  %v1351_v5 = vld [vmem:[%s1678_s1 + $0x138] sm:$0xff]  }
  0x18   :  { %1147 = vmatpush3.bf16.msra.mxu0 %v1300_v22  ;;  %v1349_v3 = vld [vmem:[%s1678_s1 + $0x1b0] sm:$0xff]   ;;  %v1352_v6 = vld [vmem:[%s1678_s1 + $0x1f8] sm:$0xff]   ;;  %v1357_v10 = vld [vmem:[%s1678_s1 + $0x200] sm:$0xff]  }
  0x19   :  { %1175 = vmatpush3.bf16.msra.mxu1 %v1301_v23  ;;  %1148 = vmatprep.subr.bf16.mxu0 %v1302_v24  ;;  %v1353_v7 = vld [vmem:[%s1679_s0 + $0x10] ss:$36 sps:$4 sm:$0xff]   ;;  %v1356_v9 = vld [vmem:[%s1678_s1 + $0x1b8] sm:$0xff]   ;;  %v1361_v13 = vld [vmem:[%s1678_s1 + $0x208] sm:$0xff]  }
  0x1a   :  { %1176 = vmatprep.subr.bf16.mxu1 %v1303_v25  ;;  %v1355_v8 = vld [vmem:[%s1679_s0 + $0x14] ss:$36 sps:$4 sm:$0xff]   ;;  %v1360_v12 = vld [vmem:[%s1679_s0 + $0x1c] ss:$36 sps:$4 sm:$0xff]   ;;  %v1366_v17 = vld [vmem:[%s1679_s0 + $0x64] ss:$36 sps:$4 sm:$0xff]  }
  0x1b   :  { %v1358_v11 = vld [vmem:[%s1679_s0 + $0x18] ss:$36 sps:$4 sm:$0xff]   ;;  %v1365_v16 = vld [vmem:[%s1678_s1 + $0x210] sm:$0xff]   ;;  %v1368_v18 = vld [vmem:[%s1679_s0 + $0x60] ss:$36 sps:$4 sm:$0xff]  }
  0x1c   :  { %1149 = vmatpush3.bf16.msra.mxu0 %v1304_v26  ;;  %v1362_v14 = vld [vmem:[%s1679_s0 + $0x5c] ss:$36 sps:$4 sm:$0xff]   ;;  %v1371_v22 = vld [vmem:[%s1678_s1 + $0x228] sm:$0xff]   ;;  %v1372_v23 = vld [vmem:[%s1678_s1 + $0x230] sm:$0xff]  }
  0x1d   :  { %1177 = vmatpush3.bf16.msra.mxu1 %v1305_v27  ;;  %1150 = vmatprep.subr.bf16.mxu0 %v1306_v28  ;;  %v1364_v15 = vld [vmem:[%s1679_s0 + $0x58] ss:$36 sps:$4 sm:$0xff]   ;;  %v1370_v20 = vld [vmem:[%s1678_s1 + $0x220] sm:$0xff]   ;;  %v1375_v25 = vld [vmem:[%s1679_s0 + $0x68] ss:$36 sps:$4 sm:$0xff]  }
  0x1e   :  { %1178 = vmatprep.subr.bf16.mxu1 %v1307_v29  ;;  %v1369_v19 = vld [vmem:[%s1678_s1 + $0x218] sm:$0xff]   ;;  %v1374_v21 = vld [vmem:[%s1679_s0 + $0x20] ss:$36 sps:$4 sm:$0xff]  }
  0x1f   :  { %v1373_v24 = vld [vmem:[%s1678_s1 + $0x238] sm:$0xff]  }
  0x20   :  { %1151 = vmatpush3.bf16.msra.mxu0 %v1308_v30 }
  0x21   :  { %1179 = vmatpush3.bf16.msra.mxu1 %v1309_v31  ;;  %1192 = vmatprep.subr.bf16.mxu0 %v1316_v36 }
  0x22   :  { %1220 = vmatprep.subr.bf16.mxu1 %v1318_v38 }
  0x23   :  { %736 = vmatmul.mubr.bf16.vlgmr.msra.gmra.mrb[0].mxu0 %v1310_v32 }
  0x24   :  { %785 = vmatmul.mubr.bf16.vlgmr.msra.gmra.mrb[0].mxu1 %v1313_v34  ;;  %1193 = vmatpush3.bf16.msra.mxu0 %v1317_v37 }
  0x25   :  { %1221 = vmatpush3.bf16.msra.mxu1 %v1319_v39  ;;  %1194 = vmatprep.subr.bf16.mxu0 %v1320_v40 }
  0x26   :  { %1222 = vmatprep.subr.bf16.mxu1 %v1322_v42  ;;  %743 = vmatprep.mubr.bf16.mxu0 %v1337_v57 }
  0x27   :  { %792 = vmatprep.mubr.bf16.mxu1 %v1339_v58 }
  0x28   :  { %1195 = vmatpush3.bf16.msra.mxu0 %v1321_v41 }
  0x29   :  { %1223 = vmatpush3.bf16.msra.mxu1 %v1323_v43  ;;  %1196 = vmatprep.subr.bf16.mxu0 %v1324_v44 }
  0x2a   :  { %1224 = vmatprep.subr.bf16.mxu1 %v1326_v46 }
  0x2b   :  { %744 = vmatmul.mubr.bf16.gmra.mrb[4].mxu0 %v1342_v60 }
  0x2c   :  { %1197 = vmatpush3.bf16.msra.mxu0 %v1325_v45  ;;  %793 = vmatmul.mubr.bf16.gmra.mrb[4].mxu1 %v1343_v61 }
  0x2d   :  { %1225 = vmatpush3.bf16.msra.mxu1 %v1327_v47  ;;  %1198 = vmatprep.subr.bf16.mxu0 %v1328_v48 }
  0x2e   :  { %1226 = vmatprep.subr.bf16.mxu1 %v1330_v50  ;;  %833 = vmatprep.mubr.bf16.mxu0 %v1355_v8 }
  0x2f   :  { %882 = vmatprep.mubr.bf16.mxu1 %v1360_v12 }
  0x30   :  { %1199 = vmatpush3.bf16.msra.mxu0 %v1329_v49 }
  0x31   :  { %1227 = vmatpush3.bf16.msra.mxu1 %v1331_v51  ;;  %1200 = vmatprep.subr.bf16.mxu0 %v1332_v52 }
  0x32   :  { %1228 = vmatprep.subr.bf16.mxu1 %v1334_v54 }
  0x34   :  { %1201 = vmatpush3.bf16.msra.mxu0 %v1333_v53 }
  0x35   :  { %1229 = vmatpush3.bf16.msra.mxu1 %v1335_v55  ;;  %1202 = vmatprep.subr.bf16.mxu0 %v1336_v56 }
  0x36   :  { %1230 = vmatprep.subr.bf16.mxu1 %v1344_v62 }
  0x38   :  { %1203 = vmatpush3.bf16.msra.mxu0 %v1341_v59 }
  0x39   :  { %1231 = vmatpush3.bf16.msra.mxu1 %v1345_v63  ;;  %1204 = vmatprep.subr.bf16.mxu0 %v1346_v0 }
  0x3a   :  { %1232 = vmatprep.subr.bf16.mxu1 %v1348_v2 }
  0x3c   :  { %1205 = vmatpush3.bf16.msra.mxu0 %v1347_v1 }
  0x3d   :  { %1233 = vmatpush3.bf16.msra.mxu1 %v1349_v3  ;;  %1206 = vmatprep.subr.bf16.mxu0 %v1350_v4 }
  0x3e   :  { %1234 = vmatprep.subr.bf16.mxu1 %v1352_v6 }
  0x40   :  { %1207 = vmatpush3.bf16.msra.mxu0 %v1351_v5 }
  0x41   :  { %1235 = vmatpush3.bf16.msra.mxu1 %v1356_v9  ;;  %1258 = vmatprep.subr.bf16.mxu0 %v1357_v10 }
  0x43   :  { %834 = vmatmul.mubr.bf16.vlgmr.msra.gmra.mrb[8].mxu0 %v1353_v7 }
  0x44   :  { %1259 = vmatpush3.bf16.msra.mxu0 %v1357_v10  ;;  %883 = vmatmul.mubr.bf16.vlgmr.msra.gmra.mrb[8].mxu1 %v1358_v11 }
  0x45   :  { %1260 = vmatprep.subr.bf16.mxu0 %v1361_v13  ;;  %841 = vmatprep.mubr.bf16.mxu0 %v1362_v14 }
  0x46   :  { %890 = vmatprep.mubr.bf16.mxu1 %v1366_v17 }
  0x48   :  { %1261 = vmatpush3.bf16.msra.mxu0 %v1361_v13 }
  0x49   :  { %1262 = vmatprep.subr.bf16.mxu0 %v1365_v16 }
  0x4b   :  { %842 = vmatmul.mubr.bf16.gmra.mrb[12].mxu0 %v1364_v15 }
  0x4c   :  { %1263 = vmatpush3.bf16.msra.mxu0 %v1365_v16  ;;  %891 = vmatmul.mubr.bf16.gmra.mrb[12].mxu1 %v1368_v18 }
  0x4d   :  { %1264 = vmatprep.subr.bf16.mxu0 %v1369_v19  ;;  %1274 = vmatprep.mubr.bf16.mxu0 %v1374_v21 }
  0x50   :  { %1265 = vmatpush3.bf16.msra.mxu0 %v1369_v19 }
  0x51   :  { %1266 = vmatprep.subr.bf16.mxu0 %v1370_v20 }
  0x54   :  { %1267 = vmatpush3.bf16.msra.mxu0 %v1370_v20 }
  0x55   :  { %1268 = vmatprep.subr.bf16.mxu0 %v1371_v22 }
  0x58   :  { %1269 = vmatpush3.bf16.msra.mxu0 %v1371_v22 }
  0x59   :  { %1270 = vmatprep.subr.bf16.mxu0 %v1372_v23 }
  0x5c   :  { %1271 = vmatpush3.bf16.msra.mxu0 %v1372_v23  ;;  %v1115_v23 = vld [vmem:[%s1680_s2] ss:$0 sm:$0xff] }
  0x5d   :  { %1272 = vmatprep.subr.bf16.mxu0 %v1373_v24 }
  0x60   :  { %1273 = vmatpush3.bf16.msra.mxu0 %v1373_v24 }
  0x63   :  { %1275 = vmatmul.mubr.bf16.vlgmr.msra.gmra.mrb[16].mxu0 %v1375_v25 }
  0xf6   :  { %v1152_v26 = vpop.f32.mrb[0].mxu0 }
  0xf7   :  { %v1180_v27 = vpop.f32.mrb[0].mxu1  ;;  %v1153_v28 = vpop.f32.mrb[1].mxu0 }
  0xf8   :  { %v1154_v29 = vadd.f32 %v1153_v28, %v1152_v26  ;;  %v1181_v30 = vpop.f32.mrb[1].mxu1  ;;  %v1155_v31 = vpop.f32.mrb[2].mxu0  ;;  %v1116_v26 = vld [vmem:[%s1680_s2 + $0x1] ss:$0 sm:$0xff] }
  0xf9   :  { %v1182_v32 = vadd.f32 %v1181_v30, %v1180_v27  ;;  %v1183_v33 = vpop.f32.mrb[2].mxu1  ;;  %v1156_v34 = vpop.f32.mrb[3].mxu0 }
  0xfa   :  { %v1157_v35 = vadd.f32 %v1156_v34, %v1155_v31  ;;  %v1184_v36 = vpop.f32.mrb[3].mxu1 }
  0xfb   :  { %v787_v37 = vadd.f32 %v1182_v32, %v1154_v29  ;;  %v1185_v38 = vadd.f32 %v1184_v36, %v1183_v33 }
  0xfd   :  { %v790_v39 = vadd.f32 %v1185_v38, %v1157_v35 }
  0xfe   :  { %v1158_v40 = vpop.f32.mrb[4].mxu0 }
  0xff   :  { %v1186_v41 = vpop.f32.mrb[4].mxu1  ;;  %v1159_v42 = vpop.f32.mrb[5].mxu0 }
 0x100   :  { %v1187_v43 = vpop.f32.mrb[5].mxu1  ;;  %v1160_v44 = vadd.f32 %v1159_v42, %v1158_v40  ;;  %v1161_v46 = vpop.f32.mrb[6].mxu0 }
 0x101   :  { %v1188_v45 = vadd.f32 %v1187_v43, %v1186_v41  ;;  %v1189_v47 = vpop.f32.mrb[6].mxu1  ;;  %v1162_v48 = vpop.f32.mrb[7].mxu0 }
 0x102   :  { %v1190_v49 = vpop.f32.mrb[7].mxu1  ;;  %v1163_v51 = vadd.f32 %v1162_v48, %v1161_v46 }
 0x103   :  { %v795_v50 = vadd.f32 %v1188_v45, %v1160_v44  ;;  %v1191_v52 = vadd.f32 %v1190_v49, %v1189_v47 }
 0x105   :  { %v798_v53 = vadd.f32 %v1191_v52, %v1163_v51 }
 0x116   :  { %v1208_v54 = vpop.f32.mrb[8].mxu0 }
 0x117   :  { %v1209_v55 = vpop.f32.mrb[9].mxu0  ;;  %v1236_v58 = vpop.f32.mrb[8].mxu1 }
 0x118   :  { %v1210_v56 = vadd.f32 %v1209_v55, %v1208_v54  ;;  %v1211_v57 = vpop.f32.mrb[10].mxu0  ;;  %v1237_v62 = vpop.f32.mrb[9].mxu1 }
 0x119   :  { %v1212_v59 = vpop.f32.mrb[11].mxu0  ;;  %v1238_v63 = vadd.f32 %v1237_v62, %v1236_v58  ;;  %v1239_v0 = vpop.f32.mrb[10].mxu1 }
 0x11a   :  { %v836_v60 = vadd.f32 %v1210_v56, %v787_v37  ;;  %v1213_v61 = vadd.f32 %v1212_v59, %v1211_v57  ;;  %v1240_v2 = vpop.f32.mrb[11].mxu1 }
 0x11b   :  { %v1241_v3 = vadd.f32 %v1240_v2, %v1239_v0 }
 0x11c   :  { %v839_v1 = vadd.f32 %v1213_v61, %v790_v39  ;;  %v885_v4 = vadd.f32 %v1238_v63, %v836_v60 }
 0x11e   :  { %v1214_v5 = vpop.f32.mrb[12].mxu0  ;;  %v888_v7 = vadd.f32 %v1241_v3, %v839_v1 }
 0x11f   :  { %v1215_v6 = vpop.f32.mrb[13].mxu0  ;;  %v1242_v10 = vpop.f32.mrb[12].mxu1 }
 0x120   :  { %v1216_v8 = vadd.f32 %v1215_v6, %v1214_v5  ;;  %v1217_v9 = vpop.f32.mrb[14].mxu0  ;;  %v1243_v14 = vpop.f32.mrb[13].mxu1 }
 0x121   :  { %v1218_v11 = vpop.f32.mrb[15].mxu0  ;;  %v1244_v15 = vadd.f32 %v1243_v14, %v1242_v10  ;;  %v1245_v16 = vpop.f32.mrb[14].mxu1 }
 0x122   :  { %v844_v12 = vadd.f32 %v1216_v8, %v795_v50  ;;  %v1219_v13 = vadd.f32 %v1218_v11, %v1217_v9  ;;  %v1246_v18 = vpop.f32.mrb[15].mxu1 }
 0x123   :  { %v1247_v19 = vadd.f32 %v1246_v18, %v1245_v16 }
 0x124   :  { %v847_v17 = vadd.f32 %v1219_v13, %v798_v53  ;;  %v893_v20 = vadd.f32 %v1244_v15, %v844_v12 }
 0x126   :  { %v896_v21 = vadd.f32 %v1247_v19, %v847_v17 }
 0x136   :  { %v1276_v22 = vpop.f32.mrb[16].mxu0 }
 0x137   :  { %v942_v24 = vadd.f32 %v1276_v22, %v893_v20  ;;  %v933_v25 = vpop.f32.mrb[17].mxu0 }
 0x138   :  { %v934_v27 = vadd.f32 %v933_v25, %v885_v4  ;;  %v1277_v28 = vpop.f32.mrb[18].mxu0 }
 0x139   :  { %v986_v29 = vmul.f32 %v1115_v23, %v942_v24  ;;  %v945_v30 = vadd.f32 %v1277_v28, %v896_v21  ;;  %v936_v31 = vpop.f32.mrb[19].mxu0 }
 0x13a   :  { %v984_v32 = vmul.f32 %v1115_v23, %v934_v27  ;;  %v937_v33 = vadd.f32 %v936_v31, %v888_v7 }
 0x13b   :  { %v995_v34 = vadd.f32 %v1116_v26, %v986_v29  ;;  %v987_v35 = vmul.f32 %v1115_v23, %v945_v30 }
 0x13c   :  { %v993_v36 = vadd.f32 %v1116_v26, %v984_v32  ;;  %v985_v37 = vmul.f32 %v1115_v23, %v937_v33 }
 0x13d   :  { %v996_v38 = vadd.f32 %v1116_v26, %v987_v35  ;;  %v999_v40 = vmax.f32 %v995_v34, 0.0 }
 0x13e   :  { %v994_v39 = vadd.f32 %v1116_v26, %v985_v37  ;;  %v997_v42 = vmax.f32 %v993_v36, 0.0 }
 0x13f   :  { %v1000_v41 = vmax.f32 %v996_v38, 0.0 }
 0x140   :  { %v998_v43 = vmax.f32 %v994_v39, 0.0 }
 0x141   :  { %v1133_v44 = vpack.c.bf16 %v1000_v41, %v999_v40 }
 0x142   :  { %v1128_v45 = vpack.c.bf16 %v998_v43, %v997_v42 }
 0x143   :  { %1135 = vst [vmem:[%s1681_s3 + $0x8] sm:$0xff] %v1133_v44  }
 0x144   :  { %1129 = vst [vmem:[%s1681_s3] sm:$0xff] %v1128_v45  }

// kernel: resnet_forward.17
= control target key start
LH: loop header
LB: loop body
LE: loop exit
PB: predicated region body
PF: predicated region fallthrough
CT: control target
= control target key end

     0   :  { %s350_s1 = inlined_call_operand.vmem [shape: bf16[128,128], index: 1, kind: input, shape index: {}]   ;;  %s351_s0 = inlined_call_operand.vmem [shape: bf16[32,128], index: 0, kind: input, shape index: {}]   ;;  %s352_s2 = inlined_call_operand.vmem [shape: f32[2,128], index: 2, kind: input, shape index: {}]   ;;  %s353_s3 = inlined_call_operand.vmem [shape: bf16[32,128], index: 3, kind: output, shape index: {}]  }
   0x1   :  { %v278_v0 = vld [vmem:[%s350_s1] sm:$0xff]   ;;  %v279_v1 = vld [vmem:[%s350_s1 + $0x8] sm:$0xff]   ;;  %v280_v2 = vld [vmem:[%s350_s1 + $0x10] sm:$0xff]  }
   0x2   :  { %258 = vmatprep.subr.bf16.mxu0 %v278_v0  ;;  %v281_v3 = vld [vmem:[%s350_s1 + $0x18] sm:$0xff]   ;;  %v286_v4 = vld [vmem:[%s351_s0] sm:$0xff]   ;;  %v283_v6 = vld [vmem:[%s350_s1 + $0x28] sm:$0xff]  }
   0x3   :  { %259 = vmatpush3.bf16.msra.mxu0 %v278_v0  ;;  %274 = vmatprep.mubr.bf16.mxu0 %v286_v4  ;;  %v282_v5 = vld [vmem:[%s350_s1 + $0x20] sm:$0xff]   ;;  %v284_v7 = vld [vmem:[%s350_s1 + $0x30] sm:$0xff]   ;;  %v285_v8 = vld [vmem:[%s350_s1 + $0x38] sm:$0xff]  }
   0x4   :  { %260 = vmatprep.subr.bf16.mxu0 %v279_v1  ;;  %v287_v9 = vld [vmem:[%s351_s0 + $0x8] sm:$0xff]   ;;  %v227_v10 = vld [vmem:[%s352_s2] ss:$0 sm:$0xff]  ;;  %v228_v14 = vld [vmem:[%s352_s2 + $0x1] ss:$0 sm:$0xff] }
   0x7   :  { %261 = vmatpush3.bf16.msra.mxu0 %v279_v1 }
   0x8   :  { %262 = vmatprep.subr.bf16.mxu0 %v280_v2 }
   0xb   :  { %263 = vmatpush3.bf16.msra.mxu0 %v280_v2 }
   0xc   :  { %264 = vmatprep.subr.bf16.mxu0 %v281_v3 }
   0xf   :  { %265 = vmatpush3.bf16.msra.mxu0 %v281_v3 }
  0x10   :  { %266 = vmatprep.subr.bf16.mxu0 %v282_v5 }
  0x13   :  { %267 = vmatpush3.bf16.msra.mxu0 %v282_v5 }
  0x14   :  { %268 = vmatprep.subr.bf16.mxu0 %v283_v6 }
  0x17   :  { %269 = vmatpush3.bf16.msra.mxu0 %v283_v6 }
  0x18   :  { %270 = vmatprep.subr.bf16.mxu0 %v284_v7 }
  0x1b   :  { %271 = vmatpush3.bf16.msra.mxu0 %v284_v7 }
  0x1c   :  { %272 = vmatprep.subr.bf16.mxu0 %v285_v8 }
  0x1f   :  { %273 = vmatpush3.bf16.msra.mxu0 %v285_v8 }
  0x22   :  { %275 = vmatmul.mubr.bf16.vlgmr.msra.gmra.mrb[0].mxu0 %v287_v9 }
  0xf5   :  { %v276_v11 = vpop.f32.mrb[0].mxu0 }
  0xf6   :  { %v182_v12 = vmul.f32 %v276_v11, %v227_v10  ;;  %v129_v13 = vpop.f32.mrb[1].mxu0 }
  0xf7   :  { %v180_v15 = vmul.f32 %v227_v10, %v129_v13  ;;  %v277_v16 = vpop.f32.mrb[2].mxu0 }
  0xf8   :  { %v183_v17 = vmul.f32 %v277_v16, %v227_v10  ;;  %v132_v18 = vpop.f32.mrb[3].mxu0  ;;  %v191_v20 = vadd.f32 %v228_v14, %v182_v12 }
  0xf9   :  { %v181_v19 = vmul.f32 %v227_v10, %v132_v18  ;;  %v189_v22 = vadd.f32 %v228_v14, %v180_v15 }
  0xfa   :  { %v192_v21 = vadd.f32 %v228_v14, %v183_v17 }
  0xfb   :  { %v190_v23 = vadd.f32 %v228_v14, %v181_v19 }
  0xfc   :  { %v245_v24 = vpack.c.bf16 %v192_v21, %v191_v20 }
  0xfd   :  { %v240_v25 = vpack.c.bf16 %v190_v23, %v189_v22 }
  0xfe   :  { %247 = vst [vmem:[%s353_s3 + $0x8] sm:$0xff] %v245_v24  }
  0xff   :  { %241 = vst [vmem:[%s353_s3] sm:$0xff] %v240_v25  }

// kernel: resnet_forward.18
= control target key start
LH: loop header
LB: loop body
LE: loop exit
PB: predicated region body
PF: predicated region fallthrough
CT: control target
= control target key end

     0   :  { %s1713_s1 = inlined_call_operand.vmem [shape: bf16[1152,128], index: 1, kind: input, shape index: {}]   ;;  %s1714_s0 = inlined_call_operand.vmem [shape: bf16[32,1152], index: 0, kind: input, shape index: {}]   ;;  %s1715_s2 = inlined_call_operand.vmem [shape: f32[2,128], index: 2, kind: input, shape index: {}]   ;;  %s1716_s3 = inlined_call_operand.vmem [shape: bf16[32,128], index: 3, kind: input, shape index: {}]   ;;  %s1717_s4 = inlined_call_operand.vmem [shape: bf16[32,128], index: 4, kind: output, shape index: {}]  }
   0x1   :  { %v1302_v0 = vld [vmem:[%s1713_s1 + $0x40] sm:$0xff]   ;;  %v1306_v4 = vld [vmem:[%s1713_s1 + $0x48] sm:$0xff]   ;;  %v1310_v8 = vld [vmem:[%s1713_s1 + $0x50] sm:$0xff]  }
   0x2   :  { %v1303_v1 = vld [vmem:[%s1713_s1 + $0xc0] sm:$0xff]   ;;  %1160 = vmatprep.subr.bf16.mxu0 %v1302_v0  ;;  %v1307_v5 = vld [vmem:[%s1713_s1 + $0xc8] sm:$0xff]   ;;  %v1311_v9 = vld [vmem:[%s1713_s1 + $0xd0] sm:$0xff]  }
   0x3   :  { %v1304_v2 = vld [vmem:[%s1713_s1] sm:$0xff]   ;;  %1188 = vmatprep.subr.bf16.mxu1 %v1303_v1  ;;  %v1308_v6 = vld [vmem:[%s1713_s1 + $0x8] sm:$0xff]   ;;  %v1312_v10 = vld [vmem:[%s1713_s1 + $0x10] sm:$0xff]  }
   0x4   :  { %v1305_v3 = vld [vmem:[%s1713_s1 + $0x80] sm:$0xff]   ;;  %1161 = vmatpush3.bf16.msra.mxu0 %v1304_v2  ;;  %v1309_v7 = vld [vmem:[%s1713_s1 + $0x88] sm:$0xff]   ;;  %v1313_v11 = vld [vmem:[%s1713_s1 + $0x90] sm:$0xff]  }
   0x5   :  { %1189 = vmatpush3.bf16.msra.mxu1 %v1305_v3  ;;  %1162 = vmatprep.subr.bf16.mxu0 %v1306_v4  ;;  %v1314_v12 = vld [vmem:[%s1713_s1 + $0x58] sm:$0xff]   ;;  %v1318_v16 = vld [vmem:[%s1713_s1 + $0x60] sm:$0xff]   ;;  %v1322_v20 = vld [vmem:[%s1713_s1 + $0x68] sm:$0xff]  }
   0x6   :  { %1190 = vmatprep.subr.bf16.mxu1 %v1307_v5  ;;  %v1315_v13 = vld [vmem:[%s1713_s1 + $0xd8] sm:$0xff]   ;;  %v1319_v17 = vld [vmem:[%s1713_s1 + $0xe0] sm:$0xff]   ;;  %v1323_v21 = vld [vmem:[%s1713_s1 + $0xe8] sm:$0xff]  }
   0x7   :  { %v1316_v14 = vld [vmem:[%s1713_s1 + $0x18] sm:$0xff]   ;;  %v1320_v18 = vld [vmem:[%s1713_s1 + $0x20] sm:$0xff]   ;;  %v1324_v22 = vld [vmem:[%s1713_s1 + $0x28] sm:$0xff]  }
   0x8   :  { %1163 = vmatpush3.bf16.msra.mxu0 %v1308_v6  ;;  %v1317_v15 = vld [vmem:[%s1713_s1 + $0x98] sm:$0xff]   ;;  %v1321_v19 = vld [vmem:[%s1713_s1 + $0xa0] sm:$0xff]   ;;  %v1325_v23 = vld [vmem:[%s1713_s1 + $0xa8] sm:$0xff]  }
   0x9   :  { %1191 = vmatpush3.bf16.msra.mxu1 %v1309_v7  ;;  %1164 = vmatprep.subr.bf16.mxu0 %v1310_v8  ;;  %v1326_v24 = vld [vmem:[%s1713_s1 + $0x70] sm:$0xff]   ;;  %v1330_v28 = vld [vmem:[%s1713_s1 + $0x78] sm:$0xff]   ;;  %v1334_v32 = vld [vmem:[%s1714_s0] ss:$36 sps:$4 sm:$0xff]  }
   0xa   :  { %1192 = vmatprep.subr.bf16.mxu1 %v1311_v9  ;;  %v1327_v25 = vld [vmem:[%s1713_s1 + $0xf0] sm:$0xff]   ;;  %v1331_v29 = vld [vmem:[%s1713_s1 + $0xf8] sm:$0xff]   ;;  %v1336_v33 = vld [vmem:[%s1714_s0 + $0x4] ss:$36 sps:$4 sm:$0xff]  }
   0xb   :  { %v1328_v26 = vld [vmem:[%s1713_s1 + $0x30] sm:$0xff]   ;;  %v1332_v30 = vld [vmem:[%s1713_s1 + $0x38] sm:$0xff]   ;;  %v1337_v34 = vld [vmem:[%s1714_s0 + $0x8] ss:$36 sps:$4 sm:$0xff]   ;;  %738 = vmatprep.mubr.bf16.mxu0 %v1336_v33 }
   0xc   :  { %1165 = vmatpush3.bf16.msra.mxu0 %v1312_v10  ;;  %v1329_v27 = vld [vmem:[%s1713_s1 + $0xb0] sm:$0xff]   ;;  %v1333_v31 = vld [vmem:[%s1713_s1 + $0xb8] sm:$0xff]   ;;  %v1340_v36 = vld [vmem:[%s1713_s1 + $0x140] sm:$0xff]  }
   0xd   :  { %1193 = vmatpush3.bf16.msra.mxu1 %v1313_v11  ;;  %1166 = vmatprep.subr.bf16.mxu0 %v1314_v12  ;;  %v1339_v35 = vld [vmem:[%s1714_s0 + $0xc] ss:$36 sps:$4 sm:$0xff]   ;;  %v1341_v37 = vld [vmem:[%s1713_s1 + $0x100] sm:$0xff]   ;;  %v1352_v48 = vld [vmem:[%s1713_s1 + $0x158] sm:$0xff]  }
   0xe   :  { %1194 = vmatprep.subr.bf16.mxu1 %v1315_v13  ;;  %787 = vmatprep.mubr.bf16.mxu1 %v1339_v35  ;;  %v1342_v38 = vld [vmem:[%s1713_s1 + $0x1c0] sm:$0xff]   ;;  %v1344_v40 = vld [vmem:[%s1713_s1 + $0x148] sm:$0xff]   ;;  %v1348_v44 = vld [vmem:[%s1713_s1 + $0x150] sm:$0xff]  }
   0xf   :  { %v1343_v39 = vld [vmem:[%s1713_s1 + $0x180] sm:$0xff]   ;;  %v1345_v41 = vld [vmem:[%s1713_s1 + $0x108] sm:$0xff]   ;;  %v1349_v45 = vld [vmem:[%s1713_s1 + $0x110] sm:$0xff]  }
  0x10   :  { %1167 = vmatpush3.bf16.msra.mxu0 %v1316_v14  ;;  %v1346_v42 = vld [vmem:[%s1713_s1 + $0x1c8] sm:$0xff]   ;;  %v1350_v46 = vld [vmem:[%s1713_s1 + $0x1d0] sm:$0xff]   ;;  %v1353_v49 = vld [vmem:[%s1713_s1 + $0x118] sm:$0xff]  }
  0x11   :  { %1195 = vmatpush3.bf16.msra.mxu1 %v1317_v15  ;;  %1168 = vmatprep.subr.bf16.mxu0 %v1318_v16  ;;  %v1347_v43 = vld [vmem:[%s1713_s1 + $0x188] sm:$0xff]   ;;  %v1351_v47 = vld [vmem:[%s1713_s1 + $0x190] sm:$0xff]   ;;  %v1354_v50 = vld [vmem:[%s1713_s1 + $0x1d8] sm:$0xff]  }
  0x12   :  { %1196 = vmatprep.subr.bf16.mxu1 %v1319_v17  ;;  %v1355_v51 = vld [vmem:[%s1713_s1 + $0x198] sm:$0xff]   ;;  %v1356_v52 = vld [vmem:[%s1713_s1 + $0x160] sm:$0xff]   ;;  %v1360_v56 = vld [vmem:[%s1713_s1 + $0x168] sm:$0xff]  }
  0x13   :  { %v1357_v53 = vld [vmem:[%s1713_s1 + $0x120] sm:$0xff]   ;;  %v1361_v57 = vld [vmem:[%s1714_s0 + $0x4c] ss:$36 sps:$4 sm:$0xff]   ;;  %v1363_v58 = vld [vmem:[%s1714_s0 + $0x54] ss:$36 sps:$4 sm:$0xff]  }
  0x14   :  { %1169 = vmatpush3.bf16.msra.mxu0 %v1320_v18  ;;  %v1358_v54 = vld [vmem:[%s1713_s1 + $0x1e0] sm:$0xff]   ;;  %v1365_v59 = vld [vmem:[%s1713_s1 + $0x128] sm:$0xff]   ;;  %v1367_v61 = vld [vmem:[%s1714_s0 + $0x50] ss:$36 sps:$4 sm:$0xff]  }
  0x15   :  { %1197 = vmatpush3.bf16.msra.mxu1 %v1321_v19  ;;  %1170 = vmatprep.subr.bf16.mxu0 %v1322_v20  ;;  %v1359_v55 = vld [vmem:[%s1713_s1 + $0x1a0] sm:$0xff]   ;;  %v1366_v60 = vld [vmem:[%s1714_s0 + $0x48] ss:$36 sps:$4 sm:$0xff]   ;;  %v1370_v0 = vld [vmem:[%s1713_s1 + $0x170] sm:$0xff]  }
  0x16   :  { %1198 = vmatprep.subr.bf16.mxu1 %v1323_v21  ;;  %v1368_v62 = vld [vmem:[%s1713_s1 + $0x1e8] sm:$0xff]   ;;  %v1371_v1 = vld [vmem:[%s1713_s1 + $0x130] sm:$0xff]   ;;  %v1374_v4 = vld [vmem:[%s1713_s1 + $0x178] sm:$0xff]  }
  0x17   :  { %v1369_v63 = vld [vmem:[%s1713_s1 + $0x1a8] sm:$0xff]   ;;  %v1372_v2 = vld [vmem:[%s1713_s1 + $0x1f0] sm:$0xff]   ;;  %v1375_v5 = vld [vmem:[%s1713_s1 + $0x138] sm:$0xff]  }
  0x18   :  { %1171 = vmatpush3.bf16.msra.mxu0 %v1324_v22  ;;  %v1373_v3 = vld [vmem:[%s1713_s1 + $0x1b0] sm:$0xff]   ;;  %v1376_v6 = vld [vmem:[%s1713_s1 + $0x1f8] sm:$0xff]   ;;  %v1381_v10 = vld [vmem:[%s1713_s1 + $0x200] sm:$0xff]  }
  0x19   :  { %1199 = vmatpush3.bf16.msra.mxu1 %v1325_v23  ;;  %1172 = vmatprep.subr.bf16.mxu0 %v1326_v24  ;;  %v1377_v7 = vld [vmem:[%s1714_s0 + $0x10] ss:$36 sps:$4 sm:$0xff]   ;;  %v1380_v9 = vld [vmem:[%s1713_s1 + $0x1b8] sm:$0xff]   ;;  %v1385_v13 = vld [vmem:[%s1713_s1 + $0x208] sm:$0xff]  }
  0x1a   :  { %1200 = vmatprep.subr.bf16.mxu1 %v1327_v25  ;;  %v1379_v8 = vld [vmem:[%s1714_s0 + $0x14] ss:$36 sps:$4 sm:$0xff]   ;;  %v1384_v12 = vld [vmem:[%s1714_s0 + $0x1c] ss:$36 sps:$4 sm:$0xff]   ;;  %v1390_v17 = vld [vmem:[%s1714_s0 + $0x64] ss:$36 sps:$4 sm:$0xff]  }
  0x1b   :  { %v1382_v11 = vld [vmem:[%s1714_s0 + $0x18] ss:$36 sps:$4 sm:$0xff]   ;;  %v1389_v16 = vld [vmem:[%s1713_s1 + $0x210] sm:$0xff]   ;;  %v1392_v18 = vld [vmem:[%s1714_s0 + $0x60] ss:$36 sps:$4 sm:$0xff]  }
  0x1c   :  { %1173 = vmatpush3.bf16.msra.mxu0 %v1328_v26  ;;  %v1386_v14 = vld [vmem:[%s1714_s0 + $0x5c] ss:$36 sps:$4 sm:$0xff]   ;;  %v1395_v22 = vld [vmem:[%s1713_s1 + $0x228] sm:$0xff]   ;;  %v1396_v23 = vld [vmem:[%s1713_s1 + $0x230] sm:$0xff]  }
  0x1d   :  { %1201 = vmatpush3.bf16.msra.mxu1 %v1329_v27  ;;  %1174 = vmatprep.subr.bf16.mxu0 %v1330_v28  ;;  %v1388_v15 = vld [vmem:[%s1714_s0 + $0x58] ss:$36 sps:$4 sm:$0xff]   ;;  %v1394_v20 = vld [vmem:[%s1713_s1 + $0x220] sm:$0xff]   ;;  %v1399_v25 = vld [vmem:[%s1714_s0 + $0x68] ss:$36 sps:$4 sm:$0xff]  }
  0x1e   :  { %1202 = vmatprep.subr.bf16.mxu1 %v1331_v29  ;;  %v1393_v19 = vld [vmem:[%s1713_s1 + $0x218] sm:$0xff]   ;;  %v1398_v21 = vld [vmem:[%s1714_s0 + $0x20] ss:$36 sps:$4 sm:$0xff]  }
  0x1f   :  { %v1397_v24 = vld [vmem:[%s1713_s1 + $0x238] sm:$0xff]  }
  0x20   :  { %1175 = vmatpush3.bf16.msra.mxu0 %v1332_v30 }
  0x21   :  { %1203 = vmatpush3.bf16.msra.mxu1 %v1333_v31  ;;  %1216 = vmatprep.subr.bf16.mxu0 %v1340_v36 }
  0x22   :  { %1244 = vmatprep.subr.bf16.mxu1 %v1342_v38 }
  0x23   :  { %739 = vmatmul.mubr.bf16.vlgmr.msra.gmra.mrb[0].mxu0 %v1334_v32 }
  0x24   :  { %788 = vmatmul.mubr.bf16.vlgmr.msra.gmra.mrb[0].mxu1 %v1337_v34  ;;  %1217 = vmatpush3.bf16.msra.mxu0 %v1341_v37 }
  0x25   :  { %1245 = vmatpush3.bf16.msra.mxu1 %v1343_v39  ;;  %1218 = vmatprep.subr.bf16.mxu0 %v1344_v40 }
  0x26   :  { %1246 = vmatprep.subr.bf16.mxu1 %v1346_v42  ;;  %746 = vmatprep.mubr.bf16.mxu0 %v1361_v57 }
  0x27   :  { %795 = vmatprep.mubr.bf16.mxu1 %v1363_v58 }
  0x28   :  { %1219 = vmatpush3.bf16.msra.mxu0 %v1345_v41 }
  0x29   :  { %1247 = vmatpush3.bf16.msra.mxu1 %v1347_v43  ;;  %1220 = vmatprep.subr.bf16.mxu0 %v1348_v44 }
  0x2a   :  { %1248 = vmatprep.subr.bf16.mxu1 %v1350_v46 }
  0x2b   :  { %747 = vmatmul.mubr.bf16.gmra.mrb[4].mxu0 %v1366_v60 }
  0x2c   :  { %1221 = vmatpush3.bf16.msra.mxu0 %v1349_v45  ;;  %796 = vmatmul.mubr.bf16.gmra.mrb[4].mxu1 %v1367_v61 }
  0x2d   :  { %1249 = vmatpush3.bf16.msra.mxu1 %v1351_v47  ;;  %1222 = vmatprep.subr.bf16.mxu0 %v1352_v48 }
  0x2e   :  { %1250 = vmatprep.subr.bf16.mxu1 %v1354_v50  ;;  %836 = vmatprep.mubr.bf16.mxu0 %v1379_v8 }
  0x2f   :  { %885 = vmatprep.mubr.bf16.mxu1 %v1384_v12 }
  0x30   :  { %1223 = vmatpush3.bf16.msra.mxu0 %v1353_v49 }
  0x31   :  { %1251 = vmatpush3.bf16.msra.mxu1 %v1355_v51  ;;  %1224 = vmatprep.subr.bf16.mxu0 %v1356_v52 }
  0x32   :  { %1252 = vmatprep.subr.bf16.mxu1 %v1358_v54 }
  0x34   :  { %1225 = vmatpush3.bf16.msra.mxu0 %v1357_v53 }
  0x35   :  { %1253 = vmatpush3.bf16.msra.mxu1 %v1359_v55  ;;  %1226 = vmatprep.subr.bf16.mxu0 %v1360_v56 }
  0x36   :  { %1254 = vmatprep.subr.bf16.mxu1 %v1368_v62 }
  0x38   :  { %1227 = vmatpush3.bf16.msra.mxu0 %v1365_v59 }
  0x39   :  { %1255 = vmatpush3.bf16.msra.mxu1 %v1369_v63  ;;  %1228 = vmatprep.subr.bf16.mxu0 %v1370_v0 }
  0x3a   :  { %1256 = vmatprep.subr.bf16.mxu1 %v1372_v2 }
  0x3c   :  { %1229 = vmatpush3.bf16.msra.mxu0 %v1371_v1 }
  0x3d   :  { %1257 = vmatpush3.bf16.msra.mxu1 %v1373_v3  ;;  %1230 = vmatprep.subr.bf16.mxu0 %v1374_v4 }
  0x3e   :  { %1258 = vmatprep.subr.bf16.mxu1 %v1376_v6 }
  0x40   :  { %1231 = vmatpush3.bf16.msra.mxu0 %v1375_v5 }
  0x41   :  { %1259 = vmatpush3.bf16.msra.mxu1 %v1380_v9  ;;  %1282 = vmatprep.subr.bf16.mxu0 %v1381_v10 }
  0x43   :  { %837 = vmatmul.mubr.bf16.vlgmr.msra.gmra.mrb[8].mxu0 %v1377_v7 }
  0x44   :  { %1283 = vmatpush3.bf16.msra.mxu0 %v1381_v10  ;;  %886 = vmatmul.mubr.bf16.vlgmr.msra.gmra.mrb[8].mxu1 %v1382_v11 }
  0x45   :  { %1284 = vmatprep.subr.bf16.mxu0 %v1385_v13  ;;  %844 = vmatprep.mubr.bf16.mxu0 %v1386_v14 }
  0x46   :  { %893 = vmatprep.mubr.bf16.mxu1 %v1390_v17 }
  0x48   :  { %1285 = vmatpush3.bf16.msra.mxu0 %v1385_v13 }
  0x49   :  { %1286 = vmatprep.subr.bf16.mxu0 %v1389_v16 }
  0x4b   :  { %845 = vmatmul.mubr.bf16.gmra.mrb[12].mxu0 %v1388_v15 }
  0x4c   :  { %1287 = vmatpush3.bf16.msra.mxu0 %v1389_v16  ;;  %894 = vmatmul.mubr.bf16.gmra.mrb[12].mxu1 %v1392_v18 }
  0x4d   :  { %1288 = vmatprep.subr.bf16.mxu0 %v1393_v19  ;;  %1298 = vmatprep.mubr.bf16.mxu0 %v1398_v21 }
  0x50   :  { %1289 = vmatpush3.bf16.msra.mxu0 %v1393_v19 }
  0x51   :  { %1290 = vmatprep.subr.bf16.mxu0 %v1394_v20 }
  0x54   :  { %1291 = vmatpush3.bf16.msra.mxu0 %v1394_v20 }
  0x55   :  { %1292 = vmatprep.subr.bf16.mxu0 %v1395_v22 }
  0x58   :  { %1293 = vmatpush3.bf16.msra.mxu0 %v1395_v22 }
  0x59   :  { %1294 = vmatprep.subr.bf16.mxu0 %v1396_v23 }
  0x5c   :  { %1295 = vmatpush3.bf16.msra.mxu0 %v1396_v23  ;;  %v1130_v23 = vld [vmem:[%s1715_s2] ss:$0 sm:$0xff] }
  0x5d   :  { %1296 = vmatprep.subr.bf16.mxu0 %v1397_v24 }
  0x60   :  { %1297 = vmatpush3.bf16.msra.mxu0 %v1397_v24  ;;  %v1158_v24 = vld [vmem:[%s1716_s3 + $0x8] sm:$0xff]  }
  0x63   :  { %1299 = vmatmul.mubr.bf16.vlgmr.msra.gmra.mrb[16].mxu0 %v1399_v25 }
  0xf6   :  { %v1176_v26 = vpop.f32.mrb[0].mxu0 }
  0xf7   :  { %v1204_v27 = vpop.f32.mrb[0].mxu1  ;;  %v1177_v28 = vpop.f32.mrb[1].mxu0 }
  0xf8   :  { %v1178_v29 = vadd.f32 %v1177_v28, %v1176_v26  ;;  %v1205_v30 = vpop.f32.mrb[1].mxu1  ;;  %v1179_v31 = vpop.f32.mrb[2].mxu0  ;;  %v1131_v28 = vld [vmem:[%s1715_s2 + $0x1] ss:$0 sm:$0xff] }
  0xf9   :  { %v1206_v32 = vadd.f32 %v1205_v30, %v1204_v27  ;;  %v1207_v33 = vpop.f32.mrb[2].mxu1  ;;  %v1180_v34 = vpop.f32.mrb[3].mxu0  ;;  %v1141_v27 = vld [vmem:[%s1716_s3] sm:$0xff]  }
  0xfa   :  { %v1181_v35 = vadd.f32 %v1180_v34, %v1179_v31  ;;  %v1208_v36 = vpop.f32.mrb[3].mxu1 }
  0xfb   :  { %v790_v37 = vadd.f32 %v1206_v32, %v1178_v29  ;;  %v1209_v38 = vadd.f32 %v1208_v36, %v1207_v33  ;;  %v1146_v32 = vunpack.c.l.bf16 %v1158_v24  ;;  %v1142_v36 = vunpack.c.l.bf16 %v1141_v27 }
  0xfd   :  { %v793_v39 = vadd.f32 %v1209_v38, %v1181_v35 }
  0xfe   :  { %v1182_v40 = vpop.f32.mrb[4].mxu0 }
  0xff   :  { %v1210_v41 = vpop.f32.mrb[4].mxu1  ;;  %v1183_v42 = vpop.f32.mrb[5].mxu0 }
 0x100   :  { %v1211_v43 = vpop.f32.mrb[5].mxu1  ;;  %v1184_v44 = vadd.f32 %v1183_v42, %v1182_v40  ;;  %v1185_v46 = vpop.f32.mrb[6].mxu0  ;;  %v1147_v40 = vunpack.c.h.bf16 %v1158_v24 }
 0x101   :  { %v1212_v45 = vadd.f32 %v1211_v43, %v1210_v41  ;;  %v1213_v47 = vpop.f32.mrb[6].mxu1  ;;  %v1186_v48 = vpop.f32.mrb[7].mxu0  ;;  %v1143_v43 = vunpack.c.h.bf16 %v1141_v27 }
 0x102   :  { %v1214_v49 = vpop.f32.mrb[7].mxu1  ;;  %v1187_v51 = vadd.f32 %v1186_v48, %v1185_v46 }
 0x103   :  { %v798_v50 = vadd.f32 %v1212_v45, %v1184_v44  ;;  %v1215_v52 = vadd.f32 %v1214_v49, %v1213_v47 }
 0x105   :  { %v801_v53 = vadd.f32 %v1215_v52, %v1187_v51 }
 0x116   :  { %v1232_v54 = vpop.f32.mrb[8].mxu0 }
 0x117   :  { %v1233_v55 = vpop.f32.mrb[9].mxu0  ;;  %v1260_v58 = vpop.f32.mrb[8].mxu1 }
 0x118   :  { %v1234_v56 = vadd.f32 %v1233_v55, %v1232_v54  ;;  %v1235_v57 = vpop.f32.mrb[10].mxu0  ;;  %v1261_v62 = vpop.f32.mrb[9].mxu1 }
 0x119   :  { %v1236_v59 = vpop.f32.mrb[11].mxu0  ;;  %v1262_v63 = vadd.f32 %v1261_v62, %v1260_v58  ;;  %v1263_v0 = vpop.f32.mrb[10].mxu1 }
 0x11a   :  { %v839_v60 = vadd.f32 %v1234_v56, %v790_v37  ;;  %v1237_v61 = vadd.f32 %v1236_v59, %v1235_v57  ;;  %v1264_v2 = vpop.f32.mrb[11].mxu1 }
 0x11b   :  { %v1265_v3 = vadd.f32 %v1264_v2, %v1263_v0 }
 0x11c   :  { %v842_v1 = vadd.f32 %v1237_v61, %v793_v39  ;;  %v888_v4 = vadd.f32 %v1262_v63, %v839_v60 }
 0x11e   :  { %v1238_v5 = vpop.f32.mrb[12].mxu0  ;;  %v891_v7 = vadd.f32 %v1265_v3, %v842_v1 }
 0x11f   :  { %v1239_v6 = vpop.f32.mrb[13].mxu0  ;;  %v1266_v10 = vpop.f32.mrb[12].mxu1 }
 0x120   :  { %v1240_v8 = vadd.f32 %v1239_v6, %v1238_v5  ;;  %v1241_v9 = vpop.f32.mrb[14].mxu0  ;;  %v1267_v14 = vpop.f32.mrb[13].mxu1 }
 0x121   :  { %v1242_v11 = vpop.f32.mrb[15].mxu0  ;;  %v1268_v15 = vadd.f32 %v1267_v14, %v1266_v10  ;;  %v1269_v16 = vpop.f32.mrb[14].mxu1 }
 0x122   :  { %v847_v12 = vadd.f32 %v1240_v8, %v798_v50  ;;  %v1243_v13 = vadd.f32 %v1242_v11, %v1241_v9  ;;  %v1270_v18 = vpop.f32.mrb[15].mxu1 }
 0x123   :  { %v1271_v19 = vadd.f32 %v1270_v18, %v1269_v16 }
 0x124   :  { %v850_v17 = vadd.f32 %v1243_v13, %v801_v53  ;;  %v896_v20 = vadd.f32 %v1268_v15, %v847_v12 }
 0x126   :  { %v899_v21 = vadd.f32 %v1271_v19, %v850_v17 }
 0x136   :  { %v1300_v22 = vpop.f32.mrb[16].mxu0 }
 0x137   :  { %v945_v25 = vadd.f32 %v1300_v22, %v896_v20  ;;  %v936_v26 = vpop.f32.mrb[17].mxu0 }
 0x138   :  { %v937_v29 = vadd.f32 %v936_v26, %v888_v4  ;;  %v1301_v30 = vpop.f32.mrb[18].mxu0 }
 0x139   :  { %v989_v31 = vmul.f32 %v1130_v23, %v945_v25  ;;  %v948_v33 = vadd.f32 %v1301_v30, %v899_v21  ;;  %v939_v34 = vpop.f32.mrb[19].mxu0 }
 0x13a   :  { %v987_v35 = vmul.f32 %v1130_v23, %v937_v29  ;;  %v940_v37 = vadd.f32 %v939_v34, %v891_v7 }
 0x13b   :  { %v998_v38 = vadd.f32 %v1131_v28, %v989_v31  ;;  %v990_v39 = vmul.f32 %v1130_v23, %v948_v33 }
 0x13c   :  { %v996_v41 = vadd.f32 %v1131_v28, %v987_v35  ;;  %v988_v42 = vmul.f32 %v1130_v23, %v940_v37 }
 0x13d   :  { %v1010_v44 = vadd.f32 %v1146_v32, %v998_v38  ;;  %v999_v45 = vadd.f32 %v1131_v28, %v990_v39 }
 0x13e   :  { %v1008_v46 = vadd.f32 %v1142_v36, %v996_v41  ;;  %v997_v47 = vadd.f32 %v1131_v28, %v988_v42 }
 0x13f   :  { %v1011_v48 = vadd.f32 %v1147_v40, %v999_v45  ;;  %v1014_v50 = vmax.f32 %v1010_v44, 0.0 }
 0x140   :  { %v1009_v49 = vadd.f32 %v1143_v43, %v997_v47  ;;  %v1012_v52 = vmax.f32 %v1008_v46, 0.0 }
 0x141   :  { %v1015_v51 = vmax.f32 %v1011_v48, 0.0 }
 0x142   :  { %v1013_v53 = vmax.f32 %v1009_v49, 0.0 }
 0x143   :  { %v1156_v54 = vpack.c.bf16 %v1015_v51, %v1014_v50 }
 0x144   :  { %v1151_v55 = vpack.c.bf16 %v1013_v53, %v1012_v52 }
 0x145   :  { %1159 = vst [vmem:[%s1717_s4 + $0x8] sm:$0xff] %v1156_v54  }
 0x146   :  { %1152 = vst [vmem:[%s1717_s4] sm:$0xff] %v1151_v55  }

// kernel: resnet_forward.19
= control target key start
LH: loop header
LB: loop body
LE: loop exit
PB: predicated region body
PF: predicated region fallthrough
CT: control target
= control target key end

     0   :  { %s2235_s12 = smov 0   ;;  %s2237_s13 = smov 0   ;;  %s2709_s0 = inlined_call_operand.vmem [shape: bf16[8,1152], index: 0, kind: input, shape index: {}]   ;;  %s2710_s1 = inlined_call_operand.vmem [shape: bf16[1152,256], index: 1, kind: input, shape index: {}]   ;;  %s2711_s2 = inlined_call_operand.vmem [shape: f32[2,256], index: 2, kind: input, shape index: {}]   ;;  %s2712_s3 = inlined_call_operand.vmem [shape: bf16[8,256], index: 3, kind: output, shape index: {}]  }
   0x1   :  { %s2239_s14 = smov 0   ;;  %s2241_s15 = smov 0  }
   0x2   :  { %s2243_s16 = smov 0  }
   0x3 LB: > { %s28_s17 = sadd.s32 1, %s2207_s15  ;;  %p76_p1 = scmp.ne.s32.totalorder %s2199_s13, %s2195_s12  ;;  %s2211_s16 = sphi %s2243_s16, %s13_s16   ;;  %s2207_s15 = sphi %s2241_s15, %s2716_s15   ;;  %s2203_s14 = sphi %s2239_s14, %s2715_s14   ;;  %s2199_s13 = sphi %s2237_s13, %s2714_s13   ;;  %s2195_s12 = sphi %s2235_s12, %s2713_s12  }
   0x4   : > { %p30_p0 = scmp.ge.s32.totalorder %s28_s17, 2  ;;  %p77_p2 = scmp.eq.s32.totalorder %s2211_s16, 0 }
   0x5   : > { %s69_s19 = sadd.s32 1, %s2199_s13  ;;  %p1841_p5 = scmp.ge.s32.totalorder %s2211_s16, 2 }
   0x6   : > { %s2718_s17 = smov (%p30_p0, %s28_s17), 0  ;;  %p78_p3 = por %p77_p2, %p76_p1 }
   0x7   : > { %s65_s18 = ssub.s32 %s2207_s15, %s2718_s17  ;;  %169 = sbr.rel (%p1841_p5) target bundleno = 114 (0x72), region = 20 }
   0x8   : > { %p67_p4 = scmp.eq.s32.totalorder %s65_s18, 0 }
   0xa   : > { %s2270_s20 = scalar_select %p67_p4, %s2199_s13, %s69_s19  }
   0xe   : > { %172 = sbr.rel (!%p78_p3) target bundleno = 114 (0x72), region = 24  ;;  %s174_s21 = sand.u32 (%p78_p3), 1, %s2199_s13  }
   0xf   : > { %s1842_s22 = sshll.u32 (%p78_p3), %s2207_s15, 2  ;;  %s2048_s23 = smul.u32 (%p78_p3), 576, %s174_s21 }
  0x10   : > { %s2278_s26 = scalar_lea.vmem (%p78_p3), %s2710_s1, %s1842_s22 }
  0x11   : > { %v197_v0 = vld [vmem:[%s2278_s26] sm:$0xf] (%p78_p3)  ;;  %v199_v1 = vld [vmem:[%s2278_s26 + $0x8] sm:$0xf] (%p78_p3)  ;;  %v201_v2 = vld [vmem:[%s2278_s26 + $0x10] sm:$0xf] (%p78_p3) }
  0x12   : > { %v203_v3 = vld [vmem:[%s2278_s26 + $0x18] sm:$0xf] (%p78_p3)  ;;  %v205_v4 = vld [vmem:[%s2278_s26 + $0x20] sm:$0xf] (%p78_p3)  ;;  %s2285_s27 = scalar_lea.vmem (%p78_p3), [#allocation3], %s2048_s23 }
  0x13   : > { %198 = vst [vmem:[%s2285_s27] sm:$0xf] (%p78_p3), %v197_v0  ;;  %200 = vst [vmem:[%s2285_s27 + $0x4] sm:$0xf] (%p78_p3), %v199_v1  ;;  %v207_v5 = vld [vmem:[%s2278_s26 + $0x28] sm:$0xf] (%p78_p3) }
  0x14   : > { %202 = vst [vmem:[%s2285_s27 + $0x8] sm:$0xf] (%p78_p3), %v201_v2  ;;  %204 = vst [vmem:[%s2285_s27 + $0xc] sm:$0xf] (%p78_p3), %v203_v3  ;;  %v209_v6 = vld [vmem:[%s2278_s26 + $0x30] sm:$0xf] (%p78_p3) }
  0x15   : > { %206 = vst [vmem:[%s2285_s27 + $0x10] sm:$0xf] %v205_v4  ;;  %v211_v7 = vld [vmem:[%s2278_s26 + $0x38] sm:$0xf]  ;;  %208 = vst [vmem:[%s2285_s27 + $0x14] sm:$0xf] %v207_v5 }
  0x16   : > { %210 = vst [vmem:[%s2285_s27 + $0x18] sm:$0xf] %v209_v6  ;;  %212 = vst [vmem:[%s2285_s27 + $0x1c] sm:$0xf] %v211_v7  ;;  %v213_v8 = vld [vmem:[%s2278_s26 + $0x40] sm:$0xf] }
  0x17   : > { %v215_v9 = vld [vmem:[%s2278_s26 + $0x48] sm:$0xf]  ;;  %v217_v10 = vld [vmem:[%s2278_s26 + $0x50] sm:$0xf]  ;;  %214 = vst [vmem:[%s2285_s27 + $0x20] sm:$0xf] %v213_v8 }
  0x18   : > { %216 = vst [vmem:[%s2285_s27 + $0x24] sm:$0xf] %v215_v9  ;;  %218 = vst [vmem:[%s2285_s27 + $0x28] sm:$0xf] %v217_v10  ;;  %v219_v11 = vld [vmem:[%s2278_s26 + $0x58] sm:$0xf] }
  0x19   : > { %v221_v12 = vld [vmem:[%s2278_s26 + $0x60] sm:$0xf]  ;;  %v223_v13 = vld [vmem:[%s2278_s26 + $0x68] sm:$0xf]  ;;  %220 = vst [vmem:[%s2285_s27 + $0x2c] sm:$0xf] %v219_v11 }
  0x1a   : > { %222 = vst [vmem:[%s2285_s27 + $0x30] sm:$0xf] %v221_v12  ;;  %224 = vst [vmem:[%s2285_s27 + $0x34] sm:$0xf] %v223_v13  ;;  %v225_v14 = vld [vmem:[%s2278_s26 + $0x70] sm:$0xf] }
  0x1b   : > { %v227_v15 = vld [vmem:[%s2278_s26 + $0x78] sm:$0xf]  ;;  %v229_v16 = vld [vmem:[%s2278_s26 + $0x80] sm:$0xf]  ;;  %226 = vst [vmem:[%s2285_s27 + $0x38] sm:$0xf] %v225_v14 }
  0x1c   : > { %228 = vst [vmem:[%s2285_s27 + $0x3c] sm:$0xf] %v227_v15  ;;  %230 = vst [vmem:[%s2285_s27 + $0x40] sm:$0xf] %v229_v16  ;;  %v231_v17 = vld [vmem:[%s2278_s26 + $0x88] sm:$0xf] }
  0x1d   : > { %v233_v18 = vld [vmem:[%s2278_s26 + $0x90] sm:$0xf]  ;;  %v235_v19 = vld [vmem:[%s2278_s26 + $0x98] sm:$0xf]  ;;  %232 = vst [vmem:[%s2285_s27 + $0x44] sm:$0xf] %v231_v17 }
  0x1e   : > { %234 = vst [vmem:[%s2285_s27 + $0x48] sm:$0xf] %v233_v18  ;;  %236 = vst [vmem:[%s2285_s27 + $0x4c] sm:$0xf] %v235_v19  ;;  %v237_v20 = vld [vmem:[%s2278_s26 + $0xa0] sm:$0xf] }
  0x1f   : > { %v239_v21 = vld [vmem:[%s2278_s26 + $0xa8] sm:$0xf]  ;;  %v241_v22 = vld [vmem:[%s2278_s26 + $0xb0] sm:$0xf]  ;;  %238 = vst [vmem:[%s2285_s27 + $0x50] sm:$0xf] %v237_v20 }
  0x20   : > { %240 = vst [vmem:[%s2285_s27 + $0x54] sm:$0xf] %v239_v21  ;;  %242 = vst [vmem:[%s2285_s27 + $0x58] sm:$0xf] %v241_v22  ;;  %v243_v23 = vld [vmem:[%s2278_s26 + $0xb8] sm:$0xf] }
  0x21   : > { %v245_v24 = vld [vmem:[%s2278_s26 + $0xc0] sm:$0xf]  ;;  %v247_v25 = vld [vmem:[%s2278_s26 + $0xc8] sm:$0xf]  ;;  %244 = vst [vmem:[%s2285_s27 + $0x5c] sm:$0xf] %v243_v23 }
  0x22   : > { %246 = vst [vmem:[%s2285_s27 + $0x60] sm:$0xf] %v245_v24  ;;  %248 = vst [vmem:[%s2285_s27 + $0x64] sm:$0xf] %v247_v25  ;;  %v249_v26 = vld [vmem:[%s2278_s26 + $0xd0] sm:$0xf] }
  0x23   : > { %v251_v27 = vld [vmem:[%s2278_s26 + $0xd8] sm:$0xf]  ;;  %v253_v28 = vld [vmem:[%s2278_s26 + $0xe0] sm:$0xf]  ;;  %250 = vst [vmem:[%s2285_s27 + $0x68] sm:$0xf] %v249_v26 }
  0x24   : > { %252 = vst [vmem:[%s2285_s27 + $0x6c] sm:$0xf] %v251_v27  ;;  %254 = vst [vmem:[%s2285_s27 + $0x70] sm:$0xf] %v253_v28  ;;  %v255_v29 = vld [vmem:[%s2278_s26 + $0xe8] sm:$0xf] }
  0x25   : > { %v257_v30 = vld [vmem:[%s2278_s26 + $0xf0] sm:$0xf]  ;;  %v259_v31 = vld [vmem:[%s2278_s26 + $0xf8] sm:$0xf]  ;;  %256 = vst [vmem:[%s2285_s27 + $0x74] sm:$0xf] %v255_v29 }
  0x26   : > { %258 = vst [vmem:[%s2285_s27 + $0x78] sm:$0xf] %v257_v30  ;;  %260 = vst [vmem:[%s2285_s27 + $0x7c] sm:$0xf] %v259_v31  ;;  %v261_v32 = vld [vmem:[%s2278_s26 + $0x100] sm:$0xf] }
  0x27   : > { %v263_v33 = vld [vmem:[%s2278_s26 + $0x108] sm:$0xf]  ;;  %v265_v34 = vld [vmem:[%s2278_s26 + $0x110] sm:$0xf]  ;;  %262 = vst [vmem:[%s2285_s27 + $0x80] sm:$0xf] %v261_v32 }
  0x28   : > { %264 = vst [vmem:[%s2285_s27 + $0x84] sm:$0xf] %v263_v33  ;;  %266 = vst [vmem:[%s2285_s27 + $0x88] sm:$0xf] %v265_v34  ;;  %v267_v35 = vld [vmem:[%s2278_s26 + $0x118] sm:$0xf] }
  0x29   : > { %v269_v36 = vld [vmem:[%s2278_s26 + $0x120] sm:$0xf]  ;;  %v271_v37 = vld [vmem:[%s2278_s26 + $0x128] sm:$0xf]  ;;  %268 = vst [vmem:[%s2285_s27 + $0x8c] sm:$0xf] %v267_v35 }
  0x2a   : > { %270 = vst [vmem:[%s2285_s27 + $0x90] sm:$0xf] %v269_v36  ;;  %272 = vst [vmem:[%s2285_s27 + $0x94] sm:$0xf] %v271_v37  ;;  %v273_v38 = vld [vmem:[%s2278_s26 + $0x130] sm:$0xf] }
  0x2b   : > { %v275_v39 = vld [vmem:[%s2278_s26 + $0x138] sm:$0xf]  ;;  %v277_v40 = vld [vmem:[%s2278_s26 + $0x140] sm:$0xf]  ;;  %274 = vst [vmem:[%s2285_s27 + $0x98] sm:$0xf] %v273_v38 }
  0x2c   : > { %276 = vst [vmem:[%s2285_s27 + $0x9c] sm:$0xf] %v275_v39  ;;  %278 = vst [vmem:[%s2285_s27 + $0xa0] sm:$0xf] %v277_v40  ;;  %v279_v41 = vld [vmem:[%s2278_s26 + $0x148] sm:$0xf] }
  0x2d   : > { %v281_v42 = vld [vmem:[%s2278_s26 + $0x150] sm:$0xf]  ;;  %v283_v43 = vld [vmem:[%s2278_s26 + $0x158] sm:$0xf]  ;;  %280 = vst [vmem:[%s2285_s27 + $0xa4] sm:$0xf] %v279_v41 }
  0x2e   : > { %282 = vst [vmem:[%s2285_s27 + $0xa8] sm:$0xf] %v281_v42  ;;  %284 = vst [vmem:[%s2285_s27 + $0xac] sm:$0xf] %v283_v43  ;;  %v285_v44 = vld [vmem:[%s2278_s26 + $0x160] sm:$0xf] }
  0x2f   : > { %v287_v45 = vld [vmem:[%s2278_s26 + $0x168] sm:$0xf]  ;;  %v289_v46 = vld [vmem:[%s2278_s26 + $0x170] sm:$0xf]  ;;  %286 = vst [vmem:[%s2285_s27 + $0xb0] sm:$0xf] %v285_v44 }
  0x30   : > { %288 = vst [vmem:[%s2285_s27 + $0xb4] sm:$0xf] %v287_v45  ;;  %290 = vst [vmem:[%s2285_s27 + $0xb8] sm:$0xf] %v289_v46  ;;  %v291_v47 = vld [vmem:[%s2278_s26 + $0x178] sm:$0xf] }
  0x31   : > { %v293_v48 = vld [vmem:[%s2278_s26 + $0x180] sm:$0xf]  ;;  %v295_v49 = vld [vmem:[%s2278_s26 + $0x188] sm:$0xf]  ;;  %292 = vst [vmem:[%s2285_s27 + $0xbc] sm:$0xf] %v291_v47 }
  0x32   : > { %294 = vst [vmem:[%s2285_s27 + $0xc0] sm:$0xf] %v293_v48  ;;  %296 = vst [vmem:[%s2285_s27 + $0xc4] sm:$0xf] %v295_v49  ;;  %v297_v50 = vld [vmem:[%s2278_s26 + $0x190] sm:$0xf] }
  0x33   : > { %v299_v51 = vld [vmem:[%s2278_s26 + $0x198] sm:$0xf]  ;;  %v301_v52 = vld [vmem:[%s2278_s26 + $0x1a0] sm:$0xf]  ;;  %298 = vst [vmem:[%s2285_s27 + $0xc8] sm:$0xf] %v297_v50 }
  0x34   : > { %300 = vst [vmem:[%s2285_s27 + $0xcc] sm:$0xf] %v299_v51  ;;  %302 = vst [vmem:[%s2285_s27 + $0xd0] sm:$0xf] %v301_v52  ;;  %v303_v53 = vld [vmem:[%s2278_s26 + $0x1a8] sm:$0xf] }
  0x35   : > { %v305_v54 = vld [vmem:[%s2278_s26 + $0x1b0] sm:$0xf]  ;;  %v307_v55 = vld [vmem:[%s2278_s26 + $0x1b8] sm:$0xf]  ;;  %304 = vst [vmem:[%s2285_s27 + $0xd4] sm:$0xf] %v303_v53 }
  0x36   : > { %306 = vst [vmem:[%s2285_s27 + $0xd8] sm:$0xf] %v305_v54  ;;  %308 = vst [vmem:[%s2285_s27 + $0xdc] sm:$0xf] %v307_v55  ;;  %v309_v56 = vld [vmem:[%s2278_s26 + $0x1c0] sm:$0xf] }
  0x37   : > { %v311_v57 = vld [vmem:[%s2278_s26 + $0x1c8] sm:$0xf]  ;;  %v313_v58 = vld [vmem:[%s2278_s26 + $0x1d0] sm:$0xf]  ;;  %310 = vst [vmem:[%s2285_s27 + $0xe0] sm:$0xf] %v309_v56 }
  0x38   : > { %312 = vst [vmem:[%s2285_s27 + $0xe4] sm:$0xf] %v311_v57  ;;  %314 = vst [vmem:[%s2285_s27 + $0xe8] sm:$0xf] %v313_v58  ;;  %v315_v59 = vld [vmem:[%s2278_s26 + $0x1d8] sm:$0xf] }
  0x39   : > { %v317_v60 = vld [vmem:[%s2278_s26 + $0x1e0] sm:$0xf]  ;;  %v319_v61 = vld [vmem:[%s2278_s26 + $0x1e8] sm:$0xf]  ;;  %316 = vst [vmem:[%s2285_s27 + $0xec] sm:$0xf] %v315_v59 }
  0x3a   : > { %318 = vst [vmem:[%s2285_s27 + $0xf0] sm:$0xf] %v317_v60  ;;  %320 = vst [vmem:[%s2285_s27 + $0xf4] sm:$0xf] %v319_v61  ;;  %v321_v62 = vld [vmem:[%s2278_s26 + $0x1f0] sm:$0xf] }
  0x3b   : > { %v323_v63 = vld [vmem:[%s2278_s26 + $0x1f8] sm:$0xf]  ;;  %v325_v0 = vld [vmem:[%s2278_s26 + $0x200] sm:$0xf]  ;;  %322 = vst [vmem:[%s2285_s27 + $0xf8] sm:$0xf] %v321_v62 }
  0x3c   : > { %324 = vst [vmem:[%s2285_s27 + $0xfc] sm:$0xf] %v323_v63  ;;  %326 = vst [vmem:[%s2285_s27 + $0x100] sm:$0xf] %v325_v0  ;;  %v327_v1 = vld [vmem:[%s2278_s26 + $0x208] sm:$0xf] }
  0x3d   : > { %v329_v2 = vld [vmem:[%s2278_s26 + $0x210] sm:$0xf]  ;;  %v331_v3 = vld [vmem:[%s2278_s26 + $0x218] sm:$0xf]  ;;  %328 = vst [vmem:[%s2285_s27 + $0x104] sm:$0xf] %v327_v1 }
  0x3e   : > { %330 = vst [vmem:[%s2285_s27 + $0x108] sm:$0xf] %v329_v2  ;;  %332 = vst [vmem:[%s2285_s27 + $0x10c] sm:$0xf] %v331_v3  ;;  %v333_v4 = vld [vmem:[%s2278_s26 + $0x220] sm:$0xf] }
  0x3f   : > { %v335_v5 = vld [vmem:[%s2278_s26 + $0x228] sm:$0xf]  ;;  %v337_v6 = vld [vmem:[%s2278_s26 + $0x230] sm:$0xf]  ;;  %334 = vst [vmem:[%s2285_s27 + $0x110] sm:$0xf] %v333_v4 }
  0x40   : > { %336 = vst [vmem:[%s2285_s27 + $0x114] sm:$0xf] %v335_v5  ;;  %338 = vst [vmem:[%s2285_s27 + $0x118] sm:$0xf] %v337_v6  ;;  %v339_v7 = vld [vmem:[%s2278_s26 + $0x238] sm:$0xf] }
  0x41   : > { %v341_v8 = vld [vmem:[%s2278_s26 + $0x240] sm:$0xf]  ;;  %v343_v9 = vld [vmem:[%s2278_s26 + $0x248] sm:$0xf]  ;;  %340 = vst [vmem:[%s2285_s27 + $0x11c] sm:$0xf] %v339_v7 }
  0x42   : > { %342 = vst [vmem:[%s2285_s27 + $0x120] sm:$0xf] %v341_v8  ;;  %344 = vst [vmem:[%s2285_s27 + $0x124] sm:$0xf] %v343_v9  ;;  %v345_v10 = vld [vmem:[%s2278_s26 + $0x250] sm:$0xf] }
  0x43   : > { %v347_v11 = vld [vmem:[%s2278_s26 + $0x258] sm:$0xf]  ;;  %v349_v12 = vld [vmem:[%s2278_s26 + $0x260] sm:$0xf]  ;;  %346 = vst [vmem:[%s2285_s27 + $0x128] sm:$0xf] %v345_v10 }
  0x44   : > { %348 = vst [vmem:[%s2285_s27 + $0x12c] sm:$0xf] %v347_v11  ;;  %350 = vst [vmem:[%s2285_s27 + $0x130] sm:$0xf] %v349_v12  ;;  %v351_v13 = vld [vmem:[%s2278_s26 + $0x268] sm:$0xf] }
  0x45   : > { %v353_v14 = vld [vmem:[%s2278_s26 + $0x270] sm:$0xf]  ;;  %v355_v15 = vld [vmem:[%s2278_s26 + $0x278] sm:$0xf]  ;;  %352 = vst [vmem:[%s2285_s27 + $0x134] sm:$0xf] %v351_v13 }
  0x46   : > { %354 = vst [vmem:[%s2285_s27 + $0x138] sm:$0xf] %v353_v14  ;;  %356 = vst [vmem:[%s2285_s27 + $0x13c] sm:$0xf] %v355_v15  ;;  %v357_v16 = vld [vmem:[%s2278_s26 + $0x280] sm:$0xf] }
  0x47   : > { %v359_v17 = vld [vmem:[%s2278_s26 + $0x288] sm:$0xf]  ;;  %v361_v18 = vld [vmem:[%s2278_s26 + $0x290] sm:$0xf]  ;;  %358 = vst [vmem:[%s2285_s27 + $0x140] sm:$0xf] %v357_v16 }
  0x48   : > { %360 = vst [vmem:[%s2285_s27 + $0x144] sm:$0xf] %v359_v17  ;;  %362 = vst [vmem:[%s2285_s27 + $0x148] sm:$0xf] %v361_v18  ;;  %v363_v19 = vld [vmem:[%s2278_s26 + $0x298] sm:$0xf] }
  0x49   : > { %v365_v20 = vld [vmem:[%s2278_s26 + $0x2a0] sm:$0xf]  ;;  %v367_v21 = vld [vmem:[%s2278_s26 + $0x2a8] sm:$0xf]  ;;  %364 = vst [vmem:[%s2285_s27 + $0x14c] sm:$0xf] %v363_v19 }
  0x4a   : > { %366 = vst [vmem:[%s2285_s27 + $0x150] sm:$0xf] %v365_v20  ;;  %368 = vst [vmem:[%s2285_s27 + $0x154] sm:$0xf] %v367_v21  ;;  %v369_v22 = vld [vmem:[%s2278_s26 + $0x2b0] sm:$0xf] }
  0x4b   : > { %v371_v23 = vld [vmem:[%s2278_s26 + $0x2b8] sm:$0xf]  ;;  %v373_v24 = vld [vmem:[%s2278_s26 + $0x2c0] sm:$0xf]  ;;  %370 = vst [vmem:[%s2285_s27 + $0x158] sm:$0xf] %v369_v22 }
  0x4c   : > { %372 = vst [vmem:[%s2285_s27 + $0x15c] sm:$0xf] %v371_v23  ;;  %374 = vst [vmem:[%s2285_s27 + $0x160] sm:$0xf] %v373_v24  ;;  %v375_v25 = vld [vmem:[%s2278_s26 + $0x2c8] sm:$0xf] }
  0x4d   : > { %v377_v26 = vld [vmem:[%s2278_s26 + $0x2d0] sm:$0xf]  ;;  %v379_v27 = vld [vmem:[%s2278_s26 + $0x2d8] sm:$0xf]  ;;  %376 = vst [vmem:[%s2285_s27 + $0x164] sm:$0xf] %v375_v25 }
  0x4e   : > { %378 = vst [vmem:[%s2285_s27 + $0x168] sm:$0xf] %v377_v26  ;;  %380 = vst [vmem:[%s2285_s27 + $0x16c] sm:$0xf] %v379_v27  ;;  %v381_v28 = vld [vmem:[%s2278_s26 + $0x2e0] sm:$0xf] }
  0x4f   : > { %v383_v29 = vld [vmem:[%s2278_s26 + $0x2e8] sm:$0xf]  ;;  %v385_v30 = vld [vmem:[%s2278_s26 + $0x2f0] sm:$0xf]  ;;  %382 = vst [vmem:[%s2285_s27 + $0x170] sm:$0xf] %v381_v28 }
  0x50   : > { %384 = vst [vmem:[%s2285_s27 + $0x174] sm:$0xf] %v383_v29  ;;  %386 = vst [vmem:[%s2285_s27 + $0x178] sm:$0xf] %v385_v30  ;;  %v387_v31 = vld [vmem:[%s2278_s26 + $0x2f8] sm:$0xf] }
  0x51   : > { %v389_v32 = vld [vmem:[%s2278_s26 + $0x300] sm:$0xf]  ;;  %v391_v33 = vld [vmem:[%s2278_s26 + $0x308] sm:$0xf]  ;;  %388 = vst [vmem:[%s2285_s27 + $0x17c] sm:$0xf] %v387_v31 }
  0x52   : > { %390 = vst [vmem:[%s2285_s27 + $0x180] sm:$0xf] %v389_v32  ;;  %392 = vst [vmem:[%s2285_s27 + $0x184] sm:$0xf] %v391_v33  ;;  %v393_v34 = vld [vmem:[%s2278_s26 + $0x310] sm:$0xf] }
  0x53   : > { %v395_v35 = vld [vmem:[%s2278_s26 + $0x318] sm:$0xf]  ;;  %v397_v36 = vld [vmem:[%s2278_s26 + $0x320] sm:$0xf]  ;;  %394 = vst [vmem:[%s2285_s27 + $0x188] sm:$0xf] %v393_v34 }
  0x54   : > { %396 = vst [vmem:[%s2285_s27 + $0x18c] sm:$0xf] %v395_v35  ;;  %398 = vst [vmem:[%s2285_s27 + $0x190] sm:$0xf] %v397_v36  ;;  %v399_v37 = vld [vmem:[%s2278_s26 + $0x328] sm:$0xf] }
  0x55   : > { %v401_v38 = vld [vmem:[%s2278_s26 + $0x330] sm:$0xf]  ;;  %v403_v39 = vld [vmem:[%s2278_s26 + $0x338] sm:$0xf]  ;;  %400 = vst [vmem:[%s2285_s27 + $0x194] sm:$0xf] %v399_v37 }
  0x56   : > { %402 = vst [vmem:[%s2285_s27 + $0x198] sm:$0xf] %v401_v38  ;;  %404 = vst [vmem:[%s2285_s27 + $0x19c] sm:$0xf] %v403_v39  ;;  %v405_v40 = vld [vmem:[%s2278_s26 + $0x340] sm:$0xf] }
  0x57   : > { %v407_v41 = vld [vmem:[%s2278_s26 + $0x348] sm:$0xf]  ;;  %v409_v42 = vld [vmem:[%s2278_s26 + $0x350] sm:$0xf]  ;;  %406 = vst [vmem:[%s2285_s27 + $0x1a0] sm:$0xf] %v405_v40 }
  0x58   : > { %408 = vst [vmem:[%s2285_s27 + $0x1a4] sm:$0xf] %v407_v41  ;;  %410 = vst [vmem:[%s2285_s27 + $0x1a8] sm:$0xf] %v409_v42  ;;  %v411_v43 = vld [vmem:[%s2278_s26 + $0x358] sm:$0xf] }
  0x59   : > { %v413_v44 = vld [vmem:[%s2278_s26 + $0x360] sm:$0xf]  ;;  %v415_v45 = vld [vmem:[%s2278_s26 + $0x368] sm:$0xf]  ;;  %412 = vst [vmem:[%s2285_s27 + $0x1ac] sm:$0xf] %v411_v43 }
  0x5a   : > { %414 = vst [vmem:[%s2285_s27 + $0x1b0] sm:$0xf] %v413_v44  ;;  %416 = vst [vmem:[%s2285_s27 + $0x1b4] sm:$0xf] %v415_v45  ;;  %v417_v46 = vld [vmem:[%s2278_s26 + $0x370] sm:$0xf] }
  0x5b   : > { %v419_v47 = vld [vmem:[%s2278_s26 + $0x378] sm:$0xf]  ;;  %v421_v48 = vld [vmem:[%s2278_s26 + $0x380] sm:$0xf]  ;;  %418 = vst [vmem:[%s2285_s27 + $0x1b8] sm:$0xf] %v417_v46 }
  0x5c   : > { %420 = vst [vmem:[%s2285_s27 + $0x1bc] sm:$0xf] %v419_v47  ;;  %422 = vst [vmem:[%s2285_s27 + $0x1c0] sm:$0xf] %v421_v48  ;;  %v423_v49 = vld [vmem:[%s2278_s26 + $0x388] sm:$0xf] }
  0x5d   : > { %v425_v50 = vld [vmem:[%s2278_s26 + $0x390] sm:$0xf]  ;;  %v427_v51 = vld [vmem:[%s2278_s26 + $0x398] sm:$0xf]  ;;  %424 = vst [vmem:[%s2285_s27 + $0x1c4] sm:$0xf] %v423_v49 }
  0x5e   : > { %426 = vst [vmem:[%s2285_s27 + $0x1c8] sm:$0xf] %v425_v50  ;;  %428 = vst [vmem:[%s2285_s27 + $0x1cc] sm:$0xf] %v427_v51  ;;  %v429_v52 = vld [vmem:[%s2278_s26 + $0x3a0] sm:$0xf] }
  0x5f   : > { %v431_v53 = vld [vmem:[%s2278_s26 + $0x3a8] sm:$0xf]  ;;  %v433_v54 = vld [vmem:[%s2278_s26 + $0x3b0] sm:$0xf]  ;;  %430 = vst [vmem:[%s2285_s27 + $0x1d0] sm:$0xf] %v429_v52 }
  0x60   : > { %432 = vst [vmem:[%s2285_s27 + $0x1d4] sm:$0xf] %v431_v53  ;;  %434 = vst [vmem:[%s2285_s27 + $0x1d8] sm:$0xf] %v433_v54  ;;  %v435_v55 = vld [vmem:[%s2278_s26 + $0x3b8] sm:$0xf] }
  0x61   : > { %v437_v56 = vld [vmem:[%s2278_s26 + $0x3c0] sm:$0xf]  ;;  %v439_v57 = vld [vmem:[%s2278_s26 + $0x3c8] sm:$0xf]  ;;  %436 = vst [vmem:[%s2285_s27 + $0x1dc] sm:$0xf] %v435_v55 }
  0x62   : > { %438 = vst [vmem:[%s2285_s27 + $0x1e0] sm:$0xf] %v437_v56  ;;  %440 = vst [vmem:[%s2285_s27 + $0x1e4] sm:$0xf] %v439_v57  ;;  %v441_v58 = vld [vmem:[%s2278_s26 + $0x3d0] sm:$0xf] }
  0x63   : > { %v443_v59 = vld [vmem:[%s2278_s26 + $0x3d8] sm:$0xf]  ;;  %v445_v60 = vld [vmem:[%s2278_s26 + $0x3e0] sm:$0xf]  ;;  %442 = vst [vmem:[%s2285_s27 + $0x1e8] sm:$0xf] %v441_v58 }
  0x64   : > { %444 = vst [vmem:[%s2285_s27 + $0x1ec] sm:$0xf] %v443_v59  ;;  %446 = vst [vmem:[%s2285_s27 + $0x1f0] sm:$0xf] %v445_v60  ;;  %v447_v61 = vld [vmem:[%s2278_s26 + $0x3e8] sm:$0xf] }
  0x65   : > { %v449_v62 = vld [vmem:[%s2278_s26 + $0x3f0] sm:$0xf]  ;;  %v451_v63 = vld [vmem:[%s2278_s26 + $0x3f8] sm:$0xf]  ;;  %448 = vst [vmem:[%s2285_s27 + $0x1f4] sm:$0xf] %v447_v61 }
  0x66   : > { %450 = vst [vmem:[%s2285_s27 + $0x1f8] sm:$0xf] %v449_v62  ;;  %452 = vst [vmem:[%s2285_s27 + $0x1fc] sm:$0xf] %v451_v63  ;;  %v453_v0 = vld [vmem:[%s2278_s26 + $0x400] sm:$0xf] }
  0x67   : > { %v455_v1 = vld [vmem:[%s2278_s26 + $0x408] sm:$0xf]  ;;  %v457_v2 = vld [vmem:[%s2278_s26 + $0x410] sm:$0xf]  ;;  %454 = vst [vmem:[%s2285_s27 + $0x200] sm:$0xf] %v453_v0 }
  0x68   : > { %456 = vst [vmem:[%s2285_s27 + $0x204] sm:$0xf] %v455_v1  ;;  %458 = vst [vmem:[%s2285_s27 + $0x208] sm:$0xf] %v457_v2  ;;  %v459_v3 = vld [vmem:[%s2278_s26 + $0x418] sm:$0xf] }
  0x69   : > { %v461_v4 = vld [vmem:[%s2278_s26 + $0x420] sm:$0xf]  ;;  %v463_v5 = vld [vmem:[%s2278_s26 + $0x428] sm:$0xf]  ;;  %460 = vst [vmem:[%s2285_s27 + $0x20c] sm:$0xf] %v459_v3 }
  0x6a   : > { %462 = vst [vmem:[%s2285_s27 + $0x210] sm:$0xf] %v461_v4  ;;  %464 = vst [vmem:[%s2285_s27 + $0x214] sm:$0xf] %v463_v5  ;;  %v465_v6 = vld [vmem:[%s2278_s26 + $0x430] sm:$0xf] }
  0x6b   : > { %v467_v7 = vld [vmem:[%s2278_s26 + $0x438] sm:$0xf]  ;;  %v469_v8 = vld [vmem:[%s2278_s26 + $0x440] sm:$0xf]  ;;  %466 = vst [vmem:[%s2285_s27 + $0x218] sm:$0xf] %v465_v6 }
  0x6c   : > { %468 = vst [vmem:[%s2285_s27 + $0x21c] sm:$0xf] %v467_v7  ;;  %470 = vst [vmem:[%s2285_s27 + $0x220] sm:$0xf] %v469_v8  ;;  %v471_v9 = vld [vmem:[%s2278_s26 + $0x448] sm:$0xf] }
  0x6d   : > { %v473_v10 = vld [vmem:[%s2278_s26 + $0x450] sm:$0xf]  ;;  %v475_v11 = vld [vmem:[%s2278_s26 + $0x458] sm:$0xf]  ;;  %472 = vst [vmem:[%s2285_s27 + $0x224] sm:$0xf] %v471_v9 }
  0x6e   : > { %474 = vst [vmem:[%s2285_s27 + $0x228] sm:$0xf] %v473_v10  ;;  %476 = vst [vmem:[%s2285_s27 + $0x22c] sm:$0xf] %v475_v11  ;;  %v477_v12 = vld [vmem:[%s2278_s26 + $0x460] sm:$0xf] }
  0x6f   : > { %v479_v13 = vld [vmem:[%s2278_s26 + $0x468] sm:$0xf]  ;;  %v481_v14 = vld [vmem:[%s2278_s26 + $0x470] sm:$0xf]  ;;  %478 = vst [vmem:[%s2285_s27 + $0x230] sm:$0xf] %v477_v12 }
  0x70   : > { %480 = vst [vmem:[%s2285_s27 + $0x234] sm:$0xf] %v479_v13  ;;  %482 = vst [vmem:[%s2285_s27 + $0x238] sm:$0xf] %v481_v14  ;;  %v483_v15 = vld [vmem:[%s2278_s26 + $0x478] sm:$0xf] }
  0x71   : > { %484 = vst [vmem:[%s2285_s27 + $0x23c] sm:$0xf] %v483_v15 }
  0x72 PF: > { %p1843_p6 = scmp.ge.s32.totalorder %s2211_s16, 1  ;;  %p801_p7 = scmp.lt.s32.totalorder %s2211_s16, 3 }
  0x74   : > { %p802_p8 = pnand %p1843_p6, %p801_p7 }
  0x75   : > { %s808_s28 = sand.u32 (!%p802_p8), 1, %s2195_s12   ;;  %v2576_v16 = vld [vmem:[%s2709_s0] sm:$0xff] (!%p802_p8)  ;;  %v2581_v17 = vld [vmem:[%s2709_s0 + $0x8] sm:$0xff] (!%p802_p8)  ;;  %v2621_v49 = vld [vmem:[%s2709_s0 + $0x10] sm:$0xff] (!%p802_p8)  ;;  %vm2214_vm0 = vmmov (!%p802_p8), 0   ;;  %p858_p9 = scmp.lt.s32.totalorder (!%p802_p8), %s2203_s14, 1 }
  0x76   : > { %805 = sbr.rel (%p802_p8) target bundleno = 443 (0x1bb), region = 69  ;;  %v1847_v18 = vcombine.high (!%p802_p8), %v2576_v16, %v2576_v16  ;;  %v1849_v19 = vcombine.high (!%p802_p8), %v2581_v17, %v2581_v17  ;;  %v2628_v52 = vld [vmem:[%s2709_s0 + $0x18] sm:$0xff] (!%p802_p8)  ;;  %v1846_v54 = vcombine.low (!%p802_p8), %v2576_v16, %v2576_v16  ;;  %v1848_v55 = vcombine.low (!%p802_p8), %v2581_v17, %v2581_v17 }
  0x77   : > { %s2049_s6 = smul.u32 (!%p802_p8), 576, %s808_s28  ;;  %v1851_v58 = vcombine.high (!%p802_p8), %v2621_v49, %v2621_v49  ;;  %v1853_v61 = vcombine.high (!%p802_p8), %v2628_v52, %v2628_v52 }
  0x78   : > { %1516 = vmatprep.mubr.bf16.mxu0 (!%p802_p8), %v1847_v18  ;;  %1556 = vmatprep.mubr.bf16.mxu1 (!%p802_p8), %v1849_v19 }
  0x79   : > { %s2587_s7 = scalar_lea.vmem (!%p802_p8), [#allocation3], %s2049_s6 }
  0x7a   : > { %v2092_v20 = vld [vmem:[%s2587_s7 + $0x40] sm:$0xff] (!%p802_p8)   ;;  %v2096_v24 = vld [vmem:[%s2587_s7 + $0x48] sm:$0xff] (!%p802_p8)   ;;  %v2100_v28 = vld [vmem:[%s2587_s7 + $0x50] sm:$0xff] (!%p802_p8)  }
  0x7b   : > { %v2093_v21 = vld [vmem:[%s2587_s7 + $0xc0] sm:$0xff] (!%p802_p8)   ;;  %1931 = vmatprep.subr.bf16.mxu0 (!%p802_p8), %v2092_v20  ;;  %v2097_v25 = vld [vmem:[%s2587_s7 + $0xc8] sm:$0xff] (!%p802_p8)   ;;  %v2101_v29 = vld [vmem:[%s2587_s7 + $0xd0] sm:$0xff] (!%p802_p8)  }
  0x7c   : > { %v2094_v22 = vld [vmem:[%s2587_s7] sm:$0xff] (!%p802_p8)   ;;  %1953 = vmatprep.subr.bf16.mxu1 (!%p802_p8), %v2093_v21  ;;  %v2098_v26 = vld [vmem:[%s2587_s7 + $0x8] sm:$0xff] (!%p802_p8)   ;;  %v2102_v30 = vld [vmem:[%s2587_s7 + $0x10] sm:$0xff] (!%p802_p8)  }
  0x7d   : > { %v2095_v23 = vld [vmem:[%s2587_s7 + $0x80] sm:$0xff]   ;;  %1932 = vmatpush3.bf16.msra.mxu0 %v2094_v22  ;;  %v2099_v27 = vld [vmem:[%s2587_s7 + $0x88] sm:$0xff]   ;;  %v2103_v31 = vld [vmem:[%s2587_s7 + $0x90] sm:$0xff]   ;;  %s2720_s14 = smov (!%p858_p9, %s2203_s14), 1 }
  0x7e   : > { %1954 = vmatpush3.bf16.msra.mxu1 %v2095_v23  ;;  %1933 = vmatprep.subr.bf16.mxu0 %v2096_v24  ;;  %v2104_v32 = vld [vmem:[%s2587_s7 + $0x58] sm:$0xff]   ;;  %v2108_v36 = vld [vmem:[%s2587_s7 + $0x60] sm:$0xff]   ;;  %v2112_v40 = vld [vmem:[%s2587_s7 + $0x68] sm:$0xff]   ;;  %s1844_s19 = sshll.u32 %s2720_s14, 1  ;;  %s1845_s24 = sshll.u32 %s2720_s14, 2 }
  0x7f   : > { %1955 = vmatprep.subr.bf16.mxu1 %v2097_v25  ;;  %v2105_v33 = vld [vmem:[%s2587_s7 + $0xd8] sm:$0xff]   ;;  %v2109_v37 = vld [vmem:[%s2587_s7 + $0xe0] sm:$0xff]   ;;  %v2113_v41 = vld [vmem:[%s2587_s7 + $0xe8] sm:$0xff]   ;;  %v1850_v25 = vcombine.low %v2621_v49, %v2621_v49  ;;  %s861_s23 = scalar_lea.vmem %s2711_s2, %s1844_s19  ;;  %s869_s27 = scalar_lea.vmem %s2712_s3, %s1845_s24 }
  0x80   : > { %v2106_v34 = vld [vmem:[%s2587_s7 + $0x18] sm:$0xff]   ;;  %v2110_v38 = vld [vmem:[%s2587_s7 + $0x20] sm:$0xff]   ;;  %v2114_v42 = vld [vmem:[%s2587_s7 + $0x28] sm:$0xff]  }
  0x81   : > { %1934 = vmatpush3.bf16.msra.mxu0 %v2098_v26  ;;  %v2107_v35 = vld [vmem:[%s2587_s7 + $0x98] sm:$0xff]   ;;  %v2111_v39 = vld [vmem:[%s2587_s7 + $0xa0] sm:$0xff]   ;;  %v2115_v43 = vld [vmem:[%s2587_s7 + $0xa8] sm:$0xff]  }
  0x82   : > { %1956 = vmatpush3.bf16.msra.mxu1 %v2099_v27  ;;  %1935 = vmatprep.subr.bf16.mxu0 %v2100_v28  ;;  %v2116_v44 = vld [vmem:[%s2587_s7 + $0x70] sm:$0xff]   ;;  %v2120_v48 = vld [vmem:[%s2587_s7 + $0x78] sm:$0xff]   ;;  %v2128_v56 = vld [vmem:[%s2587_s7 + $0x140] sm:$0xff]   ;;  %v2213_v28 = vmov 0.0  }
  0x83   : > { %1957 = vmatprep.subr.bf16.mxu1 %v2101_v29  ;;  %v2117_v45 = vld [vmem:[%s2587_s7 + $0xf0] sm:$0xff]   ;;  %v2121_v50 = vld [vmem:[%s2587_s7 + $0xf8] sm:$0xff]   ;;  %v2129_v57 = vld [vmem:[%s2587_s7 + $0x100] sm:$0xff]   ;;  %v1852_v29 = vcombine.low %v2628_v52, %v2628_v52 }
  0x84   : > { %v2118_v46 = vld [vmem:[%s2587_s7 + $0x30] sm:$0xff]   ;;  %v2122_v51 = vld [vmem:[%s2587_s7 + $0x38] sm:$0xff]   ;;  %v2130_v59 = vld [vmem:[%s2587_s7 + $0x1c0] sm:$0xff]  }
  0x85   : > { %1936 = vmatpush3.bf16.msra.mxu0 %v2102_v30  ;;  %v2119_v47 = vld [vmem:[%s2587_s7 + $0xb0] sm:$0xff]   ;;  %v2123_v53 = vld [vmem:[%s2587_s7 + $0xb8] sm:$0xff]   ;;  %v2131_v60 = vld [vmem:[%s2587_s7 + $0x180] sm:$0xff]  }
  0x86   : > { %1958 = vmatpush3.bf16.msra.mxu1 %v2103_v31  ;;  %1937 = vmatprep.subr.bf16.mxu0 %v2104_v32  ;;  %v2132_v62 = vld [vmem:[%s2587_s7 + $0x148] sm:$0xff]   ;;  %v2136_v2 = vld [vmem:[%s2587_s7 + $0x150] sm:$0xff]   ;;  %v2140_v6 = vld [vmem:[%s2587_s7 + $0x158] sm:$0xff]  }
  0x87   : > { %1959 = vmatprep.subr.bf16.mxu1 %v2105_v33  ;;  %v2133_v63 = vld [vmem:[%s2587_s7 + $0x108] sm:$0xff]   ;;  %v2137_v3 = vld [vmem:[%s2587_s7 + $0x110] sm:$0xff]   ;;  %v2141_v7 = vld [vmem:[%s2587_s7 + $0x118] sm:$0xff]  }
  0x88   : > { %v2134_v0 = vld [vmem:[%s2587_s7 + $0x1c8] sm:$0xff]   ;;  %v2138_v4 = vld [vmem:[%s2587_s7 + $0x1d0] sm:$0xff]   ;;  %v2142_v8 = vld [vmem:[%s2587_s7 + $0x1d8] sm:$0xff]  }
  0x89   : > { %1938 = vmatpush3.bf16.msra.mxu0 %v2106_v34  ;;  %v2135_v1 = vld [vmem:[%s2587_s7 + $0x188] sm:$0xff]   ;;  %v2139_v5 = vld [vmem:[%s2587_s7 + $0x190] sm:$0xff]   ;;  %v2143_v9 = vld [vmem:[%s2587_s7 + $0x198] sm:$0xff]  }
  0x8a   : > { %1960 = vmatpush3.bf16.msra.mxu1 %v2107_v35  ;;  %1939 = vmatprep.subr.bf16.mxu0 %v2108_v36  ;;  %v2144_v10 = vld [vmem:[%s2587_s7 + $0x160] sm:$0xff]   ;;  %v2148_v14 = vld [vmem:[%s2587_s7 + $0x168] sm:$0xff]   ;;  %v2152_v18 = vld [vmem:[%s2587_s7 + $0x170] sm:$0xff]  }
  0x8b   : > { %1961 = vmatprep.subr.bf16.mxu1 %v2109_v37  ;;  %v2145_v11 = vld [vmem:[%s2587_s7 + $0x120] sm:$0xff]   ;;  %v2149_v15 = vld [vmem:[%s2587_s7 + $0x128] sm:$0xff]   ;;  %v2153_v19 = vld [vmem:[%s2587_s7 + $0x130] sm:$0xff]  }
  0x8c   : > { %v2146_v12 = vld [vmem:[%s2587_s7 + $0x1e0] sm:$0xff]   ;;  %v2150_v16 = vld [vmem:[%s2587_s7 + $0x1e8] sm:$0xff]   ;;  %v2154_v20 = vld [vmem:[%s2587_s7 + $0x1f0] sm:$0xff]  }
  0x8d   : > { %1940 = vmatpush3.bf16.msra.mxu0 %v2110_v38  ;;  %v2147_v13 = vld [vmem:[%s2587_s7 + $0x1a0] sm:$0xff]   ;;  %v2151_v17 = vld [vmem:[%s2587_s7 + $0x1a8] sm:$0xff]   ;;  %v2155_v21 = vld [vmem:[%s2587_s7 + $0x1b0] sm:$0xff]  }
  0x8e   : > { %1962 = vmatpush3.bf16.msra.mxu1 %v2111_v39  ;;  %1941 = vmatprep.subr.bf16.mxu0 %v2112_v40  ;;  %v2156_v22 = vld [vmem:[%s2587_s7 + $0x178] sm:$0xff]   ;;  %v2164_v27 = vld [vmem:[%s2587_s7 + $0x200] sm:$0xff]   ;;  %v2165_v30 = vld [vmem:[%s2587_s7 + $0x208] sm:$0xff]  }
  0x8f   : > { %1963 = vmatprep.subr.bf16.mxu1 %v2113_v41  ;;  %v2157_v23 = vld [vmem:[%s2587_s7 + $0x138] sm:$0xff]   ;;  %v2166_v31 = vld [vmem:[%s2587_s7 + $0x210] sm:$0xff]   ;;  %v2168_v33 = vld [vmem:[%s2587_s7 + $0x220] sm:$0xff]  }
  0x90   : > { %v2158_v24 = vld [vmem:[%s2587_s7 + $0x1f8] sm:$0xff]   ;;  %v2169_v34 = vld [vmem:[%s2587_s7 + $0x228] sm:$0xff]   ;;  %v2170_v35 = vld [vmem:[%s2587_s7 + $0x230] sm:$0xff]  }
  0x91   : > { %1942 = vmatpush3.bf16.msra.mxu0 %v2114_v42  ;;  %v2161_v26 = vld [vmem:[%s2587_s7 + $0x1b8] sm:$0xff]   ;;  %v2172_v37 = vld [vmem:[%s2709_s0 + $0x20] ss:$0 sps:$4 sm:$0xff]  }
  0x92   : > { %1964 = vmatpush3.bf16.msra.mxu1 %v2115_v43  ;;  %1943 = vmatprep.subr.bf16.mxu0 %v2116_v44  ;;  %v2167_v32 = vld [vmem:[%s2587_s7 + $0x218] sm:$0xff]  }
  0x93   : > { %1965 = vmatprep.subr.bf16.mxu1 %v2117_v45  ;;  %v2171_v36 = vld [vmem:[%s2587_s7 + $0x238] sm:$0xff]  }
  0x95   : > { %1944 = vmatpush3.bf16.msra.mxu0 %v2118_v46 }
  0x96   : > { %1966 = vmatpush3.bf16.msra.mxu1 %v2119_v47  ;;  %1945 = vmatprep.subr.bf16.mxu0 %v2120_v48 }
  0x97   : > { %1967 = vmatprep.subr.bf16.mxu1 %v2121_v50 }
  0x99   : > { %1946 = vmatpush3.bf16.msra.mxu0 %v2122_v51 }
  0x9a   : > { %1968 = vmatpush3.bf16.msra.mxu1 %v2123_v53  ;;  %1975 = vmatprep.subr.bf16.mxu0 %v2128_v56 }
  0x9b   : > { %1997 = vmatprep.subr.bf16.mxu1 %v2130_v59 }
  0x9c   : > { %1517 = vmatmul.mubr.bf16.vlgmr.msra.gmra.mrb[0].mxu0 %v1846_v54 }
  0x9d   : > { %1557 = vmatmul.mubr.bf16.vlgmr.msra.gmra.mrb[0].mxu1 %v1848_v55  ;;  %1976 = vmatpush3.bf16.msra.mxu0 %v2129_v57 }
  0x9e   : > { %1596 = vmatprep.mubr.bf16.mxu0 %v1851_v58  ;;  %1998 = vmatpush3.bf16.msra.mxu1 %v2131_v60 }
  0x9f   : > { %1977 = vmatprep.subr.bf16.mxu0 %v2132_v62  ;;  %1636 = vmatprep.mubr.bf16.mxu1 %v1853_v61  ;;  %v1927_v62 = vld [vmem:[%s861_s23] ss:$0 sm:$0xff] }
  0xa0   : > { %1999 = vmatprep.subr.bf16.mxu1 %v2134_v0 }
  0xa1   : > { %1978 = vmatpush3.bf16.msra.mxu0 %v2133_v63 }
  0xa2   : > { %2000 = vmatpush3.bf16.msra.mxu1 %v2135_v1  ;;  %1979 = vmatprep.subr.bf16.mxu0 %v2136_v2  ;;  %v1928_v1 = vld [vmem:[%s861_s23 + $0x1] ss:$0 sm:$0xff] }
  0xa3   : > { %2001 = vmatprep.subr.bf16.mxu1 %v2138_v4 }
  0xa5   : > { %1980 = vmatpush3.bf16.msra.mxu0 %v2137_v3 }
  0xa6   : > { %2002 = vmatpush3.bf16.msra.mxu1 %v2139_v5  ;;  %1981 = vmatprep.subr.bf16.mxu0 %v2140_v6 }
  0xa7   : > { %2003 = vmatprep.subr.bf16.mxu1 %v2142_v8 }
  0xa9   : > { %1982 = vmatpush3.bf16.msra.mxu0 %v2141_v7 }
  0xaa   : > { %2004 = vmatpush3.bf16.msra.mxu1 %v2143_v9  ;;  %1983 = vmatprep.subr.bf16.mxu0 %v2144_v10 }
  0xab   : > { %2005 = vmatprep.subr.bf16.mxu1 %v2146_v12 }
  0xad   : > { %1984 = vmatpush3.bf16.msra.mxu0 %v2145_v11 }
  0xae   : > { %2006 = vmatpush3.bf16.msra.mxu1 %v2147_v13  ;;  %1985 = vmatprep.subr.bf16.mxu0 %v2148_v14 }
  0xaf   : > { %2007 = vmatprep.subr.bf16.mxu1 %v2150_v16 }
  0xb1   : > { %1986 = vmatpush3.bf16.msra.mxu0 %v2149_v15 }
  0xb2   : > { %2008 = vmatpush3.bf16.msra.mxu1 %v2151_v17  ;;  %1987 = vmatprep.subr.bf16.mxu0 %v2152_v18 }
  0xb3   : > { %2009 = vmatprep.subr.bf16.mxu1 %v2154_v20 }
  0xb5   : > { %1988 = vmatpush3.bf16.msra.mxu0 %v2153_v19 }
  0xb6   : > { %2010 = vmatpush3.bf16.msra.mxu1 %v2155_v21  ;;  %1989 = vmatprep.subr.bf16.mxu0 %v2156_v22 }
  0xb7   : > { %2011 = vmatprep.subr.bf16.mxu1 %v2158_v24 }
  0xb9   : > { %1990 = vmatpush3.bf16.msra.mxu0 %v2157_v23 }
  0xba   : > { %2028 = vmatprep.subr.bf16.mxu0 %v2213_v28  ;;  %2012 = vmatpush3.bf16.msra.mxu1 %v2161_v26 }
  0xbc   : > { %1597 = vmatmul.mubr.bf16.vlgmr.msra.gmra.mrb[4].mxu0 %v1850_v25 }
  0xbd   : > { %2029 = vmatpush3.bf16.msra.mxu0 %v2164_v27  ;;  %2044 = vmatprep.mubr.msk.bf16.mxu0 %vm2214_vm0, %v2213_v28 }
  0xbe   : > { %1637 = vmatmul.mubr.bf16.vlgmr.msra.gmra.mrb[4].mxu1 %v1852_v29  ;;  %2030 = vmatprep.subr.bf16.mxu0 %v2213_v28 }
  0xc1   : > { %2031 = vmatpush3.bf16.msra.mxu0 %v2165_v30 }
  0xc2   : > { %2032 = vmatprep.subr.bf16.mxu0 %v2213_v28 }
  0xc5   : > { %2033 = vmatpush3.bf16.msra.mxu0 %v2166_v31 }
  0xc6   : > { %2034 = vmatprep.subr.bf16.mxu0 %v2213_v28 }
  0xc9   : > { %2035 = vmatpush3.bf16.msra.mxu0 %v2167_v32 }
  0xca   : > { %2036 = vmatprep.subr.bf16.mxu0 %v2213_v28 }
  0xcd   : > { %2037 = vmatpush3.bf16.msra.mxu0 %v2168_v33 }
  0xce   : > { %2038 = vmatprep.subr.bf16.mxu0 %v2213_v28 }
  0xd1   : > { %2039 = vmatpush3.bf16.msra.mxu0 %v2169_v34 }
  0xd2   : > { %2040 = vmatprep.subr.bf16.mxu0 %v2213_v28 }
  0xd5   : > { %2041 = vmatpush3.bf16.msra.mxu0 %v2170_v35 }
  0xd6   : > { %2042 = vmatprep.subr.bf16.mxu0 %v2213_v28 }
  0xd9   : > { %2043 = vmatpush3.bf16.msra.mxu0 %v2171_v36 }
  0xdc   : > { %2045 = vmatmul.mubr.bf16.vlgmr.msra.gmra.mrb[8].mxu0 %v2172_v37 }
 0x16f   : > { %v1947_v38 = vpop.f32.mrb[0].mxu0 }
 0x170   : > { %v1969_v39 = vpop.f32.mrb[0].mxu1  ;;  %v1948_v40 = vpop.f32.mrb[1].mxu0 }
 0x171   : > { %v1949_v41 = vadd.f32 %v1948_v40, %v1947_v38  ;;  %v1970_v42 = vpop.f32.mrb[1].mxu1  ;;  %v1950_v43 = vpop.f32.mrb[2].mxu0 }
 0x172   : > { %v1971_v44 = vadd.f32 %v1970_v42, %v1969_v39  ;;  %v1951_v45 = vpop.f32.mrb[3].mxu0  ;;  %v1972_v46 = vpop.f32.mrb[2].mxu1 }
 0x173   : > { %v1973_v47 = vpop.f32.mrb[3].mxu1 }
 0x174   : > { %v1559_v48 = vadd.f32 %v1971_v44, %v1949_v41 }
 0x18f   : > { %v1991_v49 = vpop.f32.mrb[4].mxu0 }
 0x190   : > { %v1992_v50 = vpop.f32.mrb[5].mxu0 }
 0x191   : > { %v1993_v51 = vadd.f32 %v1992_v50, %v1991_v49  ;;  %v1994_v52 = vpop.f32.mrb[6].mxu0  ;;  %v2013_v53 = vpop.f32.mrb[4].mxu1 }
 0x192   : > { %v1995_v54 = vpop.f32.mrb[7].mxu0  ;;  %v2014_v55 = vpop.f32.mrb[5].mxu1 }
 0x193   : > { %v1599_v56 = vadd.f32 %v1993_v51, %v1559_v48  ;;  %v2015_v57 = vadd.f32 %v2014_v55, %v2013_v53  ;;  %v2016_v58 = vpop.f32.mrb[6].mxu1 }
 0x194   : > { %v2017_v59 = vpop.f32.mrb[7].mxu1 }
 0x195   : > { %v1639_v60 = vadd.f32 %v2015_v57, %v1599_v56 }
 0x1af   : > { %v1678_v61 = vpop.f32.mrb[8].mxu0 }
 0x1b0   : > { %v1679_v63 = vadd.f32 %v1678_v61, %v1639_v60  ;;  %v2046_v0 = vpop.f32.mrb[9].mxu0 }
 0x1b1   : > { %v1681_v2 = vpop.f32.mrb[10].mxu0 }
 0x1b2   : > { %v1705_v3 = vmul.f32 %v1927_v62, %v1679_v63  ;;  %v2047_v4 = vpop.f32.mrb[11].mxu0 }
 0x1b4   : > { %v1711_v5 = vadd.f32 %v1928_v1, %v1705_v3 }
 0x1b6   : > { %v1712_v6 = vmax.f32 %v1711_v5, 0.0 }
 0x1b8   : > { %v1713_v7 = vpack.c.bf16 %v1712_v6, %v1712_v6 }
 0x1ba   : > { %1714 = vst [vmem:[%s869_s27] sm:$0xf] %v1713_v7 }
 0x1bb PF: > { %s13_s16 = sadd.s32 1, %s2211_s16   ;;  %s2713_s12 = smov %s2199_s13 }
 0x1bc   : > { %p10_p10 = scmp.ge.s32.totalorder %s13_s16, 4   ;;  %s2714_s13 = smov %s2270_s20 }
 0x1bd   : > { %s2715_s14 = smov %s2207_s15  ;;  %s2716_s15 = smov %s2718_s17 }
 0x1be   :  { %12 = sbr.rel (!%p10_p10) target bundleno = 3 (0x3), region = 126 }

// kernel: resnet_forward.20
= control target key start
LH: loop header
LB: loop body
LE: loop exit
PB: predicated region body
PF: predicated region fallthrough
CT: control target
= control target key end

     0   :  { %s769_s12 = smov 0   ;;  %s771_s13 = smov 0   ;;  %s859_s0 = inlined_call_operand.vmem [shape: bf16[8,128], index: 0, kind: input, shape index: {}]   ;;  %s860_s1 = inlined_call_operand.vmem [shape: bf16[128,256], index: 1, kind: input, shape index: {}]   ;;  %s861_s2 = inlined_call_operand.vmem [shape: f32[2,256], index: 2, kind: input, shape index: {}]   ;;  %s862_s3 = inlined_call_operand.vmem [shape: bf16[8,256], index: 3, kind: output, shape index: {}]  }
   0x1   :  { %s773_s14 = smov 0   ;;  %s775_s15 = smov 0  }
   0x2   :  { %s777_s16 = smov 0  }
   0x3 LB: > { %s28_s17 = sadd.s32 1, %s741_s15  ;;  %p76_p1 = scmp.ne.s32.totalorder %s733_s13, %s729_s12  ;;  %s745_s16 = sphi %s777_s16, %s13_s16   ;;  %s741_s15 = sphi %s775_s15, %s866_s15   ;;  %s737_s14 = sphi %s773_s14, %s865_s14   ;;  %s733_s13 = sphi %s771_s13, %s864_s13   ;;  %s729_s12 = sphi %s769_s12, %s863_s12  }
   0x4   : > { %p30_p0 = scmp.ge.s32.totalorder %s28_s17, 2  ;;  %p77_p2 = scmp.eq.s32.totalorder %s745_s16, 0 }
   0x5   : > { %s69_s19 = sadd.s32 1, %s733_s13  ;;  %p609_p5 = scmp.ge.s32.totalorder %s745_s16, 2 }
   0x6   : > { %s868_s17 = smov (%p30_p0, %s28_s17), 0  ;;  %p78_p3 = por %p77_p2, %p76_p1 }
   0x7   : > { %s65_s18 = ssub.s32 %s741_s15, %s868_s17  ;;  %166 = sbr.rel (%p609_p5) target bundleno = 28 (0x1c), region = 20 }
   0x8   : > { %p67_p4 = scmp.eq.s32.totalorder %s65_s18, 0 }
   0xa   : > { %s804_s20 = scalar_select %p67_p4, %s733_s13, %s69_s19  }
   0xe   : > { %169 = sbr.rel (!%p78_p3) target bundleno = 28 (0x1c), region = 24  ;;  %s171_s21 = sand.u32 (%p78_p3), 1, %s733_s13  }
   0xf   : > { %s611_s22 = sshll.u32 (%p78_p3), %s741_s15, 2  ;;  %s610_s23 = sshll.u32 (%p78_p3), %s171_s21, 6 }
  0x10   : > { %s812_s26 = scalar_lea.vmem (%p78_p3), %s860_s1, %s611_s22  ;;  %s173_s27 = scalar_lea.vmem (%p78_p3), [#allocation3], %s610_s23 }
  0x11   : > { %v194_v0 = vld [vmem:[%s812_s26] sm:$0xf] (%p78_p3)  ;;  %v196_v1 = vld [vmem:[%s812_s26 + $0x8] sm:$0xf] (%p78_p3)  ;;  %v198_v2 = vld [vmem:[%s812_s26 + $0x10] sm:$0xf] (%p78_p3) }
  0x12   : > { %195 = vst [vmem:[%s173_s27] sm:$0xf] (%p78_p3), %v194_v0  ;;  %197 = vst [vmem:[%s173_s27 + $0x4] sm:$0xf] (%p78_p3), %v196_v1  ;;  %v200_v3 = vld [vmem:[%s812_s26 + $0x18] sm:$0xf] (%p78_p3) }
  0x13   : > { %v202_v4 = vld [vmem:[%s812_s26 + $0x20] sm:$0xf] (%p78_p3)  ;;  %199 = vst [vmem:[%s173_s27 + $0x8] sm:$0xf] (%p78_p3), %v198_v2  ;;  %201 = vst [vmem:[%s173_s27 + $0xc] sm:$0xf] (%p78_p3), %v200_v3 }
  0x14   : > { %203 = vst [vmem:[%s173_s27 + $0x10] sm:$0xf] (%p78_p3), %v202_v4  ;;  %v204_v5 = vld [vmem:[%s812_s26 + $0x28] sm:$0xf] (%p78_p3)  ;;  %v206_v6 = vld [vmem:[%s812_s26 + $0x30] sm:$0xf] (%p78_p3) }
  0x15   : > { %v208_v7 = vld [vmem:[%s812_s26 + $0x38] sm:$0xf]  ;;  %205 = vst [vmem:[%s173_s27 + $0x14] sm:$0xf] %v204_v5  ;;  %207 = vst [vmem:[%s173_s27 + $0x18] sm:$0xf] %v206_v6 }
  0x16   : > { %209 = vst [vmem:[%s173_s27 + $0x1c] sm:$0xf] %v208_v7  ;;  %v210_v8 = vld [vmem:[%s812_s26 + $0x40] sm:$0xf]  ;;  %v212_v9 = vld [vmem:[%s812_s26 + $0x48] sm:$0xf] }
  0x17   : > { %v214_v10 = vld [vmem:[%s812_s26 + $0x50] sm:$0xf]  ;;  %211 = vst [vmem:[%s173_s27 + $0x20] sm:$0xf] %v210_v8  ;;  %213 = vst [vmem:[%s173_s27 + $0x24] sm:$0xf] %v212_v9 }
  0x18   : > { %215 = vst [vmem:[%s173_s27 + $0x28] sm:$0xf] %v214_v10  ;;  %v216_v11 = vld [vmem:[%s812_s26 + $0x58] sm:$0xf]  ;;  %v218_v12 = vld [vmem:[%s812_s26 + $0x60] sm:$0xf] }
  0x19   : > { %v220_v13 = vld [vmem:[%s812_s26 + $0x68] sm:$0xf]  ;;  %217 = vst [vmem:[%s173_s27 + $0x2c] sm:$0xf] %v216_v11  ;;  %219 = vst [vmem:[%s173_s27 + $0x30] sm:$0xf] %v218_v12 }
  0x1a   : > { %221 = vst [vmem:[%s173_s27 + $0x34] sm:$0xf] %v220_v13  ;;  %v222_v14 = vld [vmem:[%s812_s26 + $0x70] sm:$0xf]  ;;  %v224_v15 = vld [vmem:[%s812_s26 + $0x78] sm:$0xf] }
  0x1b   : > { %223 = vst [vmem:[%s173_s27 + $0x38] sm:$0xf] %v222_v14  ;;  %225 = vst [vmem:[%s173_s27 + $0x3c] sm:$0xf] %v224_v15 }
  0x1c PF: > { %p612_p6 = scmp.ge.s32.totalorder %s745_s16, 1  ;;  %p286_p7 = scmp.lt.s32.totalorder %s745_s16, 3 }
  0x1e   : > { %p287_p8 = pnand %p612_p6, %p286_p7 }
  0x1f   : > { %s293_s28 = sand.u32 (!%p287_p8), 1, %s729_s12   ;;  %v747_v16 = vmov (!%p287_p8), 0.0   ;;  %vm748_vm0 = vmmov (!%p287_p8), 0   ;;  %v351_v25 = vld [vmem:[%s859_s0] sm:$0xf] (!%p287_p8)  ;;  %p338_p9 = scmp.lt.s32.totalorder (!%p287_p8), %s737_s14, 1 }
  0x20   : > { %290 = sbr.rel (%p287_p8) target bundleno = 285 (0x11d), region = 69  ;;  %637 = vmatprep.subr.bf16.mxu0 (!%p287_p8), %v747_v16  ;;  %s613_s29 = sshll.u32 (!%p287_p8), %s293_s28, 6  ;;  %653 = vmatprep.mubr.msk.bf16.mxu0 (!%p287_p8), %vm748_vm0, %v747_v16 }
  0x21   : > { %s295_s30 = scalar_lea.vmem (!%p287_p8), [#allocation3], %s613_s29 }
  0x22   : > { %v699_v17 = vld [vmem:[%s295_s30] sm:$0xff] (!%p287_p8)   ;;  %v700_v18 = vld [vmem:[%s295_s30 + $0x8] sm:$0xff] (!%p287_p8)   ;;  %v701_v19 = vld [vmem:[%s295_s30 + $0x10] sm:$0xff] (!%p287_p8)  }
  0x23   : > { %638 = vmatpush3.bf16.msra.mxu0 (!%p287_p8), %v699_v17  ;;  %v702_v20 = vld [vmem:[%s295_s30 + $0x18] sm:$0xff] (!%p287_p8)   ;;  %v703_v21 = vld [vmem:[%s295_s30 + $0x20] sm:$0xff] (!%p287_p8)   ;;  %v704_v22 = vld [vmem:[%s295_s30 + $0x28] sm:$0xff] (!%p287_p8)  }
  0x24   : > { %639 = vmatprep.subr.bf16.mxu0 (!%p287_p8), %v747_v16  ;;  %v705_v23 = vld [vmem:[%s295_s30 + $0x30] sm:$0xff] (!%p287_p8)   ;;  %v706_v24 = vld [vmem:[%s295_s30 + $0x38] sm:$0xff] (!%p287_p8)  }
  0x27   : > { %640 = vmatpush3.bf16.msra.mxu0 %v700_v18  ;;  %s870_s14 = smov (!%p338_p9, %s737_s14), 1 }
  0x28   : > { %641 = vmatprep.subr.bf16.mxu0 %v747_v16  ;;  %s614_s6 = sshll.u32 %s870_s14, 1  ;;  %s615_s10 = sshll.u32 %s870_s14, 2 }
  0x29   : > { %s341_s9 = scalar_lea.vmem %s861_s2, %s614_s6  ;;  %s349_s18 = scalar_lea.vmem %s862_s3, %s615_s10 }
  0x2a   : > { %v624_v26 = vld [vmem:[%s341_s9] ss:$0 sm:$0xff]  ;;  %v625_v28 = vld [vmem:[%s341_s9 + $0x1] ss:$0 sm:$0xff] }
  0x2b   : > { %642 = vmatpush3.bf16.msra.mxu0 %v701_v19 }
  0x2c   : > { %643 = vmatprep.subr.bf16.mxu0 %v747_v16 }
  0x2f   : > { %644 = vmatpush3.bf16.msra.mxu0 %v702_v20 }
  0x30   : > { %645 = vmatprep.subr.bf16.mxu0 %v747_v16 }
  0x33   : > { %646 = vmatpush3.bf16.msra.mxu0 %v703_v21 }
  0x34   : > { %647 = vmatprep.subr.bf16.mxu0 %v747_v16 }
  0x37   : > { %648 = vmatpush3.bf16.msra.mxu0 %v704_v22 }
  0x38   : > { %649 = vmatprep.subr.bf16.mxu0 %v747_v16 }
  0x3b   : > { %650 = vmatpush3.bf16.msra.mxu0 %v705_v23 }
  0x3c   : > { %651 = vmatprep.subr.bf16.mxu0 %v747_v16 }
  0x3f   : > { %652 = vmatpush3.bf16.msra.mxu0 %v706_v24 }
  0x42   : > { %654 = vmatmul.mubr.bf16.vlgmr.msra.gmra.mrb[0].mxu0 %v351_v25 }
 0x115   : > { %v450_v27 = vpop.f32.mrb[0].mxu0 }
 0x116   : > { %v477_v29 = vmul.f32 %v624_v26, %v450_v27  ;;  %v655_v30 = vpop.f32.mrb[1].mxu0 }
 0x117   : > { %v453_v31 = vpop.f32.mrb[2].mxu0 }
 0x118   : > { %v483_v32 = vadd.f32 %v625_v28, %v477_v29  ;;  %v656_v33 = vpop.f32.mrb[3].mxu0 }
 0x11a   : > { %v484_v34 = vpack.c.bf16 %v483_v32, %v483_v32 }
 0x11c   : > { %485 = vst [vmem:[%s349_s18] sm:$0xf] %v484_v34 }
 0x11d PF: > { %s13_s16 = sadd.s32 1, %s745_s16   ;;  %s863_s12 = smov %s733_s13 }
 0x11e   : > { %p10_p10 = scmp.ge.s32.totalorder %s13_s16, 4   ;;  %s864_s13 = smov %s804_s20 }
 0x11f   : > { %s865_s14 = smov %s741_s15  ;;  %s866_s15 = smov %s868_s17 }
 0x120   :  { %12 = sbr.rel (!%p10_p10) target bundleno = 3 (0x3), region = 126 }

// kernel: resnet_forward.21
= control target key start
LH: loop header
LB: loop body
LE: loop exit
PB: predicated region body
PF: predicated region fallthrough
CT: control target
= control target key end

     0   :  { %s2357_s15 = smov 0   ;;  %s2359_s16 = smov 0   ;;  %s2842_s0 = inlined_call_operand.vmem [shape: bf16[8,2304], index: 0, kind: input, shape index: {}]   ;;  %s2843_s1 = inlined_call_operand.vmem [shape: bf16[2304,256], index: 1, kind: input, shape index: {}]   ;;  %s2844_s2 = inlined_call_operand.vmem [shape: f32[2,256], index: 2, kind: input, shape index: {}]   ;;  %s2845_s3 = inlined_call_operand.vmem [shape: bf16[8,256], index: 3, kind: input, shape index: {}]   ;;  %s2846_s4 = inlined_call_operand.vmem [shape: bf16[8,256], index: 4, kind: output, shape index: {}]  }
   0x1   :  { %s2361_s17 = smov 0   ;;  %s2363_s18 = smov 0  }
   0x2   :  { %s2365_s19 = smov 0   ;;  %s2367_s20 = smov 0  }
   0x3   :  { %s2369_s21 = smov 0  }
   0x4 LB: > { %s26_s22 = sadd.s32 1, %s2320_s19  ;;  %s29_s23 = sadd.s32 1, %s2324_s20  ;;  %s2328_s21 = sphi %s2369_s21, %s14_s21   ;;  %s2324_s20 = sphi %s2367_s20, %s2852_s20   ;;  %s2320_s19 = sphi %s2365_s19, %s2851_s19   ;;  %s2316_s18 = sphi %s2363_s18, %s2850_s18   ;;  %s2312_s17 = sphi %s2361_s17, %s2849_s17   ;;  %s2308_s16 = sphi %s2359_s16, %s2848_s16   ;;  %s2304_s15 = sphi %s2357_s15, %s2847_s15  }
   0x5   : > { %p27_p0 = scmp.ge.s32.totalorder %s26_s22, 2  ;;  %p77_p1 = scmp.ne.s32.totalorder %s2308_s16, %s2304_s15 }
   0x6   : > { %p78_p2 = scmp.eq.s32.totalorder %s2328_s21, 0  ;;  %s70_s27 = sadd.s32 1, %s2308_s16 }
   0x7   : > { %s2854_s22 = smov (%p27_p0, %s26_s22), 0  ;;  %s2856_s23 = smov (!%p27_p0, %s29_s23), %s2324_s20 }
   0x8   : > { %p79_p3 = por %p78_p2, %p77_p1  ;;  %p31_p4 = scmp.ge.s32.totalorder %s2856_s23, 2 }
   0x9   : > { %s65_s24 = ssub.s32 %s2320_s19, %s2854_s22  ;;  %p1919_p6 = scmp.ge.s32.totalorder %s2328_s21, 4 }
   0xa   : > { %s2858_s23 = smov (%p31_p4, %s2856_s23), 0 }
   0xb   : > { %s66_s25 = ssub.s32 %s2324_s20, %s2858_s23  ;;  %185 = sbr.rel (%p1919_p6) target bundleno = 121 (0x79), region = 16 }
   0xc   : > { %s67_s26 = sor.u32 %s66_s25, %s65_s24 }
   0xd   : > { %p68_p5 = scmp.eq.s32.totalorder %s67_s26, 0 }
   0xf   : > { %s2408_s28 = scalar_select %p68_p5, %s2308_s16, %s70_s27  }
  0x12   : > { %201 = sbr.rel (!%p79_p3) target bundleno = 121 (0x79), region = 24  ;;  %s203_s29 = sand.u32 (%p79_p3), 1, %s2308_s16  }
  0x13   : > { %s2015_s30 = smul.u32 (%p79_p3), 288, %s2320_s19 }
  0x14   : > { %s2133_s5 = smul.u32 (%p79_p3), 576, %s203_s29 }
  0x15   : > { %s208_s6 = sadd.s32 (%p79_p3), %s2324_s20, %s2015_s30 }
  0x16   : > { %s1921_s7 = sshll.u32 (%p79_p3), %s208_s6, 2  ;;  %s2422_s11 = scalar_lea.vmem (%p79_p3), [#allocation3], %s2133_s5 }
  0x17   : > { %s2417_s10 = scalar_lea.vmem (%p79_p3), %s2843_s1, %s1921_s7 }
  0x18   : > { %v226_v0 = vld [vmem:[%s2417_s10] sm:$0xf] (%p79_p3)  ;;  %v228_v1 = vld [vmem:[%s2417_s10 + $0x8] sm:$0xf] (%p79_p3)  ;;  %v230_v2 = vld [vmem:[%s2417_s10 + $0x10] sm:$0xf] (%p79_p3) }
  0x19   : > { %227 = vst [vmem:[%s2422_s11] sm:$0xf] %v226_v0  ;;  %229 = vst [vmem:[%s2422_s11 + $0x4] sm:$0xf] %v228_v1  ;;  %v232_v3 = vld [vmem:[%s2417_s10 + $0x18] sm:$0xf] }
  0x1a   : > { %231 = vst [vmem:[%s2422_s11 + $0x8] sm:$0xf] %v230_v2  ;;  %v234_v4 = vld [vmem:[%s2417_s10 + $0x20] sm:$0xf]  ;;  %v236_v5 = vld [vmem:[%s2417_s10 + $0x28] sm:$0xf] }
  0x1b   : > { %233 = vst [vmem:[%s2422_s11 + $0xc] sm:$0xf] %v232_v3  ;;  %235 = vst [vmem:[%s2422_s11 + $0x10] sm:$0xf] %v234_v4  ;;  %v238_v6 = vld [vmem:[%s2417_s10 + $0x30] sm:$0xf] }
  0x1c   : > { %237 = vst [vmem:[%s2422_s11 + $0x14] sm:$0xf] %v236_v5  ;;  %v240_v7 = vld [vmem:[%s2417_s10 + $0x38] sm:$0xf]  ;;  %v242_v8 = vld [vmem:[%s2417_s10 + $0x40] sm:$0xf] }
  0x1d   : > { %239 = vst [vmem:[%s2422_s11 + $0x18] sm:$0xf] %v238_v6  ;;  %241 = vst [vmem:[%s2422_s11 + $0x1c] sm:$0xf] %v240_v7  ;;  %v244_v9 = vld [vmem:[%s2417_s10 + $0x48] sm:$0xf] }
  0x1e   : > { %243 = vst [vmem:[%s2422_s11 + $0x20] sm:$0xf] %v242_v8  ;;  %v246_v10 = vld [vmem:[%s2417_s10 + $0x50] sm:$0xf]  ;;  %v248_v11 = vld [vmem:[%s2417_s10 + $0x58] sm:$0xf] }
  0x1f   : > { %245 = vst [vmem:[%s2422_s11 + $0x24] sm:$0xf] %v244_v9  ;;  %247 = vst [vmem:[%s2422_s11 + $0x28] sm:$0xf] %v246_v10  ;;  %v250_v12 = vld [vmem:[%s2417_s10 + $0x60] sm:$0xf] }
  0x20   : > { %249 = vst [vmem:[%s2422_s11 + $0x2c] sm:$0xf] %v248_v11  ;;  %v252_v13 = vld [vmem:[%s2417_s10 + $0x68] sm:$0xf]  ;;  %v254_v14 = vld [vmem:[%s2417_s10 + $0x70] sm:$0xf] }
  0x21   : > { %251 = vst [vmem:[%s2422_s11 + $0x30] sm:$0xf] %v250_v12  ;;  %253 = vst [vmem:[%s2422_s11 + $0x34] sm:$0xf] %v252_v13  ;;  %v256_v15 = vld [vmem:[%s2417_s10 + $0x78] sm:$0xf] }
  0x22   : > { %255 = vst [vmem:[%s2422_s11 + $0x38] sm:$0xf] %v254_v14  ;;  %v258_v16 = vld [vmem:[%s2417_s10 + $0x80] sm:$0xf]  ;;  %v260_v17 = vld [vmem:[%s2417_s10 + $0x88] sm:$0xf] }
  0x23   : > { %257 = vst [vmem:[%s2422_s11 + $0x3c] sm:$0xf] %v256_v15  ;;  %259 = vst [vmem:[%s2422_s11 + $0x40] sm:$0xf] %v258_v16  ;;  %v262_v18 = vld [vmem:[%s2417_s10 + $0x90] sm:$0xf] }
  0x24   : > { %261 = vst [vmem:[%s2422_s11 + $0x44] sm:$0xf] %v260_v17  ;;  %v264_v19 = vld [vmem:[%s2417_s10 + $0x98] sm:$0xf]  ;;  %v266_v20 = vld [vmem:[%s2417_s10 + $0xa0] sm:$0xf] }
  0x25   : > { %263 = vst [vmem:[%s2422_s11 + $0x48] sm:$0xf] %v262_v18  ;;  %265 = vst [vmem:[%s2422_s11 + $0x4c] sm:$0xf] %v264_v19  ;;  %v268_v21 = vld [vmem:[%s2417_s10 + $0xa8] sm:$0xf] }
  0x26   : > { %267 = vst [vmem:[%s2422_s11 + $0x50] sm:$0xf] %v266_v20  ;;  %v270_v22 = vld [vmem:[%s2417_s10 + $0xb0] sm:$0xf]  ;;  %v272_v23 = vld [vmem:[%s2417_s10 + $0xb8] sm:$0xf] }
  0x27   : > { %269 = vst [vmem:[%s2422_s11 + $0x54] sm:$0xf] %v268_v21  ;;  %271 = vst [vmem:[%s2422_s11 + $0x58] sm:$0xf] %v270_v22  ;;  %v274_v24 = vld [vmem:[%s2417_s10 + $0xc0] sm:$0xf] }
  0x28   : > { %273 = vst [vmem:[%s2422_s11 + $0x5c] sm:$0xf] %v272_v23  ;;  %v276_v25 = vld [vmem:[%s2417_s10 + $0xc8] sm:$0xf]  ;;  %v278_v26 = vld [vmem:[%s2417_s10 + $0xd0] sm:$0xf] }
  0x29   : > { %275 = vst [vmem:[%s2422_s11 + $0x60] sm:$0xf] %v274_v24  ;;  %277 = vst [vmem:[%s2422_s11 + $0x64] sm:$0xf] %v276_v25  ;;  %v280_v27 = vld [vmem:[%s2417_s10 + $0xd8] sm:$0xf] }
  0x2a   : > { %279 = vst [vmem:[%s2422_s11 + $0x68] sm:$0xf] %v278_v26  ;;  %v282_v28 = vld [vmem:[%s2417_s10 + $0xe0] sm:$0xf]  ;;  %v284_v29 = vld [vmem:[%s2417_s10 + $0xe8] sm:$0xf] }
  0x2b   : > { %281 = vst [vmem:[%s2422_s11 + $0x6c] sm:$0xf] %v280_v27  ;;  %283 = vst [vmem:[%s2422_s11 + $0x70] sm:$0xf] %v282_v28  ;;  %v286_v30 = vld [vmem:[%s2417_s10 + $0xf0] sm:$0xf] }
  0x2c   : > { %285 = vst [vmem:[%s2422_s11 + $0x74] sm:$0xf] %v284_v29  ;;  %v288_v31 = vld [vmem:[%s2417_s10 + $0xf8] sm:$0xf]  ;;  %v290_v32 = vld [vmem:[%s2417_s10 + $0x100] sm:$0xf] }
  0x2d   : > { %287 = vst [vmem:[%s2422_s11 + $0x78] sm:$0xf] %v286_v30  ;;  %289 = vst [vmem:[%s2422_s11 + $0x7c] sm:$0xf] %v288_v31  ;;  %v292_v33 = vld [vmem:[%s2417_s10 + $0x108] sm:$0xf] }
  0x2e   : > { %291 = vst [vmem:[%s2422_s11 + $0x80] sm:$0xf] %v290_v32  ;;  %v294_v34 = vld [vmem:[%s2417_s10 + $0x110] sm:$0xf]  ;;  %v296_v35 = vld [vmem:[%s2417_s10 + $0x118] sm:$0xf] }
  0x2f   : > { %293 = vst [vmem:[%s2422_s11 + $0x84] sm:$0xf] %v292_v33  ;;  %295 = vst [vmem:[%s2422_s11 + $0x88] sm:$0xf] %v294_v34  ;;  %v298_v36 = vld [vmem:[%s2417_s10 + $0x120] sm:$0xf] }
  0x30   : > { %297 = vst [vmem:[%s2422_s11 + $0x8c] sm:$0xf] %v296_v35  ;;  %v300_v37 = vld [vmem:[%s2417_s10 + $0x128] sm:$0xf]  ;;  %v302_v38 = vld [vmem:[%s2417_s10 + $0x130] sm:$0xf] }
  0x31   : > { %299 = vst [vmem:[%s2422_s11 + $0x90] sm:$0xf] %v298_v36  ;;  %301 = vst [vmem:[%s2422_s11 + $0x94] sm:$0xf] %v300_v37  ;;  %v304_v39 = vld [vmem:[%s2417_s10 + $0x138] sm:$0xf] }
  0x32   : > { %303 = vst [vmem:[%s2422_s11 + $0x98] sm:$0xf] %v302_v38  ;;  %v306_v40 = vld [vmem:[%s2417_s10 + $0x140] sm:$0xf]  ;;  %v308_v41 = vld [vmem:[%s2417_s10 + $0x148] sm:$0xf] }
  0x33   : > { %305 = vst [vmem:[%s2422_s11 + $0x9c] sm:$0xf] %v304_v39  ;;  %307 = vst [vmem:[%s2422_s11 + $0xa0] sm:$0xf] %v306_v40  ;;  %v310_v42 = vld [vmem:[%s2417_s10 + $0x150] sm:$0xf] }
  0x34   : > { %309 = vst [vmem:[%s2422_s11 + $0xa4] sm:$0xf] %v308_v41  ;;  %v312_v43 = vld [vmem:[%s2417_s10 + $0x158] sm:$0xf]  ;;  %v314_v44 = vld [vmem:[%s2417_s10 + $0x160] sm:$0xf] }
  0x35   : > { %311 = vst [vmem:[%s2422_s11 + $0xa8] sm:$0xf] %v310_v42  ;;  %313 = vst [vmem:[%s2422_s11 + $0xac] sm:$0xf] %v312_v43  ;;  %v316_v45 = vld [vmem:[%s2417_s10 + $0x168] sm:$0xf] }
  0x36   : > { %315 = vst [vmem:[%s2422_s11 + $0xb0] sm:$0xf] %v314_v44  ;;  %v318_v46 = vld [vmem:[%s2417_s10 + $0x170] sm:$0xf]  ;;  %v320_v47 = vld [vmem:[%s2417_s10 + $0x178] sm:$0xf] }
  0x37   : > { %317 = vst [vmem:[%s2422_s11 + $0xb4] sm:$0xf] %v316_v45  ;;  %319 = vst [vmem:[%s2422_s11 + $0xb8] sm:$0xf] %v318_v46  ;;  %v322_v48 = vld [vmem:[%s2417_s10 + $0x180] sm:$0xf] }
  0x38   : > { %321 = vst [vmem:[%s2422_s11 + $0xbc] sm:$0xf] %v320_v47  ;;  %v324_v49 = vld [vmem:[%s2417_s10 + $0x188] sm:$0xf]  ;;  %v326_v50 = vld [vmem:[%s2417_s10 + $0x190] sm:$0xf] }
  0x39   : > { %323 = vst [vmem:[%s2422_s11 + $0xc0] sm:$0xf] %v322_v48  ;;  %325 = vst [vmem:[%s2422_s11 + $0xc4] sm:$0xf] %v324_v49  ;;  %v328_v51 = vld [vmem:[%s2417_s10 + $0x198] sm:$0xf] }
  0x3a   : > { %327 = vst [vmem:[%s2422_s11 + $0xc8] sm:$0xf] %v326_v50  ;;  %v330_v52 = vld [vmem:[%s2417_s10 + $0x1a0] sm:$0xf]  ;;  %v332_v53 = vld [vmem:[%s2417_s10 + $0x1a8] sm:$0xf] }
  0x3b   : > { %329 = vst [vmem:[%s2422_s11 + $0xcc] sm:$0xf] %v328_v51  ;;  %331 = vst [vmem:[%s2422_s11 + $0xd0] sm:$0xf] %v330_v52  ;;  %v334_v54 = vld [vmem:[%s2417_s10 + $0x1b0] sm:$0xf] }
  0x3c   : > { %333 = vst [vmem:[%s2422_s11 + $0xd4] sm:$0xf] %v332_v53  ;;  %v336_v55 = vld [vmem:[%s2417_s10 + $0x1b8] sm:$0xf]  ;;  %v338_v56 = vld [vmem:[%s2417_s10 + $0x1c0] sm:$0xf] }
  0x3d   : > { %335 = vst [vmem:[%s2422_s11 + $0xd8] sm:$0xf] %v334_v54  ;;  %337 = vst [vmem:[%s2422_s11 + $0xdc] sm:$0xf] %v336_v55  ;;  %v340_v57 = vld [vmem:[%s2417_s10 + $0x1c8] sm:$0xf] }
  0x3e   : > { %339 = vst [vmem:[%s2422_s11 + $0xe0] sm:$0xf] %v338_v56  ;;  %v342_v58 = vld [vmem:[%s2417_s10 + $0x1d0] sm:$0xf]  ;;  %v344_v59 = vld [vmem:[%s2417_s10 + $0x1d8] sm:$0xf] }
  0x3f   : > { %341 = vst [vmem:[%s2422_s11 + $0xe4] sm:$0xf] %v340_v57  ;;  %343 = vst [vmem:[%s2422_s11 + $0xe8] sm:$0xf] %v342_v58  ;;  %v346_v60 = vld [vmem:[%s2417_s10 + $0x1e0] sm:$0xf] }
  0x40   : > { %345 = vst [vmem:[%s2422_s11 + $0xec] sm:$0xf] %v344_v59  ;;  %v348_v61 = vld [vmem:[%s2417_s10 + $0x1e8] sm:$0xf]  ;;  %v350_v62 = vld [vmem:[%s2417_s10 + $0x1f0] sm:$0xf] }
  0x41   : > { %347 = vst [vmem:[%s2422_s11 + $0xf0] sm:$0xf] %v346_v60  ;;  %349 = vst [vmem:[%s2422_s11 + $0xf4] sm:$0xf] %v348_v61  ;;  %v352_v63 = vld [vmem:[%s2417_s10 + $0x1f8] sm:$0xf] }
  0x42   : > { %351 = vst [vmem:[%s2422_s11 + $0xf8] sm:$0xf] %v350_v62  ;;  %v354_v0 = vld [vmem:[%s2417_s10 + $0x200] sm:$0xf]  ;;  %v356_v1 = vld [vmem:[%s2417_s10 + $0x208] sm:$0xf] }
  0x43   : > { %353 = vst [vmem:[%s2422_s11 + $0xfc] sm:$0xf] %v352_v63  ;;  %355 = vst [vmem:[%s2422_s11 + $0x100] sm:$0xf] %v354_v0  ;;  %v358_v2 = vld [vmem:[%s2417_s10 + $0x210] sm:$0xf] }
  0x44   : > { %357 = vst [vmem:[%s2422_s11 + $0x104] sm:$0xf] %v356_v1  ;;  %v360_v3 = vld [vmem:[%s2417_s10 + $0x218] sm:$0xf]  ;;  %v362_v4 = vld [vmem:[%s2417_s10 + $0x220] sm:$0xf] }
  0x45   : > { %359 = vst [vmem:[%s2422_s11 + $0x108] sm:$0xf] %v358_v2  ;;  %361 = vst [vmem:[%s2422_s11 + $0x10c] sm:$0xf] %v360_v3  ;;  %v364_v5 = vld [vmem:[%s2417_s10 + $0x228] sm:$0xf] }
  0x46   : > { %363 = vst [vmem:[%s2422_s11 + $0x110] sm:$0xf] %v362_v4  ;;  %v366_v6 = vld [vmem:[%s2417_s10 + $0x230] sm:$0xf]  ;;  %v368_v7 = vld [vmem:[%s2417_s10 + $0x238] sm:$0xf] }
  0x47   : > { %365 = vst [vmem:[%s2422_s11 + $0x114] sm:$0xf] %v364_v5  ;;  %367 = vst [vmem:[%s2422_s11 + $0x118] sm:$0xf] %v366_v6  ;;  %v370_v8 = vld [vmem:[%s2417_s10 + $0x240] sm:$0xf] }
  0x48   : > { %369 = vst [vmem:[%s2422_s11 + $0x11c] sm:$0xf] %v368_v7  ;;  %v372_v9 = vld [vmem:[%s2417_s10 + $0x248] sm:$0xf]  ;;  %v374_v10 = vld [vmem:[%s2417_s10 + $0x250] sm:$0xf] }
  0x49   : > { %371 = vst [vmem:[%s2422_s11 + $0x120] sm:$0xf] %v370_v8  ;;  %373 = vst [vmem:[%s2422_s11 + $0x124] sm:$0xf] %v372_v9  ;;  %v376_v11 = vld [vmem:[%s2417_s10 + $0x258] sm:$0xf] }
  0x4a   : > { %375 = vst [vmem:[%s2422_s11 + $0x128] sm:$0xf] %v374_v10  ;;  %v378_v12 = vld [vmem:[%s2417_s10 + $0x260] sm:$0xf]  ;;  %v380_v13 = vld [vmem:[%s2417_s10 + $0x268] sm:$0xf] }
  0x4b   : > { %377 = vst [vmem:[%s2422_s11 + $0x12c] sm:$0xf] %v376_v11  ;;  %379 = vst [vmem:[%s2422_s11 + $0x130] sm:$0xf] %v378_v12  ;;  %v382_v14 = vld [vmem:[%s2417_s10 + $0x270] sm:$0xf] }
  0x4c   : > { %381 = vst [vmem:[%s2422_s11 + $0x134] sm:$0xf] %v380_v13  ;;  %v384_v15 = vld [vmem:[%s2417_s10 + $0x278] sm:$0xf]  ;;  %v386_v16 = vld [vmem:[%s2417_s10 + $0x280] sm:$0xf] }
  0x4d   : > { %383 = vst [vmem:[%s2422_s11 + $0x138] sm:$0xf] %v382_v14  ;;  %385 = vst [vmem:[%s2422_s11 + $0x13c] sm:$0xf] %v384_v15  ;;  %v388_v17 = vld [vmem:[%s2417_s10 + $0x288] sm:$0xf] }
  0x4e   : > { %387 = vst [vmem:[%s2422_s11 + $0x140] sm:$0xf] %v386_v16  ;;  %v390_v18 = vld [vmem:[%s2417_s10 + $0x290] sm:$0xf]  ;;  %v392_v19 = vld [vmem:[%s2417_s10 + $0x298] sm:$0xf] }
  0x4f   : > { %389 = vst [vmem:[%s2422_s11 + $0x144] sm:$0xf] %v388_v17  ;;  %391 = vst [vmem:[%s2422_s11 + $0x148] sm:$0xf] %v390_v18  ;;  %v394_v20 = vld [vmem:[%s2417_s10 + $0x2a0] sm:$0xf] }
  0x50   : > { %393 = vst [vmem:[%s2422_s11 + $0x14c] sm:$0xf] %v392_v19  ;;  %v396_v21 = vld [vmem:[%s2417_s10 + $0x2a8] sm:$0xf]  ;;  %v398_v22 = vld [vmem:[%s2417_s10 + $0x2b0] sm:$0xf] }
  0x51   : > { %395 = vst [vmem:[%s2422_s11 + $0x150] sm:$0xf] %v394_v20  ;;  %397 = vst [vmem:[%s2422_s11 + $0x154] sm:$0xf] %v396_v21  ;;  %v400_v23 = vld [vmem:[%s2417_s10 + $0x2b8] sm:$0xf] }
  0x52   : > { %399 = vst [vmem:[%s2422_s11 + $0x158] sm:$0xf] %v398_v22  ;;  %v402_v24 = vld [vmem:[%s2417_s10 + $0x2c0] sm:$0xf]  ;;  %v404_v25 = vld [vmem:[%s2417_s10 + $0x2c8] sm:$0xf] }
  0x53   : > { %401 = vst [vmem:[%s2422_s11 + $0x15c] sm:$0xf] %v400_v23  ;;  %403 = vst [vmem:[%s2422_s11 + $0x160] sm:$0xf] %v402_v24  ;;  %v406_v26 = vld [vmem:[%s2417_s10 + $0x2d0] sm:$0xf] }
  0x54   : > { %405 = vst [vmem:[%s2422_s11 + $0x164] sm:$0xf] %v404_v25  ;;  %v408_v27 = vld [vmem:[%s2417_s10 + $0x2d8] sm:$0xf]  ;;  %v410_v28 = vld [vmem:[%s2417_s10 + $0x2e0] sm:$0xf] }
  0x55   : > { %407 = vst [vmem:[%s2422_s11 + $0x168] sm:$0xf] %v406_v26  ;;  %409 = vst [vmem:[%s2422_s11 + $0x16c] sm:$0xf] %v408_v27  ;;  %v412_v29 = vld [vmem:[%s2417_s10 + $0x2e8] sm:$0xf] }
  0x56   : > { %411 = vst [vmem:[%s2422_s11 + $0x170] sm:$0xf] %v410_v28  ;;  %v414_v30 = vld [vmem:[%s2417_s10 + $0x2f0] sm:$0xf]  ;;  %v416_v31 = vld [vmem:[%s2417_s10 + $0x2f8] sm:$0xf] }
  0x57   : > { %413 = vst [vmem:[%s2422_s11 + $0x174] sm:$0xf] %v412_v29  ;;  %415 = vst [vmem:[%s2422_s11 + $0x178] sm:$0xf] %v414_v30  ;;  %v418_v32 = vld [vmem:[%s2417_s10 + $0x300] sm:$0xf] }
  0x58   : > { %417 = vst [vmem:[%s2422_s11 + $0x17c] sm:$0xf] %v416_v31  ;;  %v420_v33 = vld [vmem:[%s2417_s10 + $0x308] sm:$0xf]  ;;  %v422_v34 = vld [vmem:[%s2417_s10 + $0x310] sm:$0xf] }
  0x59   : > { %419 = vst [vmem:[%s2422_s11 + $0x180] sm:$0xf] %v418_v32  ;;  %421 = vst [vmem:[%s2422_s11 + $0x184] sm:$0xf] %v420_v33  ;;  %v424_v35 = vld [vmem:[%s2417_s10 + $0x318] sm:$0xf] }
  0x5a   : > { %423 = vst [vmem:[%s2422_s11 + $0x188] sm:$0xf] %v422_v34  ;;  %v426_v36 = vld [vmem:[%s2417_s10 + $0x320] sm:$0xf]  ;;  %v428_v37 = vld [vmem:[%s2417_s10 + $0x328] sm:$0xf] }
  0x5b   : > { %425 = vst [vmem:[%s2422_s11 + $0x18c] sm:$0xf] %v424_v35  ;;  %427 = vst [vmem:[%s2422_s11 + $0x190] sm:$0xf] %v426_v36  ;;  %v430_v38 = vld [vmem:[%s2417_s10 + $0x330] sm:$0xf] }
  0x5c   : > { %429 = vst [vmem:[%s2422_s11 + $0x194] sm:$0xf] %v428_v37  ;;  %v432_v39 = vld [vmem:[%s2417_s10 + $0x338] sm:$0xf]  ;;  %v434_v40 = vld [vmem:[%s2417_s10 + $0x340] sm:$0xf] }
  0x5d   : > { %431 = vst [vmem:[%s2422_s11 + $0x198] sm:$0xf] %v430_v38  ;;  %433 = vst [vmem:[%s2422_s11 + $0x19c] sm:$0xf] %v432_v39  ;;  %v436_v41 = vld [vmem:[%s2417_s10 + $0x348] sm:$0xf] }
  0x5e   : > { %435 = vst [vmem:[%s2422_s11 + $0x1a0] sm:$0xf] %v434_v40  ;;  %v438_v42 = vld [vmem:[%s2417_s10 + $0x350] sm:$0xf]  ;;  %v440_v43 = vld [vmem:[%s2417_s10 + $0x358] sm:$0xf] }
  0x5f   : > { %437 = vst [vmem:[%s2422_s11 + $0x1a4] sm:$0xf] %v436_v41  ;;  %439 = vst [vmem:[%s2422_s11 + $0x1a8] sm:$0xf] %v438_v42  ;;  %v442_v44 = vld [vmem:[%s2417_s10 + $0x360] sm:$0xf] }
  0x60   : > { %441 = vst [vmem:[%s2422_s11 + $0x1ac] sm:$0xf] %v440_v43  ;;  %v444_v45 = vld [vmem:[%s2417_s10 + $0x368] sm:$0xf]  ;;  %v446_v46 = vld [vmem:[%s2417_s10 + $0x370] sm:$0xf] }
  0x61   : > { %443 = vst [vmem:[%s2422_s11 + $0x1b0] sm:$0xf] %v442_v44  ;;  %445 = vst [vmem:[%s2422_s11 + $0x1b4] sm:$0xf] %v444_v45  ;;  %v448_v47 = vld [vmem:[%s2417_s10 + $0x378] sm:$0xf] }
  0x62   : > { %447 = vst [vmem:[%s2422_s11 + $0x1b8] sm:$0xf] %v446_v46  ;;  %v450_v48 = vld [vmem:[%s2417_s10 + $0x380] sm:$0xf]  ;;  %v452_v49 = vld [vmem:[%s2417_s10 + $0x388] sm:$0xf] }
  0x63   : > { %449 = vst [vmem:[%s2422_s11 + $0x1bc] sm:$0xf] %v448_v47  ;;  %451 = vst [vmem:[%s2422_s11 + $0x1c0] sm:$0xf] %v450_v48  ;;  %v454_v50 = vld [vmem:[%s2417_s10 + $0x390] sm:$0xf] }
  0x64   : > { %453 = vst [vmem:[%s2422_s11 + $0x1c4] sm:$0xf] %v452_v49  ;;  %v456_v51 = vld [vmem:[%s2417_s10 + $0x398] sm:$0xf]  ;;  %v458_v52 = vld [vmem:[%s2417_s10 + $0x3a0] sm:$0xf] }
  0x65   : > { %455 = vst [vmem:[%s2422_s11 + $0x1c8] sm:$0xf] %v454_v50  ;;  %457 = vst [vmem:[%s2422_s11 + $0x1cc] sm:$0xf] %v456_v51  ;;  %v460_v53 = vld [vmem:[%s2417_s10 + $0x3a8] sm:$0xf] }
  0x66   : > { %459 = vst [vmem:[%s2422_s11 + $0x1d0] sm:$0xf] %v458_v52  ;;  %v462_v54 = vld [vmem:[%s2417_s10 + $0x3b0] sm:$0xf]  ;;  %v464_v55 = vld [vmem:[%s2417_s10 + $0x3b8] sm:$0xf] }
  0x67   : > { %461 = vst [vmem:[%s2422_s11 + $0x1d4] sm:$0xf] %v460_v53  ;;  %463 = vst [vmem:[%s2422_s11 + $0x1d8] sm:$0xf] %v462_v54  ;;  %v466_v56 = vld [vmem:[%s2417_s10 + $0x3c0] sm:$0xf] }
  0x68   : > { %465 = vst [vmem:[%s2422_s11 + $0x1dc] sm:$0xf] %v464_v55  ;;  %v468_v57 = vld [vmem:[%s2417_s10 + $0x3c8] sm:$0xf]  ;;  %v470_v58 = vld [vmem:[%s2417_s10 + $0x3d0] sm:$0xf] }
  0x69   : > { %467 = vst [vmem:[%s2422_s11 + $0x1e0] sm:$0xf] %v466_v56  ;;  %469 = vst [vmem:[%s2422_s11 + $0x1e4] sm:$0xf] %v468_v57  ;;  %v472_v59 = vld [vmem:[%s2417_s10 + $0x3d8] sm:$0xf] }
  0x6a   : > { %471 = vst [vmem:[%s2422_s11 + $0x1e8] sm:$0xf] %v470_v58  ;;  %v474_v60 = vld [vmem:[%s2417_s10 + $0x3e0] sm:$0xf]  ;;  %v476_v61 = vld [vmem:[%s2417_s10 + $0x3e8] sm:$0xf] }
  0x6b   : > { %473 = vst [vmem:[%s2422_s11 + $0x1ec] sm:$0xf] %v472_v59  ;;  %475 = vst [vmem:[%s2422_s11 + $0x1f0] sm:$0xf] %v474_v60  ;;  %v478_v62 = vld [vmem:[%s2417_s10 + $0x3f0] sm:$0xf] }
  0x6c   : > { %477 = vst [vmem:[%s2422_s11 + $0x1f4] sm:$0xf] %v476_v61  ;;  %v480_v63 = vld [vmem:[%s2417_s10 + $0x3f8] sm:$0xf]  ;;  %v482_v0 = vld [vmem:[%s2417_s10 + $0x400] sm:$0xf] }
  0x6d   : > { %479 = vst [vmem:[%s2422_s11 + $0x1f8] sm:$0xf] %v478_v62  ;;  %481 = vst [vmem:[%s2422_s11 + $0x1fc] sm:$0xf] %v480_v63  ;;  %v484_v1 = vld [vmem:[%s2417_s10 + $0x408] sm:$0xf] }
  0x6e   : > { %483 = vst [vmem:[%s2422_s11 + $0x200] sm:$0xf] %v482_v0  ;;  %v486_v2 = vld [vmem:[%s2417_s10 + $0x410] sm:$0xf]  ;;  %v488_v3 = vld [vmem:[%s2417_s10 + $0x418] sm:$0xf] }
  0x6f   : > { %485 = vst [vmem:[%s2422_s11 + $0x204] sm:$0xf] %v484_v1  ;;  %487 = vst [vmem:[%s2422_s11 + $0x208] sm:$0xf] %v486_v2  ;;  %v490_v4 = vld [vmem:[%s2417_s10 + $0x420] sm:$0xf] }
  0x70   : > { %489 = vst [vmem:[%s2422_s11 + $0x20c] sm:$0xf] %v488_v3  ;;  %v492_v5 = vld [vmem:[%s2417_s10 + $0x428] sm:$0xf]  ;;  %v494_v6 = vld [vmem:[%s2417_s10 + $0x430] sm:$0xf] }
  0x71   : > { %491 = vst [vmem:[%s2422_s11 + $0x210] sm:$0xf] %v490_v4  ;;  %493 = vst [vmem:[%s2422_s11 + $0x214] sm:$0xf] %v492_v5  ;;  %v496_v7 = vld [vmem:[%s2417_s10 + $0x438] sm:$0xf] }
  0x72   : > { %495 = vst [vmem:[%s2422_s11 + $0x218] sm:$0xf] %v494_v6  ;;  %v498_v8 = vld [vmem:[%s2417_s10 + $0x440] sm:$0xf]  ;;  %v500_v9 = vld [vmem:[%s2417_s10 + $0x448] sm:$0xf] }
  0x73   : > { %497 = vst [vmem:[%s2422_s11 + $0x21c] sm:$0xf] %v496_v7  ;;  %499 = vst [vmem:[%s2422_s11 + $0x220] sm:$0xf] %v498_v8  ;;  %v502_v10 = vld [vmem:[%s2417_s10 + $0x450] sm:$0xf] }
  0x74   : > { %501 = vst [vmem:[%s2422_s11 + $0x224] sm:$0xf] %v500_v9  ;;  %v504_v11 = vld [vmem:[%s2417_s10 + $0x458] sm:$0xf]  ;;  %v506_v12 = vld [vmem:[%s2417_s10 + $0x460] sm:$0xf] }
  0x75   : > { %503 = vst [vmem:[%s2422_s11 + $0x228] sm:$0xf] %v502_v10  ;;  %505 = vst [vmem:[%s2422_s11 + $0x22c] sm:$0xf] %v504_v11  ;;  %v508_v13 = vld [vmem:[%s2417_s10 + $0x468] sm:$0xf] }
  0x76   : > { %507 = vst [vmem:[%s2422_s11 + $0x230] sm:$0xf] %v506_v12  ;;  %v510_v14 = vld [vmem:[%s2417_s10 + $0x470] sm:$0xf]  ;;  %v512_v15 = vld [vmem:[%s2417_s10 + $0x478] sm:$0xf] }
  0x77   : > { %509 = vst [vmem:[%s2422_s11 + $0x234] sm:$0xf] %v508_v13  ;;  %511 = vst [vmem:[%s2422_s11 + $0x238] sm:$0xf] %v510_v14 }
  0x78   : > { %513 = vst [vmem:[%s2422_s11 + $0x23c] sm:$0xf] %v512_v15 }
  0x79 PF: > { %p1922_p7 = scmp.ge.s32.totalorder %s2328_s21, 1  ;;  %p841_p8 = scmp.lt.s32.totalorder %s2328_s21, 5 }
  0x7b   : > { %p842_p9 = pnand %p1922_p7, %p841_p8 }
  0x7c   : > { %s848_s12 = sand.u32 (!%p842_p9), 1, %s2304_s15   ;;  %p908_p10 = scmp.lt.s32.totalorder (!%p842_p9), %s2316_s18, 1  ;;  %vm2331_vm0 = vmmov (!%p842_p9), 0  }
  0x7d   : > { %845 = sbr.rel (%p842_p9) target bundleno = 470 (0x1d6), region = 73  ;;  %p2008_p12 = scmp.ne.s32.totalorder (!%p842_p9), %s2312_s17, 0 }
  0x7e   : > { %s2134_s13 = smul.u32 (!%p842_p9), 576, %s848_s12 }
  0x7f   : > { %s897_s8 = smul.u32 (!%p842_p9), 9, %s2312_s17 }
  0x80   : > { %s2714_s25 = scalar_lea.vmem (!%p842_p9), [#allocation3], %s2134_s13 }
  0x81   : > { %v2193_v16 = vld [vmem:[%s2714_s25 + $0x40] sm:$0xff] (!%p842_p9)   ;;  %v2197_v20 = vld [vmem:[%s2714_s25 + $0x48] sm:$0xff] (!%p842_p9)   ;;  %v2201_v24 = vld [vmem:[%s2714_s25 + $0x50] sm:$0xff] (!%p842_p9)   ;;  %p900_p11 = scmp.lt.s32.totalorder (!%p842_p9), %s897_s8, 17 }
  0x82   : > { %v2194_v17 = vld [vmem:[%s2714_s25 + $0xc0] sm:$0xff] (!%p842_p9)   ;;  %2016 = vmatprep.subr.bf16.mxu0 (!%p842_p9), %v2193_v16  ;;  %v2198_v21 = vld [vmem:[%s2714_s25 + $0xc8] sm:$0xff] (!%p842_p9)   ;;  %v2202_v25 = vld [vmem:[%s2714_s25 + $0xd0] sm:$0xff] (!%p842_p9)  }
  0x83   : > { %v2195_v18 = vld [vmem:[%s2714_s25] sm:$0xff] (!%p842_p9)   ;;  %2038 = vmatprep.subr.bf16.mxu1 (!%p842_p9), %v2194_v17  ;;  %v2199_v22 = vld [vmem:[%s2714_s25 + $0x8] sm:$0xff] (!%p842_p9)   ;;  %v2203_v26 = vld [vmem:[%s2714_s25 + $0x10] sm:$0xff] (!%p842_p9)  }
  0x84   : > { %s2860_s18 = smov (!%p908_p10, %s2316_s18), 1  ;;  %v2196_v19 = vld [vmem:[%s2714_s25 + $0x80] sm:$0xff]   ;;  %2017 = vmatpush3.bf16.msra.mxu0 %v2195_v18  ;;  %v2200_v23 = vld [vmem:[%s2714_s25 + $0x88] sm:$0xff]   ;;  %v2204_v27 = vld [vmem:[%s2714_s25 + $0x90] sm:$0xff]   ;;  %s2862_s8 = smov (!%p900_p11, %s897_s8), 17 }
  0x85   : > { %s1924_s14 = sshll.u32 %s2860_s18, 1  ;;  %s1925_s24 = sshll.u32 %s2860_s18, 2  ;;  %2039 = vmatpush3.bf16.msra.mxu1 %v2196_v19  ;;  %2018 = vmatprep.subr.bf16.mxu0 %v2197_v20  ;;  %v2205_v28 = vld [vmem:[%s2714_s25 + $0x58] sm:$0xff]   ;;  %v2209_v32 = vld [vmem:[%s2714_s25 + $0x60] sm:$0xff]   ;;  %v2213_v36 = vld [vmem:[%s2714_s25 + $0x68] sm:$0xff]  }
  0x86   : > { %s2719_s29 = scalar_lea.vmem %s2844_s2, %s1924_s14  ;;  %s2724_s5 = scalar_lea.vmem %s2845_s3, %s1925_s24  ;;  %2040 = vmatprep.subr.bf16.mxu1 %v2198_v21  ;;  %v2206_v29 = vld [vmem:[%s2714_s25 + $0xd8] sm:$0xff]   ;;  %v2210_v33 = vld [vmem:[%s2714_s25 + $0xe0] sm:$0xff]   ;;  %v2214_v37 = vld [vmem:[%s2714_s25 + $0xe8] sm:$0xff]  }
  0x87   : > { %s2730_s7 = scalar_lea.vmem %s2846_s4, %s1925_s24  ;;  %v2207_v30 = vld [vmem:[%s2714_s25 + $0x18] sm:$0xff]   ;;  %v2211_v34 = vld [vmem:[%s2714_s25 + $0x20] sm:$0xff]   ;;  %v2215_v38 = vld [vmem:[%s2714_s25 + $0x28] sm:$0xff]   ;;  %s1923_s9 = sshll.u32 %s2862_s8, 2 }
  0x88   : > { %2019 = vmatpush3.bf16.msra.mxu0 %v2199_v22  ;;  %v2208_v31 = vld [vmem:[%s2714_s25 + $0x98] sm:$0xff]   ;;  %v2212_v35 = vld [vmem:[%s2714_s25 + $0xa0] sm:$0xff]   ;;  %v2216_v39 = vld [vmem:[%s2714_s25 + $0xa8] sm:$0xff]   ;;  %s2764_s12 = scalar_lea.vmem %s2842_s0, %s1923_s9 }
  0x89   : > { %2041 = vmatpush3.bf16.msra.mxu1 %v2200_v23  ;;  %2020 = vmatprep.subr.bf16.mxu0 %v2201_v24  ;;  %v2217_v40 = vld [vmem:[%s2714_s25 + $0x70] sm:$0xff]   ;;  %v2221_v44 = vld [vmem:[%s2714_s25 + $0x78] sm:$0xff]   ;;  %v930_v49 = vld [vmem:[%s2764_s12 + $0x8] sm:$0xff] }
  0x8a   : > { %2042 = vmatprep.subr.bf16.mxu1 %v2202_v25  ;;  %v2218_v41 = vld [vmem:[%s2714_s25 + $0xf0] sm:$0xff]   ;;  %v2222_v45 = vld [vmem:[%s2714_s25 + $0xf8] sm:$0xff]   ;;  %v1929_v52 = vcombine.low %v930_v49, %v930_v49  ;;  %v1930_v53 = vcombine.high %v930_v49, %v930_v49  ;;  %v2229_v54 = vld [vmem:[%s2714_s25 + $0x140] sm:$0xff]  }
  0x8b   : > { %v2219_v42 = vld [vmem:[%s2714_s25 + $0x30] sm:$0xff]   ;;  %v2223_v46 = vld [vmem:[%s2714_s25 + $0x38] sm:$0xff]   ;;  %v2230_v55 = vld [vmem:[%s2714_s25 + $0x100] sm:$0xff]  }
  0x8c   : > { %2021 = vmatpush3.bf16.msra.mxu0 %v2203_v26  ;;  %v2220_v43 = vld [vmem:[%s2714_s25 + $0xb0] sm:$0xff]   ;;  %v2224_v47 = vld [vmem:[%s2714_s25 + $0xb8] sm:$0xff]   ;;  %1614 = vmatprep.mubr.bf16.mxu1 %v1930_v53  ;;  %v2231_v56 = vld [vmem:[%s2714_s25 + $0x1c0] sm:$0xff]   ;;  %v2330_v26 = vmov 0.0  }
  0x8d   : > { %2043 = vmatpush3.bf16.msra.mxu1 %v2204_v27  ;;  %2022 = vmatprep.subr.bf16.mxu0 %v2205_v28  ;;  %v929_v48 = vld [vmem:[%s2764_s12] sm:$0xff]  ;;  %v2232_v57 = vld [vmem:[%s2714_s25 + $0x180] sm:$0xff]   ;;  %v2233_v58 = vld [vmem:[%s2714_s25 + $0x148] sm:$0xff]  }
  0x8e   : > { %2044 = vmatprep.subr.bf16.mxu1 %v2206_v29  ;;  %v1927_v50 = vcombine.low %v929_v48, %v929_v48  ;;  %v1928_v51 = vcombine.high %v929_v48, %v929_v48  ;;  %v2234_v59 = vld [vmem:[%s2714_s25 + $0x108] sm:$0xff]   ;;  %v2237_v62 = vld [vmem:[%s2714_s25 + $0x150] sm:$0xff]   ;;  %v2241_v2 = vld [vmem:[%s2714_s25 + $0x158] sm:$0xff]  }
  0x8f   : > { %v2235_v60 = vld [vmem:[%s2714_s25 + $0x1c8] sm:$0xff]   ;;  %v2238_v63 = vld [vmem:[%s2714_s25 + $0x110] sm:$0xff]   ;;  %v2242_v3 = vld [vmem:[%s2714_s25 + $0x118] sm:$0xff]  }
  0x90   : > { %2023 = vmatpush3.bf16.msra.mxu0 %v2207_v30  ;;  %1574 = vmatprep.mubr.bf16.mxu0 %v1928_v51  ;;  %v2236_v61 = vld [vmem:[%s2714_s25 + $0x188] sm:$0xff]   ;;  %v2239_v0 = vld [vmem:[%s2714_s25 + $0x1d0] sm:$0xff]   ;;  %v2243_v4 = vld [vmem:[%s2714_s25 + $0x1d8] sm:$0xff]  }
  0x91   : > { %2045 = vmatpush3.bf16.msra.mxu1 %v2208_v31  ;;  %2024 = vmatprep.subr.bf16.mxu0 %v2209_v32  ;;  %v2240_v1 = vld [vmem:[%s2714_s25 + $0x190] sm:$0xff]   ;;  %v2244_v5 = vld [vmem:[%s2714_s25 + $0x198] sm:$0xff]   ;;  %v2245_v6 = vld [vmem:[%s2714_s25 + $0x160] sm:$0xff]  }
  0x92   : > { %2046 = vmatprep.subr.bf16.mxu1 %v2210_v33  ;;  %v2246_v7 = vld [vmem:[%s2714_s25 + $0x120] sm:$0xff]   ;;  %v2249_v10 = vld [vmem:[%s2714_s25 + $0x168] sm:$0xff]   ;;  %v2253_v14 = vld [vmem:[%s2714_s25 + $0x170] sm:$0xff]  }
  0x93   : > { %v2247_v8 = vld [vmem:[%s2714_s25 + $0x1e0] sm:$0xff]   ;;  %v2250_v11 = vld [vmem:[%s2714_s25 + $0x128] sm:$0xff]   ;;  %v2254_v15 = vld [vmem:[%s2714_s25 + $0x130] sm:$0xff]  }
  0x94   : > { %2025 = vmatpush3.bf16.msra.mxu0 %v2211_v34  ;;  %v2248_v9 = vld [vmem:[%s2714_s25 + $0x1a0] sm:$0xff]   ;;  %v2251_v12 = vld [vmem:[%s2714_s25 + $0x1e8] sm:$0xff]   ;;  %v2255_v16 = vld [vmem:[%s2714_s25 + $0x1f0] sm:$0xff]  }
  0x95   : > { %2047 = vmatpush3.bf16.msra.mxu1 %v2212_v35  ;;  %2026 = vmatprep.subr.bf16.mxu0 %v2213_v36  ;;  %v2252_v13 = vld [vmem:[%s2714_s25 + $0x1a8] sm:$0xff]   ;;  %v2256_v17 = vld [vmem:[%s2714_s25 + $0x1b0] sm:$0xff]   ;;  %v2257_v18 = vld [vmem:[%s2714_s25 + $0x178] sm:$0xff]  }
  0x96   : > { %2048 = vmatprep.subr.bf16.mxu1 %v2214_v37  ;;  %v2258_v19 = vld [vmem:[%s2714_s25 + $0x138] sm:$0xff]   ;;  %v931_v21 = vld [vmem:[%s2764_s12 + $0x10] sm:$0xff]  ;;  %v932_v25 = vld [vmem:[%s2764_s12 + $0x18] sm:$0xff] }
  0x97   : > { %v2259_v20 = vld [vmem:[%s2714_s25 + $0x1f8] sm:$0xff]   ;;  %v1931_v22 = vcombine.low %v931_v21, %v931_v21  ;;  %v1932_v23 = vcombine.high %v931_v21, %v931_v21  ;;  %v1933_v27 = vcombine.low %v932_v25, %v932_v25  ;;  %v1934_v28 = vcombine.high %v932_v25, %v932_v25  ;;  %v2265_v29 = vld [vmem:[%s2714_s25 + $0x200] sm:$0xff]   ;;  %v2266_v30 = vld [vmem:[%s2714_s25 + $0x208] sm:$0xff]  }
  0x98   : > { %2027 = vmatpush3.bf16.msra.mxu0 %v2215_v38  ;;  %v2262_v24 = vld [vmem:[%s2714_s25 + $0x1b8] sm:$0xff]   ;;  %v2267_v31 = vld [vmem:[%s2714_s25 + $0x210] sm:$0xff]   ;;  %v2269_v33 = vld [vmem:[%s2714_s25 + $0x220] sm:$0xff]  }
  0x99   : > { %2049 = vmatpush3.bf16.msra.mxu1 %v2216_v39  ;;  %2028 = vmatprep.subr.bf16.mxu0 %v2217_v40  ;;  %v2268_v32 = vld [vmem:[%s2714_s25 + $0x218] sm:$0xff]   ;;  %v2270_v34 = vld [vmem:[%s2714_s25 + $0x228] sm:$0xff]   ;;  %v2271_v35 = vld [vmem:[%s2714_s25 + $0x230] sm:$0xff]  }
  0x9a   : > { %2050 = vmatprep.subr.bf16.mxu1 %v2218_v41  ;;  %v2272_v36 = vld [vmem:[%s2714_s25 + $0x238] sm:$0xff]  }
  0x9b   : > { %v2273_v37 = vld [vmem:[%s2764_s12 + $0x20] ss:$0 sps:$4 sm:$0xff]  }
  0x9c   : > { %2029 = vmatpush3.bf16.msra.mxu0 %v2219_v42 }
  0x9d   : > { %2051 = vmatpush3.bf16.msra.mxu1 %v2220_v43  ;;  %2030 = vmatprep.subr.bf16.mxu0 %v2221_v44 }
  0x9e   : > { %2052 = vmatprep.subr.bf16.mxu1 %v2222_v45 }
  0xa0   : > { %2031 = vmatpush3.bf16.msra.mxu0 %v2223_v46 }
  0xa1   : > { %2053 = vmatpush3.bf16.msra.mxu1 %v2224_v47  ;;  %2060 = vmatprep.subr.bf16.mxu0 %v2229_v54 }
  0xa2   : > { %2082 = vmatprep.subr.bf16.mxu1 %v2231_v56 }
  0xa3   : > { %1575 = vmatmul.mubr.bf16.vlgmr.msra.gmra.mrb[0].mxu0 %v1927_v50 }
  0xa4   : > { %1615 = vmatmul.mubr.bf16.vlgmr.msra.gmra.mrb[0].mxu1 %v1929_v52  ;;  %2061 = vmatpush3.bf16.msra.mxu0 %v2230_v55 }
  0xa5   : > { %2083 = vmatpush3.bf16.msra.mxu1 %v2232_v57  ;;  %2062 = vmatprep.subr.bf16.mxu0 %v2233_v58 }
  0xa6   : > { %2084 = vmatprep.subr.bf16.mxu1 %v2235_v60  ;;  %1654 = vmatprep.mubr.bf16.mxu0 %v1932_v23 }
  0xa7   : > { %1694 = vmatprep.mubr.bf16.mxu1 %v1934_v28 }
  0xa8   : > { %2063 = vmatpush3.bf16.msra.mxu0 %v2234_v59 }
  0xa9   : > { %2085 = vmatpush3.bf16.msra.mxu1 %v2236_v61  ;;  %2064 = vmatprep.subr.bf16.mxu0 %v2237_v62 }
  0xaa   : > { %2086 = vmatprep.subr.bf16.mxu1 %v2239_v0 }
  0xac   : > { %2065 = vmatpush3.bf16.msra.mxu0 %v2238_v63 }
  0xad   : > { %2087 = vmatpush3.bf16.msra.mxu1 %v2240_v1  ;;  %2066 = vmatprep.subr.bf16.mxu0 %v2241_v2 }
  0xae   : > { %2088 = vmatprep.subr.bf16.mxu1 %v2243_v4 }
  0xb0   : > { %2067 = vmatpush3.bf16.msra.mxu0 %v2242_v3 }
  0xb1   : > { %2089 = vmatpush3.bf16.msra.mxu1 %v2244_v5  ;;  %2068 = vmatprep.subr.bf16.mxu0 %v2245_v6 }
  0xb2   : > { %2090 = vmatprep.subr.bf16.mxu1 %v2247_v8 }
  0xb4   : > { %2069 = vmatpush3.bf16.msra.mxu0 %v2246_v7 }
  0xb5   : > { %2091 = vmatpush3.bf16.msra.mxu1 %v2248_v9  ;;  %2070 = vmatprep.subr.bf16.mxu0 %v2249_v10 }
  0xb6   : > { %2092 = vmatprep.subr.bf16.mxu1 %v2251_v12 }
  0xb8   : > { %2071 = vmatpush3.bf16.msra.mxu0 %v2250_v11 }
  0xb9   : > { %2093 = vmatpush3.bf16.msra.mxu1 %v2252_v13  ;;  %2072 = vmatprep.subr.bf16.mxu0 %v2253_v14 }
  0xba   : > { %2094 = vmatprep.subr.bf16.mxu1 %v2255_v16 }
  0xbc   : > { %2073 = vmatpush3.bf16.msra.mxu0 %v2254_v15 }
  0xbd   : > { %2095 = vmatpush3.bf16.msra.mxu1 %v2256_v17  ;;  %2074 = vmatprep.subr.bf16.mxu0 %v2257_v18 }
  0xbe   : > { %2096 = vmatprep.subr.bf16.mxu1 %v2259_v20 }
  0xc0   : > { %2075 = vmatpush3.bf16.msra.mxu0 %v2258_v19 }
  0xc1   : > { %2113 = vmatprep.subr.bf16.mxu0 %v2330_v26  ;;  %2097 = vmatpush3.bf16.msra.mxu1 %v2262_v24 }
  0xc3   : > { %1655 = vmatmul.mubr.bf16.vlgmr.msra.gmra.mrb[4].mxu0 %v1931_v22 }
  0xc4   : > { %2114 = vmatpush3.bf16.msra.mxu0 %v2265_v29  ;;  %2129 = vmatprep.mubr.msk.bf16.mxu0 %vm2331_vm0, %v2330_v26 }
  0xc5   : > { %1695 = vmatmul.mubr.bf16.vlgmr.msra.gmra.mrb[4].mxu1 %v1933_v27  ;;  %2115 = vmatprep.subr.bf16.mxu0 %v2330_v26 }
  0xc8   : > { %2116 = vmatpush3.bf16.msra.mxu0 %v2266_v30 }
  0xc9   : > { %2117 = vmatprep.subr.bf16.mxu0 %v2330_v26 }
  0xcc   : > { %2118 = vmatpush3.bf16.msra.mxu0 %v2267_v31 }
  0xcd   : > { %2119 = vmatprep.subr.bf16.mxu0 %v2330_v26 }
  0xd0   : > { %2120 = vmatpush3.bf16.msra.mxu0 %v2268_v32 }
  0xd1   : > { %2121 = vmatprep.subr.bf16.mxu0 %v2330_v26 }
  0xd4   : > { %2122 = vmatpush3.bf16.msra.mxu0 %v2269_v33 }
  0xd5   : > { %2123 = vmatprep.subr.bf16.mxu0 %v2330_v26 }
  0xd8   : > { %2124 = vmatpush3.bf16.msra.mxu0 %v2270_v34 }
  0xd9   : > { %2125 = vmatprep.subr.bf16.mxu0 %v2330_v26 }
  0xdc   : > { %2126 = vmatpush3.bf16.msra.mxu0 %v2271_v35 }
  0xdd   : > { %2127 = vmatprep.subr.bf16.mxu0 %v2330_v26 }
  0xe0   : > { %2128 = vmatpush3.bf16.msra.mxu0 %v2272_v36 }
  0xe3   : > { %2130 = vmatmul.mubr.bf16.vlgmr.msra.gmra.mrb[8].mxu0 %v2273_v37 }
 0x176   : > { %v2032_v38 = vpop.f32.mrb[0].mxu0 }
 0x177   : > { %v2054_v39 = vpop.f32.mrb[0].mxu1  ;;  %v2033_v40 = vpop.f32.mrb[1].mxu0 }
 0x178   : > { %v2034_v41 = vadd.f32 %v2033_v40, %v2032_v38  ;;  %v2055_v42 = vpop.f32.mrb[1].mxu1  ;;  %v2035_v43 = vpop.f32.mrb[2].mxu0 }
 0x179   : > { %v2056_v44 = vadd.f32 %v2055_v42, %v2054_v39  ;;  %v2036_v45 = vpop.f32.mrb[3].mxu0  ;;  %v2057_v46 = vpop.f32.mrb[2].mxu1 }
 0x17a   : > { %v2058_v47 = vpop.f32.mrb[3].mxu1 }
 0x17b   : > { %v1617_v48 = vadd.f32 %v2056_v44, %v2034_v41 }
 0x196   : > { %v2076_v49 = vpop.f32.mrb[4].mxu0 }
 0x197   : > { %v2077_v50 = vpop.f32.mrb[5].mxu0 }
 0x198   : > { %v2078_v51 = vadd.f32 %v2077_v50, %v2076_v49  ;;  %v2079_v52 = vpop.f32.mrb[6].mxu0  ;;  %v2098_v53 = vpop.f32.mrb[4].mxu1 }
 0x199   : > { %v2080_v54 = vpop.f32.mrb[7].mxu0  ;;  %v2099_v55 = vpop.f32.mrb[5].mxu1 }
 0x19a   : > { %v1657_v56 = vadd.f32 %v2078_v51, %v1617_v48  ;;  %v2100_v57 = vadd.f32 %v2099_v55, %v2098_v53  ;;  %v2101_v58 = vpop.f32.mrb[6].mxu1 }
 0x19b   : > { %v2102_v59 = vpop.f32.mrb[7].mxu1 }
 0x19c   : > { %v1697_v60 = vadd.f32 %v2100_v57, %v1657_v56 }
 0x1b3   : > { %1745 = sbr.rel (%p2008_p12) target bundleno = 442 (0x1ba), region = 81 }
 0x1b6   : > { %v1736_v61 = vpop.f32.mrb[8].mxu0 }
 0x1b7   : > { %v1737_v62 = vadd.f32 %v1736_v61, %v1697_v60  ;;  %v2131_v63 = vpop.f32.mrb[9].mxu0 }
 0x1b8   : > { %v1739_v0 = vpop.f32.mrb[10].mxu0 }
 0x1b9   : > { %v2132_v1 = vpop.f32.mrb[11].mxu0  ;;  %1746 = vst [vmem:[#allocation2] sm:$0xff] (!%p2008_p12), %v1737_v62 }
 0x1ba PF: > { %p2009_p13 = scmp.le.s32.totalorder %s2312_s17, 0 }
 0x1bc   : > { %1750 = sbr.rel (%p2009_p13) target bundleno = 452 (0x1c4), region = 85 }
 0x1c0   : > { %v1751_v2 = vld [vmem:[#allocation2] sm:$0xff] (!%p2009_p13) }
 0x1c1   : > { %v1752_v3 = vadd.f32 (!%p2009_p13), %v1751_v2, %v1737_v62 }
 0x1c3   : > { %1753 = vst [vmem:[#allocation2] sm:$0xff] %v1752_v3 }
 0x1c4 PF: > { %p2010_p0 = scmp.ne.s32.totalorder %s2312_s17, 1 }
 0x1c5   : > { %v2011_v5 = vld [vmem:[%s2719_s29] ss:$0 sm:$0xff] (!%p2010_p0)  ;;  %v2012_v6 = vld [vmem:[%s2719_s29 + $0x1] ss:$0 sm:$0xff] (!%p2010_p0) }
 0x1c6   : > { %1757 = sbr.rel (%p2010_p0) target bundleno = 470 (0x1d6), region = 89  ;;  %v1771_v8 = vld [vmem:[%s2724_s5] sm:$0xf] (!%p2010_p0) }
 0x1c7   : > { %v1772_v9 = vunpack.c.l.bf16 (!%p2010_p0), %v1771_v8 }
 0x1ca   : > { %v1758_v4 = vld [vmem:[#allocation2] sm:$0xff] (!%p2010_p0) }
 0x1cb   : > { %v1764_v7 = vmul.f32 (!%p2010_p0), %v2011_v5, %v1758_v4 }
 0x1cd   : > { %v1770_v10 = vadd.f32 %v2012_v6, %v1764_v7 }
 0x1cf   : > { %v1773_v11 = vadd.f32 %v1772_v9, %v1770_v10 }
 0x1d1   : > { %v1774_v12 = vmax.f32 %v1773_v11, 0.0 }
 0x1d3   : > { %v1775_v13 = vpack.c.bf16 %v1774_v12, %v1774_v12 }
 0x1d5   : > { %1776 = vst [vmem:[%s2730_s7] sm:$0xf] %v1775_v13 }
 0x1d6 PF: > { %s14_s21 = sadd.s32 1, %s2328_s21   ;;  %s2847_s15 = smov %s2308_s16 }
 0x1d7   : > { %p11_p1 = scmp.ge.s32.totalorder %s14_s21, 6   ;;  %s2848_s16 = smov %s2408_s28 }
 0x1d8   : > { %s2849_s17 = smov %s2320_s19  ;;  %s2850_s18 = smov %s2324_s20 }
 0x1d9   : > { %s2851_s19 = smov %s2854_s22  ;;  %s2852_s20 = smov %s2858_s23 }
 0x1da   :  { %13 = sbr.rel (!%p11_p1) target bundleno = 4 (0x4), region = 133 }

// kernel: resnet_forward.22
= control target key start
LH: loop header
LB: loop body
LE: loop exit
PB: predicated region body
PF: predicated region fallthrough
CT: control target
= control target key end

     0   :  { %s2718_s12 = smov 0   ;;  %s2720_s13 = smov 0   ;;  %s3280_s0 = inlined_call_operand.vmem [shape: bf16[8,2304], index: 0, kind: input, shape index: {}]   ;;  %s3281_s1 = inlined_call_operand.vmem [shape: bf16[2304,512], index: 1, kind: input, shape index: {}]   ;;  %s3282_s2 = inlined_call_operand.vmem [shape: f32[2,512], index: 2, kind: input, shape index: {}]   ;;  %s3283_s3 = inlined_call_operand.vmem [shape: bf16[8,512], index: 3, kind: output, shape index: {}]  }
   0x1   :  { %s2722_s14 = smov 0   ;;  %s2724_s15 = smov 0  }
   0x2   :  { %s2726_s16 = smov 0   ;;  %s2728_s17 = smov 0  }
   0x3   :  { %s2730_s18 = smov 0  }
   0x4 LB: > { %s25_s19 = sadd.s32 1, %s2687_s16  ;;  %s28_s20 = sadd.s32 1, %s2691_s17  ;;  %s2695_s18 = sphi %s2730_s18, %s13_s18   ;;  %s2691_s17 = sphi %s2728_s17, %s3289_s17   ;;  %s2687_s16 = sphi %s2726_s16, %s3288_s16   ;;  %s2683_s15 = sphi %s2724_s15, %s3287_s15   ;;  %s2679_s14 = sphi %s2722_s14, %s3286_s14   ;;  %s2675_s13 = sphi %s2720_s13, %s3285_s13   ;;  %s2671_s12 = sphi %s2718_s12, %s3284_s12  }
   0x5   : > { %p26_p0 = scmp.ge.s32.totalorder %s25_s19, 2  ;;  %p76_p1 = scmp.ne.s32.totalorder %s2675_s13, %s2671_s12 }
   0x6   : > { %p77_p2 = scmp.eq.s32.totalorder %s2695_s18, 0  ;;  %s69_s24 = sadd.s32 1, %s2675_s13 }
   0x7   : > { %s3291_s19 = smov (%p26_p0, %s25_s19), 0  ;;  %s3293_s20 = smov (!%p26_p0, %s28_s20), %s2691_s17 }
   0x8   : > { %p78_p3 = por %p77_p2, %p76_p1  ;;  %p30_p4 = scmp.ge.s32.totalorder %s3293_s20, 2 }
   0x9   : > { %s64_s21 = ssub.s32 %s2687_s16, %s3291_s19  ;;  %p2171_p6 = scmp.ge.s32.totalorder %s2695_s18, 4 }
   0xa   : > { %s3295_s20 = smov (%p30_p4, %s3293_s20), 0 }
   0xb   : > { %s65_s22 = ssub.s32 %s2691_s17, %s3295_s20  ;;  %156 = sbr.rel (%p2171_p6) target bundleno = 98 (0x62), region = 16 }
   0xc   : > { %s66_s23 = sor.u32 %s65_s22, %s64_s21 }
   0xd   : > { %p67_p5 = scmp.eq.s32.totalorder %s66_s23, 0 }
   0xf   : > { %s2769_s25 = scalar_select %p67_p5, %s2675_s13, %s69_s24  }
  0x12   : > { %172 = sbr.rel (!%p78_p3) target bundleno = 98 (0x62), region = 24  ;;  %s174_s26 = sand.u32 (%p78_p3), 1, %s2675_s13  }
  0x13   : > { %s2357_s27 = smul.u32 (%p78_p3), 1152, %s174_s26  ;;  %s2172_s28 = sshll.u32 (%p78_p3), %s2691_s17, 1 }
  0x14   : > { %s2341_s29 = smul.u32 (%p78_p3), 576, %s2687_s16 }
  0x15   : > { %s2783_s8 = scalar_lea.vmem (%p78_p3), [#allocation3], %s2357_s27 }
  0x16   : > { %s180_s30 = sadd.s32 (%p78_p3), %s2341_s29, %s2172_s28 }
  0x17   : > { %s2174_s4 = sshll.u32 (%p78_p3), %s180_s30, 2 }
  0x18   : > { %s2778_s7 = scalar_lea.vmem (%p78_p3), %s3281_s1, %s2174_s4 }
  0x19   : > { %v496_v0 = vld [vmem:[%s2778_s7] sm:$0xff]  ;;  %v498_v1 = vld [vmem:[%s2778_s7 + $0x10] sm:$0xff] }
  0x1a   : > { %v500_v2 = vld [vmem:[%s2778_s7 + $0x20] sm:$0xff]  ;;  %497 = vst [vmem:[%s2783_s8] sm:$0xff] %v496_v0  ;;  %499 = vst [vmem:[%s2783_s8 + $0x8] sm:$0xff] %v498_v1  ;;  %v502_v3 = vld [vmem:[%s2778_s7 + $0x30] sm:$0xff] }
  0x1b   : > { %501 = vst [vmem:[%s2783_s8 + $0x10] sm:$0xff] %v500_v2  ;;  %v504_v4 = vld [vmem:[%s2778_s7 + $0x40] sm:$0xff]  ;;  %v506_v5 = vld [vmem:[%s2778_s7 + $0x50] sm:$0xff]  ;;  %503 = vst [vmem:[%s2783_s8 + $0x18] sm:$0xff] %v502_v3 }
  0x1c   : > { %505 = vst [vmem:[%s2783_s8 + $0x20] sm:$0xff] %v504_v4  ;;  %507 = vst [vmem:[%s2783_s8 + $0x28] sm:$0xff] %v506_v5  ;;  %v508_v6 = vld [vmem:[%s2778_s7 + $0x60] sm:$0xff]  ;;  %v510_v7 = vld [vmem:[%s2778_s7 + $0x70] sm:$0xff] }
  0x1d   : > { %v512_v8 = vld [vmem:[%s2778_s7 + $0x80] sm:$0xff]  ;;  %509 = vst [vmem:[%s2783_s8 + $0x30] sm:$0xff] %v508_v6  ;;  %511 = vst [vmem:[%s2783_s8 + $0x38] sm:$0xff] %v510_v7  ;;  %v514_v9 = vld [vmem:[%s2778_s7 + $0x90] sm:$0xff] }
  0x1e   : > { %513 = vst [vmem:[%s2783_s8 + $0x40] sm:$0xff] %v512_v8  ;;  %v516_v10 = vld [vmem:[%s2778_s7 + $0xa0] sm:$0xff]  ;;  %v518_v11 = vld [vmem:[%s2778_s7 + $0xb0] sm:$0xff]  ;;  %515 = vst [vmem:[%s2783_s8 + $0x48] sm:$0xff] %v514_v9 }
  0x1f   : > { %517 = vst [vmem:[%s2783_s8 + $0x50] sm:$0xff] %v516_v10  ;;  %519 = vst [vmem:[%s2783_s8 + $0x58] sm:$0xff] %v518_v11  ;;  %v520_v12 = vld [vmem:[%s2778_s7 + $0xc0] sm:$0xff]  ;;  %v522_v13 = vld [vmem:[%s2778_s7 + $0xd0] sm:$0xff] }
  0x20   : > { %v524_v14 = vld [vmem:[%s2778_s7 + $0xe0] sm:$0xff]  ;;  %521 = vst [vmem:[%s2783_s8 + $0x60] sm:$0xff] %v520_v12  ;;  %523 = vst [vmem:[%s2783_s8 + $0x68] sm:$0xff] %v522_v13  ;;  %v526_v15 = vld [vmem:[%s2778_s7 + $0xf0] sm:$0xff] }
  0x21   : > { %525 = vst [vmem:[%s2783_s8 + $0x70] sm:$0xff] %v524_v14  ;;  %v528_v16 = vld [vmem:[%s2778_s7 + $0x100] sm:$0xff]  ;;  %v530_v17 = vld [vmem:[%s2778_s7 + $0x110] sm:$0xff]  ;;  %527 = vst [vmem:[%s2783_s8 + $0x78] sm:$0xff] %v526_v15 }
  0x22   : > { %529 = vst [vmem:[%s2783_s8 + $0x80] sm:$0xff] %v528_v16  ;;  %531 = vst [vmem:[%s2783_s8 + $0x88] sm:$0xff] %v530_v17  ;;  %v532_v18 = vld [vmem:[%s2778_s7 + $0x120] sm:$0xff]  ;;  %v534_v19 = vld [vmem:[%s2778_s7 + $0x130] sm:$0xff] }
  0x23   : > { %v536_v20 = vld [vmem:[%s2778_s7 + $0x140] sm:$0xff]  ;;  %533 = vst [vmem:[%s2783_s8 + $0x90] sm:$0xff] %v532_v18  ;;  %535 = vst [vmem:[%s2783_s8 + $0x98] sm:$0xff] %v534_v19  ;;  %v538_v21 = vld [vmem:[%s2778_s7 + $0x150] sm:$0xff] }
  0x24   : > { %537 = vst [vmem:[%s2783_s8 + $0xa0] sm:$0xff] %v536_v20  ;;  %v540_v22 = vld [vmem:[%s2778_s7 + $0x160] sm:$0xff]  ;;  %v542_v23 = vld [vmem:[%s2778_s7 + $0x170] sm:$0xff]  ;;  %539 = vst [vmem:[%s2783_s8 + $0xa8] sm:$0xff] %v538_v21 }
  0x25   : > { %541 = vst [vmem:[%s2783_s8 + $0xb0] sm:$0xff] %v540_v22  ;;  %543 = vst [vmem:[%s2783_s8 + $0xb8] sm:$0xff] %v542_v23  ;;  %v544_v24 = vld [vmem:[%s2778_s7 + $0x180] sm:$0xff]  ;;  %v546_v25 = vld [vmem:[%s2778_s7 + $0x190] sm:$0xff] }
  0x26   : > { %v548_v26 = vld [vmem:[%s2778_s7 + $0x1a0] sm:$0xff]  ;;  %545 = vst [vmem:[%s2783_s8 + $0xc0] sm:$0xff] %v544_v24  ;;  %547 = vst [vmem:[%s2783_s8 + $0xc8] sm:$0xff] %v546_v25  ;;  %v550_v27 = vld [vmem:[%s2778_s7 + $0x1b0] sm:$0xff] }
  0x27   : > { %549 = vst [vmem:[%s2783_s8 + $0xd0] sm:$0xff] %v548_v26  ;;  %v552_v28 = vld [vmem:[%s2778_s7 + $0x1c0] sm:$0xff]  ;;  %v554_v29 = vld [vmem:[%s2778_s7 + $0x1d0] sm:$0xff]  ;;  %551 = vst [vmem:[%s2783_s8 + $0xd8] sm:$0xff] %v550_v27 }
  0x28   : > { %553 = vst [vmem:[%s2783_s8 + $0xe0] sm:$0xff] %v552_v28  ;;  %555 = vst [vmem:[%s2783_s8 + $0xe8] sm:$0xff] %v554_v29  ;;  %v556_v30 = vld [vmem:[%s2778_s7 + $0x1e0] sm:$0xff]  ;;  %v558_v31 = vld [vmem:[%s2778_s7 + $0x1f0] sm:$0xff] }
  0x29   : > { %v560_v32 = vld [vmem:[%s2778_s7 + $0x200] sm:$0xff]  ;;  %557 = vst [vmem:[%s2783_s8 + $0xf0] sm:$0xff] %v556_v30  ;;  %559 = vst [vmem:[%s2783_s8 + $0xf8] sm:$0xff] %v558_v31  ;;  %v562_v33 = vld [vmem:[%s2778_s7 + $0x210] sm:$0xff] }
  0x2a   : > { %561 = vst [vmem:[%s2783_s8 + $0x100] sm:$0xff] %v560_v32  ;;  %v564_v34 = vld [vmem:[%s2778_s7 + $0x220] sm:$0xff]  ;;  %v566_v35 = vld [vmem:[%s2778_s7 + $0x230] sm:$0xff]  ;;  %563 = vst [vmem:[%s2783_s8 + $0x108] sm:$0xff] %v562_v33 }
  0x2b   : > { %565 = vst [vmem:[%s2783_s8 + $0x110] sm:$0xff] %v564_v34  ;;  %567 = vst [vmem:[%s2783_s8 + $0x118] sm:$0xff] %v566_v35  ;;  %v568_v36 = vld [vmem:[%s2778_s7 + $0x240] sm:$0xff]  ;;  %v570_v37 = vld [vmem:[%s2778_s7 + $0x250] sm:$0xff] }
  0x2c   : > { %v572_v38 = vld [vmem:[%s2778_s7 + $0x260] sm:$0xff]  ;;  %569 = vst [vmem:[%s2783_s8 + $0x120] sm:$0xff] %v568_v36  ;;  %571 = vst [vmem:[%s2783_s8 + $0x128] sm:$0xff] %v570_v37  ;;  %v574_v39 = vld [vmem:[%s2778_s7 + $0x270] sm:$0xff] }
  0x2d   : > { %573 = vst [vmem:[%s2783_s8 + $0x130] sm:$0xff] %v572_v38  ;;  %v576_v40 = vld [vmem:[%s2778_s7 + $0x280] sm:$0xff]  ;;  %v578_v41 = vld [vmem:[%s2778_s7 + $0x290] sm:$0xff]  ;;  %575 = vst [vmem:[%s2783_s8 + $0x138] sm:$0xff] %v574_v39 }
  0x2e   : > { %577 = vst [vmem:[%s2783_s8 + $0x140] sm:$0xff] %v576_v40  ;;  %579 = vst [vmem:[%s2783_s8 + $0x148] sm:$0xff] %v578_v41  ;;  %v580_v42 = vld [vmem:[%s2778_s7 + $0x2a0] sm:$0xff]  ;;  %v582_v43 = vld [vmem:[%s2778_s7 + $0x2b0] sm:$0xff] }
  0x2f   : > { %v584_v44 = vld [vmem:[%s2778_s7 + $0x2c0] sm:$0xff]  ;;  %581 = vst [vmem:[%s2783_s8 + $0x150] sm:$0xff] %v580_v42  ;;  %583 = vst [vmem:[%s2783_s8 + $0x158] sm:$0xff] %v582_v43  ;;  %v586_v45 = vld [vmem:[%s2778_s7 + $0x2d0] sm:$0xff] }
  0x30   : > { %585 = vst [vmem:[%s2783_s8 + $0x160] sm:$0xff] %v584_v44  ;;  %v588_v46 = vld [vmem:[%s2778_s7 + $0x2e0] sm:$0xff]  ;;  %v590_v47 = vld [vmem:[%s2778_s7 + $0x2f0] sm:$0xff]  ;;  %587 = vst [vmem:[%s2783_s8 + $0x168] sm:$0xff] %v586_v45 }
  0x31   : > { %589 = vst [vmem:[%s2783_s8 + $0x170] sm:$0xff] %v588_v46  ;;  %591 = vst [vmem:[%s2783_s8 + $0x178] sm:$0xff] %v590_v47  ;;  %v592_v48 = vld [vmem:[%s2778_s7 + $0x300] sm:$0xff]  ;;  %v594_v49 = vld [vmem:[%s2778_s7 + $0x310] sm:$0xff] }
  0x32   : > { %v596_v50 = vld [vmem:[%s2778_s7 + $0x320] sm:$0xff]  ;;  %593 = vst [vmem:[%s2783_s8 + $0x180] sm:$0xff] %v592_v48  ;;  %595 = vst [vmem:[%s2783_s8 + $0x188] sm:$0xff] %v594_v49  ;;  %v598_v51 = vld [vmem:[%s2778_s7 + $0x330] sm:$0xff] }
  0x33   : > { %597 = vst [vmem:[%s2783_s8 + $0x190] sm:$0xff] %v596_v50  ;;  %v600_v52 = vld [vmem:[%s2778_s7 + $0x340] sm:$0xff]  ;;  %v602_v53 = vld [vmem:[%s2778_s7 + $0x350] sm:$0xff]  ;;  %599 = vst [vmem:[%s2783_s8 + $0x198] sm:$0xff] %v598_v51 }
  0x34   : > { %601 = vst [vmem:[%s2783_s8 + $0x1a0] sm:$0xff] %v600_v52  ;;  %603 = vst [vmem:[%s2783_s8 + $0x1a8] sm:$0xff] %v602_v53  ;;  %v604_v54 = vld [vmem:[%s2778_s7 + $0x360] sm:$0xff]  ;;  %v606_v55 = vld [vmem:[%s2778_s7 + $0x370] sm:$0xff] }
  0x35   : > { %v608_v56 = vld [vmem:[%s2778_s7 + $0x380] sm:$0xff]  ;;  %605 = vst [vmem:[%s2783_s8 + $0x1b0] sm:$0xff] %v604_v54  ;;  %607 = vst [vmem:[%s2783_s8 + $0x1b8] sm:$0xff] %v606_v55  ;;  %v610_v57 = vld [vmem:[%s2778_s7 + $0x390] sm:$0xff] }
  0x36   : > { %609 = vst [vmem:[%s2783_s8 + $0x1c0] sm:$0xff] %v608_v56  ;;  %v612_v58 = vld [vmem:[%s2778_s7 + $0x3a0] sm:$0xff]  ;;  %v614_v59 = vld [vmem:[%s2778_s7 + $0x3b0] sm:$0xff]  ;;  %611 = vst [vmem:[%s2783_s8 + $0x1c8] sm:$0xff] %v610_v57 }
  0x37   : > { %613 = vst [vmem:[%s2783_s8 + $0x1d0] sm:$0xff] %v612_v58  ;;  %615 = vst [vmem:[%s2783_s8 + $0x1d8] sm:$0xff] %v614_v59  ;;  %v616_v60 = vld [vmem:[%s2778_s7 + $0x3c0] sm:$0xff]  ;;  %v618_v61 = vld [vmem:[%s2778_s7 + $0x3d0] sm:$0xff] }
  0x38   : > { %v620_v62 = vld [vmem:[%s2778_s7 + $0x3e0] sm:$0xff]  ;;  %617 = vst [vmem:[%s2783_s8 + $0x1e0] sm:$0xff] %v616_v60  ;;  %619 = vst [vmem:[%s2783_s8 + $0x1e8] sm:$0xff] %v618_v61  ;;  %v622_v63 = vld [vmem:[%s2778_s7 + $0x3f0] sm:$0xff] }
  0x39   : > { %621 = vst [vmem:[%s2783_s8 + $0x1f0] sm:$0xff] %v620_v62  ;;  %v624_v0 = vld [vmem:[%s2778_s7 + $0x400] sm:$0xff]  ;;  %v626_v1 = vld [vmem:[%s2778_s7 + $0x410] sm:$0xff]  ;;  %623 = vst [vmem:[%s2783_s8 + $0x1f8] sm:$0xff] %v622_v63 }
  0x3a   : > { %625 = vst [vmem:[%s2783_s8 + $0x200] sm:$0xff] %v624_v0  ;;  %627 = vst [vmem:[%s2783_s8 + $0x208] sm:$0xff] %v626_v1  ;;  %v628_v2 = vld [vmem:[%s2778_s7 + $0x420] sm:$0xff]  ;;  %v630_v3 = vld [vmem:[%s2778_s7 + $0x430] sm:$0xff] }
  0x3b   : > { %v632_v4 = vld [vmem:[%s2778_s7 + $0x440] sm:$0xff]  ;;  %629 = vst [vmem:[%s2783_s8 + $0x210] sm:$0xff] %v628_v2  ;;  %631 = vst [vmem:[%s2783_s8 + $0x218] sm:$0xff] %v630_v3  ;;  %v634_v5 = vld [vmem:[%s2778_s7 + $0x450] sm:$0xff] }
  0x3c   : > { %633 = vst [vmem:[%s2783_s8 + $0x220] sm:$0xff] %v632_v4  ;;  %v636_v6 = vld [vmem:[%s2778_s7 + $0x460] sm:$0xff]  ;;  %v638_v7 = vld [vmem:[%s2778_s7 + $0x470] sm:$0xff]  ;;  %635 = vst [vmem:[%s2783_s8 + $0x228] sm:$0xff] %v634_v5 }
  0x3d   : > { %637 = vst [vmem:[%s2783_s8 + $0x230] sm:$0xff] %v636_v6  ;;  %639 = vst [vmem:[%s2783_s8 + $0x238] sm:$0xff] %v638_v7  ;;  %v640_v8 = vld [vmem:[%s2778_s7 + $0x480] sm:$0xff]  ;;  %v642_v9 = vld [vmem:[%s2778_s7 + $0x490] sm:$0xff] }
  0x3e   : > { %v644_v10 = vld [vmem:[%s2778_s7 + $0x4a0] sm:$0xff]  ;;  %641 = vst [vmem:[%s2783_s8 + $0x240] sm:$0xff] %v640_v8  ;;  %643 = vst [vmem:[%s2783_s8 + $0x248] sm:$0xff] %v642_v9  ;;  %v646_v11 = vld [vmem:[%s2778_s7 + $0x4b0] sm:$0xff] }
  0x3f   : > { %645 = vst [vmem:[%s2783_s8 + $0x250] sm:$0xff] %v644_v10  ;;  %v648_v12 = vld [vmem:[%s2778_s7 + $0x4c0] sm:$0xff]  ;;  %v650_v13 = vld [vmem:[%s2778_s7 + $0x4d0] sm:$0xff]  ;;  %647 = vst [vmem:[%s2783_s8 + $0x258] sm:$0xff] %v646_v11 }
  0x40   : > { %649 = vst [vmem:[%s2783_s8 + $0x260] sm:$0xff] %v648_v12  ;;  %651 = vst [vmem:[%s2783_s8 + $0x268] sm:$0xff] %v650_v13  ;;  %v652_v14 = vld [vmem:[%s2778_s7 + $0x4e0] sm:$0xff]  ;;  %v654_v15 = vld [vmem:[%s2778_s7 + $0x4f0] sm:$0xff] }
  0x41   : > { %v656_v16 = vld [vmem:[%s2778_s7 + $0x500] sm:$0xff]  ;;  %653 = vst [vmem:[%s2783_s8 + $0x270] sm:$0xff] %v652_v14  ;;  %655 = vst [vmem:[%s2783_s8 + $0x278] sm:$0xff] %v654_v15  ;;  %v658_v17 = vld [vmem:[%s2778_s7 + $0x510] sm:$0xff] }
  0x42   : > { %657 = vst [vmem:[%s2783_s8 + $0x280] sm:$0xff] %v656_v16  ;;  %v660_v18 = vld [vmem:[%s2778_s7 + $0x520] sm:$0xff]  ;;  %v662_v19 = vld [vmem:[%s2778_s7 + $0x530] sm:$0xff]  ;;  %659 = vst [vmem:[%s2783_s8 + $0x288] sm:$0xff] %v658_v17 }
  0x43   : > { %661 = vst [vmem:[%s2783_s8 + $0x290] sm:$0xff] %v660_v18  ;;  %663 = vst [vmem:[%s2783_s8 + $0x298] sm:$0xff] %v662_v19  ;;  %v664_v20 = vld [vmem:[%s2778_s7 + $0x540] sm:$0xff]  ;;  %v666_v21 = vld [vmem:[%s2778_s7 + $0x550] sm:$0xff] }
  0x44   : > { %v668_v22 = vld [vmem:[%s2778_s7 + $0x560] sm:$0xff]  ;;  %665 = vst [vmem:[%s2783_s8 + $0x2a0] sm:$0xff] %v664_v20  ;;  %667 = vst [vmem:[%s2783_s8 + $0x2a8] sm:$0xff] %v666_v21  ;;  %v670_v23 = vld [vmem:[%s2778_s7 + $0x570] sm:$0xff] }
  0x45   : > { %669 = vst [vmem:[%s2783_s8 + $0x2b0] sm:$0xff] %v668_v22  ;;  %v672_v24 = vld [vmem:[%s2778_s7 + $0x580] sm:$0xff]  ;;  %v674_v25 = vld [vmem:[%s2778_s7 + $0x590] sm:$0xff]  ;;  %671 = vst [vmem:[%s2783_s8 + $0x2b8] sm:$0xff] %v670_v23 }
  0x46   : > { %673 = vst [vmem:[%s2783_s8 + $0x2c0] sm:$0xff] %v672_v24  ;;  %675 = vst [vmem:[%s2783_s8 + $0x2c8] sm:$0xff] %v674_v25  ;;  %v676_v26 = vld [vmem:[%s2778_s7 + $0x5a0] sm:$0xff]  ;;  %v678_v27 = vld [vmem:[%s2778_s7 + $0x5b0] sm:$0xff] }
  0x47   : > { %v680_v28 = vld [vmem:[%s2778_s7 + $0x5c0] sm:$0xff]  ;;  %677 = vst [vmem:[%s2783_s8 + $0x2d0] sm:$0xff] %v676_v26  ;;  %679 = vst [vmem:[%s2783_s8 + $0x2d8] sm:$0xff] %v678_v27  ;;  %v682_v29 = vld [vmem:[%s2778_s7 + $0x5d0] sm:$0xff] }
  0x48   : > { %681 = vst [vmem:[%s2783_s8 + $0x2e0] sm:$0xff] %v680_v28  ;;  %v684_v30 = vld [vmem:[%s2778_s7 + $0x5e0] sm:$0xff]  ;;  %v686_v31 = vld [vmem:[%s2778_s7 + $0x5f0] sm:$0xff]  ;;  %683 = vst [vmem:[%s2783_s8 + $0x2e8] sm:$0xff] %v682_v29 }
  0x49   : > { %685 = vst [vmem:[%s2783_s8 + $0x2f0] sm:$0xff] %v684_v30  ;;  %687 = vst [vmem:[%s2783_s8 + $0x2f8] sm:$0xff] %v686_v31  ;;  %v688_v32 = vld [vmem:[%s2778_s7 + $0x600] sm:$0xff]  ;;  %v690_v33 = vld [vmem:[%s2778_s7 + $0x610] sm:$0xff] }
  0x4a   : > { %v692_v34 = vld [vmem:[%s2778_s7 + $0x620] sm:$0xff]  ;;  %689 = vst [vmem:[%s2783_s8 + $0x300] sm:$0xff] %v688_v32  ;;  %691 = vst [vmem:[%s2783_s8 + $0x308] sm:$0xff] %v690_v33  ;;  %v694_v35 = vld [vmem:[%s2778_s7 + $0x630] sm:$0xff] }
  0x4b   : > { %693 = vst [vmem:[%s2783_s8 + $0x310] sm:$0xff] %v692_v34  ;;  %v696_v36 = vld [vmem:[%s2778_s7 + $0x640] sm:$0xff]  ;;  %v698_v37 = vld [vmem:[%s2778_s7 + $0x650] sm:$0xff]  ;;  %695 = vst [vmem:[%s2783_s8 + $0x318] sm:$0xff] %v694_v35 }
  0x4c   : > { %697 = vst [vmem:[%s2783_s8 + $0x320] sm:$0xff] %v696_v36  ;;  %699 = vst [vmem:[%s2783_s8 + $0x328] sm:$0xff] %v698_v37  ;;  %v700_v38 = vld [vmem:[%s2778_s7 + $0x660] sm:$0xff]  ;;  %v702_v39 = vld [vmem:[%s2778_s7 + $0x670] sm:$0xff] }
  0x4d   : > { %v704_v40 = vld [vmem:[%s2778_s7 + $0x680] sm:$0xff]  ;;  %701 = vst [vmem:[%s2783_s8 + $0x330] sm:$0xff] %v700_v38  ;;  %703 = vst [vmem:[%s2783_s8 + $0x338] sm:$0xff] %v702_v39  ;;  %v706_v41 = vld [vmem:[%s2778_s7 + $0x690] sm:$0xff] }
  0x4e   : > { %705 = vst [vmem:[%s2783_s8 + $0x340] sm:$0xff] %v704_v40  ;;  %v708_v42 = vld [vmem:[%s2778_s7 + $0x6a0] sm:$0xff]  ;;  %v710_v43 = vld [vmem:[%s2778_s7 + $0x6b0] sm:$0xff]  ;;  %707 = vst [vmem:[%s2783_s8 + $0x348] sm:$0xff] %v706_v41 }
  0x4f   : > { %709 = vst [vmem:[%s2783_s8 + $0x350] sm:$0xff] %v708_v42  ;;  %711 = vst [vmem:[%s2783_s8 + $0x358] sm:$0xff] %v710_v43  ;;  %v712_v44 = vld [vmem:[%s2778_s7 + $0x6c0] sm:$0xff]  ;;  %v714_v45 = vld [vmem:[%s2778_s7 + $0x6d0] sm:$0xff] }
  0x50   : > { %v716_v46 = vld [vmem:[%s2778_s7 + $0x6e0] sm:$0xff]  ;;  %713 = vst [vmem:[%s2783_s8 + $0x360] sm:$0xff] %v712_v44  ;;  %715 = vst [vmem:[%s2783_s8 + $0x368] sm:$0xff] %v714_v45  ;;  %v718_v47 = vld [vmem:[%s2778_s7 + $0x6f0] sm:$0xff] }
  0x51   : > { %717 = vst [vmem:[%s2783_s8 + $0x370] sm:$0xff] %v716_v46  ;;  %v720_v48 = vld [vmem:[%s2778_s7 + $0x700] sm:$0xff]  ;;  %v722_v49 = vld [vmem:[%s2778_s7 + $0x710] sm:$0xff]  ;;  %719 = vst [vmem:[%s2783_s8 + $0x378] sm:$0xff] %v718_v47 }
  0x52   : > { %721 = vst [vmem:[%s2783_s8 + $0x380] sm:$0xff] %v720_v48  ;;  %723 = vst [vmem:[%s2783_s8 + $0x388] sm:$0xff] %v722_v49  ;;  %v724_v50 = vld [vmem:[%s2778_s7 + $0x720] sm:$0xff]  ;;  %v726_v51 = vld [vmem:[%s2778_s7 + $0x730] sm:$0xff] }
  0x53   : > { %v728_v52 = vld [vmem:[%s2778_s7 + $0x740] sm:$0xff]  ;;  %725 = vst [vmem:[%s2783_s8 + $0x390] sm:$0xff] %v724_v50  ;;  %727 = vst [vmem:[%s2783_s8 + $0x398] sm:$0xff] %v726_v51  ;;  %v730_v53 = vld [vmem:[%s2778_s7 + $0x750] sm:$0xff] }
  0x54   : > { %729 = vst [vmem:[%s2783_s8 + $0x3a0] sm:$0xff] %v728_v52  ;;  %v732_v54 = vld [vmem:[%s2778_s7 + $0x760] sm:$0xff]  ;;  %v734_v55 = vld [vmem:[%s2778_s7 + $0x770] sm:$0xff]  ;;  %731 = vst [vmem:[%s2783_s8 + $0x3a8] sm:$0xff] %v730_v53 }
  0x55   : > { %733 = vst [vmem:[%s2783_s8 + $0x3b0] sm:$0xff] %v732_v54  ;;  %735 = vst [vmem:[%s2783_s8 + $0x3b8] sm:$0xff] %v734_v55  ;;  %v736_v56 = vld [vmem:[%s2778_s7 + $0x780] sm:$0xff]  ;;  %v738_v57 = vld [vmem:[%s2778_s7 + $0x790] sm:$0xff] }
  0x56   : > { %v740_v58 = vld [vmem:[%s2778_s7 + $0x7a0] sm:$0xff]  ;;  %737 = vst [vmem:[%s2783_s8 + $0x3c0] sm:$0xff] %v736_v56  ;;  %739 = vst [vmem:[%s2783_s8 + $0x3c8] sm:$0xff] %v738_v57  ;;  %v742_v59 = vld [vmem:[%s2778_s7 + $0x7b0] sm:$0xff] }
  0x57   : > { %741 = vst [vmem:[%s2783_s8 + $0x3d0] sm:$0xff] %v740_v58  ;;  %v744_v60 = vld [vmem:[%s2778_s7 + $0x7c0] sm:$0xff]  ;;  %v746_v61 = vld [vmem:[%s2778_s7 + $0x7d0] sm:$0xff]  ;;  %743 = vst [vmem:[%s2783_s8 + $0x3d8] sm:$0xff] %v742_v59 }
  0x58   : > { %745 = vst [vmem:[%s2783_s8 + $0x3e0] sm:$0xff] %v744_v60  ;;  %747 = vst [vmem:[%s2783_s8 + $0x3e8] sm:$0xff] %v746_v61  ;;  %v748_v62 = vld [vmem:[%s2778_s7 + $0x7e0] sm:$0xff]  ;;  %v750_v63 = vld [vmem:[%s2778_s7 + $0x7f0] sm:$0xff] }
  0x59   : > { %v752_v0 = vld [vmem:[%s2778_s7 + $0x800] sm:$0xff]  ;;  %749 = vst [vmem:[%s2783_s8 + $0x3f0] sm:$0xff] %v748_v62  ;;  %751 = vst [vmem:[%s2783_s8 + $0x3f8] sm:$0xff] %v750_v63  ;;  %v754_v1 = vld [vmem:[%s2778_s7 + $0x810] sm:$0xff] }
  0x5a   : > { %753 = vst [vmem:[%s2783_s8 + $0x400] sm:$0xff] %v752_v0  ;;  %v756_v2 = vld [vmem:[%s2778_s7 + $0x820] sm:$0xff]  ;;  %v758_v3 = vld [vmem:[%s2778_s7 + $0x830] sm:$0xff]  ;;  %755 = vst [vmem:[%s2783_s8 + $0x408] sm:$0xff] %v754_v1 }
  0x5b   : > { %757 = vst [vmem:[%s2783_s8 + $0x410] sm:$0xff] %v756_v2  ;;  %759 = vst [vmem:[%s2783_s8 + $0x418] sm:$0xff] %v758_v3  ;;  %v760_v4 = vld [vmem:[%s2778_s7 + $0x840] sm:$0xff]  ;;  %v762_v5 = vld [vmem:[%s2778_s7 + $0x850] sm:$0xff] }
  0x5c   : > { %v764_v6 = vld [vmem:[%s2778_s7 + $0x860] sm:$0xff]  ;;  %761 = vst [vmem:[%s2783_s8 + $0x420] sm:$0xff] %v760_v4  ;;  %763 = vst [vmem:[%s2783_s8 + $0x428] sm:$0xff] %v762_v5  ;;  %v766_v7 = vld [vmem:[%s2778_s7 + $0x870] sm:$0xff] }
  0x5d   : > { %765 = vst [vmem:[%s2783_s8 + $0x430] sm:$0xff] %v764_v6  ;;  %v768_v8 = vld [vmem:[%s2778_s7 + $0x880] sm:$0xff]  ;;  %v770_v9 = vld [vmem:[%s2778_s7 + $0x890] sm:$0xff]  ;;  %767 = vst [vmem:[%s2783_s8 + $0x438] sm:$0xff] %v766_v7 }
  0x5e   : > { %769 = vst [vmem:[%s2783_s8 + $0x440] sm:$0xff] %v768_v8  ;;  %771 = vst [vmem:[%s2783_s8 + $0x448] sm:$0xff] %v770_v9  ;;  %v772_v10 = vld [vmem:[%s2778_s7 + $0x8a0] sm:$0xff]  ;;  %v774_v11 = vld [vmem:[%s2778_s7 + $0x8b0] sm:$0xff] }
  0x5f   : > { %v776_v12 = vld [vmem:[%s2778_s7 + $0x8c0] sm:$0xff]  ;;  %773 = vst [vmem:[%s2783_s8 + $0x450] sm:$0xff] %v772_v10  ;;  %775 = vst [vmem:[%s2783_s8 + $0x458] sm:$0xff] %v774_v11  ;;  %v778_v13 = vld [vmem:[%s2778_s7 + $0x8d0] sm:$0xff] }
  0x60   : > { %777 = vst [vmem:[%s2783_s8 + $0x460] sm:$0xff] %v776_v12  ;;  %v780_v14 = vld [vmem:[%s2778_s7 + $0x8e0] sm:$0xff]  ;;  %v782_v15 = vld [vmem:[%s2778_s7 + $0x8f0] sm:$0xff]  ;;  %779 = vst [vmem:[%s2783_s8 + $0x468] sm:$0xff] %v778_v13 }
  0x61   : > { %781 = vst [vmem:[%s2783_s8 + $0x470] sm:$0xff] %v780_v14  ;;  %783 = vst [vmem:[%s2783_s8 + $0x478] sm:$0xff] %v782_v15 }
  0x62 PF: > { %p2175_p7 = scmp.ge.s32.totalorder %s2695_s18, 1  ;;  %p797_p8 = scmp.lt.s32.totalorder %s2695_s18, 5 }
  0x64   : > { %p798_p9 = pnand %p2175_p7, %p797_p8 }
  0x65   : > { %s804_s9 = sand.u32 (!%p798_p9), 1, %s2671_s12   ;;  %s2177_s10 = sshll.u32 (!%p798_p9), %s2683_s15, 1 }
  0x66   : > { %801 = sbr.rel (%p798_p9) target bundleno = 512 (0x200), region = 66  ;;  %p858_p10 = scmp.lt.s32.totalorder (!%p798_p9), %s2177_s10, 3 }
  0x67   : > { %s2358_s11 = smul.u32 (!%p798_p9), 1152, %s804_s9  ;;  %p2334_p12 = scmp.ne.s32.totalorder (!%p798_p9), %s2679_s14, 0 }
  0x68   : > { %s845_s29 = smul.u32 (!%p798_p9), 9, %s2679_s14 }
  0x69   : > { %s3074_s21 = scalar_lea.vmem (!%p798_p9), [#allocation3], %s2358_s11 }
  0x6a   : > { %v2416_v16 = vld [vmem:[%s3074_s21 + $0x4] ss:$8 sps:$4 sm:$0xff] (!%p798_p9)   ;;  %v2420_v18 = vld [vmem:[%s3074_s21] ss:$8 sps:$4 sm:$0xff] (!%p798_p9)   ;;  %v2422_v20 = vld [vmem:[%s3074_s21 + $0x14] ss:$8 sps:$4 sm:$0xff] (!%p798_p9)  }
  0x6b   : > { %v2418_v17 = vld [vmem:[%s3074_s21 + $0x204] ss:$8 sps:$4 sm:$0xff] (!%p798_p9)   ;;  %1775 = vmatprep.subr.bf16.mxu1 (!%p798_p9), %v2416_v16  ;;  %v2421_v19 = vld [vmem:[%s3074_s21 + $0x200] ss:$8 sps:$4 sm:$0xff] (!%p798_p9)   ;;  %v2424_v21 = vld [vmem:[%s3074_s21 + $0x214] ss:$8 sps:$4 sm:$0xff] (!%p798_p9)  }
  0x6c   : > { %1857 = vmatprep.subr.bf16.mxu0 (!%p798_p9), %v2418_v17  ;;  %1776 = vmatpush1.bf16.msra.mxu1 (!%p798_p9), %v2420_v18  ;;  %v2426_v22 = vld [vmem:[%s3074_s21 + $0x10] ss:$8 sps:$4 sm:$0xff] (!%p798_p9)   ;;  %v2428_v24 = vld [vmem:[%s3074_s21 + $0x24] ss:$8 sps:$4 sm:$0xff] (!%p798_p9)   ;;  %v2432_v26 = vld [vmem:[%s3074_s21 + $0x20] ss:$8 sps:$4 sm:$0xff] (!%p798_p9)  }
  0x6d   : > { %s3297_s10 = smov (!%p858_p10, %s2177_s10), 3  ;;  %1858 = vmatpush1.bf16.msra.mxu0 %v2421_v19  ;;  %1777 = vmatprep.subr.bf16.mxu1 %v2422_v20  ;;  %v2427_v23 = vld [vmem:[%s3074_s21 + $0x210] ss:$8 sps:$4 sm:$0xff]   ;;  %v2430_v25 = vld [vmem:[%s3074_s21 + $0x224] ss:$8 sps:$4 sm:$0xff]   ;;  %p848_p11 = scmp.lt.s32.totalorder %s845_s29, 17 }
  0x6e   : > { %s2178_s22 = sshll.u32 %s3297_s10, 1  ;;  %s2180_s23 = sshll.u32 %s3297_s10, 2  ;;  %1859 = vmatprep.subr.bf16.mxu0 %v2424_v21  ;;  %v2433_v27 = vld [vmem:[%s3074_s21 + $0x220] ss:$8 sps:$4 sm:$0xff]   ;;  %v2434_v28 = vld [vmem:[%s3074_s21 + $0x34] ss:$8 sps:$4 sm:$0xff]  }
  0x6f   : > { %s3083_s24 = scalar_lea.vmem %s3282_s2, %s2178_s22  ;;  %s3088_s28 = scalar_lea.vmem %s3283_s3, %s2180_s23  ;;  %v2436_v29 = vld [vmem:[%s3074_s21 + $0x234] ss:$8 sps:$4 sm:$0xff]   ;;  %v2438_v30 = vld [vmem:[%s3074_s21 + $0x30] ss:$8 sps:$4 sm:$0xff]   ;;  %v2440_v32 = vld [vmem:[%s3074_s21 + $0x44] ss:$8 sps:$4 sm:$0xff]  }
  0x70   : > { %1778 = vmatpush1.bf16.msra.mxu1 %v2426_v22  ;;  %v2439_v31 = vld [vmem:[%s3074_s21 + $0x230] ss:$8 sps:$4 sm:$0xff]   ;;  %v2442_v33 = vld [vmem:[%s3074_s21 + $0x244] ss:$8 sps:$4 sm:$0xff]   ;;  %v2444_v34 = vld [vmem:[%s3074_s21 + $0x40] ss:$8 sps:$4 sm:$0xff]  }
  0x71   : > { %1860 = vmatpush1.bf16.msra.mxu0 %v2427_v23  ;;  %1779 = vmatprep.subr.bf16.mxu1 %v2428_v24  ;;  %v2445_v35 = vld [vmem:[%s3074_s21 + $0x240] ss:$8 sps:$4 sm:$0xff]   ;;  %v2446_v36 = vld [vmem:[%s3074_s21 + $0x54] ss:$8 sps:$4 sm:$0xff]   ;;  %v2450_v38 = vld [vmem:[%s3074_s21 + $0x50] ss:$8 sps:$4 sm:$0xff]  }
  0x72   : > { %1861 = vmatprep.subr.bf16.mxu0 %v2430_v25  ;;  %v2448_v37 = vld [vmem:[%s3074_s21 + $0x254] ss:$8 sps:$4 sm:$0xff]   ;;  %v2451_v39 = vld [vmem:[%s3074_s21 + $0x250] ss:$8 sps:$4 sm:$0xff]   ;;  %v2452_v40 = vld [vmem:[%s3074_s21 + $0x64] ss:$8 sps:$4 sm:$0xff]  }
  0x73   : > { %v2454_v41 = vld [vmem:[%s3074_s21 + $0x264] ss:$8 sps:$4 sm:$0xff]   ;;  %v2456_v42 = vld [vmem:[%s3074_s21 + $0x60] ss:$8 sps:$4 sm:$0xff]   ;;  %v2458_v44 = vld [vmem:[%s3074_s21 + $0x74] ss:$8 sps:$4 sm:$0xff]  }
  0x74   : > { %1780 = vmatpush1.bf16.msra.mxu1 %v2432_v26  ;;  %v2457_v43 = vld [vmem:[%s3074_s21 + $0x260] ss:$8 sps:$4 sm:$0xff]   ;;  %v2460_v45 = vld [vmem:[%s3074_s21 + $0x274] ss:$8 sps:$4 sm:$0xff]   ;;  %v2462_v46 = vld [vmem:[%s3074_s21 + $0x70] ss:$8 sps:$4 sm:$0xff]  }
  0x75   : > { %1862 = vmatpush1.bf16.msra.mxu0 %v2433_v27  ;;  %1781 = vmatprep.subr.bf16.mxu1 %v2434_v28  ;;  %v2463_v47 = vld [vmem:[%s3074_s21 + $0x270] ss:$8 sps:$4 sm:$0xff]   ;;  %v2464_v48 = vld [vmem:[%s3074_s21 + $0x84] ss:$8 sps:$4 sm:$0xff]   ;;  %v2468_v50 = vld [vmem:[%s3074_s21 + $0x80] ss:$8 sps:$4 sm:$0xff]  }
  0x76   : > { %1863 = vmatprep.subr.bf16.mxu0 %v2436_v29  ;;  %v2466_v49 = vld [vmem:[%s3074_s21 + $0x284] ss:$8 sps:$4 sm:$0xff]   ;;  %v2469_v51 = vld [vmem:[%s3074_s21 + $0x280] ss:$8 sps:$4 sm:$0xff]   ;;  %v2470_v52 = vld [vmem:[%s3074_s21 + $0x94] ss:$8 sps:$4 sm:$0xff]  }
  0x77   : > { %v2472_v53 = vld [vmem:[%s3074_s21 + $0x294] ss:$8 sps:$4 sm:$0xff]   ;;  %s3299_s29 = smov (!%p848_p11, %s845_s29), 17  ;;  %v2474_v54 = vld [vmem:[%s3074_s21 + $0x90] ss:$8 sps:$4 sm:$0xff]  }
  0x78   : > { %1782 = vmatpush1.bf16.msra.mxu1 %v2438_v30  ;;  %v2475_v55 = vld [vmem:[%s3074_s21 + $0x290] ss:$8 sps:$4 sm:$0xff]   ;;  %v2476_v56 = vld [vmem:[%s3074_s21 + $0xa4] ss:$8 sps:$4 sm:$0xff]   ;;  %s2176_s30 = sshll.u32 %s3299_s29, 2 }
  0x79   : > { %1864 = vmatpush1.bf16.msra.mxu0 %v2439_v31  ;;  %1783 = vmatprep.subr.bf16.mxu1 %v2440_v32  ;;  %v2478_v57 = vld [vmem:[%s3074_s21 + $0x2a4] ss:$8 sps:$4 sm:$0xff]   ;;  %v2480_v58 = vld [vmem:[%s3074_s21 + $0xa0] ss:$8 sps:$4 sm:$0xff]   ;;  %v2482_v60 = vld [vmem:[%s3074_s21 + $0xb4] ss:$8 sps:$4 sm:$0xff]   ;;  %s3135_s6 = scalar_lea.vmem %s3280_s0, %s2176_s30 }
  0x7a   : > { %1865 = vmatprep.subr.bf16.mxu0 %v2442_v33  ;;  %v2481_v59 = vld [vmem:[%s3074_s21 + $0x2a0] ss:$8 sps:$4 sm:$0xff]   ;;  %v2484_v61 = vld [vmem:[%s3074_s21 + $0x2b4] ss:$8 sps:$4 sm:$0xff]   ;;  %v2486_v62 = vld [vmem:[%s3074_s21 + $0xb0] ss:$8 sps:$4 sm:$0xff]  }
  0x7b   : > { %v874_v63 = vld [vmem:[%s3135_s6] sm:$0xff]  ;;  %v2488_v1 = vld [vmem:[%s3074_s21 + $0xc4] ss:$8 sps:$4 sm:$0xff]   ;;  %v2492_v6 = vld [vmem:[%s3074_s21 + $0xc0] ss:$8 sps:$4 sm:$0xff]  }
  0x7c   : > { %1784 = vmatpush1.bf16.msra.mxu1 %v2444_v34  ;;  %v2487_v0 = vld [vmem:[%s3074_s21 + $0x2b0] ss:$8 sps:$4 sm:$0xff]   ;;  %v2182_v2 = vcombine.high %v874_v63, %v874_v63  ;;  %v876_v3 = vld [vmem:[%s3135_s6 + $0x10] sm:$0xff]  ;;  %v2494_v8 = vld [vmem:[%s3074_s21 + $0xd4] ss:$8 sps:$4 sm:$0xff]   ;;  %v2181_v22 = vcombine.low %v874_v63, %v874_v63 }
  0x7d   : > { %1866 = vmatpush1.bf16.msra.mxu0 %v2445_v35  ;;  %1785 = vmatprep.subr.bf16.mxu1 %v2446_v36  ;;  %v2490_v4 = vld [vmem:[%s3074_s21 + $0x2c4] ss:$8 sps:$4 sm:$0xff]   ;;  %v2186_v5 = vcombine.high %v876_v3, %v876_v3  ;;  %v2493_v7 = vld [vmem:[%s3074_s21 + $0x2c0] ss:$8 sps:$4 sm:$0xff]   ;;  %v2496_v9 = vld [vmem:[%s3074_s21 + $0x2d4] ss:$8 sps:$4 sm:$0xff]   ;;  %v2185_v24 = vcombine.low %v876_v3, %v876_v3 }
  0x7e   : > { %1867 = vmatprep.subr.bf16.mxu0 %v2448_v37  ;;  %1807 = vmatprep.mubr.bf16.mxu1 %v2182_v2  ;;  %v2498_v10 = vld [vmem:[%s3074_s21 + $0xd0] ss:$8 sps:$4 sm:$0xff]   ;;  %v2500_v12 = vld [vmem:[%s3074_s21 + $0xe4] ss:$8 sps:$4 sm:$0xff]   ;;  %v2504_v14 = vld [vmem:[%s3074_s21 + $0xe0] ss:$8 sps:$4 sm:$0xff]  }
  0x7f   : > { %1889 = vmatprep.mubr.bf16.mxu0 %v2186_v5  ;;  %v2499_v11 = vld [vmem:[%s3074_s21 + $0x2d0] ss:$8 sps:$4 sm:$0xff]   ;;  %v2502_v13 = vld [vmem:[%s3074_s21 + $0x2e4] ss:$8 sps:$4 sm:$0xff]   ;;  %v2505_v15 = vld [vmem:[%s3074_s21 + $0x2e0] ss:$8 sps:$4 sm:$0xff]  }
  0x80   : > { %1786 = vmatpush1.bf16.msra.mxu1 %v2450_v38  ;;  %v2506_v16 = vld [vmem:[%s3074_s21 + $0xf4] ss:$8 sps:$4 sm:$0xff]   ;;  %v2510_v18 = vld [vmem:[%s3074_s21 + $0xf0] ss:$8 sps:$4 sm:$0xff]   ;;  %v2516_v20 = vld [vmem:[%s3074_s21 + $0x104] ss:$8 sps:$4 sm:$0xff]  }
  0x81   : > { %1868 = vmatpush1.bf16.msra.mxu0 %v2451_v39  ;;  %1787 = vmatprep.subr.bf16.mxu1 %v2452_v40  ;;  %v2508_v17 = vld [vmem:[%s3074_s21 + $0x2f4] ss:$8 sps:$4 sm:$0xff]   ;;  %v2511_v19 = vld [vmem:[%s3074_s21 + $0x2f0] ss:$8 sps:$4 sm:$0xff]   ;;  %v2521_v21 = vld [vmem:[%s3074_s21 + $0x304] ss:$8 sps:$4 sm:$0xff]  }
  0x82   : > { %1869 = vmatprep.subr.bf16.mxu0 %v2454_v41  ;;  %v2514_v23 = vld [vmem:[%s3074_s21 + $0x100] ss:$8 sps:$4 sm:$0xff]   ;;  %v2524_v26 = vld [vmem:[%s3074_s21 + $0x114] ss:$8 sps:$4 sm:$0xff]   ;;  %v2522_v28 = vld [vmem:[%s3074_s21 + $0x110] ss:$8 sps:$4 sm:$0xff]  }
  0x83   : > { %v2519_v25 = vld [vmem:[%s3074_s21 + $0x300] ss:$8 sps:$4 sm:$0xff]   ;;  %v2527_v27 = vld [vmem:[%s3074_s21 + $0x314] ss:$8 sps:$4 sm:$0xff]   ;;  %v2525_v29 = vld [vmem:[%s3074_s21 + $0x310] ss:$8 sps:$4 sm:$0xff]  }
  0x84   : > { %1788 = vmatpush1.bf16.msra.mxu1 %v2456_v42  ;;  %v2530_v30 = vld [vmem:[%s3074_s21 + $0x124] ss:$8 sps:$4 sm:$0xff]   ;;  %v2528_v32 = vld [vmem:[%s3074_s21 + $0x120] ss:$8 sps:$4 sm:$0xff]   ;;  %v2536_v34 = vld [vmem:[%s3074_s21 + $0x134] ss:$8 sps:$4 sm:$0xff]  }
  0x85   : > { %1870 = vmatpush1.bf16.msra.mxu0 %v2457_v43  ;;  %1789 = vmatprep.subr.bf16.mxu1 %v2458_v44  ;;  %v2533_v31 = vld [vmem:[%s3074_s21 + $0x324] ss:$8 sps:$4 sm:$0xff]   ;;  %v2531_v33 = vld [vmem:[%s3074_s21 + $0x320] ss:$8 sps:$4 sm:$0xff]   ;;  %v2539_v35 = vld [vmem:[%s3074_s21 + $0x334] ss:$8 sps:$4 sm:$0xff]  }
  0x86   : > { %1871 = vmatprep.subr.bf16.mxu0 %v2460_v45  ;;  %v2534_v36 = vld [vmem:[%s3074_s21 + $0x130] ss:$8 sps:$4 sm:$0xff]   ;;  %v2542_v38 = vld [vmem:[%s3074_s21 + $0x144] ss:$8 sps:$4 sm:$0xff]   ;;  %v2540_v40 = vld [vmem:[%s3074_s21 + $0x140] ss:$8 sps:$4 sm:$0xff]  }
  0x87   : > { %v2537_v37 = vld [vmem:[%s3074_s21 + $0x330] ss:$8 sps:$4 sm:$0xff]   ;;  %v2545_v39 = vld [vmem:[%s3074_s21 + $0x344] ss:$8 sps:$4 sm:$0xff]   ;;  %v2543_v41 = vld [vmem:[%s3074_s21 + $0x340] ss:$8 sps:$4 sm:$0xff]  }
  0x88   : > { %1790 = vmatpush1.bf16.msra.mxu1 %v2462_v46  ;;  %v2548_v42 = vld [vmem:[%s3074_s21 + $0x154] ss:$8 sps:$4 sm:$0xff]   ;;  %v2546_v44 = vld [vmem:[%s3074_s21 + $0x150] ss:$8 sps:$4 sm:$0xff]   ;;  %v2554_v46 = vld [vmem:[%s3074_s21 + $0x164] ss:$8 sps:$4 sm:$0xff]  }
  0x89   : > { %1872 = vmatpush1.bf16.msra.mxu0 %v2463_v47  ;;  %1791 = vmatprep.subr.bf16.mxu1 %v2464_v48  ;;  %v2551_v43 = vld [vmem:[%s3074_s21 + $0x354] ss:$8 sps:$4 sm:$0xff]   ;;  %v2549_v45 = vld [vmem:[%s3074_s21 + $0x350] ss:$8 sps:$4 sm:$0xff]   ;;  %v2557_v47 = vld [vmem:[%s3074_s21 + $0x364] ss:$8 sps:$4 sm:$0xff]  }
  0x8a   : > { %1873 = vmatprep.subr.bf16.mxu0 %v2466_v49  ;;  %v3185_v48 = vld [vmem:[%s3135_s6 + $0x8] sm:$0xff]  ;;  %v3188_v49 = vld [vmem:[%s3135_s6 + $0x18] sm:$0xff] }
  0x8b   : > { %v2575_v63 = vld [vmem:[%s3074_s21 + $0x394] ss:$8 sps:$4 sm:$0xff]   ;;  %v2578_v2 = vld [vmem:[%s3074_s21 + $0x1a4] ss:$8 sps:$4 sm:$0xff]   ;;  %v2579_v5 = vld [vmem:[%s3074_s21 + $0x3a0] ss:$8 sps:$4 sm:$0xff]  }
  0x8c   : > { %1792 = vmatpush1.bf16.msra.mxu1 %v2468_v50  ;;  %v2552_v50 = vld [vmem:[%s3074_s21 + $0x160] ss:$8 sps:$4 sm:$0xff]   ;;  %v2581_v3 = vld [vmem:[%s3074_s21 + $0x3a4] ss:$8 sps:$4 sm:$0xff]  }
  0x8d   : > { %1874 = vmatpush1.bf16.msra.mxu0 %v2469_v51  ;;  %1793 = vmatprep.subr.bf16.mxu1 %v2470_v52  ;;  %v2184_v51 = vcombine.high %v3185_v48, %v3185_v48  ;;  %v2188_v52 = vcombine.high %v3188_v49, %v3188_v49 }
  0x8e   : > { %1875 = vmatprep.subr.bf16.mxu0 %v2472_v53  ;;  %v2555_v53 = vld [vmem:[%s3074_s21 + $0x360] ss:$8 sps:$4 sm:$0xff]  }
  0x90   : > { %1794 = vmatpush1.bf16.msra.mxu1 %v2474_v54  ;;  %v2560_v54 = vld [vmem:[%s3074_s21 + $0x174] ss:$8 sps:$4 sm:$0xff]  }
  0x91   : > { %1876 = vmatpush1.bf16.msra.mxu0 %v2475_v55  ;;  %1795 = vmatprep.subr.bf16.mxu1 %v2476_v56  ;;  %v2563_v55 = vld [vmem:[%s3074_s21 + $0x374] ss:$8 sps:$4 sm:$0xff]   ;;  %v2558_v56 = vld [vmem:[%s3074_s21 + $0x170] ss:$8 sps:$4 sm:$0xff]  }
  0x92   : > { %1877 = vmatprep.subr.bf16.mxu0 %v2478_v57  ;;  %v2561_v57 = vld [vmem:[%s3074_s21 + $0x370] ss:$8 sps:$4 sm:$0xff]  }
  0x94   : > { %1796 = vmatpush1.bf16.msra.mxu1 %v2480_v58  ;;  %v2566_v58 = vld [vmem:[%s3074_s21 + $0x184] ss:$8 sps:$4 sm:$0xff]  }
  0x95   : > { %1878 = vmatpush1.bf16.msra.mxu0 %v2481_v59  ;;  %1797 = vmatprep.subr.bf16.mxu1 %v2482_v60  ;;  %v2569_v59 = vld [vmem:[%s3074_s21 + $0x384] ss:$8 sps:$4 sm:$0xff]   ;;  %v2564_v60 = vld [vmem:[%s3074_s21 + $0x180] ss:$8 sps:$4 sm:$0xff]  }
  0x96   : > { %1879 = vmatprep.subr.bf16.mxu0 %v2484_v61  ;;  %v2567_v61 = vld [vmem:[%s3074_s21 + $0x380] ss:$8 sps:$4 sm:$0xff]  }
  0x98   : > { %1798 = vmatpush1.bf16.msra.mxu1 %v2486_v62  ;;  %v2572_v62 = vld [vmem:[%s3074_s21 + $0x194] ss:$8 sps:$4 sm:$0xff]  }
  0x99   : > { %1880 = vmatpush1.bf16.msra.mxu0 %v2487_v0  ;;  %1799 = vmatprep.subr.bf16.mxu1 %v2488_v1  ;;  %v2570_v0 = vld [vmem:[%s3074_s21 + $0x190] ss:$8 sps:$4 sm:$0xff]  }
  0x9a   : > { %1881 = vmatprep.subr.bf16.mxu0 %v2490_v4  ;;  %v2573_v1 = vld [vmem:[%s3074_s21 + $0x390] ss:$8 sps:$4 sm:$0xff]   ;;  %v2576_v4 = vld [vmem:[%s3074_s21 + $0x1a0] ss:$8 sps:$4 sm:$0xff]  }
  0x9c   : > { %1800 = vmatpush1.bf16.msra.mxu1 %v2492_v6  ;;  %v2584_v6 = vld [vmem:[%s3074_s21 + $0x1b4] ss:$8 sps:$4 sm:$0xff]  }
  0x9d   : > { %1882 = vmatpush1.bf16.msra.mxu0 %v2493_v7  ;;  %1801 = vmatprep.subr.bf16.mxu1 %v2494_v8  ;;  %v2587_v7 = vld [vmem:[%s3074_s21 + $0x3b4] ss:$8 sps:$4 sm:$0xff]   ;;  %v2582_v8 = vld [vmem:[%s3074_s21 + $0x1b0] ss:$8 sps:$4 sm:$0xff]  }
  0x9e   : > { %1883 = vmatprep.subr.bf16.mxu0 %v2496_v9  ;;  %v2585_v9 = vld [vmem:[%s3074_s21 + $0x3b0] ss:$8 sps:$4 sm:$0xff]  }
  0xa0   : > { %1802 = vmatpush1.bf16.msra.mxu1 %v2498_v10  ;;  %v2590_v10 = vld [vmem:[%s3074_s21 + $0x1c4] ss:$8 sps:$4 sm:$0xff]  }
  0xa1   : > { %1884 = vmatpush1.bf16.msra.mxu0 %v2499_v11  ;;  %1803 = vmatprep.subr.bf16.mxu1 %v2500_v12  ;;  %v2593_v11 = vld [vmem:[%s3074_s21 + $0x3c4] ss:$8 sps:$4 sm:$0xff]   ;;  %v2588_v12 = vld [vmem:[%s3074_s21 + $0x1c0] ss:$8 sps:$4 sm:$0xff]  }
  0xa2   : > { %1885 = vmatprep.subr.bf16.mxu0 %v2502_v13  ;;  %v2591_v13 = vld [vmem:[%s3074_s21 + $0x3c0] ss:$8 sps:$4 sm:$0xff]  }
  0xa4   : > { %1804 = vmatpush1.bf16.msra.mxu1 %v2504_v14  ;;  %v2596_v14 = vld [vmem:[%s3074_s21 + $0x1d4] ss:$8 sps:$4 sm:$0xff]  }
  0xa5   : > { %1886 = vmatpush1.bf16.msra.mxu0 %v2505_v15  ;;  %1805 = vmatprep.subr.bf16.mxu1 %v2506_v16  ;;  %v2599_v15 = vld [vmem:[%s3074_s21 + $0x3d4] ss:$8 sps:$4 sm:$0xff]   ;;  %v2594_v16 = vld [vmem:[%s3074_s21 + $0x1d0] ss:$8 sps:$4 sm:$0xff]  }
  0xa6   : > { %1887 = vmatprep.subr.bf16.mxu0 %v2508_v17  ;;  %v2597_v17 = vld [vmem:[%s3074_s21 + $0x3d0] ss:$8 sps:$4 sm:$0xff]  }
  0xa8   : > { %1806 = vmatpush1.bf16.msra.mxu1 %v2510_v18  ;;  %v2602_v18 = vld [vmem:[%s3074_s21 + $0x1e4] ss:$8 sps:$4 sm:$0xff]  }
  0xa9   : > { %1888 = vmatpush1.bf16.msra.mxu0 %v2511_v19  ;;  %1816 = vmatprep.subr.bf16.mxu1 %v2516_v20  ;;  %v2605_v19 = vld [vmem:[%s3074_s21 + $0x3e4] ss:$8 sps:$4 sm:$0xff]   ;;  %v2600_v20 = vld [vmem:[%s3074_s21 + $0x1e0] ss:$8 sps:$4 sm:$0xff]  }
  0xaa   : > { %1898 = vmatprep.subr.bf16.mxu0 %v2521_v21  ;;  %v2603_v21 = vld [vmem:[%s3074_s21 + $0x3e0] ss:$8 sps:$4 sm:$0xff]  }
  0xab   : > { %1808 = vmatmul.mubr.bf16.vlgmr.msra.gmra.mrb[0].mxu1 %v2181_v22  ;;  %v2608_v22 = vld [vmem:[%s3074_s21 + $0x1f4] ss:$8 sps:$4 sm:$0xff]  }
  0xac   : > { %1890 = vmatmul.mubr.bf16.vlgmr.msra.gmra.mrb[0].mxu0 %v2185_v24  ;;  %1817 = vmatpush1.bf16.msra.mxu1 %v2514_v23  ;;  %v2611_v23 = vld [vmem:[%s3074_s21 + $0x3f4] ss:$8 sps:$4 sm:$0xff]   ;;  %v2606_v24 = vld [vmem:[%s3074_s21 + $0x1f0] ss:$8 sps:$4 sm:$0xff]  }
  0xad   : > { %1899 = vmatpush1.bf16.msra.mxu0 %v2519_v25  ;;  %1818 = vmatprep.subr.bf16.mxu1 %v2524_v26  ;;  %v2609_v25 = vld [vmem:[%s3074_s21 + $0x3f0] ss:$8 sps:$4 sm:$0xff]   ;;  %v2618_v26 = vld [vmem:[%s3074_s21 + $0x404] ss:$8 sps:$4 sm:$0xff]  }
  0xae   : > { %1900 = vmatprep.subr.bf16.mxu0 %v2527_v27  ;;  %1848 = vmatprep.mubr.bf16.mxu1 %v2184_v51  ;;  %v2183_v27 = vcombine.low %v3185_v48, %v3185_v48 }
  0xaf   : > { %1930 = vmatprep.mubr.bf16.mxu0 %v2188_v52 }
  0xb0   : > { %1819 = vmatpush1.bf16.msra.mxu1 %v2522_v28  ;;  %v2187_v28 = vcombine.low %v3188_v49, %v3188_v49 }
  0xb1   : > { %1901 = vmatpush1.bf16.msra.mxu0 %v2525_v29  ;;  %1820 = vmatprep.subr.bf16.mxu1 %v2530_v30  ;;  %v2616_v29 = vld [vmem:[%s3074_s21 + $0x400] ss:$8 sps:$4 sm:$0xff]   ;;  %v2621_v30 = vld [vmem:[%s3074_s21 + $0x414] ss:$8 sps:$4 sm:$0xff]  }
  0xb2   : > { %1902 = vmatprep.subr.bf16.mxu0 %v2533_v31  ;;  %v2619_v31 = vld [vmem:[%s3074_s21 + $0x410] ss:$8 sps:$4 sm:$0xff]  }
  0xb4   : > { %1821 = vmatpush1.bf16.msra.mxu1 %v2528_v32  ;;  %v2697_v32 = vmov 0  }
  0xb5   : > { %1903 = vmatpush1.bf16.msra.mxu0 %v2531_v33  ;;  %1822 = vmatprep.subr.bf16.mxu1 %v2536_v34  ;;  %v2624_v33 = vld [vmem:[%s3074_s21 + $0x424] ss:$8 sps:$4 sm:$0xff]   ;;  %v2622_v34 = vld [vmem:[%s3074_s21 + $0x420] ss:$8 sps:$4 sm:$0xff]  }
  0xb6   : > { %1904 = vmatprep.subr.bf16.mxu0 %v2539_v35  ;;  %v2627_v35 = vld [vmem:[%s3074_s21 + $0x434] ss:$8 sps:$4 sm:$0xff]  }
  0xb8   : > { %1823 = vmatpush1.bf16.msra.mxu1 %v2534_v36  ;;  %v2625_v36 = vld [vmem:[%s3074_s21 + $0x430] ss:$8 sps:$4 sm:$0xff]  }
  0xb9   : > { %1905 = vmatpush1.bf16.msra.mxu0 %v2537_v37  ;;  %1824 = vmatprep.subr.bf16.mxu1 %v2542_v38  ;;  %v2630_v37 = vld [vmem:[%s3074_s21 + $0x444] ss:$8 sps:$4 sm:$0xff]   ;;  %v2628_v38 = vld [vmem:[%s3074_s21 + $0x440] ss:$8 sps:$4 sm:$0xff]  }
  0xba   : > { %1906 = vmatprep.subr.bf16.mxu0 %v2545_v39  ;;  %v2633_v39 = vld [vmem:[%s3074_s21 + $0x454] ss:$8 sps:$4 sm:$0xff]  }
  0xbc   : > { %1825 = vmatpush1.bf16.msra.mxu1 %v2540_v40  ;;  %v2631_v40 = vld [vmem:[%s3074_s21 + $0x450] ss:$8 sps:$4 sm:$0xff]  }
  0xbd   : > { %1907 = vmatpush1.bf16.msra.mxu0 %v2543_v41  ;;  %1826 = vmatprep.subr.bf16.mxu1 %v2548_v42  ;;  %v2636_v41 = vld [vmem:[%s3074_s21 + $0x464] ss:$8 sps:$4 sm:$0xff]   ;;  %v2634_v42 = vld [vmem:[%s3074_s21 + $0x460] ss:$8 sps:$4 sm:$0xff]  }
  0xbe   : > { %1908 = vmatprep.subr.bf16.mxu0 %v2551_v43  ;;  %v2639_v43 = vld [vmem:[%s3074_s21 + $0x474] ss:$8 sps:$4 sm:$0xff]  }
  0xc0   : > { %1827 = vmatpush1.bf16.msra.mxu1 %v2546_v44  ;;  %v2637_v44 = vld [vmem:[%s3074_s21 + $0x470] ss:$8 sps:$4 sm:$0xff]  }
  0xc1   : > { %1909 = vmatpush1.bf16.msra.mxu0 %v2549_v45  ;;  %1828 = vmatprep.subr.bf16.mxu1 %v2554_v46  ;;  %v2640_v45 = vld [vmem:[%s3135_s6 + $0x20] ss:$0 sps:$4 sm:$0xff]  }
  0xc2   : > { %1910 = vmatprep.subr.bf16.mxu0 %v2557_v47 }
  0xc4   : > { %1829 = vmatpush1.bf16.msra.mxu1 %v2552_v50 }
  0xc5   : > { %1911 = vmatpush1.bf16.msra.mxu0 %v2555_v53  ;;  %1830 = vmatprep.subr.bf16.mxu1 %v2560_v54 }
  0xc6   : > { %1912 = vmatprep.subr.bf16.mxu0 %v2563_v55 }
  0xc8   : > { %1831 = vmatpush1.bf16.msra.mxu1 %v2558_v56 }
  0xc9   : > { %1913 = vmatpush1.bf16.msra.mxu0 %v2561_v57  ;;  %1832 = vmatprep.subr.bf16.mxu1 %v2566_v58 }
  0xca   : > { %1914 = vmatprep.subr.bf16.mxu0 %v2569_v59 }
  0xcc   : > { %1833 = vmatpush1.bf16.msra.mxu1 %v2564_v60 }
  0xcd   : > { %1915 = vmatpush1.bf16.msra.mxu0 %v2567_v61  ;;  %1834 = vmatprep.subr.bf16.mxu1 %v2572_v62 }
  0xce   : > { %1916 = vmatprep.subr.bf16.mxu0 %v2575_v63 }
  0xd0   : > { %1835 = vmatpush1.bf16.msra.mxu1 %v2570_v0 }
  0xd1   : > { %1917 = vmatpush1.bf16.msra.mxu0 %v2573_v1  ;;  %1836 = vmatprep.subr.bf16.mxu1 %v2578_v2 }
  0xd2   : > { %1918 = vmatprep.subr.bf16.mxu0 %v2581_v3 }
  0xd4   : > { %1837 = vmatpush1.bf16.msra.mxu1 %v2576_v4 }
  0xd5   : > { %1919 = vmatpush1.bf16.msra.mxu0 %v2579_v5  ;;  %1838 = vmatprep.subr.bf16.mxu1 %v2584_v6 }
  0xd6   : > { %1920 = vmatprep.subr.bf16.mxu0 %v2587_v7 }
  0xd8   : > { %1839 = vmatpush1.bf16.msra.mxu1 %v2582_v8 }
  0xd9   : > { %1921 = vmatpush1.bf16.msra.mxu0 %v2585_v9  ;;  %1840 = vmatprep.subr.bf16.mxu1 %v2590_v10 }
  0xda   : > { %1922 = vmatprep.subr.bf16.mxu0 %v2593_v11 }
  0xdc   : > { %1841 = vmatpush1.bf16.msra.mxu1 %v2588_v12 }
  0xdd   : > { %1923 = vmatpush1.bf16.msra.mxu0 %v2591_v13  ;;  %1842 = vmatprep.subr.bf16.mxu1 %v2596_v14 }
  0xde   : > { %1924 = vmatprep.subr.bf16.mxu0 %v2599_v15 }
  0xe0   : > { %1843 = vmatpush1.bf16.msra.mxu1 %v2594_v16 }
  0xe1   : > { %1925 = vmatpush1.bf16.msra.mxu0 %v2597_v17  ;;  %1844 = vmatprep.subr.bf16.mxu1 %v2602_v18 }
  0xe2   : > { %1926 = vmatprep.subr.bf16.mxu0 %v2605_v19 }
  0xe4   : > { %1845 = vmatpush1.bf16.msra.mxu1 %v2600_v20 }
  0xe5   : > { %1927 = vmatpush1.bf16.msra.mxu0 %v2603_v21  ;;  %1846 = vmatprep.subr.bf16.mxu1 %v2608_v22 }
  0xe6   : > { %1928 = vmatprep.subr.bf16.mxu0 %v2611_v23 }
  0xe8   : > { %1847 = vmatpush1.bf16.msra.mxu1 %v2606_v24 }
  0xe9   : > { %1929 = vmatpush1.bf16.msra.mxu0 %v2609_v25 }
  0xea   : > { %1939 = vmatprep.subr.bf16.mxu0 %v2618_v26 }
  0xeb   : > { %1849 = vmatmul.mubr.bf16.vlgmr.msra.gmra.mrb[0].mxu1 %v2183_v27 }
  0xec   : > { %1931 = vmatmul.mubr.bf16.vlgmr.msra.gmra.mrb[0].mxu0 %v2187_v28 }
  0xed   : > { %1940 = vmatpush1.bf16.msra.mxu0 %v2616_v29  ;;  %1971 = vmatprep.mubr.bf16.mxu0 %v2697_v32 }
  0xee   : > { %1941 = vmatprep.subr.bf16.mxu0 %v2621_v30 }
  0xf1   : > { %1942 = vmatpush1.bf16.msra.mxu0 %v2619_v31 }
  0xf2   : > { %1943 = vmatprep.subr.bf16.mxu0 %v2624_v33 }
  0xf5   : > { %1944 = vmatpush1.bf16.msra.mxu0 %v2622_v34 }
  0xf6   : > { %1945 = vmatprep.subr.bf16.mxu0 %v2627_v35 }
  0xf9   : > { %1946 = vmatpush1.bf16.msra.mxu0 %v2625_v36 }
  0xfa   : > { %1947 = vmatprep.subr.bf16.mxu0 %v2630_v37 }
  0xfd   : > { %1948 = vmatpush1.bf16.msra.mxu0 %v2628_v38 }
  0xfe   : > { %1949 = vmatprep.subr.bf16.mxu0 %v2633_v39 }
 0x101   : > { %1950 = vmatpush1.bf16.msra.mxu0 %v2631_v40 }
 0x102   : > { %1951 = vmatprep.subr.bf16.mxu0 %v2636_v41 }
 0x105   : > { %1952 = vmatpush1.bf16.msra.mxu0 %v2634_v42 }
 0x106   : > { %1953 = vmatprep.subr.bf16.mxu0 %v2639_v43 }
 0x109   : > { %1954 = vmatpush1.bf16.msra.mxu0 %v2637_v44 }
 0x10c   : > { %1972 = vmatmul.mubr.bf16.vlgmr.msra.gmra.mrb[0].mxu0 %v2640_v45 }
 0x1be   : > { %v1850_v46 = vpop.f32.mrb[0].mxu1 }
 0x1bf   : > { %v1852_v47 = vpop.f32.mrb[1].mxu1 }
 0x1c0   : > { %v1854_v48 = vpop.f32.mrb[2].mxu1 }
 0x1c1   : > { %v1855_v49 = vpop.f32.mrb[3].mxu1 }
 0x1dc   : > { %1983 = sbr.rel (%p2334_p12) target bundleno = 484 (0x1e4), region = 74 }
 0x1df   : > { %v1973_v50 = vpop.f32.mrb[0].mxu0 }
 0x1e0   : > { %v2343_v51 = vadd.f32 %v1973_v50, %v1850_v46  ;;  %v1975_v52 = vpop.f32.mrb[1].mxu0 }
 0x1e1   : > { %v2344_v53 = vadd.f32 %v1975_v52, %v1852_v47  ;;  %v1977_v54 = vpop.f32.mrb[2].mxu0 }
 0x1e2   : > { %v1978_v55 = vpop.f32.mrb[3].mxu0  ;;  %1984 = vst [vmem:[#allocation2] sm:$0xff] (!%p2334_p12), %v2343_v51 }
 0x1e3   : > { %1985 = vst [vmem:[#allocation2 + $0x8] sm:$0xff] %v2344_v53 }
 0x1e4 PF: > { %p2335_p13 = scmp.le.s32.totalorder %s2679_s14, 0 }
 0x1e6   : > { %1989 = sbr.rel (%p2335_p13) target bundleno = 494 (0x1ee), region = 78 }
 0x1ea   : > { %v1990_v56 = vld [vmem:[#allocation2] sm:$0xff] (!%p2335_p13)  ;;  %v1991_v57 = vld [vmem:[#allocation2 + $0x8] sm:$0xff] (!%p2335_p13) }
 0x1eb   : > { %v1992_v58 = vadd.f32 (!%p2335_p13), %v2343_v51, %v1990_v56  ;;  %v1993_v59 = vadd.f32 (!%p2335_p13), %v2344_v53, %v1991_v57 }
 0x1ed   : > { %1994 = vst [vmem:[#allocation2] sm:$0xff] %v1992_v58  ;;  %1995 = vst [vmem:[#allocation2 + $0x8] sm:$0xff] %v1993_v59 }
 0x1ee PF: > { %p2336_p0 = scmp.ne.s32.totalorder %s2679_s14, 1 }
 0x1ef   : > { %v2004_v60 = vlaneseq (!%p2336_p0)  ;;  %v2002_v62 = vld [vmem:[%s3083_s24] ss:$2 sm:$0x3] (!%p2336_p0)  ;;  %v2337_v63 = vld [vmem:[%s3083_s24 + $0x1] ss:$2 sm:$0x3] (!%p2336_p0) }
 0x1f0   : > { %1999 = sbr.rel (%p2336_p0) target bundleno = 512 (0x200), region = 82 }
 0x1f1   : > { %v2005_v61 = vshrl.u32 (!%p2336_p0), %v2004_v60, 7 }
 0x1f3   : > { %v2006_v0 = vsub.s32 (!%p2336_p0), 0, %v2005_v61  ;;  %v2010_v1 = vsub.s32 (!%p2336_p0), 1, %v2005_v61 }
 0x1f4   : > { %v2000_v2 = vld [vmem:[#allocation2] sm:$0xff] (!%p2336_p0)  ;;  %v2001_v3 = vld [vmem:[#allocation2 + $0x8] sm:$0xff] (!%p2336_p0) }
 0x1f5   : > { %v2007_v4 = vrot.slane (!%p2336_p0), %v2002_v62, %v2006_v0  ;;  %v2011_v5 = vrot.slane (!%p2336_p0), %v2002_v62, %v2010_v1  ;;  %v2022_v6 = vrot.slane (!%p2336_p0), %v2337_v63, %v2006_v0  ;;  %v2026_v7 = vrot.slane (!%p2336_p0), %v2337_v63, %v2010_v1 }
 0x1f7   : > { %v2014_v8 = vmul.f32 %v2007_v4, %v2000_v2  ;;  %v2015_v9 = vmul.f32 %v2011_v5, %v2001_v3 }
 0x1f9   : > { %v2029_v10 = vadd.f32 %v2022_v6, %v2014_v8  ;;  %v2030_v11 = vadd.f32 %v2026_v7, %v2015_v9 }
 0x1fb   : > { %v2031_v12 = vmax.f32 %v2029_v10, 0.0  ;;  %v2032_v13 = vmax.f32 %v2030_v11, 0.0 }
 0x1fd   : > { %v2342_v14 = vpack.c.bf16 %v2032_v13, %v2031_v12 }
 0x1ff   : > { %2041 = vst [vmem:[%s3088_s28] sm:$0xff] %v2342_v14 }
 0x200 PF: > { %s13_s18 = sadd.s32 1, %s2695_s18   ;;  %s3284_s12 = smov %s2675_s13 }
 0x201   : > { %p10_p1 = scmp.ge.s32.totalorder %s13_s18, 6   ;;  %s3285_s13 = smov %s2769_s25 }
 0x202   : > { %s3286_s14 = smov %s2687_s16  ;;  %s3287_s15 = smov %s2691_s17 }
 0x203   : > { %s3288_s16 = smov %s3291_s19  ;;  %s3289_s17 = smov %s3295_s20 }
 0x204   :  { %12 = sbr.rel (!%p10_p1) target bundleno = 4 (0x4), region = 124 }

// kernel: resnet_forward.23
= control target key start
LH: loop header
LB: loop body
LE: loop exit
PB: predicated region body
PF: predicated region fallthrough
CT: control target
= control target key end

     0   :  { %s1055_s12 = smov 0   ;;  %s1057_s13 = smov 0   ;;  %s1234_s0 = inlined_call_operand.vmem [shape: bf16[8,256], index: 0, kind: input, shape index: {}]   ;;  %s1235_s1 = inlined_call_operand.vmem [shape: bf16[256,512], index: 1, kind: input, shape index: {}]   ;;  %s1236_s2 = inlined_call_operand.vmem [shape: f32[2,512], index: 2, kind: input, shape index: {}]   ;;  %s1237_s3 = inlined_call_operand.vmem [shape: bf16[8,512], index: 3, kind: output, shape index: {}]  }
   0x1   :  { %s1059_s14 = smov 0   ;;  %s1061_s15 = smov 0  }
   0x2   :  { %s1063_s16 = smov 0  }
   0x3 LB: > { %s28_s17 = sadd.s32 1, %s1029_s15  ;;  %p76_p1 = scmp.ne.s32.totalorder %s1021_s13, %s1017_s12  ;;  %s1033_s16 = sphi %s1063_s16, %s13_s16   ;;  %s1029_s15 = sphi %s1061_s15, %s1241_s15   ;;  %s1025_s14 = sphi %s1059_s14, %s1240_s14   ;;  %s1021_s13 = sphi %s1057_s13, %s1239_s13   ;;  %s1017_s12 = sphi %s1055_s12, %s1238_s12  }
   0x4   : > { %p30_p0 = scmp.ge.s32.totalorder %s28_s17, 2  ;;  %p77_p2 = scmp.eq.s32.totalorder %s1033_s16, 0 }
   0x5   : > { %s69_s19 = sadd.s32 1, %s1021_s13  ;;  %p855_p5 = scmp.ge.s32.totalorder %s1033_s16, 2 }
   0x6   : > { %s1243_s17 = smov (%p30_p0, %s28_s17), 0  ;;  %p78_p3 = por %p77_p2, %p76_p1 }
   0x7   : > { %s65_s18 = ssub.s32 %s1029_s15, %s1243_s17  ;;  %169 = sbr.rel (%p855_p5) target bundleno = 34 (0x22), region = 20 }
   0x8   : > { %p67_p4 = scmp.eq.s32.totalorder %s65_s18, 0 }
   0xa   : > { %s1090_s20 = scalar_select %p67_p4, %s1021_s13, %s69_s19  }
   0xe   : > { %172 = sbr.rel (!%p78_p3) target bundleno = 34 (0x22), region = 24  ;;  %s174_s21 = sand.u32 (%p78_p3), 1, %s1021_s13  }
   0xf   : > { %s903_s22 = sshll.u32 (%p78_p3), %s1029_s15, 3  ;;  %s856_s23 = sshll.u32 (%p78_p3), %s174_s21, 8 }
  0x10   : > { %s1098_s26 = scalar_lea.vmem (%p78_p3), %s1235_s1, %s903_s22  ;;  %s1103_s27 = scalar_lea.vmem (%p78_p3), [#allocation3], %s856_s23 }
  0x11   : > { %v272_v0 = vld [vmem:[%s1098_s26] sm:$0xff] (%p78_p3)  ;;  %v274_v1 = vld [vmem:[%s1098_s26 + $0x10] sm:$0xff] (%p78_p3) }
  0x12   : > { %v276_v2 = vld [vmem:[%s1098_s26 + $0x20] sm:$0xff] (%p78_p3)  ;;  %273 = vst [vmem:[%s1103_s27] sm:$0xff] (%p78_p3), %v272_v0  ;;  %275 = vst [vmem:[%s1103_s27 + $0x8] sm:$0xff] (%p78_p3), %v274_v1  ;;  %v278_v3 = vld [vmem:[%s1098_s26 + $0x30] sm:$0xff] (%p78_p3) }
  0x13   : > { %277 = vst [vmem:[%s1103_s27 + $0x10] sm:$0xff] (%p78_p3), %v276_v2  ;;  %v280_v4 = vld [vmem:[%s1098_s26 + $0x40] sm:$0xff] (%p78_p3)  ;;  %v282_v5 = vld [vmem:[%s1098_s26 + $0x50] sm:$0xff] (%p78_p3)  ;;  %279 = vst [vmem:[%s1103_s27 + $0x18] sm:$0xff] (%p78_p3), %v278_v3 }
  0x14   : > { %281 = vst [vmem:[%s1103_s27 + $0x20] sm:$0xff] (%p78_p3), %v280_v4  ;;  %283 = vst [vmem:[%s1103_s27 + $0x28] sm:$0xff] (%p78_p3), %v282_v5  ;;  %v284_v6 = vld [vmem:[%s1098_s26 + $0x60] sm:$0xff] (%p78_p3)  ;;  %v286_v7 = vld [vmem:[%s1098_s26 + $0x70] sm:$0xff] (%p78_p3) }
  0x15   : > { %v288_v8 = vld [vmem:[%s1098_s26 + $0x80] sm:$0xff]  ;;  %285 = vst [vmem:[%s1103_s27 + $0x30] sm:$0xff] %v284_v6  ;;  %287 = vst [vmem:[%s1103_s27 + $0x38] sm:$0xff] %v286_v7  ;;  %v290_v9 = vld [vmem:[%s1098_s26 + $0x90] sm:$0xff] }
  0x16   : > { %289 = vst [vmem:[%s1103_s27 + $0x40] sm:$0xff] %v288_v8  ;;  %v292_v10 = vld [vmem:[%s1098_s26 + $0xa0] sm:$0xff]  ;;  %v294_v11 = vld [vmem:[%s1098_s26 + $0xb0] sm:$0xff]  ;;  %291 = vst [vmem:[%s1103_s27 + $0x48] sm:$0xff] %v290_v9 }
  0x17   : > { %293 = vst [vmem:[%s1103_s27 + $0x50] sm:$0xff] %v292_v10  ;;  %295 = vst [vmem:[%s1103_s27 + $0x58] sm:$0xff] %v294_v11  ;;  %v296_v12 = vld [vmem:[%s1098_s26 + $0xc0] sm:$0xff]  ;;  %v298_v13 = vld [vmem:[%s1098_s26 + $0xd0] sm:$0xff] }
  0x18   : > { %v300_v14 = vld [vmem:[%s1098_s26 + $0xe0] sm:$0xff]  ;;  %297 = vst [vmem:[%s1103_s27 + $0x60] sm:$0xff] %v296_v12  ;;  %299 = vst [vmem:[%s1103_s27 + $0x68] sm:$0xff] %v298_v13  ;;  %v302_v15 = vld [vmem:[%s1098_s26 + $0xf0] sm:$0xff] }
  0x19   : > { %301 = vst [vmem:[%s1103_s27 + $0x70] sm:$0xff] %v300_v14  ;;  %v304_v16 = vld [vmem:[%s1098_s26 + $0x100] sm:$0xff]  ;;  %v306_v17 = vld [vmem:[%s1098_s26 + $0x110] sm:$0xff]  ;;  %303 = vst [vmem:[%s1103_s27 + $0x78] sm:$0xff] %v302_v15 }
  0x1a   : > { %305 = vst [vmem:[%s1103_s27 + $0x80] sm:$0xff] %v304_v16  ;;  %307 = vst [vmem:[%s1103_s27 + $0x88] sm:$0xff] %v306_v17  ;;  %v308_v18 = vld [vmem:[%s1098_s26 + $0x120] sm:$0xff]  ;;  %v310_v19 = vld [vmem:[%s1098_s26 + $0x130] sm:$0xff] }
  0x1b   : > { %v312_v20 = vld [vmem:[%s1098_s26 + $0x140] sm:$0xff]  ;;  %309 = vst [vmem:[%s1103_s27 + $0x90] sm:$0xff] %v308_v18  ;;  %311 = vst [vmem:[%s1103_s27 + $0x98] sm:$0xff] %v310_v19  ;;  %v314_v21 = vld [vmem:[%s1098_s26 + $0x150] sm:$0xff] }
  0x1c   : > { %313 = vst [vmem:[%s1103_s27 + $0xa0] sm:$0xff] %v312_v20  ;;  %v316_v22 = vld [vmem:[%s1098_s26 + $0x160] sm:$0xff]  ;;  %v318_v23 = vld [vmem:[%s1098_s26 + $0x170] sm:$0xff]  ;;  %315 = vst [vmem:[%s1103_s27 + $0xa8] sm:$0xff] %v314_v21 }
  0x1d   : > { %317 = vst [vmem:[%s1103_s27 + $0xb0] sm:$0xff] %v316_v22  ;;  %319 = vst [vmem:[%s1103_s27 + $0xb8] sm:$0xff] %v318_v23  ;;  %v320_v24 = vld [vmem:[%s1098_s26 + $0x180] sm:$0xff]  ;;  %v322_v25 = vld [vmem:[%s1098_s26 + $0x190] sm:$0xff] }
  0x1e   : > { %v324_v26 = vld [vmem:[%s1098_s26 + $0x1a0] sm:$0xff]  ;;  %321 = vst [vmem:[%s1103_s27 + $0xc0] sm:$0xff] %v320_v24  ;;  %323 = vst [vmem:[%s1103_s27 + $0xc8] sm:$0xff] %v322_v25  ;;  %v326_v27 = vld [vmem:[%s1098_s26 + $0x1b0] sm:$0xff] }
  0x1f   : > { %325 = vst [vmem:[%s1103_s27 + $0xd0] sm:$0xff] %v324_v26  ;;  %v328_v28 = vld [vmem:[%s1098_s26 + $0x1c0] sm:$0xff]  ;;  %v330_v29 = vld [vmem:[%s1098_s26 + $0x1d0] sm:$0xff]  ;;  %327 = vst [vmem:[%s1103_s27 + $0xd8] sm:$0xff] %v326_v27 }
  0x20   : > { %329 = vst [vmem:[%s1103_s27 + $0xe0] sm:$0xff] %v328_v28  ;;  %331 = vst [vmem:[%s1103_s27 + $0xe8] sm:$0xff] %v330_v29  ;;  %v332_v30 = vld [vmem:[%s1098_s26 + $0x1e0] sm:$0xff]  ;;  %v334_v31 = vld [vmem:[%s1098_s26 + $0x1f0] sm:$0xff] }
  0x21   : > { %333 = vst [vmem:[%s1103_s27 + $0xf0] sm:$0xff] %v332_v30  ;;  %335 = vst [vmem:[%s1103_s27 + $0xf8] sm:$0xff] %v334_v31 }
  0x22 PF: > { %p859_p6 = scmp.ge.s32.totalorder %s1033_s16, 1  ;;  %p349_p7 = scmp.lt.s32.totalorder %s1033_s16, 3 }
  0x24   : > { %p350_p8 = pnand %p859_p6, %p349_p7 }
  0x25   : > { %s356_s28 = sand.u32 (!%p350_p8), 1, %s1017_s12   ;;  %v1172_v32 = vld [vmem:[%s1234_s0] sm:$0xff] (!%p350_p8)  ;;  %s861_s6 = sshll.u32 (!%p350_p8), %s1025_s14, 1  ;;  %v689_v3 = vlaneseq (!%p350_p8) }
  0x26   : > { %353 = sbr.rel (%p350_p8) target bundleno = 325 (0x145), region = 66  ;;  %s860_s4 = sshll.u32 (!%p350_p8), %s356_s28, 8  ;;  %v866_v33 = vcombine.high (!%p350_p8), %v1172_v32, %v1172_v32  ;;  %v865_v2 = vcombine.low (!%p350_p8), %v1172_v32, %v1172_v32 }
  0x27   : > { %s1176_s5 = scalar_lea.vmem (!%p350_p8), [#allocation3], %s860_s4  ;;  %p410_p9 = scmp.lt.s32.totalorder (!%p350_p8), %s861_s6, 3  ;;  %v690_v4 = vshrl.u32 (!%p350_p8), %v689_v3, 7 }
  0x28   : > { %v945_v34 = vld [vmem:[%s1176_s5 + $0x4] ss:$8 sps:$4 sm:$0xff] (!%p350_p8)   ;;  %657 = vmatprep.mubr.bf16.mxu0 (!%p350_p8), %v866_v33  ;;  %v947_v35 = vld [vmem:[%s1176_s5] ss:$8 sps:$4 sm:$0xff] (!%p350_p8)   ;;  %v948_v36 = vld [vmem:[%s1176_s5 + $0x14] ss:$8 sps:$4 sm:$0xff] (!%p350_p8)  }
  0x29   : > { %625 = vmatprep.subr.bf16.mxu0 (!%p350_p8), %v945_v34  ;;  %v950_v37 = vld [vmem:[%s1176_s5 + $0x10] ss:$8 sps:$4 sm:$0xff] (!%p350_p8)   ;;  %v951_v38 = vld [vmem:[%s1176_s5 + $0x24] ss:$8 sps:$4 sm:$0xff] (!%p350_p8)   ;;  %v953_v39 = vld [vmem:[%s1176_s5 + $0x20] ss:$8 sps:$4 sm:$0xff] (!%p350_p8)  }
  0x2a   : > { %626 = vmatpush1.bf16.msra.mxu0 (!%p350_p8), %v947_v35  ;;  %v954_v40 = vld [vmem:[%s1176_s5 + $0x34] ss:$8 sps:$4 sm:$0xff] (!%p350_p8)   ;;  %v956_v41 = vld [vmem:[%s1176_s5 + $0x30] ss:$8 sps:$4 sm:$0xff] (!%p350_p8)   ;;  %v957_v42 = vld [vmem:[%s1176_s5 + $0x44] ss:$8 sps:$4 sm:$0xff] (!%p350_p8)  }
  0x2b   : > { %627 = vmatprep.subr.bf16.mxu0 (!%p350_p8), %v948_v36  ;;  %v959_v43 = vld [vmem:[%s1176_s5 + $0x40] ss:$8 sps:$4 sm:$0xff] (!%p350_p8)   ;;  %v960_v44 = vld [vmem:[%s1176_s5 + $0x54] ss:$8 sps:$4 sm:$0xff] (!%p350_p8)   ;;  %v962_v45 = vld [vmem:[%s1176_s5 + $0x50] ss:$8 sps:$4 sm:$0xff] (!%p350_p8)  }
  0x2c   : > { %v963_v46 = vld [vmem:[%s1176_s5 + $0x64] ss:$8 sps:$4 sm:$0xff] (!%p350_p8)   ;;  %v965_v47 = vld [vmem:[%s1176_s5 + $0x60] ss:$8 sps:$4 sm:$0xff] (!%p350_p8)   ;;  %v966_v48 = vld [vmem:[%s1176_s5 + $0x74] ss:$8 sps:$4 sm:$0xff] (!%p350_p8)  }
  0x2d   : > { %v968_v49 = vld [vmem:[%s1176_s5 + $0x70] ss:$8 sps:$4 sm:$0xff]   ;;  %v969_v50 = vld [vmem:[%s1176_s5 + $0x84] ss:$8 sps:$4 sm:$0xff]   ;;  %v971_v51 = vld [vmem:[%s1176_s5 + $0x80] ss:$8 sps:$4 sm:$0xff]  }
  0x2e   : > { %628 = vmatpush1.bf16.msra.mxu0 %v950_v37  ;;  %v972_v52 = vld [vmem:[%s1176_s5 + $0x94] ss:$8 sps:$4 sm:$0xff]   ;;  %v974_v53 = vld [vmem:[%s1176_s5 + $0x90] ss:$8 sps:$4 sm:$0xff]   ;;  %v975_v54 = vld [vmem:[%s1176_s5 + $0xa4] ss:$8 sps:$4 sm:$0xff]  }
  0x2f   : > { %629 = vmatprep.subr.bf16.mxu0 %v951_v38  ;;  %v977_v55 = vld [vmem:[%s1176_s5 + $0xa0] ss:$8 sps:$4 sm:$0xff]   ;;  %v978_v56 = vld [vmem:[%s1176_s5 + $0xb4] ss:$8 sps:$4 sm:$0xff]   ;;  %v980_v57 = vld [vmem:[%s1176_s5 + $0xb0] ss:$8 sps:$4 sm:$0xff]  }
  0x30   : > { %v981_v58 = vld [vmem:[%s1176_s5 + $0xc4] ss:$8 sps:$4 sm:$0xff]   ;;  %v983_v59 = vld [vmem:[%s1176_s5 + $0xc0] ss:$8 sps:$4 sm:$0xff]   ;;  %v984_v60 = vld [vmem:[%s1176_s5 + $0xd4] ss:$8 sps:$4 sm:$0xff]  }
  0x31   : > { %v986_v61 = vld [vmem:[%s1176_s5 + $0xd0] ss:$8 sps:$4 sm:$0xff]   ;;  %v987_v62 = vld [vmem:[%s1176_s5 + $0xe4] ss:$8 sps:$4 sm:$0xff]   ;;  %v989_v63 = vld [vmem:[%s1176_s5 + $0xe0] ss:$8 sps:$4 sm:$0xff]  }
  0x32   : > { %630 = vmatpush1.bf16.msra.mxu0 %v953_v39  ;;  %v990_v0 = vld [vmem:[%s1176_s5 + $0xf4] ss:$8 sps:$4 sm:$0xff]   ;;  %v992_v1 = vld [vmem:[%s1176_s5 + $0xf0] ss:$8 sps:$4 sm:$0xff]   ;;  %s1245_s6 = smov (!%p410_p9, %s861_s6), 3  ;;  %v691_v5 = vsub.s32 0, %v690_v4 }
  0x33   : > { %631 = vmatprep.subr.bf16.mxu0 %v954_v40  ;;  %s862_s7 = sshll.u32 %s1245_s6, 1  ;;  %v695_v7 = vsub.s32 1, %v690_v4  ;;  %s864_s11 = sshll.u32 %s1245_s6, 2 }
  0x34   : > { %s413_s10 = scalar_lea.vmem %s1236_s2, %s862_s7  ;;  %s423_s18 = scalar_lea.vmem %s1237_s3, %s864_s11 }
  0x35   : > { %v687_v6 = vld [vmem:[%s413_s10] ss:$2 sm:$0x3]  ;;  %v899_v8 = vld [vmem:[%s413_s10 + $0x1] ss:$2 sm:$0x3] }
  0x36   : > { %632 = vmatpush1.bf16.msra.mxu0 %v956_v41  ;;  %v692_v9 = vrot.slane %v687_v6, %v691_v5  ;;  %v696_v10 = vrot.slane %v687_v6, %v695_v7  ;;  %v707_v11 = vrot.slane %v899_v8, %v691_v5  ;;  %v711_v13 = vrot.slane %v899_v8, %v695_v7 }
  0x37   : > { %633 = vmatprep.subr.bf16.mxu0 %v957_v42 }
  0x3a   : > { %634 = vmatpush1.bf16.msra.mxu0 %v959_v43 }
  0x3b   : > { %635 = vmatprep.subr.bf16.mxu0 %v960_v44 }
  0x3e   : > { %636 = vmatpush1.bf16.msra.mxu0 %v962_v45 }
  0x3f   : > { %637 = vmatprep.subr.bf16.mxu0 %v963_v46 }
  0x42   : > { %638 = vmatpush1.bf16.msra.mxu0 %v965_v47 }
  0x43   : > { %639 = vmatprep.subr.bf16.mxu0 %v966_v48 }
  0x46   : > { %640 = vmatpush1.bf16.msra.mxu0 %v968_v49 }
  0x47   : > { %641 = vmatprep.subr.bf16.mxu0 %v969_v50 }
  0x4a   : > { %642 = vmatpush1.bf16.msra.mxu0 %v971_v51 }
  0x4b   : > { %643 = vmatprep.subr.bf16.mxu0 %v972_v52 }
  0x4e   : > { %644 = vmatpush1.bf16.msra.mxu0 %v974_v53 }
  0x4f   : > { %645 = vmatprep.subr.bf16.mxu0 %v975_v54 }
  0x52   : > { %646 = vmatpush1.bf16.msra.mxu0 %v977_v55 }
  0x53   : > { %647 = vmatprep.subr.bf16.mxu0 %v978_v56 }
  0x56   : > { %648 = vmatpush1.bf16.msra.mxu0 %v980_v57 }
  0x57   : > { %649 = vmatprep.subr.bf16.mxu0 %v981_v58 }
  0x5a   : > { %650 = vmatpush1.bf16.msra.mxu0 %v983_v59 }
  0x5b   : > { %651 = vmatprep.subr.bf16.mxu0 %v984_v60 }
  0x5e   : > { %652 = vmatpush1.bf16.msra.mxu0 %v986_v61 }
  0x5f   : > { %653 = vmatprep.subr.bf16.mxu0 %v987_v62 }
  0x62   : > { %654 = vmatpush1.bf16.msra.mxu0 %v989_v63 }
  0x63   : > { %655 = vmatprep.subr.bf16.mxu0 %v990_v0 }
  0x66   : > { %656 = vmatpush1.bf16.msra.mxu0 %v992_v1 }
  0x69   : > { %658 = vmatmul.mubr.bf16.vlgmr.msra.gmra.mrb[0].mxu0 %v865_v2 }
 0x13c   : > { %v659_v12 = vpop.f32.mrb[0].mxu0 }
 0x13d   : > { %v699_v14 = vmul.f32 %v692_v9, %v659_v12  ;;  %v661_v15 = vpop.f32.mrb[1].mxu0 }
 0x13e   : > { %v700_v16 = vmul.f32 %v696_v10, %v661_v15  ;;  %v663_v17 = vpop.f32.mrb[2].mxu0 }
 0x13f   : > { %v714_v18 = vadd.f32 %v707_v11, %v699_v14  ;;  %v664_v19 = vpop.f32.mrb[3].mxu0 }
 0x140   : > { %v715_v20 = vadd.f32 %v711_v13, %v700_v16 }
 0x142   : > { %v904_v21 = vpack.c.bf16 %v715_v20, %v714_v18 }
 0x144   : > { %724 = vst [vmem:[%s423_s18] sm:$0xff] %v904_v21 }
 0x145 PF: > { %s13_s16 = sadd.s32 1, %s1033_s16   ;;  %s1238_s12 = smov %s1021_s13 }
 0x146   : > { %p10_p10 = scmp.ge.s32.totalorder %s13_s16, 4   ;;  %s1239_s13 = smov %s1090_s20 }
 0x147   : > { %s1240_s14 = smov %s1029_s15  ;;  %s1241_s15 = smov %s1243_s17 }
 0x148   :  { %12 = sbr.rel (!%p10_p10) target bundleno = 3 (0x3), region = 124 }

// kernel: resnet_forward.24
= control target key start
LH: loop header
LB: loop body
LE: loop exit
PB: predicated region body
PF: predicated region fallthrough
CT: control target
= control target key end

     0   :  { %s3470_s15 = smov 0   ;;  %s3472_s16 = smov 0   ;;  %s4195_s0 = inlined_call_operand.vmem [shape: bf16[8,4608], index: 0, kind: input, shape index: {}]   ;;  %s4196_s1 = inlined_call_operand.vmem [shape: bf16[4608,512], index: 1, kind: input, shape index: {}]   ;;  %s4197_s2 = inlined_call_operand.vmem [shape: f32[2,512], index: 2, kind: input, shape index: {}]   ;;  %s4198_s3 = inlined_call_operand.vmem [shape: bf16[8,512], index: 3, kind: input, shape index: {}]   ;;  %s4199_s4 = inlined_call_operand.vmem [shape: bf16[8,512], index: 4, kind: output, shape index: {}]  }
   0x1   :  { %s3474_s17 = smov 0   ;;  %s3476_s18 = smov 0  }
   0x2   :  { %s3478_s19 = smov 0   ;;  %s3480_s20 = smov 0  }
   0x3   :  { %s3482_s21 = smov 0  }
   0x4 LB: > { %s26_s22 = sadd.s32 1, %s3435_s19  ;;  %s29_s23 = sadd.s32 1, %s3439_s20  ;;  %s3443_s21 = sphi %s3482_s21, %s14_s21   ;;  %s3439_s20 = sphi %s3480_s20, %s4205_s20   ;;  %s3435_s19 = sphi %s3478_s19, %s4204_s19   ;;  %s3431_s18 = sphi %s3476_s18, %s4203_s18   ;;  %s3427_s17 = sphi %s3474_s17, %s4202_s17   ;;  %s3423_s16 = sphi %s3472_s16, %s4201_s16   ;;  %s3419_s15 = sphi %s3470_s15, %s4200_s15  }
   0x5   : > { %p27_p0 = scmp.ge.s32.totalorder %s26_s22, 3  ;;  %p77_p1 = scmp.ne.s32.totalorder %s3423_s16, %s3419_s15 }
   0x6   : > { %p78_p2 = scmp.eq.s32.totalorder %s3443_s21, 0  ;;  %s70_s27 = sadd.s32 1, %s3423_s16 }
   0x7   : > { %s4207_s22 = smov (%p27_p0, %s26_s22), 0  ;;  %s4209_s23 = smov (!%p27_p0, %s29_s23), %s3439_s20 }
   0x8   : > { %p79_p3 = por %p78_p2, %p77_p1  ;;  %p31_p4 = scmp.ge.s32.totalorder %s4209_s23, 2 }
   0x9   : > { %s65_s24 = ssub.s32 %s3435_s19, %s4207_s22  ;;  %p2788_p6 = scmp.ge.s32.totalorder %s3443_s21, 6 }
   0xa   : > { %s4211_s23 = smov (%p31_p4, %s4209_s23), 0 }
   0xb   : > { %s66_s25 = ssub.s32 %s3439_s20, %s4211_s23  ;;  %185 = sbr.rel (%p2788_p6) target bundleno = 122 (0x7a), region = 16 }
   0xc   : > { %s67_s26 = sor.u32 %s66_s25, %s65_s24 }
   0xd   : > { %p68_p5 = scmp.eq.s32.totalorder %s67_s26, 0 }
   0xf   : > { %s3521_s28 = scalar_select %p68_p5, %s3423_s16, %s70_s27  }
  0x12   : > { %201 = sbr.rel (!%p79_p3) target bundleno = 122 (0x7a), region = 24  ;;  %s203_s29 = sand.u32 (%p79_p3), 1, %s3423_s16  }
  0x13   : > { %s3031_s30 = smul.u32 (%p79_p3), 1536, %s203_s29  ;;  %s2789_s5 = sshll.u32 (%p79_p3), %s3439_s20, 1 }
  0x14   : > { %s3011_s6 = smul.u32 (%p79_p3), 768, %s3435_s19 }
  0x15   : > { %s3535_s12 = scalar_lea.vmem (%p79_p3), [#allocation3], %s3031_s30 }
  0x16   : > { %s209_s7 = sadd.s32 (%p79_p3), %s3011_s6, %s2789_s5 }
  0x17   : > { %s2791_s8 = sshll.u32 (%p79_p3), %s209_s7, 2 }
  0x18   : > { %s3530_s11 = scalar_lea.vmem (%p79_p3), %s4196_s1, %s2791_s8 }
  0x19   : > { %v621_v0 = vld [vmem:[%s3530_s11] sm:$0xff]  ;;  %v623_v1 = vld [vmem:[%s3530_s11 + $0x10] sm:$0xff] }
  0x1a   : > { %v625_v2 = vld [vmem:[%s3530_s11 + $0x20] sm:$0xff]  ;;  %622 = vst [vmem:[%s3535_s12] sm:$0xff] %v621_v0  ;;  %624 = vst [vmem:[%s3535_s12 + $0x8] sm:$0xff] %v623_v1  ;;  %v627_v3 = vld [vmem:[%s3530_s11 + $0x30] sm:$0xff] }
  0x1b   : > { %626 = vst [vmem:[%s3535_s12 + $0x10] sm:$0xff] %v625_v2  ;;  %v629_v4 = vld [vmem:[%s3530_s11 + $0x40] sm:$0xff]  ;;  %v631_v5 = vld [vmem:[%s3530_s11 + $0x50] sm:$0xff]  ;;  %628 = vst [vmem:[%s3535_s12 + $0x18] sm:$0xff] %v627_v3 }
  0x1c   : > { %630 = vst [vmem:[%s3535_s12 + $0x20] sm:$0xff] %v629_v4  ;;  %632 = vst [vmem:[%s3535_s12 + $0x28] sm:$0xff] %v631_v5  ;;  %v633_v6 = vld [vmem:[%s3530_s11 + $0x60] sm:$0xff]  ;;  %v635_v7 = vld [vmem:[%s3530_s11 + $0x70] sm:$0xff] }
  0x1d   : > { %v637_v8 = vld [vmem:[%s3530_s11 + $0x80] sm:$0xff]  ;;  %634 = vst [vmem:[%s3535_s12 + $0x30] sm:$0xff] %v633_v6  ;;  %636 = vst [vmem:[%s3535_s12 + $0x38] sm:$0xff] %v635_v7  ;;  %v639_v9 = vld [vmem:[%s3530_s11 + $0x90] sm:$0xff] }
  0x1e   : > { %638 = vst [vmem:[%s3535_s12 + $0x40] sm:$0xff] %v637_v8  ;;  %v641_v10 = vld [vmem:[%s3530_s11 + $0xa0] sm:$0xff]  ;;  %v643_v11 = vld [vmem:[%s3530_s11 + $0xb0] sm:$0xff]  ;;  %640 = vst [vmem:[%s3535_s12 + $0x48] sm:$0xff] %v639_v9 }
  0x1f   : > { %642 = vst [vmem:[%s3535_s12 + $0x50] sm:$0xff] %v641_v10  ;;  %644 = vst [vmem:[%s3535_s12 + $0x58] sm:$0xff] %v643_v11  ;;  %v645_v12 = vld [vmem:[%s3530_s11 + $0xc0] sm:$0xff]  ;;  %v647_v13 = vld [vmem:[%s3530_s11 + $0xd0] sm:$0xff] }
  0x20   : > { %v649_v14 = vld [vmem:[%s3530_s11 + $0xe0] sm:$0xff]  ;;  %646 = vst [vmem:[%s3535_s12 + $0x60] sm:$0xff] %v645_v12  ;;  %648 = vst [vmem:[%s3535_s12 + $0x68] sm:$0xff] %v647_v13  ;;  %v651_v15 = vld [vmem:[%s3530_s11 + $0xf0] sm:$0xff] }
  0x21   : > { %650 = vst [vmem:[%s3535_s12 + $0x70] sm:$0xff] %v649_v14  ;;  %v653_v16 = vld [vmem:[%s3530_s11 + $0x100] sm:$0xff]  ;;  %v655_v17 = vld [vmem:[%s3530_s11 + $0x110] sm:$0xff]  ;;  %652 = vst [vmem:[%s3535_s12 + $0x78] sm:$0xff] %v651_v15 }
  0x22   : > { %654 = vst [vmem:[%s3535_s12 + $0x80] sm:$0xff] %v653_v16  ;;  %656 = vst [vmem:[%s3535_s12 + $0x88] sm:$0xff] %v655_v17  ;;  %v657_v18 = vld [vmem:[%s3530_s11 + $0x120] sm:$0xff]  ;;  %v659_v19 = vld [vmem:[%s3530_s11 + $0x130] sm:$0xff] }
  0x23   : > { %v661_v20 = vld [vmem:[%s3530_s11 + $0x140] sm:$0xff]  ;;  %658 = vst [vmem:[%s3535_s12 + $0x90] sm:$0xff] %v657_v18  ;;  %660 = vst [vmem:[%s3535_s12 + $0x98] sm:$0xff] %v659_v19  ;;  %v663_v21 = vld [vmem:[%s3530_s11 + $0x150] sm:$0xff] }
  0x24   : > { %662 = vst [vmem:[%s3535_s12 + $0xa0] sm:$0xff] %v661_v20  ;;  %v665_v22 = vld [vmem:[%s3530_s11 + $0x160] sm:$0xff]  ;;  %v667_v23 = vld [vmem:[%s3530_s11 + $0x170] sm:$0xff]  ;;  %664 = vst [vmem:[%s3535_s12 + $0xa8] sm:$0xff] %v663_v21 }
  0x25   : > { %666 = vst [vmem:[%s3535_s12 + $0xb0] sm:$0xff] %v665_v22  ;;  %668 = vst [vmem:[%s3535_s12 + $0xb8] sm:$0xff] %v667_v23  ;;  %v669_v24 = vld [vmem:[%s3530_s11 + $0x180] sm:$0xff]  ;;  %v671_v25 = vld [vmem:[%s3530_s11 + $0x190] sm:$0xff] }
  0x26   : > { %v673_v26 = vld [vmem:[%s3530_s11 + $0x1a0] sm:$0xff]  ;;  %670 = vst [vmem:[%s3535_s12 + $0xc0] sm:$0xff] %v669_v24  ;;  %672 = vst [vmem:[%s3535_s12 + $0xc8] sm:$0xff] %v671_v25  ;;  %v675_v27 = vld [vmem:[%s3530_s11 + $0x1b0] sm:$0xff] }
  0x27   : > { %674 = vst [vmem:[%s3535_s12 + $0xd0] sm:$0xff] %v673_v26  ;;  %v677_v28 = vld [vmem:[%s3530_s11 + $0x1c0] sm:$0xff]  ;;  %v679_v29 = vld [vmem:[%s3530_s11 + $0x1d0] sm:$0xff]  ;;  %676 = vst [vmem:[%s3535_s12 + $0xd8] sm:$0xff] %v675_v27 }
  0x28   : > { %678 = vst [vmem:[%s3535_s12 + $0xe0] sm:$0xff] %v677_v28  ;;  %680 = vst [vmem:[%s3535_s12 + $0xe8] sm:$0xff] %v679_v29  ;;  %v681_v30 = vld [vmem:[%s3530_s11 + $0x1e0] sm:$0xff]  ;;  %v683_v31 = vld [vmem:[%s3530_s11 + $0x1f0] sm:$0xff] }
  0x29   : > { %v685_v32 = vld [vmem:[%s3530_s11 + $0x200] sm:$0xff]  ;;  %682 = vst [vmem:[%s3535_s12 + $0xf0] sm:$0xff] %v681_v30  ;;  %684 = vst [vmem:[%s3535_s12 + $0xf8] sm:$0xff] %v683_v31  ;;  %v687_v33 = vld [vmem:[%s3530_s11 + $0x210] sm:$0xff] }
  0x2a   : > { %686 = vst [vmem:[%s3535_s12 + $0x100] sm:$0xff] %v685_v32  ;;  %v689_v34 = vld [vmem:[%s3530_s11 + $0x220] sm:$0xff]  ;;  %v691_v35 = vld [vmem:[%s3530_s11 + $0x230] sm:$0xff]  ;;  %688 = vst [vmem:[%s3535_s12 + $0x108] sm:$0xff] %v687_v33 }
  0x2b   : > { %690 = vst [vmem:[%s3535_s12 + $0x110] sm:$0xff] %v689_v34  ;;  %692 = vst [vmem:[%s3535_s12 + $0x118] sm:$0xff] %v691_v35  ;;  %v693_v36 = vld [vmem:[%s3530_s11 + $0x240] sm:$0xff]  ;;  %v695_v37 = vld [vmem:[%s3530_s11 + $0x250] sm:$0xff] }
  0x2c   : > { %v697_v38 = vld [vmem:[%s3530_s11 + $0x260] sm:$0xff]  ;;  %694 = vst [vmem:[%s3535_s12 + $0x120] sm:$0xff] %v693_v36  ;;  %696 = vst [vmem:[%s3535_s12 + $0x128] sm:$0xff] %v695_v37  ;;  %v699_v39 = vld [vmem:[%s3530_s11 + $0x270] sm:$0xff] }
  0x2d   : > { %698 = vst [vmem:[%s3535_s12 + $0x130] sm:$0xff] %v697_v38  ;;  %v701_v40 = vld [vmem:[%s3530_s11 + $0x280] sm:$0xff]  ;;  %v703_v41 = vld [vmem:[%s3530_s11 + $0x290] sm:$0xff]  ;;  %700 = vst [vmem:[%s3535_s12 + $0x138] sm:$0xff] %v699_v39 }
  0x2e   : > { %702 = vst [vmem:[%s3535_s12 + $0x140] sm:$0xff] %v701_v40  ;;  %704 = vst [vmem:[%s3535_s12 + $0x148] sm:$0xff] %v703_v41  ;;  %v705_v42 = vld [vmem:[%s3530_s11 + $0x2a0] sm:$0xff]  ;;  %v707_v43 = vld [vmem:[%s3530_s11 + $0x2b0] sm:$0xff] }
  0x2f   : > { %v709_v44 = vld [vmem:[%s3530_s11 + $0x2c0] sm:$0xff]  ;;  %706 = vst [vmem:[%s3535_s12 + $0x150] sm:$0xff] %v705_v42  ;;  %708 = vst [vmem:[%s3535_s12 + $0x158] sm:$0xff] %v707_v43  ;;  %v711_v45 = vld [vmem:[%s3530_s11 + $0x2d0] sm:$0xff] }
  0x30   : > { %710 = vst [vmem:[%s3535_s12 + $0x160] sm:$0xff] %v709_v44  ;;  %v713_v46 = vld [vmem:[%s3530_s11 + $0x2e0] sm:$0xff]  ;;  %v715_v47 = vld [vmem:[%s3530_s11 + $0x2f0] sm:$0xff]  ;;  %712 = vst [vmem:[%s3535_s12 + $0x168] sm:$0xff] %v711_v45 }
  0x31   : > { %714 = vst [vmem:[%s3535_s12 + $0x170] sm:$0xff] %v713_v46  ;;  %716 = vst [vmem:[%s3535_s12 + $0x178] sm:$0xff] %v715_v47  ;;  %v717_v48 = vld [vmem:[%s3530_s11 + $0x300] sm:$0xff]  ;;  %v719_v49 = vld [vmem:[%s3530_s11 + $0x310] sm:$0xff] }
  0x32   : > { %v721_v50 = vld [vmem:[%s3530_s11 + $0x320] sm:$0xff]  ;;  %718 = vst [vmem:[%s3535_s12 + $0x180] sm:$0xff] %v717_v48  ;;  %720 = vst [vmem:[%s3535_s12 + $0x188] sm:$0xff] %v719_v49  ;;  %v723_v51 = vld [vmem:[%s3530_s11 + $0x330] sm:$0xff] }
  0x33   : > { %722 = vst [vmem:[%s3535_s12 + $0x190] sm:$0xff] %v721_v50  ;;  %v725_v52 = vld [vmem:[%s3530_s11 + $0x340] sm:$0xff]  ;;  %v727_v53 = vld [vmem:[%s3530_s11 + $0x350] sm:$0xff]  ;;  %724 = vst [vmem:[%s3535_s12 + $0x198] sm:$0xff] %v723_v51 }
  0x34   : > { %726 = vst [vmem:[%s3535_s12 + $0x1a0] sm:$0xff] %v725_v52  ;;  %728 = vst [vmem:[%s3535_s12 + $0x1a8] sm:$0xff] %v727_v53  ;;  %v729_v54 = vld [vmem:[%s3530_s11 + $0x360] sm:$0xff]  ;;  %v731_v55 = vld [vmem:[%s3530_s11 + $0x370] sm:$0xff] }
  0x35   : > { %v733_v56 = vld [vmem:[%s3530_s11 + $0x380] sm:$0xff]  ;;  %730 = vst [vmem:[%s3535_s12 + $0x1b0] sm:$0xff] %v729_v54  ;;  %732 = vst [vmem:[%s3535_s12 + $0x1b8] sm:$0xff] %v731_v55  ;;  %v735_v57 = vld [vmem:[%s3530_s11 + $0x390] sm:$0xff] }
  0x36   : > { %734 = vst [vmem:[%s3535_s12 + $0x1c0] sm:$0xff] %v733_v56  ;;  %v737_v58 = vld [vmem:[%s3530_s11 + $0x3a0] sm:$0xff]  ;;  %v739_v59 = vld [vmem:[%s3530_s11 + $0x3b0] sm:$0xff]  ;;  %736 = vst [vmem:[%s3535_s12 + $0x1c8] sm:$0xff] %v735_v57 }
  0x37   : > { %738 = vst [vmem:[%s3535_s12 + $0x1d0] sm:$0xff] %v737_v58  ;;  %740 = vst [vmem:[%s3535_s12 + $0x1d8] sm:$0xff] %v739_v59  ;;  %v741_v60 = vld [vmem:[%s3530_s11 + $0x3c0] sm:$0xff]  ;;  %v743_v61 = vld [vmem:[%s3530_s11 + $0x3d0] sm:$0xff] }
  0x38   : > { %v745_v62 = vld [vmem:[%s3530_s11 + $0x3e0] sm:$0xff]  ;;  %742 = vst [vmem:[%s3535_s12 + $0x1e0] sm:$0xff] %v741_v60  ;;  %744 = vst [vmem:[%s3535_s12 + $0x1e8] sm:$0xff] %v743_v61  ;;  %v747_v63 = vld [vmem:[%s3530_s11 + $0x3f0] sm:$0xff] }
  0x39   : > { %746 = vst [vmem:[%s3535_s12 + $0x1f0] sm:$0xff] %v745_v62  ;;  %v749_v0 = vld [vmem:[%s3530_s11 + $0x400] sm:$0xff]  ;;  %v751_v1 = vld [vmem:[%s3530_s11 + $0x410] sm:$0xff]  ;;  %748 = vst [vmem:[%s3535_s12 + $0x1f8] sm:$0xff] %v747_v63 }
  0x3a   : > { %750 = vst [vmem:[%s3535_s12 + $0x200] sm:$0xff] %v749_v0  ;;  %752 = vst [vmem:[%s3535_s12 + $0x208] sm:$0xff] %v751_v1  ;;  %v753_v2 = vld [vmem:[%s3530_s11 + $0x420] sm:$0xff]  ;;  %v755_v3 = vld [vmem:[%s3530_s11 + $0x430] sm:$0xff] }
  0x3b   : > { %v757_v4 = vld [vmem:[%s3530_s11 + $0x440] sm:$0xff]  ;;  %754 = vst [vmem:[%s3535_s12 + $0x210] sm:$0xff] %v753_v2  ;;  %756 = vst [vmem:[%s3535_s12 + $0x218] sm:$0xff] %v755_v3  ;;  %v759_v5 = vld [vmem:[%s3530_s11 + $0x450] sm:$0xff] }
  0x3c   : > { %758 = vst [vmem:[%s3535_s12 + $0x220] sm:$0xff] %v757_v4  ;;  %v761_v6 = vld [vmem:[%s3530_s11 + $0x460] sm:$0xff]  ;;  %v763_v7 = vld [vmem:[%s3530_s11 + $0x470] sm:$0xff]  ;;  %760 = vst [vmem:[%s3535_s12 + $0x228] sm:$0xff] %v759_v5 }
  0x3d   : > { %762 = vst [vmem:[%s3535_s12 + $0x230] sm:$0xff] %v761_v6  ;;  %764 = vst [vmem:[%s3535_s12 + $0x238] sm:$0xff] %v763_v7  ;;  %v765_v8 = vld [vmem:[%s3530_s11 + $0x480] sm:$0xff]  ;;  %v767_v9 = vld [vmem:[%s3530_s11 + $0x490] sm:$0xff] }
  0x3e   : > { %v769_v10 = vld [vmem:[%s3530_s11 + $0x4a0] sm:$0xff]  ;;  %766 = vst [vmem:[%s3535_s12 + $0x240] sm:$0xff] %v765_v8  ;;  %768 = vst [vmem:[%s3535_s12 + $0x248] sm:$0xff] %v767_v9  ;;  %v771_v11 = vld [vmem:[%s3530_s11 + $0x4b0] sm:$0xff] }
  0x3f   : > { %770 = vst [vmem:[%s3535_s12 + $0x250] sm:$0xff] %v769_v10  ;;  %v773_v12 = vld [vmem:[%s3530_s11 + $0x4c0] sm:$0xff]  ;;  %v775_v13 = vld [vmem:[%s3530_s11 + $0x4d0] sm:$0xff]  ;;  %772 = vst [vmem:[%s3535_s12 + $0x258] sm:$0xff] %v771_v11 }
  0x40   : > { %774 = vst [vmem:[%s3535_s12 + $0x260] sm:$0xff] %v773_v12  ;;  %776 = vst [vmem:[%s3535_s12 + $0x268] sm:$0xff] %v775_v13  ;;  %v777_v14 = vld [vmem:[%s3530_s11 + $0x4e0] sm:$0xff]  ;;  %v779_v15 = vld [vmem:[%s3530_s11 + $0x4f0] sm:$0xff] }
  0x41   : > { %v781_v16 = vld [vmem:[%s3530_s11 + $0x500] sm:$0xff]  ;;  %778 = vst [vmem:[%s3535_s12 + $0x270] sm:$0xff] %v777_v14  ;;  %780 = vst [vmem:[%s3535_s12 + $0x278] sm:$0xff] %v779_v15  ;;  %v783_v17 = vld [vmem:[%s3530_s11 + $0x510] sm:$0xff] }
  0x42   : > { %782 = vst [vmem:[%s3535_s12 + $0x280] sm:$0xff] %v781_v16  ;;  %v785_v18 = vld [vmem:[%s3530_s11 + $0x520] sm:$0xff]  ;;  %v787_v19 = vld [vmem:[%s3530_s11 + $0x530] sm:$0xff]  ;;  %784 = vst [vmem:[%s3535_s12 + $0x288] sm:$0xff] %v783_v17 }
  0x43   : > { %786 = vst [vmem:[%s3535_s12 + $0x290] sm:$0xff] %v785_v18  ;;  %788 = vst [vmem:[%s3535_s12 + $0x298] sm:$0xff] %v787_v19  ;;  %v789_v20 = vld [vmem:[%s3530_s11 + $0x540] sm:$0xff]  ;;  %v791_v21 = vld [vmem:[%s3530_s11 + $0x550] sm:$0xff] }
  0x44   : > { %v793_v22 = vld [vmem:[%s3530_s11 + $0x560] sm:$0xff]  ;;  %790 = vst [vmem:[%s3535_s12 + $0x2a0] sm:$0xff] %v789_v20  ;;  %792 = vst [vmem:[%s3535_s12 + $0x2a8] sm:$0xff] %v791_v21  ;;  %v795_v23 = vld [vmem:[%s3530_s11 + $0x570] sm:$0xff] }
  0x45   : > { %794 = vst [vmem:[%s3535_s12 + $0x2b0] sm:$0xff] %v793_v22  ;;  %v797_v24 = vld [vmem:[%s3530_s11 + $0x580] sm:$0xff]  ;;  %v799_v25 = vld [vmem:[%s3530_s11 + $0x590] sm:$0xff]  ;;  %796 = vst [vmem:[%s3535_s12 + $0x2b8] sm:$0xff] %v795_v23 }
  0x46   : > { %798 = vst [vmem:[%s3535_s12 + $0x2c0] sm:$0xff] %v797_v24  ;;  %800 = vst [vmem:[%s3535_s12 + $0x2c8] sm:$0xff] %v799_v25  ;;  %v801_v26 = vld [vmem:[%s3530_s11 + $0x5a0] sm:$0xff]  ;;  %v803_v27 = vld [vmem:[%s3530_s11 + $0x5b0] sm:$0xff] }
  0x47   : > { %v805_v28 = vld [vmem:[%s3530_s11 + $0x5c0] sm:$0xff]  ;;  %802 = vst [vmem:[%s3535_s12 + $0x2d0] sm:$0xff] %v801_v26  ;;  %804 = vst [vmem:[%s3535_s12 + $0x2d8] sm:$0xff] %v803_v27  ;;  %v807_v29 = vld [vmem:[%s3530_s11 + $0x5d0] sm:$0xff] }
  0x48   : > { %806 = vst [vmem:[%s3535_s12 + $0x2e0] sm:$0xff] %v805_v28  ;;  %v809_v30 = vld [vmem:[%s3530_s11 + $0x5e0] sm:$0xff]  ;;  %v811_v31 = vld [vmem:[%s3530_s11 + $0x5f0] sm:$0xff]  ;;  %808 = vst [vmem:[%s3535_s12 + $0x2e8] sm:$0xff] %v807_v29 }
  0x49   : > { %810 = vst [vmem:[%s3535_s12 + $0x2f0] sm:$0xff] %v809_v30  ;;  %812 = vst [vmem:[%s3535_s12 + $0x2f8] sm:$0xff] %v811_v31  ;;  %v813_v32 = vld [vmem:[%s3530_s11 + $0x600] sm:$0xff]  ;;  %v815_v33 = vld [vmem:[%s3530_s11 + $0x610] sm:$0xff] }
  0x4a   : > { %v817_v34 = vld [vmem:[%s3530_s11 + $0x620] sm:$0xff]  ;;  %814 = vst [vmem:[%s3535_s12 + $0x300] sm:$0xff] %v813_v32  ;;  %816 = vst [vmem:[%s3535_s12 + $0x308] sm:$0xff] %v815_v33  ;;  %v819_v35 = vld [vmem:[%s3530_s11 + $0x630] sm:$0xff] }
  0x4b   : > { %818 = vst [vmem:[%s3535_s12 + $0x310] sm:$0xff] %v817_v34  ;;  %v821_v36 = vld [vmem:[%s3530_s11 + $0x640] sm:$0xff]  ;;  %v823_v37 = vld [vmem:[%s3530_s11 + $0x650] sm:$0xff]  ;;  %820 = vst [vmem:[%s3535_s12 + $0x318] sm:$0xff] %v819_v35 }
  0x4c   : > { %822 = vst [vmem:[%s3535_s12 + $0x320] sm:$0xff] %v821_v36  ;;  %824 = vst [vmem:[%s3535_s12 + $0x328] sm:$0xff] %v823_v37  ;;  %v825_v38 = vld [vmem:[%s3530_s11 + $0x660] sm:$0xff]  ;;  %v827_v39 = vld [vmem:[%s3530_s11 + $0x670] sm:$0xff] }
  0x4d   : > { %v829_v40 = vld [vmem:[%s3530_s11 + $0x680] sm:$0xff]  ;;  %826 = vst [vmem:[%s3535_s12 + $0x330] sm:$0xff] %v825_v38  ;;  %828 = vst [vmem:[%s3535_s12 + $0x338] sm:$0xff] %v827_v39  ;;  %v831_v41 = vld [vmem:[%s3530_s11 + $0x690] sm:$0xff] }
  0x4e   : > { %830 = vst [vmem:[%s3535_s12 + $0x340] sm:$0xff] %v829_v40  ;;  %v833_v42 = vld [vmem:[%s3530_s11 + $0x6a0] sm:$0xff]  ;;  %v835_v43 = vld [vmem:[%s3530_s11 + $0x6b0] sm:$0xff]  ;;  %832 = vst [vmem:[%s3535_s12 + $0x348] sm:$0xff] %v831_v41 }
  0x4f   : > { %834 = vst [vmem:[%s3535_s12 + $0x350] sm:$0xff] %v833_v42  ;;  %836 = vst [vmem:[%s3535_s12 + $0x358] sm:$0xff] %v835_v43  ;;  %v837_v44 = vld [vmem:[%s3530_s11 + $0x6c0] sm:$0xff]  ;;  %v839_v45 = vld [vmem:[%s3530_s11 + $0x6d0] sm:$0xff] }
  0x50   : > { %v841_v46 = vld [vmem:[%s3530_s11 + $0x6e0] sm:$0xff]  ;;  %838 = vst [vmem:[%s3535_s12 + $0x360] sm:$0xff] %v837_v44  ;;  %840 = vst [vmem:[%s3535_s12 + $0x368] sm:$0xff] %v839_v45  ;;  %v843_v47 = vld [vmem:[%s3530_s11 + $0x6f0] sm:$0xff] }
  0x51   : > { %842 = vst [vmem:[%s3535_s12 + $0x370] sm:$0xff] %v841_v46  ;;  %v845_v48 = vld [vmem:[%s3530_s11 + $0x700] sm:$0xff]  ;;  %v847_v49 = vld [vmem:[%s3530_s11 + $0x710] sm:$0xff]  ;;  %844 = vst [vmem:[%s3535_s12 + $0x378] sm:$0xff] %v843_v47 }
  0x52   : > { %846 = vst [vmem:[%s3535_s12 + $0x380] sm:$0xff] %v845_v48  ;;  %848 = vst [vmem:[%s3535_s12 + $0x388] sm:$0xff] %v847_v49  ;;  %v849_v50 = vld [vmem:[%s3530_s11 + $0x720] sm:$0xff]  ;;  %v851_v51 = vld [vmem:[%s3530_s11 + $0x730] sm:$0xff] }
  0x53   : > { %v853_v52 = vld [vmem:[%s3530_s11 + $0x740] sm:$0xff]  ;;  %850 = vst [vmem:[%s3535_s12 + $0x390] sm:$0xff] %v849_v50  ;;  %852 = vst [vmem:[%s3535_s12 + $0x398] sm:$0xff] %v851_v51  ;;  %v855_v53 = vld [vmem:[%s3530_s11 + $0x750] sm:$0xff] }
  0x54   : > { %854 = vst [vmem:[%s3535_s12 + $0x3a0] sm:$0xff] %v853_v52  ;;  %v857_v54 = vld [vmem:[%s3530_s11 + $0x760] sm:$0xff]  ;;  %v859_v55 = vld [vmem:[%s3530_s11 + $0x770] sm:$0xff]  ;;  %856 = vst [vmem:[%s3535_s12 + $0x3a8] sm:$0xff] %v855_v53 }
  0x55   : > { %858 = vst [vmem:[%s3535_s12 + $0x3b0] sm:$0xff] %v857_v54  ;;  %860 = vst [vmem:[%s3535_s12 + $0x3b8] sm:$0xff] %v859_v55  ;;  %v861_v56 = vld [vmem:[%s3530_s11 + $0x780] sm:$0xff]  ;;  %v863_v57 = vld [vmem:[%s3530_s11 + $0x790] sm:$0xff] }
  0x56   : > { %v865_v58 = vld [vmem:[%s3530_s11 + $0x7a0] sm:$0xff]  ;;  %862 = vst [vmem:[%s3535_s12 + $0x3c0] sm:$0xff] %v861_v56  ;;  %864 = vst [vmem:[%s3535_s12 + $0x3c8] sm:$0xff] %v863_v57  ;;  %v867_v59 = vld [vmem:[%s3530_s11 + $0x7b0] sm:$0xff] }
  0x57   : > { %866 = vst [vmem:[%s3535_s12 + $0x3d0] sm:$0xff] %v865_v58  ;;  %v869_v60 = vld [vmem:[%s3530_s11 + $0x7c0] sm:$0xff]  ;;  %v871_v61 = vld [vmem:[%s3530_s11 + $0x7d0] sm:$0xff]  ;;  %868 = vst [vmem:[%s3535_s12 + $0x3d8] sm:$0xff] %v867_v59 }
  0x58   : > { %870 = vst [vmem:[%s3535_s12 + $0x3e0] sm:$0xff] %v869_v60  ;;  %872 = vst [vmem:[%s3535_s12 + $0x3e8] sm:$0xff] %v871_v61  ;;  %v873_v62 = vld [vmem:[%s3530_s11 + $0x7e0] sm:$0xff]  ;;  %v875_v63 = vld [vmem:[%s3530_s11 + $0x7f0] sm:$0xff] }
  0x59   : > { %v877_v0 = vld [vmem:[%s3530_s11 + $0x800] sm:$0xff]  ;;  %874 = vst [vmem:[%s3535_s12 + $0x3f0] sm:$0xff] %v873_v62  ;;  %876 = vst [vmem:[%s3535_s12 + $0x3f8] sm:$0xff] %v875_v63  ;;  %v879_v1 = vld [vmem:[%s3530_s11 + $0x810] sm:$0xff] }
  0x5a   : > { %878 = vst [vmem:[%s3535_s12 + $0x400] sm:$0xff] %v877_v0  ;;  %v881_v2 = vld [vmem:[%s3530_s11 + $0x820] sm:$0xff]  ;;  %v883_v3 = vld [vmem:[%s3530_s11 + $0x830] sm:$0xff]  ;;  %880 = vst [vmem:[%s3535_s12 + $0x408] sm:$0xff] %v879_v1 }
  0x5b   : > { %882 = vst [vmem:[%s3535_s12 + $0x410] sm:$0xff] %v881_v2  ;;  %884 = vst [vmem:[%s3535_s12 + $0x418] sm:$0xff] %v883_v3  ;;  %v885_v4 = vld [vmem:[%s3530_s11 + $0x840] sm:$0xff]  ;;  %v887_v5 = vld [vmem:[%s3530_s11 + $0x850] sm:$0xff] }
  0x5c   : > { %v889_v6 = vld [vmem:[%s3530_s11 + $0x860] sm:$0xff]  ;;  %886 = vst [vmem:[%s3535_s12 + $0x420] sm:$0xff] %v885_v4  ;;  %888 = vst [vmem:[%s3535_s12 + $0x428] sm:$0xff] %v887_v5  ;;  %v891_v7 = vld [vmem:[%s3530_s11 + $0x870] sm:$0xff] }
  0x5d   : > { %890 = vst [vmem:[%s3535_s12 + $0x430] sm:$0xff] %v889_v6  ;;  %v893_v8 = vld [vmem:[%s3530_s11 + $0x880] sm:$0xff]  ;;  %v895_v9 = vld [vmem:[%s3530_s11 + $0x890] sm:$0xff]  ;;  %892 = vst [vmem:[%s3535_s12 + $0x438] sm:$0xff] %v891_v7 }
  0x5e   : > { %894 = vst [vmem:[%s3535_s12 + $0x440] sm:$0xff] %v893_v8  ;;  %896 = vst [vmem:[%s3535_s12 + $0x448] sm:$0xff] %v895_v9  ;;  %v897_v10 = vld [vmem:[%s3530_s11 + $0x8a0] sm:$0xff]  ;;  %v899_v11 = vld [vmem:[%s3530_s11 + $0x8b0] sm:$0xff] }
  0x5f   : > { %v901_v12 = vld [vmem:[%s3530_s11 + $0x8c0] sm:$0xff]  ;;  %898 = vst [vmem:[%s3535_s12 + $0x450] sm:$0xff] %v897_v10  ;;  %900 = vst [vmem:[%s3535_s12 + $0x458] sm:$0xff] %v899_v11  ;;  %v903_v13 = vld [vmem:[%s3530_s11 + $0x8d0] sm:$0xff] }
  0x60   : > { %902 = vst [vmem:[%s3535_s12 + $0x460] sm:$0xff] %v901_v12  ;;  %v905_v14 = vld [vmem:[%s3530_s11 + $0x8e0] sm:$0xff]  ;;  %v907_v15 = vld [vmem:[%s3530_s11 + $0x8f0] sm:$0xff]  ;;  %904 = vst [vmem:[%s3535_s12 + $0x468] sm:$0xff] %v903_v13 }
  0x61   : > { %906 = vst [vmem:[%s3535_s12 + $0x470] sm:$0xff] %v905_v14  ;;  %908 = vst [vmem:[%s3535_s12 + $0x478] sm:$0xff] %v907_v15  ;;  %v909_v16 = vld [vmem:[%s3530_s11 + $0x900] sm:$0xff]  ;;  %v911_v17 = vld [vmem:[%s3530_s11 + $0x910] sm:$0xff] }
  0x62   : > { %v913_v18 = vld [vmem:[%s3530_s11 + $0x920] sm:$0xff]  ;;  %910 = vst [vmem:[%s3535_s12 + $0x480] sm:$0xff] %v909_v16  ;;  %912 = vst [vmem:[%s3535_s12 + $0x488] sm:$0xff] %v911_v17  ;;  %v915_v19 = vld [vmem:[%s3530_s11 + $0x930] sm:$0xff] }
  0x63   : > { %914 = vst [vmem:[%s3535_s12 + $0x490] sm:$0xff] %v913_v18  ;;  %v917_v20 = vld [vmem:[%s3530_s11 + $0x940] sm:$0xff]  ;;  %v919_v21 = vld [vmem:[%s3530_s11 + $0x950] sm:$0xff]  ;;  %916 = vst [vmem:[%s3535_s12 + $0x498] sm:$0xff] %v915_v19 }
  0x64   : > { %918 = vst [vmem:[%s3535_s12 + $0x4a0] sm:$0xff] %v917_v20  ;;  %920 = vst [vmem:[%s3535_s12 + $0x4a8] sm:$0xff] %v919_v21  ;;  %v921_v22 = vld [vmem:[%s3530_s11 + $0x960] sm:$0xff]  ;;  %v923_v23 = vld [vmem:[%s3530_s11 + $0x970] sm:$0xff] }
  0x65   : > { %v925_v24 = vld [vmem:[%s3530_s11 + $0x980] sm:$0xff]  ;;  %922 = vst [vmem:[%s3535_s12 + $0x4b0] sm:$0xff] %v921_v22  ;;  %924 = vst [vmem:[%s3535_s12 + $0x4b8] sm:$0xff] %v923_v23  ;;  %v927_v25 = vld [vmem:[%s3530_s11 + $0x990] sm:$0xff] }
  0x66   : > { %926 = vst [vmem:[%s3535_s12 + $0x4c0] sm:$0xff] %v925_v24  ;;  %v929_v26 = vld [vmem:[%s3530_s11 + $0x9a0] sm:$0xff]  ;;  %v931_v27 = vld [vmem:[%s3530_s11 + $0x9b0] sm:$0xff]  ;;  %928 = vst [vmem:[%s3535_s12 + $0x4c8] sm:$0xff] %v927_v25 }
  0x67   : > { %930 = vst [vmem:[%s3535_s12 + $0x4d0] sm:$0xff] %v929_v26  ;;  %932 = vst [vmem:[%s3535_s12 + $0x4d8] sm:$0xff] %v931_v27  ;;  %v933_v28 = vld [vmem:[%s3530_s11 + $0x9c0] sm:$0xff]  ;;  %v935_v29 = vld [vmem:[%s3530_s11 + $0x9d0] sm:$0xff] }
  0x68   : > { %v937_v30 = vld [vmem:[%s3530_s11 + $0x9e0] sm:$0xff]  ;;  %934 = vst [vmem:[%s3535_s12 + $0x4e0] sm:$0xff] %v933_v28  ;;  %936 = vst [vmem:[%s3535_s12 + $0x4e8] sm:$0xff] %v935_v29  ;;  %v939_v31 = vld [vmem:[%s3530_s11 + $0x9f0] sm:$0xff] }
  0x69   : > { %938 = vst [vmem:[%s3535_s12 + $0x4f0] sm:$0xff] %v937_v30  ;;  %v941_v32 = vld [vmem:[%s3530_s11 + $0xa00] sm:$0xff]  ;;  %v943_v33 = vld [vmem:[%s3530_s11 + $0xa10] sm:$0xff]  ;;  %940 = vst [vmem:[%s3535_s12 + $0x4f8] sm:$0xff] %v939_v31 }
  0x6a   : > { %942 = vst [vmem:[%s3535_s12 + $0x500] sm:$0xff] %v941_v32  ;;  %944 = vst [vmem:[%s3535_s12 + $0x508] sm:$0xff] %v943_v33  ;;  %v945_v34 = vld [vmem:[%s3530_s11 + $0xa20] sm:$0xff]  ;;  %v947_v35 = vld [vmem:[%s3530_s11 + $0xa30] sm:$0xff] }
  0x6b   : > { %v949_v36 = vld [vmem:[%s3530_s11 + $0xa40] sm:$0xff]  ;;  %946 = vst [vmem:[%s3535_s12 + $0x510] sm:$0xff] %v945_v34  ;;  %948 = vst [vmem:[%s3535_s12 + $0x518] sm:$0xff] %v947_v35  ;;  %v951_v37 = vld [vmem:[%s3530_s11 + $0xa50] sm:$0xff] }
  0x6c   : > { %950 = vst [vmem:[%s3535_s12 + $0x520] sm:$0xff] %v949_v36  ;;  %v953_v38 = vld [vmem:[%s3530_s11 + $0xa60] sm:$0xff]  ;;  %v955_v39 = vld [vmem:[%s3530_s11 + $0xa70] sm:$0xff]  ;;  %952 = vst [vmem:[%s3535_s12 + $0x528] sm:$0xff] %v951_v37 }
  0x6d   : > { %954 = vst [vmem:[%s3535_s12 + $0x530] sm:$0xff] %v953_v38  ;;  %956 = vst [vmem:[%s3535_s12 + $0x538] sm:$0xff] %v955_v39  ;;  %v957_v40 = vld [vmem:[%s3530_s11 + $0xa80] sm:$0xff]  ;;  %v959_v41 = vld [vmem:[%s3530_s11 + $0xa90] sm:$0xff] }
  0x6e   : > { %v961_v42 = vld [vmem:[%s3530_s11 + $0xaa0] sm:$0xff]  ;;  %958 = vst [vmem:[%s3535_s12 + $0x540] sm:$0xff] %v957_v40  ;;  %960 = vst [vmem:[%s3535_s12 + $0x548] sm:$0xff] %v959_v41  ;;  %v963_v43 = vld [vmem:[%s3530_s11 + $0xab0] sm:$0xff] }
  0x6f   : > { %962 = vst [vmem:[%s3535_s12 + $0x550] sm:$0xff] %v961_v42  ;;  %v965_v44 = vld [vmem:[%s3530_s11 + $0xac0] sm:$0xff]  ;;  %v967_v45 = vld [vmem:[%s3530_s11 + $0xad0] sm:$0xff]  ;;  %964 = vst [vmem:[%s3535_s12 + $0x558] sm:$0xff] %v963_v43 }
  0x70   : > { %966 = vst [vmem:[%s3535_s12 + $0x560] sm:$0xff] %v965_v44  ;;  %968 = vst [vmem:[%s3535_s12 + $0x568] sm:$0xff] %v967_v45  ;;  %v969_v46 = vld [vmem:[%s3530_s11 + $0xae0] sm:$0xff]  ;;  %v971_v47 = vld [vmem:[%s3530_s11 + $0xaf0] sm:$0xff] }
  0x71   : > { %v973_v48 = vld [vmem:[%s3530_s11 + $0xb00] sm:$0xff]  ;;  %970 = vst [vmem:[%s3535_s12 + $0x570] sm:$0xff] %v969_v46  ;;  %972 = vst [vmem:[%s3535_s12 + $0x578] sm:$0xff] %v971_v47  ;;  %v975_v49 = vld [vmem:[%s3530_s11 + $0xb10] sm:$0xff] }
  0x72   : > { %974 = vst [vmem:[%s3535_s12 + $0x580] sm:$0xff] %v973_v48  ;;  %v977_v50 = vld [vmem:[%s3530_s11 + $0xb20] sm:$0xff]  ;;  %v979_v51 = vld [vmem:[%s3530_s11 + $0xb30] sm:$0xff]  ;;  %976 = vst [vmem:[%s3535_s12 + $0x588] sm:$0xff] %v975_v49 }
  0x73   : > { %978 = vst [vmem:[%s3535_s12 + $0x590] sm:$0xff] %v977_v50  ;;  %980 = vst [vmem:[%s3535_s12 + $0x598] sm:$0xff] %v979_v51  ;;  %v981_v52 = vld [vmem:[%s3530_s11 + $0xb40] sm:$0xff]  ;;  %v983_v53 = vld [vmem:[%s3530_s11 + $0xb50] sm:$0xff] }
  0x74   : > { %v985_v54 = vld [vmem:[%s3530_s11 + $0xb60] sm:$0xff]  ;;  %982 = vst [vmem:[%s3535_s12 + $0x5a0] sm:$0xff] %v981_v52  ;;  %984 = vst [vmem:[%s3535_s12 + $0x5a8] sm:$0xff] %v983_v53  ;;  %v987_v55 = vld [vmem:[%s3530_s11 + $0xb70] sm:$0xff] }
  0x75   : > { %986 = vst [vmem:[%s3535_s12 + $0x5b0] sm:$0xff] %v985_v54  ;;  %v989_v56 = vld [vmem:[%s3530_s11 + $0xb80] sm:$0xff]  ;;  %v991_v57 = vld [vmem:[%s3530_s11 + $0xb90] sm:$0xff]  ;;  %988 = vst [vmem:[%s3535_s12 + $0x5b8] sm:$0xff] %v987_v55 }
  0x76   : > { %990 = vst [vmem:[%s3535_s12 + $0x5c0] sm:$0xff] %v989_v56  ;;  %992 = vst [vmem:[%s3535_s12 + $0x5c8] sm:$0xff] %v991_v57  ;;  %v993_v58 = vld [vmem:[%s3530_s11 + $0xba0] sm:$0xff]  ;;  %v995_v59 = vld [vmem:[%s3530_s11 + $0xbb0] sm:$0xff] }
  0x77   : > { %v997_v60 = vld [vmem:[%s3530_s11 + $0xbc0] sm:$0xff]  ;;  %994 = vst [vmem:[%s3535_s12 + $0x5d0] sm:$0xff] %v993_v58  ;;  %996 = vst [vmem:[%s3535_s12 + $0x5d8] sm:$0xff] %v995_v59  ;;  %v999_v61 = vld [vmem:[%s3530_s11 + $0xbd0] sm:$0xff] }
  0x78   : > { %998 = vst [vmem:[%s3535_s12 + $0x5e0] sm:$0xff] %v997_v60  ;;  %v1001_v62 = vld [vmem:[%s3530_s11 + $0xbe0] sm:$0xff]  ;;  %v1003_v63 = vld [vmem:[%s3530_s11 + $0xbf0] sm:$0xff]  ;;  %1000 = vst [vmem:[%s3535_s12 + $0x5e8] sm:$0xff] %v999_v61 }
  0x79   : > { %1002 = vst [vmem:[%s3535_s12 + $0x5f0] sm:$0xff] %v1001_v62  ;;  %1004 = vst [vmem:[%s3535_s12 + $0x5f8] sm:$0xff] %v1003_v63 }
  0x7a PF: > { %p2792_p7 = scmp.ge.s32.totalorder %s3443_s21, 1  ;;  %p1031_p8 = scmp.lt.s32.totalorder %s3443_s21, 7 }
  0x7c   : > { %p1032_p9 = pnand %p2792_p7, %p1031_p8 }
  0x7d   : > { %s1038_s13 = sand.u32 (!%p1032_p9), 1, %s3419_s15   ;;  %s2794_s14 = sshll.u32 (!%p1032_p9), %s3431_s18, 1 }
  0x7e   : > { %1035 = sbr.rel (%p1032_p9) target bundleno = 570 (0x23a), region = 70  ;;  %p1103_p10 = scmp.lt.s32.totalorder (!%p1032_p9), %s2794_s14, 3 }
  0x7f   : > { %s3032_s24 = smul.u32 (!%p1032_p9), 1536, %s1038_s13  ;;  %p3004_p12 = scmp.ne.s32.totalorder (!%p1032_p9), %s3427_s17, 0 }
  0x80   : > { %s1090_s10 = smul.u32 (!%p1032_p9), 12, %s3427_s17 }
  0x81   : > { %s3922_s25 = scalar_lea.vmem (!%p1032_p9), [#allocation3], %s3032_s24 }
  0x82   : > { %v3089_v0 = vld [vmem:[%s3922_s25 + $0x4] ss:$8 sps:$4 sm:$0xff] (!%p1032_p9)   ;;  %v3093_v2 = vld [vmem:[%s3922_s25] ss:$8 sps:$4 sm:$0xff] (!%p1032_p9)   ;;  %v3095_v4 = vld [vmem:[%s3922_s25 + $0x14] ss:$8 sps:$4 sm:$0xff] (!%p1032_p9)  }
  0x83   : > { %v3091_v1 = vld [vmem:[%s3922_s25 + $0x304] ss:$8 sps:$4 sm:$0xff] (!%p1032_p9)   ;;  %2328 = vmatprep.subr.bf16.mxu1 (!%p1032_p9), %v3089_v0  ;;  %v3094_v3 = vld [vmem:[%s3922_s25 + $0x300] ss:$8 sps:$4 sm:$0xff] (!%p1032_p9)   ;;  %v3097_v5 = vld [vmem:[%s3922_s25 + $0x314] ss:$8 sps:$4 sm:$0xff] (!%p1032_p9)  }
  0x84   : > { %2451 = vmatprep.subr.bf16.mxu0 (!%p1032_p9), %v3091_v1  ;;  %2329 = vmatpush1.bf16.msra.mxu1 (!%p1032_p9), %v3093_v2  ;;  %v3099_v6 = vld [vmem:[%s3922_s25 + $0x10] ss:$8 sps:$4 sm:$0xff] (!%p1032_p9)   ;;  %v3101_v8 = vld [vmem:[%s3922_s25 + $0x24] ss:$8 sps:$4 sm:$0xff] (!%p1032_p9)   ;;  %v3105_v10 = vld [vmem:[%s3922_s25 + $0x20] ss:$8 sps:$4 sm:$0xff] (!%p1032_p9)  }
  0x85   : > { %s4213_s14 = smov (!%p1103_p10, %s2794_s14), 3  ;;  %2452 = vmatpush1.bf16.msra.mxu0 %v3094_v3  ;;  %2330 = vmatprep.subr.bf16.mxu1 %v3095_v4  ;;  %v3100_v7 = vld [vmem:[%s3922_s25 + $0x310] ss:$8 sps:$4 sm:$0xff]   ;;  %v3103_v9 = vld [vmem:[%s3922_s25 + $0x324] ss:$8 sps:$4 sm:$0xff]   ;;  %p1093_p11 = scmp.lt.s32.totalorder %s1090_s10, 35 }
  0x86   : > { %s2795_s26 = sshll.u32 %s4213_s14, 1  ;;  %s2797_s27 = sshll.u32 %s4213_s14, 2  ;;  %2453 = vmatprep.subr.bf16.mxu0 %v3097_v5  ;;  %v3106_v11 = vld [vmem:[%s3922_s25 + $0x320] ss:$8 sps:$4 sm:$0xff]   ;;  %v3107_v12 = vld [vmem:[%s3922_s25 + $0x34] ss:$8 sps:$4 sm:$0xff]  }
  0x87   : > { %s3931_s29 = scalar_lea.vmem %s4197_s2, %s2795_s26  ;;  %s3936_s6 = scalar_lea.vmem %s4198_s3, %s2797_s27  ;;  %v3109_v13 = vld [vmem:[%s3922_s25 + $0x334] ss:$8 sps:$4 sm:$0xff]   ;;  %v3111_v14 = vld [vmem:[%s3922_s25 + $0x30] ss:$8 sps:$4 sm:$0xff]   ;;  %v3113_v16 = vld [vmem:[%s3922_s25 + $0x44] ss:$8 sps:$4 sm:$0xff]  }
  0x88   : > { %s3942_s9 = scalar_lea.vmem %s4199_s4, %s2797_s27  ;;  %2331 = vmatpush1.bf16.msra.mxu1 %v3099_v6  ;;  %v3112_v15 = vld [vmem:[%s3922_s25 + $0x330] ss:$8 sps:$4 sm:$0xff]   ;;  %v3115_v17 = vld [vmem:[%s3922_s25 + $0x344] ss:$8 sps:$4 sm:$0xff]   ;;  %v3117_v18 = vld [vmem:[%s3922_s25 + $0x40] ss:$8 sps:$4 sm:$0xff]  }
  0x89   : > { %2454 = vmatpush1.bf16.msra.mxu0 %v3100_v7  ;;  %2332 = vmatprep.subr.bf16.mxu1 %v3101_v8  ;;  %v3118_v19 = vld [vmem:[%s3922_s25 + $0x340] ss:$8 sps:$4 sm:$0xff]   ;;  %v3119_v20 = vld [vmem:[%s3922_s25 + $0x54] ss:$8 sps:$4 sm:$0xff]   ;;  %v3123_v22 = vld [vmem:[%s3922_s25 + $0x50] ss:$8 sps:$4 sm:$0xff]  }
  0x8a   : > { %2455 = vmatprep.subr.bf16.mxu0 %v3103_v9  ;;  %v3121_v21 = vld [vmem:[%s3922_s25 + $0x354] ss:$8 sps:$4 sm:$0xff]   ;;  %v3124_v23 = vld [vmem:[%s3922_s25 + $0x350] ss:$8 sps:$4 sm:$0xff]   ;;  %v3125_v24 = vld [vmem:[%s3922_s25 + $0x64] ss:$8 sps:$4 sm:$0xff]  }
  0x8b   : > { %v3127_v25 = vld [vmem:[%s3922_s25 + $0x364] ss:$8 sps:$4 sm:$0xff]   ;;  %v3129_v26 = vld [vmem:[%s3922_s25 + $0x60] ss:$8 sps:$4 sm:$0xff]   ;;  %v3131_v28 = vld [vmem:[%s3922_s25 + $0x74] ss:$8 sps:$4 sm:$0xff]  }
  0x8c   : > { %2333 = vmatpush1.bf16.msra.mxu1 %v3105_v10  ;;  %v3130_v27 = vld [vmem:[%s3922_s25 + $0x360] ss:$8 sps:$4 sm:$0xff]   ;;  %v3133_v29 = vld [vmem:[%s3922_s25 + $0x374] ss:$8 sps:$4 sm:$0xff]   ;;  %v3135_v30 = vld [vmem:[%s3922_s25 + $0x70] ss:$8 sps:$4 sm:$0xff]  }
  0x8d   : > { %2456 = vmatpush1.bf16.msra.mxu0 %v3106_v11  ;;  %2334 = vmatprep.subr.bf16.mxu1 %v3107_v12  ;;  %v3136_v31 = vld [vmem:[%s3922_s25 + $0x370] ss:$8 sps:$4 sm:$0xff]   ;;  %v3137_v32 = vld [vmem:[%s3922_s25 + $0x84] ss:$8 sps:$4 sm:$0xff]   ;;  %v3141_v34 = vld [vmem:[%s3922_s25 + $0x80] ss:$8 sps:$4 sm:$0xff]  }
  0x8e   : > { %2457 = vmatprep.subr.bf16.mxu0 %v3109_v13  ;;  %v3139_v33 = vld [vmem:[%s3922_s25 + $0x384] ss:$8 sps:$4 sm:$0xff]   ;;  %v3142_v35 = vld [vmem:[%s3922_s25 + $0x380] ss:$8 sps:$4 sm:$0xff]   ;;  %v3143_v36 = vld [vmem:[%s3922_s25 + $0x94] ss:$8 sps:$4 sm:$0xff]  }
  0x8f   : > { %v3145_v37 = vld [vmem:[%s3922_s25 + $0x394] ss:$8 sps:$4 sm:$0xff]   ;;  %s4215_s10 = smov (!%p1093_p11, %s1090_s10), 35  ;;  %v3147_v38 = vld [vmem:[%s3922_s25 + $0x90] ss:$8 sps:$4 sm:$0xff]  }
  0x90   : > { %2335 = vmatpush1.bf16.msra.mxu1 %v3111_v14  ;;  %v3148_v39 = vld [vmem:[%s3922_s25 + $0x390] ss:$8 sps:$4 sm:$0xff]   ;;  %v3149_v40 = vld [vmem:[%s3922_s25 + $0xa4] ss:$8 sps:$4 sm:$0xff]   ;;  %s2793_s11 = sshll.u32 %s4215_s10, 2 }
  0x91   : > { %2458 = vmatpush1.bf16.msra.mxu0 %v3112_v15  ;;  %2336 = vmatprep.subr.bf16.mxu1 %v3113_v16  ;;  %v3151_v41 = vld [vmem:[%s3922_s25 + $0x3a4] ss:$8 sps:$4 sm:$0xff]   ;;  %v3153_v42 = vld [vmem:[%s3922_s25 + $0xa0] ss:$8 sps:$4 sm:$0xff]   ;;  %v3155_v44 = vld [vmem:[%s3922_s25 + $0xb4] ss:$8 sps:$4 sm:$0xff]   ;;  %s3988_s14 = scalar_lea.vmem %s4195_s0, %s2793_s11 }
  0x92   : > { %2459 = vmatprep.subr.bf16.mxu0 %v3115_v17  ;;  %v3154_v43 = vld [vmem:[%s3922_s25 + $0x3a0] ss:$8 sps:$4 sm:$0xff]   ;;  %v3157_v45 = vld [vmem:[%s3922_s25 + $0x3b4] ss:$8 sps:$4 sm:$0xff]   ;;  %v3159_v46 = vld [vmem:[%s3922_s25 + $0xb0] ss:$8 sps:$4 sm:$0xff]  }
  0x93   : > { %v1128_v47 = vld [vmem:[%s3988_s14] sm:$0xff]  ;;  %v3161_v49 = vld [vmem:[%s3922_s25 + $0xc4] ss:$8 sps:$4 sm:$0xff]   ;;  %v3165_v54 = vld [vmem:[%s3922_s25 + $0xc0] ss:$8 sps:$4 sm:$0xff]  }
  0x94   : > { %2337 = vmatpush1.bf16.msra.mxu1 %v3117_v18  ;;  %v3160_v48 = vld [vmem:[%s3922_s25 + $0x3b0] ss:$8 sps:$4 sm:$0xff]   ;;  %v2801_v50 = vcombine.high %v1128_v47, %v1128_v47  ;;  %v1131_v51 = vld [vmem:[%s3988_s14 + $0x18] sm:$0xff]  ;;  %v3167_v56 = vld [vmem:[%s3922_s25 + $0xd4] ss:$8 sps:$4 sm:$0xff]   ;;  %v2800_v6 = vcombine.low %v1128_v47, %v1128_v47 }
  0x95   : > { %2460 = vmatpush1.bf16.msra.mxu0 %v3118_v19  ;;  %2338 = vmatprep.subr.bf16.mxu1 %v3119_v20  ;;  %v3163_v52 = vld [vmem:[%s3922_s25 + $0x3c4] ss:$8 sps:$4 sm:$0xff]   ;;  %v2807_v53 = vcombine.high %v1131_v51, %v1131_v51  ;;  %v3166_v55 = vld [vmem:[%s3922_s25 + $0x3c0] ss:$8 sps:$4 sm:$0xff]   ;;  %v3169_v57 = vld [vmem:[%s3922_s25 + $0x3d4] ss:$8 sps:$4 sm:$0xff]   ;;  %v2806_v8 = vcombine.low %v1131_v51, %v1131_v51 }
  0x96   : > { %2461 = vmatprep.subr.bf16.mxu0 %v3121_v21  ;;  %2360 = vmatprep.mubr.bf16.mxu1 %v2801_v50  ;;  %v3171_v58 = vld [vmem:[%s3922_s25 + $0xd0] ss:$8 sps:$4 sm:$0xff]   ;;  %v3173_v60 = vld [vmem:[%s3922_s25 + $0xe4] ss:$8 sps:$4 sm:$0xff]   ;;  %v3177_v62 = vld [vmem:[%s3922_s25 + $0xe0] ss:$8 sps:$4 sm:$0xff]  }
  0x97   : > { %2483 = vmatprep.mubr.bf16.mxu0 %v2807_v53  ;;  %v3172_v59 = vld [vmem:[%s3922_s25 + $0x3d0] ss:$8 sps:$4 sm:$0xff]   ;;  %v3175_v61 = vld [vmem:[%s3922_s25 + $0x3e4] ss:$8 sps:$4 sm:$0xff]   ;;  %v3178_v63 = vld [vmem:[%s3922_s25 + $0x3e0] ss:$8 sps:$4 sm:$0xff]  }
  0x98   : > { %2339 = vmatpush1.bf16.msra.mxu1 %v3123_v22  ;;  %v3179_v0 = vld [vmem:[%s3922_s25 + $0xf4] ss:$8 sps:$4 sm:$0xff]   ;;  %v3183_v2 = vld [vmem:[%s3922_s25 + $0xf0] ss:$8 sps:$4 sm:$0xff]   ;;  %v3189_v4 = vld [vmem:[%s3922_s25 + $0x104] ss:$8 sps:$4 sm:$0xff]  }
  0x99   : > { %2462 = vmatpush1.bf16.msra.mxu0 %v3124_v23  ;;  %2340 = vmatprep.subr.bf16.mxu1 %v3125_v24  ;;  %v3181_v1 = vld [vmem:[%s3922_s25 + $0x3f4] ss:$8 sps:$4 sm:$0xff]   ;;  %v3184_v3 = vld [vmem:[%s3922_s25 + $0x3f0] ss:$8 sps:$4 sm:$0xff]   ;;  %v3194_v5 = vld [vmem:[%s3922_s25 + $0x404] ss:$8 sps:$4 sm:$0xff]  }
  0x9a   : > { %2463 = vmatprep.subr.bf16.mxu0 %v3127_v25  ;;  %v3187_v7 = vld [vmem:[%s3922_s25 + $0x100] ss:$8 sps:$4 sm:$0xff]   ;;  %v3197_v10 = vld [vmem:[%s3922_s25 + $0x114] ss:$8 sps:$4 sm:$0xff]   ;;  %v3195_v12 = vld [vmem:[%s3922_s25 + $0x110] ss:$8 sps:$4 sm:$0xff]  }
  0x9b   : > { %v3192_v9 = vld [vmem:[%s3922_s25 + $0x400] ss:$8 sps:$4 sm:$0xff]   ;;  %v3200_v11 = vld [vmem:[%s3922_s25 + $0x414] ss:$8 sps:$4 sm:$0xff]   ;;  %v3198_v13 = vld [vmem:[%s3922_s25 + $0x410] ss:$8 sps:$4 sm:$0xff]  }
  0x9c   : > { %2341 = vmatpush1.bf16.msra.mxu1 %v3129_v26  ;;  %v3203_v14 = vld [vmem:[%s3922_s25 + $0x124] ss:$8 sps:$4 sm:$0xff]   ;;  %v3201_v16 = vld [vmem:[%s3922_s25 + $0x120] ss:$8 sps:$4 sm:$0xff]   ;;  %v3209_v18 = vld [vmem:[%s3922_s25 + $0x134] ss:$8 sps:$4 sm:$0xff]  }
  0x9d   : > { %2464 = vmatpush1.bf16.msra.mxu0 %v3130_v27  ;;  %2342 = vmatprep.subr.bf16.mxu1 %v3131_v28  ;;  %v3206_v15 = vld [vmem:[%s3922_s25 + $0x424] ss:$8 sps:$4 sm:$0xff]   ;;  %v3204_v17 = vld [vmem:[%s3922_s25 + $0x420] ss:$8 sps:$4 sm:$0xff]   ;;  %v3212_v19 = vld [vmem:[%s3922_s25 + $0x434] ss:$8 sps:$4 sm:$0xff]  }
  0x9e   : > { %2465 = vmatprep.subr.bf16.mxu0 %v3133_v29  ;;  %v3207_v20 = vld [vmem:[%s3922_s25 + $0x130] ss:$8 sps:$4 sm:$0xff]   ;;  %v3215_v22 = vld [vmem:[%s3922_s25 + $0x144] ss:$8 sps:$4 sm:$0xff]   ;;  %v3213_v24 = vld [vmem:[%s3922_s25 + $0x140] ss:$8 sps:$4 sm:$0xff]  }
  0x9f   : > { %v3210_v21 = vld [vmem:[%s3922_s25 + $0x430] ss:$8 sps:$4 sm:$0xff]   ;;  %v3218_v23 = vld [vmem:[%s3922_s25 + $0x444] ss:$8 sps:$4 sm:$0xff]   ;;  %v3216_v25 = vld [vmem:[%s3922_s25 + $0x440] ss:$8 sps:$4 sm:$0xff]  }
  0xa0   : > { %2343 = vmatpush1.bf16.msra.mxu1 %v3135_v30  ;;  %v3221_v26 = vld [vmem:[%s3922_s25 + $0x154] ss:$8 sps:$4 sm:$0xff]   ;;  %v3219_v28 = vld [vmem:[%s3922_s25 + $0x150] ss:$8 sps:$4 sm:$0xff]   ;;  %v3227_v30 = vld [vmem:[%s3922_s25 + $0x164] ss:$8 sps:$4 sm:$0xff]  }
  0xa1   : > { %2466 = vmatpush1.bf16.msra.mxu0 %v3136_v31  ;;  %2344 = vmatprep.subr.bf16.mxu1 %v3137_v32  ;;  %v3224_v27 = vld [vmem:[%s3922_s25 + $0x454] ss:$8 sps:$4 sm:$0xff]   ;;  %v3222_v29 = vld [vmem:[%s3922_s25 + $0x450] ss:$8 sps:$4 sm:$0xff]   ;;  %v3230_v31 = vld [vmem:[%s3922_s25 + $0x464] ss:$8 sps:$4 sm:$0xff]  }
  0xa2   : > { %2467 = vmatprep.subr.bf16.mxu0 %v3139_v33  ;;  %v4038_v32 = vld [vmem:[%s3988_s14 + $0x8] sm:$0xff]  ;;  %v3225_v33 = vld [vmem:[%s3922_s25 + $0x160] ss:$8 sps:$4 sm:$0xff]   ;;  %v3251_v50 = vld [vmem:[%s3922_s25 + $0x1a4] ss:$8 sps:$4 sm:$0xff]  }
  0xa3   : > { %v3248_v47 = vld [vmem:[%s3922_s25 + $0x494] ss:$8 sps:$4 sm:$0xff]   ;;  %v3254_v51 = vld [vmem:[%s3922_s25 + $0x4a4] ss:$8 sps:$4 sm:$0xff]   ;;  %v3252_v53 = vld [vmem:[%s3922_s25 + $0x4a0] ss:$8 sps:$4 sm:$0xff]  }
  0xa4   : > { %2345 = vmatpush1.bf16.msra.mxu1 %v3141_v34  ;;  %v3228_v34 = vld [vmem:[%s3922_s25 + $0x460] ss:$8 sps:$4 sm:$0xff]  }
  0xa5   : > { %2468 = vmatpush1.bf16.msra.mxu0 %v3142_v35  ;;  %2346 = vmatprep.subr.bf16.mxu1 %v3143_v36  ;;  %v2803_v35 = vcombine.high %v4038_v32, %v4038_v32  ;;  %v4045_v36 = vld [vmem:[%s3988_s14 + $0x20] sm:$0xff] }
  0xa6   : > { %2469 = vmatprep.subr.bf16.mxu0 %v3145_v37  ;;  %v3233_v37 = vld [vmem:[%s3922_s25 + $0x174] ss:$8 sps:$4 sm:$0xff]  }
  0xa8   : > { %2347 = vmatpush1.bf16.msra.mxu1 %v3147_v38  ;;  %v3236_v38 = vld [vmem:[%s3922_s25 + $0x474] ss:$8 sps:$4 sm:$0xff]  }
  0xa9   : > { %2470 = vmatpush1.bf16.msra.mxu0 %v3148_v39  ;;  %2348 = vmatprep.subr.bf16.mxu1 %v3149_v40  ;;  %v2809_v39 = vcombine.high %v4045_v36, %v4045_v36  ;;  %v3231_v40 = vld [vmem:[%s3922_s25 + $0x170] ss:$8 sps:$4 sm:$0xff]  }
  0xaa   : > { %2471 = vmatprep.subr.bf16.mxu0 %v3151_v41  ;;  %v3234_v41 = vld [vmem:[%s3922_s25 + $0x470] ss:$8 sps:$4 sm:$0xff]  }
  0xac   : > { %2349 = vmatpush1.bf16.msra.mxu1 %v3153_v42  ;;  %v3239_v42 = vld [vmem:[%s3922_s25 + $0x184] ss:$8 sps:$4 sm:$0xff]  }
  0xad   : > { %2472 = vmatpush1.bf16.msra.mxu0 %v3154_v43  ;;  %2350 = vmatprep.subr.bf16.mxu1 %v3155_v44  ;;  %v3242_v43 = vld [vmem:[%s3922_s25 + $0x484] ss:$8 sps:$4 sm:$0xff]   ;;  %v3237_v44 = vld [vmem:[%s3922_s25 + $0x180] ss:$8 sps:$4 sm:$0xff]  }
  0xae   : > { %2473 = vmatprep.subr.bf16.mxu0 %v3157_v45  ;;  %v3240_v45 = vld [vmem:[%s3922_s25 + $0x480] ss:$8 sps:$4 sm:$0xff]  }
  0xb0   : > { %2351 = vmatpush1.bf16.msra.mxu1 %v3159_v46  ;;  %v3245_v46 = vld [vmem:[%s3922_s25 + $0x194] ss:$8 sps:$4 sm:$0xff]  }
  0xb1   : > { %2474 = vmatpush1.bf16.msra.mxu0 %v3160_v48  ;;  %2352 = vmatprep.subr.bf16.mxu1 %v3161_v49  ;;  %v3243_v48 = vld [vmem:[%s3922_s25 + $0x190] ss:$8 sps:$4 sm:$0xff]  }
  0xb2   : > { %2475 = vmatprep.subr.bf16.mxu0 %v3163_v52  ;;  %v3246_v49 = vld [vmem:[%s3922_s25 + $0x490] ss:$8 sps:$4 sm:$0xff]   ;;  %v3249_v52 = vld [vmem:[%s3922_s25 + $0x1a0] ss:$8 sps:$4 sm:$0xff]  }
  0xb4   : > { %2353 = vmatpush1.bf16.msra.mxu1 %v3165_v54  ;;  %v3257_v54 = vld [vmem:[%s3922_s25 + $0x1b4] ss:$8 sps:$4 sm:$0xff]  }
  0xb5   : > { %2476 = vmatpush1.bf16.msra.mxu0 %v3166_v55  ;;  %2354 = vmatprep.subr.bf16.mxu1 %v3167_v56  ;;  %v3260_v55 = vld [vmem:[%s3922_s25 + $0x4b4] ss:$8 sps:$4 sm:$0xff]   ;;  %v3255_v56 = vld [vmem:[%s3922_s25 + $0x1b0] ss:$8 sps:$4 sm:$0xff]  }
  0xb6   : > { %2477 = vmatprep.subr.bf16.mxu0 %v3169_v57  ;;  %v3258_v57 = vld [vmem:[%s3922_s25 + $0x4b0] ss:$8 sps:$4 sm:$0xff]  }
  0xb8   : > { %2355 = vmatpush1.bf16.msra.mxu1 %v3171_v58  ;;  %v3263_v58 = vld [vmem:[%s3922_s25 + $0x1c4] ss:$8 sps:$4 sm:$0xff]  }
  0xb9   : > { %2478 = vmatpush1.bf16.msra.mxu0 %v3172_v59  ;;  %2356 = vmatprep.subr.bf16.mxu1 %v3173_v60  ;;  %v3266_v59 = vld [vmem:[%s3922_s25 + $0x4c4] ss:$8 sps:$4 sm:$0xff]   ;;  %v3261_v60 = vld [vmem:[%s3922_s25 + $0x1c0] ss:$8 sps:$4 sm:$0xff]  }
  0xba   : > { %2479 = vmatprep.subr.bf16.mxu0 %v3175_v61  ;;  %v3264_v61 = vld [vmem:[%s3922_s25 + $0x4c0] ss:$8 sps:$4 sm:$0xff]  }
  0xbc   : > { %2357 = vmatpush1.bf16.msra.mxu1 %v3177_v62  ;;  %v3269_v62 = vld [vmem:[%s3922_s25 + $0x1d4] ss:$8 sps:$4 sm:$0xff]  }
  0xbd   : > { %2480 = vmatpush1.bf16.msra.mxu0 %v3178_v63  ;;  %2358 = vmatprep.subr.bf16.mxu1 %v3179_v0  ;;  %v3272_v63 = vld [vmem:[%s3922_s25 + $0x4d4] ss:$8 sps:$4 sm:$0xff]   ;;  %v3267_v0 = vld [vmem:[%s3922_s25 + $0x1d0] ss:$8 sps:$4 sm:$0xff]  }
  0xbe   : > { %2481 = vmatprep.subr.bf16.mxu0 %v3181_v1  ;;  %v3270_v1 = vld [vmem:[%s3922_s25 + $0x4d0] ss:$8 sps:$4 sm:$0xff]  }
  0xc0   : > { %2359 = vmatpush1.bf16.msra.mxu1 %v3183_v2  ;;  %v3275_v2 = vld [vmem:[%s3922_s25 + $0x1e4] ss:$8 sps:$4 sm:$0xff]  }
  0xc1   : > { %2482 = vmatpush1.bf16.msra.mxu0 %v3184_v3  ;;  %2369 = vmatprep.subr.bf16.mxu1 %v3189_v4  ;;  %v3278_v3 = vld [vmem:[%s3922_s25 + $0x4e4] ss:$8 sps:$4 sm:$0xff]   ;;  %v3273_v4 = vld [vmem:[%s3922_s25 + $0x1e0] ss:$8 sps:$4 sm:$0xff]  }
  0xc2   : > { %2492 = vmatprep.subr.bf16.mxu0 %v3194_v5  ;;  %v3276_v5 = vld [vmem:[%s3922_s25 + $0x4e0] ss:$8 sps:$4 sm:$0xff]  }
  0xc3   : > { %2361 = vmatmul.mubr.bf16.vlgmr.msra.gmra.mrb[0].mxu1 %v2800_v6  ;;  %v3281_v6 = vld [vmem:[%s3922_s25 + $0x1f4] ss:$8 sps:$4 sm:$0xff]  }
  0xc4   : > { %2484 = vmatmul.mubr.bf16.vlgmr.msra.gmra.mrb[0].mxu0 %v2806_v8  ;;  %2370 = vmatpush1.bf16.msra.mxu1 %v3187_v7  ;;  %v3284_v7 = vld [vmem:[%s3922_s25 + $0x4f4] ss:$8 sps:$4 sm:$0xff]   ;;  %v3279_v8 = vld [vmem:[%s3922_s25 + $0x1f0] ss:$8 sps:$4 sm:$0xff]  }
  0xc5   : > { %2493 = vmatpush1.bf16.msra.mxu0 %v3192_v9  ;;  %2371 = vmatprep.subr.bf16.mxu1 %v3197_v10  ;;  %v3282_v9 = vld [vmem:[%s3922_s25 + $0x4f0] ss:$8 sps:$4 sm:$0xff]   ;;  %v3289_v10 = vld [vmem:[%s3922_s25 + $0x204] ss:$8 sps:$4 sm:$0xff]  }
  0xc6   : > { %2494 = vmatprep.subr.bf16.mxu0 %v3200_v11  ;;  %2401 = vmatprep.mubr.bf16.mxu1 %v2803_v35  ;;  %v3294_v11 = vld [vmem:[%s3922_s25 + $0x504] ss:$8 sps:$4 sm:$0xff]   ;;  %v3316_v35 = vld [vmem:[%s3922_s25 + $0x540] ss:$8 sps:$4 sm:$0xff]  }
  0xc7   : > { %2524 = vmatprep.mubr.bf16.mxu0 %v2809_v39  ;;  %v3322_v39 = vld [vmem:[%s3922_s25 + $0x550] ss:$8 sps:$4 sm:$0xff]  }
  0xc8   : > { %2372 = vmatpush1.bf16.msra.mxu1 %v3195_v12  ;;  %v2802_v12 = vcombine.low %v4038_v32, %v4038_v32  ;;  %v3315_v32 = vld [vmem:[%s3922_s25 + $0x244] ss:$8 sps:$4 sm:$0xff]  }
  0xc9   : > { %2495 = vmatpush1.bf16.msra.mxu0 %v3198_v13  ;;  %2373 = vmatprep.subr.bf16.mxu1 %v3203_v14  ;;  %v3287_v13 = vld [vmem:[%s3922_s25 + $0x200] ss:$8 sps:$4 sm:$0xff]   ;;  %v2808_v14 = vcombine.low %v4045_v36, %v4045_v36  ;;  %v3321_v36 = vld [vmem:[%s3922_s25 + $0x254] ss:$8 sps:$4 sm:$0xff]  }
  0xca   : > { %2496 = vmatprep.subr.bf16.mxu0 %v3206_v15  ;;  %v3292_v15 = vld [vmem:[%s3922_s25 + $0x500] ss:$8 sps:$4 sm:$0xff]  }
  0xcc   : > { %2374 = vmatpush1.bf16.msra.mxu1 %v3201_v16  ;;  %v3297_v16 = vld [vmem:[%s3922_s25 + $0x214] ss:$8 sps:$4 sm:$0xff]  }
  0xcd   : > { %2497 = vmatpush1.bf16.msra.mxu0 %v3204_v17  ;;  %2375 = vmatprep.subr.bf16.mxu1 %v3209_v18  ;;  %v3300_v17 = vld [vmem:[%s3922_s25 + $0x514] ss:$8 sps:$4 sm:$0xff]   ;;  %v4096_v18 = vld [vmem:[%s3988_s14 + $0x10] sm:$0xff] }
  0xce   : > { %2498 = vmatprep.subr.bf16.mxu0 %v3212_v19  ;;  %v2805_v19 = vcombine.high %v4096_v18, %v4096_v18 }
  0xd0   : > { %2376 = vmatpush1.bf16.msra.mxu1 %v3207_v20  ;;  %v4101_v20 = vld [vmem:[%s3988_s14 + $0x28] sm:$0xff] }
  0xd1   : > { %2499 = vmatpush1.bf16.msra.mxu0 %v3210_v21  ;;  %2377 = vmatprep.subr.bf16.mxu1 %v3215_v22  ;;  %v2811_v21 = vcombine.high %v4101_v20, %v4101_v20  ;;  %v3295_v22 = vld [vmem:[%s3922_s25 + $0x210] ss:$8 sps:$4 sm:$0xff]  }
  0xd2   : > { %2500 = vmatprep.subr.bf16.mxu0 %v3218_v23  ;;  %v3298_v23 = vld [vmem:[%s3922_s25 + $0x510] ss:$8 sps:$4 sm:$0xff]  }
  0xd4   : > { %2378 = vmatpush1.bf16.msra.mxu1 %v3213_v24  ;;  %v3303_v24 = vld [vmem:[%s3922_s25 + $0x224] ss:$8 sps:$4 sm:$0xff]  }
  0xd5   : > { %2501 = vmatpush1.bf16.msra.mxu0 %v3216_v25  ;;  %2379 = vmatprep.subr.bf16.mxu1 %v3221_v26  ;;  %v3306_v25 = vld [vmem:[%s3922_s25 + $0x524] ss:$8 sps:$4 sm:$0xff]   ;;  %v3301_v26 = vld [vmem:[%s3922_s25 + $0x220] ss:$8 sps:$4 sm:$0xff]  }
  0xd6   : > { %2502 = vmatprep.subr.bf16.mxu0 %v3224_v27  ;;  %v3304_v27 = vld [vmem:[%s3922_s25 + $0x520] ss:$8 sps:$4 sm:$0xff]  }
  0xd8   : > { %2380 = vmatpush1.bf16.msra.mxu1 %v3219_v28  ;;  %v3309_v28 = vld [vmem:[%s3922_s25 + $0x234] ss:$8 sps:$4 sm:$0xff]  }
  0xd9   : > { %2503 = vmatpush1.bf16.msra.mxu0 %v3222_v29  ;;  %2381 = vmatprep.subr.bf16.mxu1 %v3227_v30  ;;  %v3312_v29 = vld [vmem:[%s3922_s25 + $0x534] ss:$8 sps:$4 sm:$0xff]   ;;  %v3307_v30 = vld [vmem:[%s3922_s25 + $0x230] ss:$8 sps:$4 sm:$0xff]  }
  0xda   : > { %2504 = vmatprep.subr.bf16.mxu0 %v3230_v31  ;;  %v3310_v31 = vld [vmem:[%s3922_s25 + $0x530] ss:$8 sps:$4 sm:$0xff]  }
  0xdc   : > { %2382 = vmatpush1.bf16.msra.mxu1 %v3225_v33  ;;  %v3318_v33 = vld [vmem:[%s3922_s25 + $0x544] ss:$8 sps:$4 sm:$0xff]  }
  0xdd   : > { %2505 = vmatpush1.bf16.msra.mxu0 %v3228_v34  ;;  %2383 = vmatprep.subr.bf16.mxu1 %v3233_v37  ;;  %v3313_v34 = vld [vmem:[%s3922_s25 + $0x240] ss:$8 sps:$4 sm:$0xff]   ;;  %v3324_v37 = vld [vmem:[%s3922_s25 + $0x554] ss:$8 sps:$4 sm:$0xff]  }
  0xde   : > { %2506 = vmatprep.subr.bf16.mxu0 %v3236_v38  ;;  %v3319_v38 = vld [vmem:[%s3922_s25 + $0x250] ss:$8 sps:$4 sm:$0xff]  }
  0xe0   : > { %2384 = vmatpush1.bf16.msra.mxu1 %v3231_v40  ;;  %v3327_v40 = vld [vmem:[%s3922_s25 + $0x264] ss:$8 sps:$4 sm:$0xff]  }
  0xe1   : > { %2507 = vmatpush1.bf16.msra.mxu0 %v3234_v41  ;;  %2385 = vmatprep.subr.bf16.mxu1 %v3239_v42  ;;  %v3330_v41 = vld [vmem:[%s3922_s25 + $0x564] ss:$8 sps:$4 sm:$0xff]   ;;  %v3325_v42 = vld [vmem:[%s3922_s25 + $0x260] ss:$8 sps:$4 sm:$0xff]  }
  0xe2   : > { %2508 = vmatprep.subr.bf16.mxu0 %v3242_v43  ;;  %v3328_v43 = vld [vmem:[%s3922_s25 + $0x560] ss:$8 sps:$4 sm:$0xff]  }
  0xe4   : > { %2386 = vmatpush1.bf16.msra.mxu1 %v3237_v44  ;;  %v3333_v44 = vld [vmem:[%s3922_s25 + $0x274] ss:$8 sps:$4 sm:$0xff]  }
  0xe5   : > { %2509 = vmatpush1.bf16.msra.mxu0 %v3240_v45  ;;  %2387 = vmatprep.subr.bf16.mxu1 %v3245_v46  ;;  %v3336_v45 = vld [vmem:[%s3922_s25 + $0x574] ss:$8 sps:$4 sm:$0xff]   ;;  %v3331_v46 = vld [vmem:[%s3922_s25 + $0x270] ss:$8 sps:$4 sm:$0xff]  }
  0xe6   : > { %2510 = vmatprep.subr.bf16.mxu0 %v3248_v47  ;;  %v3334_v47 = vld [vmem:[%s3922_s25 + $0x570] ss:$8 sps:$4 sm:$0xff]  }
  0xe8   : > { %2388 = vmatpush1.bf16.msra.mxu1 %v3243_v48  ;;  %v3339_v48 = vld [vmem:[%s3922_s25 + $0x284] ss:$8 sps:$4 sm:$0xff]  }
  0xe9   : > { %2511 = vmatpush1.bf16.msra.mxu0 %v3246_v49  ;;  %2389 = vmatprep.subr.bf16.mxu1 %v3251_v50  ;;  %v3342_v49 = vld [vmem:[%s3922_s25 + $0x584] ss:$8 sps:$4 sm:$0xff]   ;;  %v3337_v50 = vld [vmem:[%s3922_s25 + $0x280] ss:$8 sps:$4 sm:$0xff]  }
  0xea   : > { %2512 = vmatprep.subr.bf16.mxu0 %v3254_v51  ;;  %v3340_v51 = vld [vmem:[%s3922_s25 + $0x580] ss:$8 sps:$4 sm:$0xff]  }
  0xec   : > { %2390 = vmatpush1.bf16.msra.mxu1 %v3249_v52  ;;  %v3345_v52 = vld [vmem:[%s3922_s25 + $0x294] ss:$8 sps:$4 sm:$0xff]  }
  0xed   : > { %2513 = vmatpush1.bf16.msra.mxu0 %v3252_v53  ;;  %2391 = vmatprep.subr.bf16.mxu1 %v3257_v54  ;;  %v3348_v53 = vld [vmem:[%s3922_s25 + $0x594] ss:$8 sps:$4 sm:$0xff]   ;;  %v3343_v54 = vld [vmem:[%s3922_s25 + $0x290] ss:$8 sps:$4 sm:$0xff]  }
  0xee   : > { %2514 = vmatprep.subr.bf16.mxu0 %v3260_v55  ;;  %v3346_v55 = vld [vmem:[%s3922_s25 + $0x590] ss:$8 sps:$4 sm:$0xff]  }
  0xf0   : > { %2392 = vmatpush1.bf16.msra.mxu1 %v3255_v56  ;;  %v3351_v56 = vld [vmem:[%s3922_s25 + $0x2a4] ss:$8 sps:$4 sm:$0xff]  }
  0xf1   : > { %2515 = vmatpush1.bf16.msra.mxu0 %v3258_v57  ;;  %2393 = vmatprep.subr.bf16.mxu1 %v3263_v58  ;;  %v3354_v57 = vld [vmem:[%s3922_s25 + $0x5a4] ss:$8 sps:$4 sm:$0xff]   ;;  %v3349_v58 = vld [vmem:[%s3922_s25 + $0x2a0] ss:$8 sps:$4 sm:$0xff]  }
  0xf2   : > { %2516 = vmatprep.subr.bf16.mxu0 %v3266_v59  ;;  %v3352_v59 = vld [vmem:[%s3922_s25 + $0x5a0] ss:$8 sps:$4 sm:$0xff]  }
  0xf4   : > { %2394 = vmatpush1.bf16.msra.mxu1 %v3261_v60  ;;  %v3357_v60 = vld [vmem:[%s3922_s25 + $0x2b4] ss:$8 sps:$4 sm:$0xff]  }
  0xf5   : > { %2517 = vmatpush1.bf16.msra.mxu0 %v3264_v61  ;;  %2395 = vmatprep.subr.bf16.mxu1 %v3269_v62  ;;  %v3360_v61 = vld [vmem:[%s3922_s25 + $0x5b4] ss:$8 sps:$4 sm:$0xff]   ;;  %v3355_v62 = vld [vmem:[%s3922_s25 + $0x2b0] ss:$8 sps:$4 sm:$0xff]  }
  0xf6   : > { %2518 = vmatprep.subr.bf16.mxu0 %v3272_v63  ;;  %v3358_v63 = vld [vmem:[%s3922_s25 + $0x5b0] ss:$8 sps:$4 sm:$0xff]  }
  0xf8   : > { %2396 = vmatpush1.bf16.msra.mxu1 %v3267_v0  ;;  %v3363_v0 = vld [vmem:[%s3922_s25 + $0x2c4] ss:$8 sps:$4 sm:$0xff]  }
  0xf9   : > { %2519 = vmatpush1.bf16.msra.mxu0 %v3270_v1  ;;  %2397 = vmatprep.subr.bf16.mxu1 %v3275_v2  ;;  %v3366_v1 = vld [vmem:[%s3922_s25 + $0x5c4] ss:$8 sps:$4 sm:$0xff]   ;;  %v3361_v2 = vld [vmem:[%s3922_s25 + $0x2c0] ss:$8 sps:$4 sm:$0xff]  }
  0xfa   : > { %2520 = vmatprep.subr.bf16.mxu0 %v3278_v3  ;;  %v3364_v3 = vld [vmem:[%s3922_s25 + $0x5c0] ss:$8 sps:$4 sm:$0xff]  }
  0xfc   : > { %2398 = vmatpush1.bf16.msra.mxu1 %v3273_v4  ;;  %v3369_v4 = vld [vmem:[%s3922_s25 + $0x2d4] ss:$8 sps:$4 sm:$0xff]  }
  0xfd   : > { %2521 = vmatpush1.bf16.msra.mxu0 %v3276_v5  ;;  %2399 = vmatprep.subr.bf16.mxu1 %v3281_v6  ;;  %v3372_v5 = vld [vmem:[%s3922_s25 + $0x5d4] ss:$8 sps:$4 sm:$0xff]   ;;  %v3367_v6 = vld [vmem:[%s3922_s25 + $0x2d0] ss:$8 sps:$4 sm:$0xff]  }
  0xfe   : > { %2522 = vmatprep.subr.bf16.mxu0 %v3284_v7  ;;  %v3370_v7 = vld [vmem:[%s3922_s25 + $0x5d0] ss:$8 sps:$4 sm:$0xff]  }
 0x100   : > { %2400 = vmatpush1.bf16.msra.mxu1 %v3279_v8  ;;  %v3375_v8 = vld [vmem:[%s3922_s25 + $0x2e4] ss:$8 sps:$4 sm:$0xff]  }
 0x101   : > { %2523 = vmatpush1.bf16.msra.mxu0 %v3282_v9  ;;  %2410 = vmatprep.subr.bf16.mxu1 %v3289_v10  ;;  %v3378_v9 = vld [vmem:[%s3922_s25 + $0x5e4] ss:$8 sps:$4 sm:$0xff]   ;;  %v3373_v10 = vld [vmem:[%s3922_s25 + $0x2e0] ss:$8 sps:$4 sm:$0xff]  }
 0x102   : > { %2533 = vmatprep.subr.bf16.mxu0 %v3294_v11  ;;  %v3376_v11 = vld [vmem:[%s3922_s25 + $0x5e0] ss:$8 sps:$4 sm:$0xff]  }
 0x103   : > { %2402 = vmatmul.mubr.bf16.vlgmr.msra.gmra.mrb[0].mxu1 %v2802_v12  ;;  %v3381_v12 = vld [vmem:[%s3922_s25 + $0x2f4] ss:$8 sps:$4 sm:$0xff]  }
 0x104   : > { %2525 = vmatmul.mubr.bf16.vlgmr.msra.gmra.mrb[0].mxu0 %v2808_v14  ;;  %2411 = vmatpush1.bf16.msra.mxu1 %v3287_v13  ;;  %v3384_v13 = vld [vmem:[%s3922_s25 + $0x5f4] ss:$8 sps:$4 sm:$0xff]   ;;  %v3379_v14 = vld [vmem:[%s3922_s25 + $0x2f0] ss:$8 sps:$4 sm:$0xff]  }
 0x105   : > { %2534 = vmatpush1.bf16.msra.mxu0 %v3292_v15  ;;  %2412 = vmatprep.subr.bf16.mxu1 %v3297_v16  ;;  %v3382_v15 = vld [vmem:[%s3922_s25 + $0x5f0] ss:$8 sps:$4 sm:$0xff]   ;;  %v2804_v16 = vcombine.low %v4096_v18, %v4096_v18 }
 0x106   : > { %2535 = vmatprep.subr.bf16.mxu0 %v3300_v17  ;;  %2442 = vmatprep.mubr.bf16.mxu1 %v2805_v19  ;;  %v2810_v17 = vcombine.low %v4101_v20, %v4101_v20 }
 0x107   : > { %2565 = vmatprep.mubr.bf16.mxu0 %v2811_v21 }
 0x108   : > { %2413 = vmatpush1.bf16.msra.mxu1 %v3295_v22 }
 0x109   : > { %2536 = vmatpush1.bf16.msra.mxu0 %v3298_v23  ;;  %2414 = vmatprep.subr.bf16.mxu1 %v3303_v24 }
 0x10a   : > { %2537 = vmatprep.subr.bf16.mxu0 %v3306_v25 }
 0x10c   : > { %2415 = vmatpush1.bf16.msra.mxu1 %v3301_v26 }
 0x10d   : > { %2538 = vmatpush1.bf16.msra.mxu0 %v3304_v27  ;;  %2416 = vmatprep.subr.bf16.mxu1 %v3309_v28 }
 0x10e   : > { %2539 = vmatprep.subr.bf16.mxu0 %v3312_v29 }
 0x110   : > { %2417 = vmatpush1.bf16.msra.mxu1 %v3307_v30 }
 0x111   : > { %2540 = vmatpush1.bf16.msra.mxu0 %v3310_v31  ;;  %2418 = vmatprep.subr.bf16.mxu1 %v3315_v32 }
 0x112   : > { %2541 = vmatprep.subr.bf16.mxu0 %v3318_v33 }
 0x114   : > { %2419 = vmatpush1.bf16.msra.mxu1 %v3313_v34 }
 0x115   : > { %2542 = vmatpush1.bf16.msra.mxu0 %v3316_v35  ;;  %2420 = vmatprep.subr.bf16.mxu1 %v3321_v36 }
 0x116   : > { %2543 = vmatprep.subr.bf16.mxu0 %v3324_v37 }
 0x118   : > { %2421 = vmatpush1.bf16.msra.mxu1 %v3319_v38 }
 0x119   : > { %2544 = vmatpush1.bf16.msra.mxu0 %v3322_v39  ;;  %2422 = vmatprep.subr.bf16.mxu1 %v3327_v40 }
 0x11a   : > { %2545 = vmatprep.subr.bf16.mxu0 %v3330_v41 }
 0x11c   : > { %2423 = vmatpush1.bf16.msra.mxu1 %v3325_v42 }
 0x11d   : > { %2546 = vmatpush1.bf16.msra.mxu0 %v3328_v43  ;;  %2424 = vmatprep.subr.bf16.mxu1 %v3333_v44 }
 0x11e   : > { %2547 = vmatprep.subr.bf16.mxu0 %v3336_v45 }
 0x120   : > { %2425 = vmatpush1.bf16.msra.mxu1 %v3331_v46 }
 0x121   : > { %2548 = vmatpush1.bf16.msra.mxu0 %v3334_v47  ;;  %2426 = vmatprep.subr.bf16.mxu1 %v3339_v48 }
 0x122   : > { %2549 = vmatprep.subr.bf16.mxu0 %v3342_v49 }
 0x124   : > { %2427 = vmatpush1.bf16.msra.mxu1 %v3337_v50 }
 0x125   : > { %2550 = vmatpush1.bf16.msra.mxu0 %v3340_v51  ;;  %2428 = vmatprep.subr.bf16.mxu1 %v3345_v52 }
 0x126   : > { %2551 = vmatprep.subr.bf16.mxu0 %v3348_v53 }
 0x128   : > { %2429 = vmatpush1.bf16.msra.mxu1 %v3343_v54 }
 0x129   : > { %2552 = vmatpush1.bf16.msra.mxu0 %v3346_v55  ;;  %2430 = vmatprep.subr.bf16.mxu1 %v3351_v56 }
 0x12a   : > { %2553 = vmatprep.subr.bf16.mxu0 %v3354_v57 }
 0x12c   : > { %2431 = vmatpush1.bf16.msra.mxu1 %v3349_v58 }
 0x12d   : > { %2554 = vmatpush1.bf16.msra.mxu0 %v3352_v59  ;;  %2432 = vmatprep.subr.bf16.mxu1 %v3357_v60 }
 0x12e   : > { %2555 = vmatprep.subr.bf16.mxu0 %v3360_v61 }
 0x130   : > { %2433 = vmatpush1.bf16.msra.mxu1 %v3355_v62 }
 0x131   : > { %2556 = vmatpush1.bf16.msra.mxu0 %v3358_v63  ;;  %2434 = vmatprep.subr.bf16.mxu1 %v3363_v0 }
 0x132   : > { %2557 = vmatprep.subr.bf16.mxu0 %v3366_v1 }
 0x134   : > { %2435 = vmatpush1.bf16.msra.mxu1 %v3361_v2 }
 0x135   : > { %2558 = vmatpush1.bf16.msra.mxu0 %v3364_v3  ;;  %2436 = vmatprep.subr.bf16.mxu1 %v3369_v4 }
 0x136   : > { %2559 = vmatprep.subr.bf16.mxu0 %v3372_v5 }
 0x138   : > { %2437 = vmatpush1.bf16.msra.mxu1 %v3367_v6 }
 0x139   : > { %2560 = vmatpush1.bf16.msra.mxu0 %v3370_v7  ;;  %2438 = vmatprep.subr.bf16.mxu1 %v3375_v8 }
 0x13a   : > { %2561 = vmatprep.subr.bf16.mxu0 %v3378_v9 }
 0x13c   : > { %2439 = vmatpush1.bf16.msra.mxu1 %v3373_v10 }
 0x13d   : > { %2562 = vmatpush1.bf16.msra.mxu0 %v3376_v11  ;;  %2440 = vmatprep.subr.bf16.mxu1 %v3381_v12 }
 0x13e   : > { %2563 = vmatprep.subr.bf16.mxu0 %v3384_v13 }
 0x140   : > { %2441 = vmatpush1.bf16.msra.mxu1 %v3379_v14 }
 0x141   : > { %2564 = vmatpush1.bf16.msra.mxu0 %v3382_v15 }
 0x143   : > { %2443 = vmatmul.mubr.bf16.vlgmr.msra.gmra.mrb[0].mxu1 %v2804_v16 }
 0x144   : > { %2566 = vmatmul.mubr.bf16.vlgmr.msra.gmra.mrb[0].mxu0 %v2810_v17 }
 0x214   : > { %2577 = sbr.rel (%p3004_p12) target bundleno = 540 (0x21c), region = 78 }
 0x216   : > { %v2444_v19 = vpop.f32.mrb[0].mxu1 }
 0x217   : > { %v2567_v21 = vpop.f32.mrb[0].mxu0  ;;  %v2446_v23 = vpop.f32.mrb[1].mxu1 }
 0x218   : > { %v3013_v22 = vadd.f32 %v2567_v21, %v2444_v19  ;;  %v2569_v24 = vpop.f32.mrb[1].mxu0  ;;  %v2448_v26 = vpop.f32.mrb[2].mxu1 }
 0x219   : > { %v3014_v25 = vadd.f32 %v2569_v24, %v2446_v23  ;;  %v2571_v27 = vpop.f32.mrb[2].mxu0  ;;  %v2449_v28 = vpop.f32.mrb[3].mxu1 }
 0x21a   : > { %v2572_v29 = vpop.f32.mrb[3].mxu0  ;;  %2578 = vst [vmem:[#allocation2] sm:$0xff] (!%p3004_p12), %v3013_v22 }
 0x21b   : > { %2579 = vst [vmem:[#allocation2 + $0x8] sm:$0xff] %v3014_v25 }
 0x21c PF: > { %p3005_p13 = scmp.le.s32.totalorder %s3427_s17, 0 }
 0x21e   : > { %2583 = sbr.rel (%p3005_p13) target bundleno = 550 (0x226), region = 82 }
 0x222   : > { %v2584_v18 = vld [vmem:[#allocation2] sm:$0xff] (!%p3005_p13)  ;;  %v2585_v20 = vld [vmem:[#allocation2 + $0x8] sm:$0xff] (!%p3005_p13) }
 0x223   : > { %v2586_v30 = vadd.f32 (!%p3005_p13), %v3013_v22, %v2584_v18  ;;  %v2587_v31 = vadd.f32 (!%p3005_p13), %v3014_v25, %v2585_v20 }
 0x225   : > { %2588 = vst [vmem:[#allocation2] sm:$0xff] %v2586_v30  ;;  %2589 = vst [vmem:[#allocation2 + $0x8] sm:$0xff] %v2587_v31 }
 0x226 PF: > { %p3006_p0 = scmp.ne.s32.totalorder %s3427_s17, 2 }
 0x227   : > { %v2598_v32 = vlaneseq (!%p3006_p0)  ;;  %v2596_v34 = vld [vmem:[%s3931_s29] ss:$2 sm:$0x3] (!%p3006_p0)  ;;  %v3007_v35 = vld [vmem:[%s3931_s29 + $0x1] ss:$2 sm:$0x3] (!%p3006_p0) }
 0x228   : > { %2593 = sbr.rel (%p3006_p0) target bundleno = 570 (0x23a), region = 86  ;;  %v2625_v40 = vld [vmem:[%s3936_s6] sm:$0xff] (!%p3006_p0) }
 0x229   : > { %v2599_v33 = vshrl.u32 (!%p3006_p0), %v2598_v32, 7  ;;  %v2626_v47 = vunpack.c.l.bf16 (!%p3006_p0), %v2625_v40  ;;  %v2627_v48 = vunpack.c.h.bf16 (!%p3006_p0), %v2625_v40 }
 0x22b   : > { %v2600_v36 = vsub.s32 (!%p3006_p0), 0, %v2599_v33  ;;  %v2604_v37 = vsub.s32 (!%p3006_p0), 1, %v2599_v33 }
 0x22c   : > { %v2594_v38 = vld [vmem:[#allocation2] sm:$0xff] (!%p3006_p0)  ;;  %v2595_v39 = vld [vmem:[#allocation2 + $0x8] sm:$0xff] (!%p3006_p0) }
 0x22d   : > { %v2601_v41 = vrot.slane (!%p3006_p0), %v2596_v34, %v2600_v36  ;;  %v2605_v42 = vrot.slane (!%p3006_p0), %v2596_v34, %v2604_v37  ;;  %v2616_v43 = vrot.slane (!%p3006_p0), %v3007_v35, %v2600_v36  ;;  %v2620_v44 = vrot.slane (!%p3006_p0), %v3007_v35, %v2604_v37 }
 0x22f   : > { %v2608_v45 = vmul.f32 %v2601_v41, %v2594_v38  ;;  %v2609_v46 = vmul.f32 %v2605_v42, %v2595_v39 }
 0x231   : > { %v2623_v49 = vadd.f32 %v2616_v43, %v2608_v45  ;;  %v2624_v50 = vadd.f32 %v2620_v44, %v2609_v46 }
 0x233   : > { %v2628_v51 = vadd.f32 %v2626_v47, %v2623_v49  ;;  %v2629_v52 = vadd.f32 %v2627_v48, %v2624_v50 }
 0x235   : > { %v2630_v53 = vmax.f32 %v2628_v51, 0.0  ;;  %v2631_v54 = vmax.f32 %v2629_v52, 0.0 }
 0x237   : > { %v3012_v55 = vpack.c.bf16 %v2631_v54, %v2630_v53 }
 0x239   : > { %2640 = vst [vmem:[%s3942_s9] sm:$0xff] %v3012_v55 }
 0x23a PF: > { %s14_s21 = sadd.s32 1, %s3443_s21   ;;  %s4200_s15 = smov %s3423_s16 }
 0x23b   : > { %p11_p1 = scmp.ge.s32.totalorder %s14_s21, 8   ;;  %s4201_s16 = smov %s3521_s28 }
 0x23c   : > { %s4202_s17 = smov %s3435_s19  ;;  %s4203_s18 = smov %s3439_s20 }
 0x23d   : > { %s4204_s19 = smov %s4207_s22  ;;  %s4205_s20 = smov %s4211_s23 }
 0x23e   :  { %13 = sbr.rel (!%p11_p1) target bundleno = 4 (0x4), region = 131 }

// kernel: resnet_forward.25
= control target key start
LH: loop header
LB: loop body
LE: loop exit
PB: predicated region body
PF: predicated region fallthrough
CT: control target
= control target key end

     0   :  { %v94_v51 = vlaneseq  ;;  %s695_s0 = inlined_call_operand.vmem [shape: bf16[2,1,512], index: 0, kind: input, shape index: {}]   ;;  %s696_s1 = inlined_call_operand.vmem [shape: f32[512,128], index: 1, kind: input, shape index: {}]   ;;  %s697_s2 = inlined_call_operand.vmem [shape: f32[1,128], index: 2, kind: input, shape index: {}]   ;;  %s698_s3 = inlined_call_operand.hbm [shape: f32[2,128], index: 3, kind: output, shape index: {}]  }
   0x1   :  { %v37_v0 = vld [vmem:[%s696_s1 + $0x80] sm:$0xff]  ;;  %v38_v1 = vld [vmem:[%s696_s1 + $0x88] sm:$0xff]  ;;  %v39_v11 = vld [vmem:[%s696_s1 + $0x90] sm:$0xff] }
   0x2   :  { %v21_v2 = vld [vmem:[%s696_s1] sm:$0xff]  ;;  %v365_v3 = vpack.c.bf16 %v38_v1, %v37_v0  ;;  %v22_v4 = vld [vmem:[%s696_s1 + $0x8] sm:$0xff]  ;;  %v40_v13 = vld [vmem:[%s696_s1 + $0x98] sm:$0xff]  ;;  %v607_v0 = vshrl.u32 %v94_v51, 7 }
   0x3   :  { %v69_v5 = vld [vmem:[%s696_s1 + $0x180] sm:$0xff]  ;;  %v70_v6 = vld [vmem:[%s696_s1 + $0x188] sm:$0xff]  ;;  %v367_v7 = vpack.c.bf16 %v22_v4, %v21_v2  ;;  %v23_v14 = vld [vmem:[%s696_s1 + $0x10] sm:$0xff]  ;;  %v369_v16 = vpack.c.bf16 %v40_v13, %v39_v11 }
   0x4   :  { %v397_v8 = vpack.c.bf16 %v70_v6, %v69_v5  ;;  %v53_v9 = vld [vmem:[%s696_s1 + $0x100] sm:$0xff]  ;;  %v54_v10 = vld [vmem:[%s696_s1 + $0x108] sm:$0xff]  ;;  %366 = vmatprep.subr.bf16.mxu0 %v365_v3  ;;  %v24_v15 = vld [vmem:[%s696_s1 + $0x18] sm:$0xff] }
   0x5   :  { %v399_v12 = vpack.c.bf16 %v54_v10, %v53_v9  ;;  %368 = vmatpush3.bf16.msra.mxu0 %v367_v7  ;;  %v371_v17 = vpack.c.bf16 %v24_v15, %v23_v14  ;;  %v71_v18 = vld [vmem:[%s696_s1 + $0x190] sm:$0xff]  ;;  %v72_v19 = vld [vmem:[%s696_s1 + $0x198] sm:$0xff]  ;;  %v41_v23 = vld [vmem:[%s696_s1 + $0xa0] sm:$0xff] }
   0x6   :  { %398 = vmatprep.subr.bf16.mxu1 %v397_v8  ;;  %v55_v20 = vld [vmem:[%s696_s1 + $0x110] sm:$0xff]  ;;  %v401_v21 = vpack.c.bf16 %v72_v19, %v71_v18  ;;  %v56_v22 = vld [vmem:[%s696_s1 + $0x118] sm:$0xff]  ;;  %v42_v24 = vld [vmem:[%s696_s1 + $0xa8] sm:$0xff]  ;;  %370 = vmatprep.subr.bf16.mxu0 %v369_v16  ;;  %v100_v16 = vsub.s32 2, %v607_v0 }
   0x7   :  { %400 = vmatpush3.bf16.msra.mxu1 %v399_v12  ;;  %v403_v25 = vpack.c.bf16 %v56_v22, %v55_v20  ;;  %v373_v26 = vpack.c.bf16 %v42_v24, %v41_v23  ;;  %v25_v27 = vld [vmem:[%s696_s1 + $0x20] sm:$0xff]  ;;  %v26_v28 = vld [vmem:[%s696_s1 + $0x28] sm:$0xff]  ;;  %v43_v35 = vld [vmem:[%s696_s1 + $0xb0] sm:$0xff] }
   0x8   :  { %v73_v29 = vld [vmem:[%s696_s1 + $0x1a0] sm:$0xff]  ;;  %402 = vmatprep.subr.bf16.mxu1 %v401_v21  ;;  %v74_v30 = vld [vmem:[%s696_s1 + $0x1a8] sm:$0xff]  ;;  %v375_v33 = vpack.c.bf16 %v26_v28, %v25_v27  ;;  %v44_v36 = vld [vmem:[%s696_s1 + $0xb8] sm:$0xff]  ;;  %v108_v21 = vsub.s32 6, %v607_v0 }
   0x9   :  { %v57_v31 = vld [vmem:[%s696_s1 + $0x120] sm:$0xff]  ;;  %v58_v32 = vld [vmem:[%s696_s1 + $0x128] sm:$0xff]  ;;  %372 = vmatpush3.bf16.msra.mxu0 %v371_v17  ;;  %v405_v34 = vpack.c.bf16 %v74_v30, %v73_v29  ;;  %v27_v37 = vld [vmem:[%s696_s1 + $0x30] sm:$0xff]  ;;  %v377_v39 = vpack.c.bf16 %v44_v36, %v43_v35 }
   0xa   :  { %374 = vmatprep.subr.bf16.mxu0 %v373_v26  ;;  %v407_v38 = vpack.c.bf16 %v58_v32, %v57_v31  ;;  %v28_v40 = vld [vmem:[%s696_s1 + $0x38] sm:$0xff]  ;;  %v75_v41 = vld [vmem:[%s696_s1 + $0x1b0] sm:$0xff]  ;;  %v45_v46 = vld [vmem:[%s696_s1 + $0xc0] sm:$0xff] }
   0xb   :  { %404 = vmatpush3.bf16.msra.mxu1 %v403_v25  ;;  %v76_v42 = vld [vmem:[%s696_s1 + $0x1b8] sm:$0xff]  ;;  %v59_v44 = vld [vmem:[%s696_s1 + $0x130] sm:$0xff]  ;;  %v46_v47 = vld [vmem:[%s696_s1 + $0xc8] sm:$0xff]  ;;  %v379_v48 = vpack.c.bf16 %v28_v40, %v27_v37 }
   0xc   :  { %406 = vmatprep.subr.bf16.mxu1 %v405_v34  ;;  %v409_v43 = vpack.c.bf16 %v76_v42, %v75_v41  ;;  %v60_v45 = vld [vmem:[%s696_s1 + $0x138] sm:$0xff]  ;;  %v77_v49 = vld [vmem:[%s696_s1 + $0x1c0] sm:$0xff]  ;;  %v78_v50 = vld [vmem:[%s696_s1 + $0x1c8] sm:$0xff]  ;;  %v381_v53 = vpack.c.bf16 %v46_v47, %v45_v46 }
   0xd   :  { %376 = vmatpush3.bf16.msra.mxu0 %v375_v33  ;;  %v411_v52 = vpack.c.bf16 %v60_v45, %v59_v44  ;;  %v29_v54 = vld [vmem:[%s696_s1 + $0x40] sm:$0xff]  ;;  %v30_v55 = vld [vmem:[%s696_s1 + $0x48] sm:$0xff]  ;;  %v413_v57 = vpack.c.bf16 %v78_v50, %v77_v49  ;;  %v47_v59 = vld [vmem:[%s696_s1 + $0xd0] sm:$0xff] }
   0xe   :  { %378 = vmatprep.subr.bf16.mxu0 %v377_v39  ;;  %v61_v56 = vld [vmem:[%s696_s1 + $0x140] sm:$0xff]  ;;  %v62_v58 = vld [vmem:[%s696_s1 + $0x148] sm:$0xff]  ;;  %v48_v60 = vld [vmem:[%s696_s1 + $0xd8] sm:$0xff]  ;;  %v383_v63 = vpack.c.bf16 %v30_v55, %v29_v54 }
   0xf   :  { %408 = vmatpush3.bf16.msra.mxu1 %v407_v38  ;;  %v79_v61 = vld [vmem:[%s696_s1 + $0x1d0] sm:$0xff]  ;;  %v80_v62 = vld [vmem:[%s696_s1 + $0x1d8] sm:$0xff]  ;;  %v415_v1 = vpack.c.bf16 %v62_v58, %v61_v56  ;;  %v385_v2 = vpack.c.bf16 %v48_v60, %v47_v59  ;;  %v49_v8 = vld [vmem:[%s696_s1 + $0xe0] sm:$0xff] }
  0x10   :  { %410 = vmatprep.subr.bf16.mxu1 %v409_v43  ;;  %v31_v3 = vld [vmem:[%s696_s1 + $0x50] sm:$0xff]  ;;  %v32_v4 = vld [vmem:[%s696_s1 + $0x58] sm:$0xff]  ;;  %v417_v6 = vpack.c.bf16 %v80_v62, %v79_v61  ;;  %v50_v9 = vld [vmem:[%s696_s1 + $0xe8] sm:$0xff] }
  0x11   :  { %380 = vmatpush3.bf16.msra.mxu0 %v379_v48  ;;  %v63_v5 = vld [vmem:[%s696_s1 + $0x150] sm:$0xff]  ;;  %v64_v7 = vld [vmem:[%s696_s1 + $0x158] sm:$0xff]  ;;  %v81_v10 = vld [vmem:[%s696_s1 + $0x1e0] sm:$0xff]  ;;  %v387_v12 = vpack.c.bf16 %v32_v4, %v31_v3  ;;  %v389_v18 = vpack.c.bf16 %v50_v9, %v49_v8 }
  0x12   :  { %382 = vmatprep.subr.bf16.mxu0 %v381_v53  ;;  %v82_v11 = vld [vmem:[%s696_s1 + $0x1e8] sm:$0xff]  ;;  %v33_v13 = vld [vmem:[%s696_s1 + $0x60] sm:$0xff]  ;;  %v419_v17 = vpack.c.bf16 %v64_v7, %v63_v5 }
  0x13   :  { %412 = vmatpush3.bf16.msra.mxu1 %v411_v52  ;;  %v34_v14 = vld [vmem:[%s696_s1 + $0x68] sm:$0xff]  ;;  %v65_v15 = vld [vmem:[%s696_s1 + $0x160] sm:$0xff] }
  0x14   :  { %414 = vmatprep.subr.bf16.mxu1 %v413_v57  ;;  %v66_v19 = vld [vmem:[%s696_s1 + $0x168] sm:$0xff]  ;;  %v292_v20 = vld [vmem:[%s695_s0] sm:$0xff]  }
  0x15   :  { %384 = vmatpush3.bf16.msra.mxu0 %v383_v63 }
  0x16   :  { %386 = vmatprep.subr.bf16.mxu0 %v385_v2 }
  0x17   :  { %416 = vmatpush3.bf16.msra.mxu1 %v415_v1 }
  0x18   :  { %8 = vsyncpa [#allocation3], 0  ;;  %418 = vmatprep.subr.bf16.mxu1 %v417_v6  ;;  %v421_v22 = vpack.c.bf16 %v82_v11, %v81_v10  ;;  %v51_v23 = vld [vmem:[%s696_s1 + $0xf0] sm:$0xff]  ;;  %v52_v24 = vld [vmem:[%s696_s1 + $0xf8] sm:$0xff]  ;;  %v293_v25 = vunpack.c.l.bf16 %v292_v20  ;;  %v294_v26 = vunpack.c.h.bf16 %v292_v20  ;;  %vm126_vm0 = vcmask 1041409   ;;  %s454_s7 = smov [#allocation2]  }
  0x19   :  { %v83_v27 = vld [vmem:[%s696_s1 + $0x1f0] sm:$0xff]  ;;  %v84_v28 = vld [vmem:[%s696_s1 + $0x1f8] sm:$0xff]  ;;  %v96_v29 = vsub.s32 0, %v607_v0  ;;  %388 = vmatpush3.bf16.msra.mxu0 %v387_v12  ;;  %v391_v30 = vpack.c.bf16 %v34_v14, %v33_v13  ;;  %v423_v31 = vpack.c.bf16 %v66_v19, %v65_v15  ;;  %v393_v34 = vpack.c.bf16 %v52_v24, %v51_v23  ;;  %v290_v54 = vld [vmem:[%s697_s2] ss:$0 sm:$0xff]  ;;  %s282_s8 = sshll.u32 %s454_s7, 4  ;;  %s283_s8 = int_to_ptr.vmem [resolvable:$true] %s282_s8 }
  0x1a   :  { %v101_v32 = vrot.slane %v293_v25, %v100_v16  ;;  %v117_v33 = vrot.slane %v294_v26, %v100_v16  ;;  %390 = vmatprep.subr.bf16.mxu0 %v389_v18  ;;  %v35_v35 = vld [vmem:[%s696_s1 + $0x70] sm:$0xff]  ;;  %v36_v36 = vld [vmem:[%s696_s1 + $0x78] sm:$0xff]  ;;  %v109_v37 = vrot.slane %v293_v25, %v108_v21  ;;  %v125_v38 = vrot.slane %v294_v26, %v108_v21  ;;  %s430_s9 = scalar_lea.vmem %s283_s8, 32  ;;  %p435_p1 = scmp.lt.s32.totalorder %s283_s8, %s283_s8 }
  0x1b   :  { %420 = vmatpush3.bf16.msra.mxu1 %v419_v17  ;;  %v104_v39 = vsub.s32 4, %v607_v0  ;;  %v425_v40 = vpack.c.bf16 %v84_v28, %v83_v27  ;;  %v67_v41 = vld [vmem:[%s696_s1 + $0x170] sm:$0xff]  ;;  %v68_v42 = vld [vmem:[%s696_s1 + $0x178] sm:$0xff]  ;;  %v395_v45 = vpack.c.bf16 %v36_v36, %v35_v35  ;;  %v97_v46 = vrot.slane %v293_v25, %v96_v29  ;;  %p431_p0 = scmp.ne.s32.totalorder %s283_s8, %s430_s9  ;;  %p436_p2 = scmp.lt.s32.totalorder %s430_s9, %s430_s9 }
  0x1c   :  { %422 = vmatprep.subr.bf16.mxu1 %v421_v22  ;;  %v128_v43 = vsel %vm126_vm0, %v117_v33, %v101_v32  ;;  %v130_v44 = vsel %vm126_vm0, %v125_v38, %v109_v37  ;;  %v113_v47 = vrot.slane %v294_v26, %v96_v29  ;;  %v427_v48 = vpack.c.bf16 %v68_v42, %v67_v41 }
  0x1d   :  { %199 = vmatprep.mubr.f32.mxu0 %v128_v43  ;;  %392 = vmatpush3.bf16.msra.mxu0 %v391_v30  ;;  %v105_v49 = vrot.slane %v293_v25, %v104_v39  ;;  %v121_v50 = vrot.slane %v294_v26, %v104_v39  ;;  %p437_p3 = por %p436_p2, %p435_p1 }
  0x1e   :  { %269 = vmatprep.mubr.f32.mxu1 %v130_v44  ;;  %394 = vmatprep.subr.bf16.mxu0 %v393_v34  ;;  %v127_v51 = vsel %vm126_vm0, %v113_v47, %v97_v46 }
  0x1f   :  { %424 = vmatpush3.bf16.msra.mxu1 %v423_v31  ;;  %v129_v52 = vsel %vm126_vm0, %v121_v50, %v105_v49  ;;  %p438_p4 = pnand %p437_p3, %p431_p0 }
  0x20   :  { %426 = vmatprep.subr.bf16.mxu1 %v425_v40 }
  0x21   :  { %396 = vmatpush3.bf16.msra.mxu0 %v395_v45 }
  0x23   :  { %428 = vmatpush3.bf16.msra.mxu1 %v427_v48 }
  0x24   :  { %200 = vmatmul.mubr.f32.vlgmr.msra.gmra.mrb[0].mxu0 %v127_v51 }
  0x26   :  { %270 = vmatmul.mubr.f32.vlgmr.msra.gmra.mrb[0].mxu1 %v129_v52 }
  0xf7   :  { %v327_v53 = vpop.f32.mrb[0].mxu0 }
  0xf8   :  { %v328_v55 = vpop.f32.mrb[1].mxu0 }
  0xf9   :  { %v362_v56 = vpop.f32.mrb[0].mxu1  ;;  %v329_v57 = vadd.f32 %v328_v55, %v327_v53 }
  0xfa   :  { %v363_v58 = vpop.f32.mrb[1].mxu1 }
  0xfb   :  { %v364_v59 = vadd.f32 %v363_v58, %v362_v56  ;;  %v202_v60 = vadd.f32 %v329_v57, %v290_v54 }
  0xfd   :  { %v272_v61 = vadd.f32 %v364_v59, %v202_v60 }
  0xff   :  { %275 = vst [vmem:[#allocation2] sm:$0x3] %v272_v61 }
 0x100   :  { %441 = shalt.err (!%p438_p4)
}
 0x101   :  { %s442_s11 = scalar_lea.hbm %s698_s3, 32 }
 0x102   :  { %p443_p5 = scmp.ne.s32.totalorder %s698_s3, %s442_s11  ;;  %p446_p6 = scmp.lt.u32.totalorder %s442_s11, %s698_s3 }
 0x104   :  { %p448_p7 = pnand %p446_p6, %p443_p5 }
 0x106   :  { %451 = shalt.err (!%p448_p7)
}
 0x107   :  { %285 = dma.vmem_to_hbm [thread:$0]  %s283_s8, 32, %s698_s3, [#allocation3]  }
 0x108   :  { %452 = dma.done.wait [#allocation3], 32  }
 0x109   :  { %453 = vsyncadd [#allocation3], 4294967264 }
 0x10a   :  { %289 = vsyncpa [#allocation3], 1 }

</bundles_post_ra>
